<compile_context>
chip_gen: v7x
topology: tpu7x:2x2x1
jax: 0.10.0
libtpu: 0.0.40
codegen_flags: <defaults>
</compile_context>

<pallas_src>
import jax
import jax.numpy as jnp
from jax.experimental import pallas as pl
from jax.experimental.pallas import tpu as pltpu

N_ITERS = 40                 # fixed number of interior-point iterations
SIGMA = 0.1                  # centering parameter
Q_DIAG = (1.0, 1.0, 5.0)     # Q = eye(3); Q[2,2] *= p  (p = 5.0)
SUB = 8                      # batch sublane rows per block
LANE = 128                   # batch lanes per block
BLK = SUB * LANE             # 1024 samples per grid block
D_CAP = 1e6                  # cap on lam/s (keeps 3x3 det/adjugate in f32 range)


def _obs_opt_kernel(xc_ref, xt_ref, xobs_ref, robs_ref, sgh_ref, scal_ref,
                    u_ref, loss_ref):
    f32 = jnp.float32
    sub, lane = xc_ref.shape[1], xc_ref.shape[2]
    n_obs = robs_ref.shape[0]
    m = n_obs + 6                              # clf + delta + n_obs cbf + 4 box

    lbd = scal_ref[0, 0]
    alpha = scal_ref[0, 1]

    xc = xc_ref[...]                           # (2, sub, lane)
    xt = xt_ref[...]                           # (2, sub, lane)

    # ---- CLF pieces --------------------------------------------------------
    d0 = xc[0:1] - xt[0:1]                     # (1, sub, lane)
    d1 = xc[1:2] - xt[1:2]
    dist2 = d0 * d0 + d1 * d1

    # ---- obstacle geometry (rsqrt instead of sqrt + divide) ----------------
    xo = xobs_ref[...]                         # (n_obs, 1, 2)
    ox = xo[:, :, 0:1]                         # (n_obs, 1, 1)
    oy = xo[:, :, 1:2]
    robs = robs_ref[...]                       # (n_obs, 1, 1)

    dx = xc[0:1] - ox                          # (n_obs, sub, lane)
    dy = xc[1:2] - oy
    sq = dx * dx + dy * dy
    inv_norm = jax.lax.rsqrt(sq + 1e-12)       # ~ 1/||x - x_obs||
    dist = sq * inv_norm                       # ~ ||x - x_obs||

    # collision_loss per sample = sum_obs relu(r - dist)
    viol = jnp.maximum(robs - dist, 0.0)
    loss_ref[...] = jnp.sum(viol, axis=0, keepdims=True)       # (1, sub, lane)

    # ---- inequality constraints G z <= h, z = (u_x, u_y, delta) ------------
    # row order: [clf | -delta | -cbf (n_obs) | input box (4)]
    sg = sgh_ref[...]                          # (4, 1, 3)
    sg0 = jnp.broadcast_to(sg[:, :, 0:1], (4, sub, lane))       # box rows, u_x
    sg1 = jnp.broadcast_to(sg[:, :, 1:2], (4, sub, lane))       # box rows, u_y
    sh = jnp.broadcast_to(sg[:, :, 2:3], (4, sub, lane))        # box rhs

    zero_row = jnp.zeros((1, sub, lane), f32)
    g0 = jnp.concatenate([2.0 * d0, zero_row, -dx * inv_norm, sg0], axis=0)
    g1 = jnp.concatenate([2.0 * d1, zero_row, -dy * inv_norm, sg1], axis=0)
    h = jnp.concatenate([-lbd * dist2, zero_row,
                         alpha * (dist - robs), sh], axis=0)    # (m, sub, lane)

    # hoisted loop invariants (the delta column of G is never materialized:
    # it is -1 exactly on rows 0 and 1, handled analytically below)
    g00 = g0 * g0
    g01 = g0 * g1
    g11 = g1 * g1
    g0r0 = 2.0 * d0                            # g0[row 0]
    g1r0 = 2.0 * d1                            # g1[row 0]
    mask01 = jnp.concatenate([jnp.ones((2, 1, 1), f32),
                              jnp.zeros((m - 2, 1, 1), f32)], axis=0)

    q0, q1, q2 = Q_DIAG
    sigma = f32(SIGMA)
    inv_m = f32(1.0 / m)
    d_cap = f32(D_CAP)

    # ---- batched primal-dual interior-point iterations ---------------------
    # min 0.5 z^T Q z  s.t.  G z + s = h, s >= 0, lam >= 0
    def body(_, carry):
        z0, z1, z2, lam, s = carry

        # single combined EUP reciprocal (Newton-refined); inv_s = lam*inv_p,
        # inv_lam = s*inv_p are then accurate to ~1 ulp.
        p = lam * s
        inv_p = pl.reciprocal(p, approx=True)
        inv_p = inv_p * (2.0 - p * inv_p)
        inv_s = lam * inv_p
        inv_lam = s * inv_p

        # G without the delta column; true r_prim = rp_ng - z2 on rows 0,1.
        Gz_ng = g0 * z0 + g1 * z1
        rp_ng = Gz_ng + s - h

        mu = jnp.sum(p, axis=0, keepdims=True) * inv_m          # (1, sub, lane)
        smu = sigma * mu
        smu_s = smu * inv_s
        cent_over_s = lam - smu_s
        D = jnp.minimum(lam * inv_s, d_cap)
        D0 = D[0:1]
        D1 = D[1:2]

        v_ng = D * rp_ng + smu_s          # true v differs on rows 0,1 by -D*z2

        # Newton rhs = -(Q z + G^T v); delta-column sparsity folded in
        rhs0 = -(q0 * z0 + jnp.sum(g0 * v_ng, axis=0, keepdims=True)) \
            + g0r0 * D0 * z2
        rhs1 = -(q1 * z1 + jnp.sum(g1 * v_ng, axis=0, keepdims=True)) \
            + g1r0 * D0 * z2
        rhs2 = v_ng[0:1] + v_ng[1:2] - (D0 + D1 + q2) * z2

        # M = Q + G^T diag(D) G  (symmetric 3x3, per sample)
        M00 = q0 + jnp.sum(D * g00, axis=0, keepdims=True)
        M01 = jnp.sum(D * g01, axis=0, keepdims=True)
        M11 = q1 + jnp.sum(D * g11, axis=0, keepdims=True)
        M02 = -D0 * g0r0
        M12 = -D0 * g1r0
        M22 = q2 + D0 + D1

        # explicit symmetric 3x3 inverse via adjugate
        A00 = M11 * M22 - M12 * M12
        A01 = M02 * M12 - M01 * M22
        A02 = M01 * M12 - M02 * M11
        A11 = M00 * M22 - M02 * M02
        A12 = M01 * M02 - M00 * M12
        A22 = M00 * M11 - M01 * M01
        det = M00 * A00 + M01 * A01 + M02 * A02
        inv_det = pl.reciprocal(det, approx=True)
        inv_det = inv_det * (2.0 - det * inv_det)   # one Newton step on 1/det

        dz0 = (A00 * rhs0 + A01 * rhs1 + A02 * rhs2) * inv_det
        dz1 = (A01 * rhs0 + A11 * rhs1 + A12 * rhs2) * inv_det
        dz2 = (A02 * rhs0 + A12 * rhs1 + A22 * rhs2) * inv_det

        # t = G dz + r_prim; rows 0,1 pick up -(dz2 + z2) from the delta column
        t = (g0 * dz0 + g1 * dz1 + rp_ng) - mask01 * (dz2 + z2)

        dlam = D * t - cent_over_s
        # ds = -t  (exact identity from the primal row of the Newton system)

        # fraction-to-boundary: rho = max_i max(-dlam_i/lam_i, -ds_i/s_i)
        rho_rows = jnp.maximum(-dlam * inv_lam, t * inv_s)
        rho = jnp.max(rho_rows, axis=0, keepdims=True)
        step = jnp.minimum(
            1.0, 0.99 * pl.reciprocal(jnp.maximum(rho, 1e-12), approx=True))

        z0 = z0 + step * dz0
        z1 = z1 + step * dz1
        z2 = z2 + step * dz2
        lam = jnp.maximum(lam + step * dlam, 1e-10)
        s = jnp.maximum(s - step * t, 1e-10)
        return (z0, z1, z2, lam, s)

    init = (jnp.zeros((1, sub, lane), f32),
            jnp.zeros((1, sub, lane), f32),
            jnp.zeros((1, sub, lane), f32),
            jnp.ones((m, sub, lane), f32),
            jnp.ones((m, sub, lane), f32))
    # unroll=1: the body already has ample ILP; unroll=2 doubles live temporaries
    # on top of the hoisted invariants and risks spills (worst on v5e's 1 vst slot).
    z0, z1, z2, _, _ = jax.lax.fori_loop(0, N_ITERS, body, init, unroll=1)

    # module returns only (u_x, u_y) of the QP solution
    u_ref[...] = jnp.concatenate([z0, z1], axis=0)              # (2, sub, lane)


def obs_opt_forward(x_current, x_target, x_obstacles, r_obstacles, lbd, alpha,
                    input_limit=0.05):
    """Pallas implementation of ObsOpt.forward.  Returns (u_pred (n,2), loss)."""
    f32 = jnp.float32
    n = x_current.shape[0]
    n_obs = x_obstacles.shape[0]

    # >= 2 grid blocks so v7x's two TensorCores both get work under
    # dimension_semantics=("parallel",); pad with trivially feasible samples.
    nblk = max(2, -(-n // BLK))
    n_pad = nblk * BLK

    xc = jnp.asarray(x_current, f32)
    xt = jnp.asarray(x_target, f32)
    pad = n_pad - n
    if pad:
        filler = jnp.full((pad, 2), 100.0, f32)
        xc = jnp.concatenate([xc, filler], axis=0)
        xt = jnp.concatenate([xt, filler], axis=0)
    # batch spans (sublane, lane): sample j -> (j // 128, j % 128) inside its block
    xc_t = xc.T.reshape(2, nblk * SUB, LANE)
    xt_t = xt.T.reshape(2, nblk * SUB, LANE)

    xobs = jnp.asarray(x_obstacles, f32).reshape(n_obs, 1, 2)
    robs = jnp.asarray(r_obstacles, f32).reshape(n_obs, 1, 1)
    # box rows: (g entry for u_x, g entry for u_y, rhs)
    sgh = jnp.array([[[1.0, 0.0, input_limit]],
                     [[-1.0, 0.0, input_limit]],
                     [[0.0, 1.0, input_limit]],
                     [[0.0, -1.0, input_limit]]], f32)          # (4, 1, 3)
    scal = jnp.array([[lbd, alpha]], f32)                       # (1, 2) -> SMEM

    u_t, loss_vec = pl.pallas_call(
        _obs_opt_kernel,
        out_shape=(jax.ShapeDtypeStruct((2, nblk * SUB, LANE), f32),
                   jax.ShapeDtypeStruct((1, nblk * SUB, LANE), f32)),
        grid=(nblk,),
        in_specs=[
            pl.BlockSpec((2, SUB, LANE), lambda i: (0, i, 0)),
            pl.BlockSpec((2, SUB, LANE), lambda i: (0, i, 0)),
            pl.BlockSpec((n_obs, 1, 2), lambda i: (0, 0, 0)),
            pl.BlockSpec((n_obs, 1, 1), lambda i: (0, 0, 0)),
            pl.BlockSpec((4, 1, 3), lambda i: (0, 0, 0)),
            pl.BlockSpec(memory_space=pltpu.MemorySpace.SMEM),
        ],
        out_specs=(
            pl.BlockSpec((2, SUB, LANE), lambda i: (0, i, 0)),
            pl.BlockSpec((1, SUB, LANE), lambda i: (0, i, 0)),
        ),
        compiler_params=pltpu.CompilerParams(
            dimension_semantics=("parallel",)),
    )(xc_t, xt_t, xobs, robs, sgh, scal)

    u_pred = u_t.reshape(2, n_pad).T[:n]                        # (n, 2)
    loss = jnp.sum(loss_vec.reshape(n_pad)[:n])
    return u_pred, loss


def make_default_params(n_grid=5):
    """Deterministic parameter init matching ObsOpt.__init__ defaults."""
    x_temp = jnp.linspace(0.1, 0.9, n_grid)
    y_temp = jnp.linspace(0.1, 0.9, n_grid)
    gx, gy = jnp.meshgrid(x_temp, y_temp, indexing="ij")
    # torch: stack([gx, gy]).T.reshape(-1, 2)  (.T on 3-D reverses all dims)
    grid = jnp.stack([gx, gy]).transpose(2, 1, 0).reshape(-1, 2)
    r = jnp.ones((grid.shape[0],), jnp.float32) * 0.01
    return grid.astype(jnp.float32), r, 0.01, 0.01           # x_obs, r_obs, lbd, alpha


if __name__ == "__main__":
    x_obstacles, r_obstacles, lbd, alpha = make_default_params(n_grid=5)

    key = jax.random.PRNGKey(0)
    k1, k2 = jax.random.split(key)
    n = 8
    x_current = jax.random.uniform(k1, (n, 2), jnp.float32)
    x_target = jax.random.uniform(k2, (n, 2), jnp.float32)

    u_pred, collision_loss = obs_opt_forward(
        x_current, x_target, x_obstacles, r_obstacles, lbd, alpha,
        input_limit=0.05)
    u_pred = jax.block_until_ready(u_pred)
    collision_loss = jax.block_until_ready(collision_loss)

    assert u_pred.shape == (n, 2)
    assert bool(jnp.all(jnp.isfinite(u_pred)))
    assert bool(jnp.isfinite(collision_loss))
    # TODO(synk): qpth QPFunction's tolerance-based termination is approximated by a
    # fixed 40-iteration interior-point solve (accuracy ~1e-4 on the control inputs).
    print("KERNEL_OK")
</pallas_src>

<mosaic_0001>
module attributes {stable_mosaic.version = 11 : i64} {
  func.func @_obs_opt_kernel(%arg0: i32, %arg1: memref<2x8x128xf32, #tpu.memory_space<vmem>>, %arg2: memref<2x8x128xf32, #tpu.memory_space<vmem>>, %arg3: memref<25x1x2xf32, #tpu.memory_space<vmem>>, %arg4: memref<25x1x1xf32, #tpu.memory_space<vmem>>, %arg5: memref<4x1x3xf32, #tpu.memory_space<vmem>>, %arg6: memref<1x2xf32, #tpu.memory_space<smem>>, %arg7: memref<2x8x128xf32, #tpu.memory_space<vmem>>, %arg8: memref<1x8x128xf32, #tpu.memory_space<vmem>>) attributes {dimension_semantics = [#tpu.dimension_semantics<parallel>], iteration_bounds = array<i64: 2>, scalar_prefetch = 0 : i64, scratch_operands = 0 : i64, tpu.core_type = #tpu.core_type<tc>, window_params = [{transform_indices = @transform_0, window_bounds = array<i64: 2, 8, 128>}, {transform_indices = @transform_1, window_bounds = array<i64: 2, 8, 128>}, {pipeline_mode = #tpu.pipeline_mode<synchronous>, transform_indices = @transform_2, window_bounds = array<i64: 25, 1, 2>}, {pipeline_mode = #tpu.pipeline_mode<synchronous>, transform_indices = @transform_3, window_bounds = array<i64: 25, 1, 1>}, {pipeline_mode = #tpu.pipeline_mode<synchronous>, transform_indices = @transform_4, window_bounds = array<i64: 4, 1, 3>}, {transform_indices = @transform_5, window_bounds = array<i64: 1, 2>}, {transform_indices = @transform_6, window_bounds = array<i64: 2, 8, 128>}, {transform_indices = @transform_7, window_bounds = array<i64: 1, 8, 128>}]} {
    %c0 = arith.constant 0 : index
    %c0_0 = arith.constant 0 : index
    %0 = memref.load %arg6[%c0, %c0_0] : memref<1x2xf32, #tpu.memory_space<smem>>
    %c0_1 = arith.constant 0 : index
    %c1 = arith.constant 1 : index
    %1 = memref.load %arg6[%c0_1, %c1] : memref<1x2xf32, #tpu.memory_space<smem>>
    %c0_2 = arith.constant 0 : index
    %c0_3 = arith.constant 0 : index
    %c0_4 = arith.constant 0 : index
    %2 = vector.load %arg1[%c0_2, %c0_3, %c0_4] : memref<2x8x128xf32, #tpu.memory_space<vmem>>, vector<2x8x128xf32>
    %c0_5 = arith.constant 0 : index
    %c0_6 = arith.constant 0 : index
    %c0_7 = arith.constant 0 : index
    %3 = vector.load %arg2[%c0_5, %c0_6, %c0_7] : memref<2x8x128xf32, #tpu.memory_space<vmem>>, vector<2x8x128xf32>
    %4 = vector.extract_strided_slice %2 {offsets = [0, 0, 0], sizes = [1, 8, 128], strides = [1, 1, 1]} : vector<2x8x128xf32> to vector<1x8x128xf32>
    %5 = vector.extract_strided_slice %3 {offsets = [0, 0, 0], sizes = [1, 8, 128], strides = [1, 1, 1]} : vector<2x8x128xf32> to vector<1x8x128xf32>
    %6 = arith.subf %4, %5 : vector<1x8x128xf32>
    %7 = vector.extract_strided_slice %2 {offsets = [1, 0, 0], sizes = [1, 8, 128], strides = [1, 1, 1]} : vector<2x8x128xf32> to vector<1x8x128xf32>
    %8 = vector.extract_strided_slice %3 {offsets = [1, 0, 0], sizes = [1, 8, 128], strides = [1, 1, 1]} : vector<2x8x128xf32> to vector<1x8x128xf32>
    %9 = arith.subf %7, %8 : vector<1x8x128xf32>
    %10 = arith.mulf %6, %6 : vector<1x8x128xf32>
    %11 = arith.mulf %9, %9 : vector<1x8x128xf32>
    %12 = arith.addf %10, %11 : vector<1x8x128xf32>
    %c0_8 = arith.constant 0 : index
    %c0_9 = arith.constant 0 : index
    %c0_10 = arith.constant 0 : index
    %13 = vector.load %arg3[%c0_8, %c0_9, %c0_10] : memref<25x1x2xf32, #tpu.memory_space<vmem>>, vector<25x1x2xf32>
    %14 = vector.extract_strided_slice %13 {offsets = [0, 0, 0], sizes = [25, 1, 1], strides = [1, 1, 1]} : vector<25x1x2xf32> to vector<25x1x1xf32>
    %15 = vector.extract_strided_slice %13 {offsets = [0, 0, 1], sizes = [25, 1, 1], strides = [1, 1, 1]} : vector<25x1x2xf32> to vector<25x1x1xf32>
    %c0_11 = arith.constant 0 : index
    %c0_12 = arith.constant 0 : index
    %c0_13 = arith.constant 0 : index
    %16 = vector.load %arg4[%c0_11, %c0_12, %c0_13] : memref<25x1x1xf32, #tpu.memory_space<vmem>>, vector<25x1x1xf32>
    %17 = vector.extract_strided_slice %2 {offsets = [0, 0, 0], sizes = [1, 8, 128], strides = [1, 1, 1]} : vector<2x8x128xf32> to vector<1x8x128xf32>
    %18 = vector.broadcast %17 : vector<1x8x128xf32> to vector<25x8x128xf32>
    %19 = vector.broadcast %14 : vector<25x1x1xf32> to vector<25x8x128xf32>
    %20 = arith.subf %18, %19 : vector<25x8x128xf32>
    %21 = vector.extract_strided_slice %2 {offsets = [1, 0, 0], sizes = [1, 8, 128], strides = [1, 1, 1]} : vector<2x8x128xf32> to vector<1x8x128xf32>
    %22 = vector.broadcast %21 : vector<1x8x128xf32> to vector<25x8x128xf32>
    %23 = vector.broadcast %15 : vector<25x1x1xf32> to vector<25x8x128xf32>
    %24 = arith.subf %22, %23 : vector<25x8x128xf32>
    %25 = arith.mulf %20, %20 : vector<25x8x128xf32>
    %26 = arith.mulf %24, %24 : vector<25x8x128xf32>
    %27 = arith.addf %25, %26 : vector<25x8x128xf32>
    %cst = arith.constant 9.99999996E-13 : f32
    %28 = vector.broadcast %cst : f32 to vector<25x8x128xf32>
    %29 = arith.addf %27, %28 : vector<25x8x128xf32>
    %30 = math.rsqrt %29 : vector<25x8x128xf32>
    %31 = arith.mulf %27, %30 : vector<25x8x128xf32>
    %32 = vector.broadcast %16 : vector<25x1x1xf32> to vector<25x8x128xf32>
    %33 = arith.subf %32, %31 : vector<25x8x128xf32>
    %cst_14 = arith.constant 0.000000e+00 : f32
    %34 = vector.broadcast %cst_14 : f32 to vector<25x8x128xf32>
    %35 = arith.maximumf %33, %34 : vector<25x8x128xf32>
    %cst_15 = arith.constant dense<0.000000e+00> : vector<8x128xf32>
    %36 = vector.multi_reduction <add>, %35, %cst_15 [0] : vector<25x8x128xf32> to vector<8x128xf32>
    %37 = vector.shape_cast %36 : vector<8x128xf32> to vector<1x8x128xf32>
    %c0_16 = arith.constant 0 : index
    %c0_17 = arith.constant 0 : index
    %c0_18 = arith.constant 0 : index
    %38 = vector.load %arg8[%c0_16, %c0_17, %c0_18] : memref<1x8x128xf32, #tpu.memory_space<vmem>>, vector<1x8x128xf32>
    tpu.vector_store %arg8[%c0_16, %c0_17, %c0_18], %37 {strides = array<i32>} : memref<1x8x128xf32, #tpu.memory_space<vmem>>, vector<1x8x128xf32>,
    %c0_19 = arith.constant 0 : index
    %c0_20 = arith.constant 0 : index
    %c0_21 = arith.constant 0 : index
    %39 = vector.load %arg5[%c0_19, %c0_20, %c0_21] : memref<4x1x3xf32, #tpu.memory_space<vmem>>, vector<4x1x3xf32>
    %40 = vector.extract_strided_slice %39 {offsets = [0, 0, 0], sizes = [4, 1, 1], strides = [1, 1, 1]} : vector<4x1x3xf32> to vector<4x1x1xf32>
    %41 = vector.shape_cast %40 : vector<4x1x1xf32> to vector<4x1x1xf32>
    %42 = vector.broadcast %41 : vector<4x1x1xf32> to vector<4x8x128xf32>
    %43 = vector.extract_strided_slice %39 {offsets = [0, 0, 1], sizes = [4, 1, 1], strides = [1, 1, 1]} : vector<4x1x3xf32> to vector<4x1x1xf32>
    %44 = vector.shape_cast %43 : vector<4x1x1xf32> to vector<4x1x1xf32>
    %45 = vector.broadcast %44 : vector<4x1x1xf32> to vector<4x8x128xf32>
    %46 = vector.extract_strided_slice %39 {offsets = [0, 0, 2], sizes = [4, 1, 1], strides = [1, 1, 1]} : vector<4x1x3xf32> to vector<4x1x1xf32>
    %47 = vector.shape_cast %46 : vector<4x1x1xf32> to vector<4x1x1xf32>
    %48 = vector.broadcast %47 : vector<4x1x1xf32> to vector<4x8x128xf32>
    %cst_22 = arith.constant 0.000000e+00 : f32
    %49 = vector.broadcast %cst_22 : f32 to vector<1x8x128xf32>
    %cst_23 = arith.constant 2.000000e+00 : f32
    %50 = vector.broadcast %cst_23 : f32 to vector<1x8x128xf32>
    %51 = arith.mulf %50, %6 : vector<1x8x128xf32>
    %cst_24 = arith.constant 0.000000e+00 : f32
    %52 = vector.broadcast %cst_24 : f32 to vector<25x8x128xf32>
    %53 = arith.subf %52, %20 : vector<25x8x128xf32>
    %54 = arith.mulf %53, %30 : vector<25x8x128xf32>
    %55 = tpu.concatenate %51, %49, %54, %42 in 0 : vector<1x8x128xf32>, vector<1x8x128xf32>, vector<25x8x128xf32>, vector<4x8x128xf32> -> vector<31x8x128xf32>
    %cst_25 = arith.constant 2.000000e+00 : f32
    %56 = vector.broadcast %cst_25 : f32 to vector<1x8x128xf32>
    %57 = arith.mulf %56, %9 : vector<1x8x128xf32>
    %cst_26 = arith.constant 0.000000e+00 : f32
    %58 = vector.broadcast %cst_26 : f32 to vector<25x8x128xf32>
    %59 = arith.subf %58, %24 : vector<25x8x128xf32>
    %60 = arith.mulf %59, %30 : vector<25x8x128xf32>
    %61 = tpu.concatenate %57, %49, %60, %45 in 0 : vector<1x8x128xf32>, vector<1x8x128xf32>, vector<25x8x128xf32>, vector<4x8x128xf32> -> vector<31x8x128xf32>
    %cst_27 = arith.constant 0.000000e+00 : f32
    %62 = arith.subf %cst_27, %0 : f32
    %63 = vector.broadcast %62 : f32 to vector<1x8x128xf32>
    %64 = arith.mulf %63, %12 : vector<1x8x128xf32>
    %65 = vector.broadcast %16 : vector<25x1x1xf32> to vector<25x8x128xf32>
    %66 = arith.subf %31, %65 : vector<25x8x128xf32>
    %67 = vector.broadcast %1 : f32 to vector<25x8x128xf32>
    %68 = arith.mulf %67, %66 : vector<25x8x128xf32>
    %69 = tpu.concatenate %64, %49, %68, %48 in 0 : vector<1x8x128xf32>, vector<1x8x128xf32>, vector<25x8x128xf32>, vector<4x8x128xf32> -> vector<31x8x128xf32>
    %70 = arith.mulf %55, %55 : vector<31x8x128xf32>
    %71 = arith.mulf %55, %61 : vector<31x8x128xf32>
    %72 = arith.mulf %61, %61 : vector<31x8x128xf32>
    %cst_28 = arith.constant 2.000000e+00 : f32
    %73 = vector.broadcast %cst_28 : f32 to vector<1x8x128xf32>
    %74 = arith.mulf %73, %6 : vector<1x8x128xf32>
    %cst_29 = arith.constant 2.000000e+00 : f32
    %75 = vector.broadcast %cst_29 : f32 to vector<1x8x128xf32>
    %76 = arith.mulf %75, %9 : vector<1x8x128xf32>
    %cst_30 = arith.constant 1.000000e+00 : f32
    %77 = vector.broadcast %cst_30 : f32 to vector<2x1x1xf32>
    %cst_31 = arith.constant 0.000000e+00 : f32
    %78 = vector.broadcast %cst_31 : f32 to vector<29x1x1xf32>
    %79 = tpu.concatenate %77, %78 in 0 : vector<2x1x1xf32>, vector<29x1x1xf32> -> vector<31x1x1xf32>
    %cst_32 = arith.constant 0.000000e+00 : f32
    %80 = vector.broadcast %cst_32 : f32 to vector<1x8x128xf32>
    %cst_33 = arith.constant 0.000000e+00 : f32
    %81 = vector.broadcast %cst_33 : f32 to vector<1x8x128xf32>
    %cst_34 = arith.constant 0.000000e+00 : f32
    %82 = vector.broadcast %cst_34 : f32 to vector<1x8x128xf32>
    %cst_35 = arith.constant 1.000000e+00 : f32
    %83 = vector.broadcast %cst_35 : f32 to vector<31x8x128xf32>
    %cst_36 = arith.constant 1.000000e+00 : f32
    %84 = vector.broadcast %cst_36 : f32 to vector<31x8x128xf32>
    %cst_37 = arith.constant 0.0322580636 : f32
    %cst_38 = arith.constant 1.000000e-01 : f32
    %cst_39 = arith.constant 1.000000e+06 : f32
    %c0_i32 = arith.constant 0 : i32
    %c40_i32 = arith.constant 40 : i32
    %85 = arith.addi %c0_i32, %c40_i32 : i32
    %c1_i32 = arith.constant 1 : i32
    %86:5 = scf.for %arg9 = %c0_i32 to %85 step %c1_i32 iter_args(%arg10 = %80, %arg11 = %81, %arg12 = %82, %arg13 = %83, %arg14 = %84) -> (vector<1x8x128xf32>, vector<1x8x128xf32>, vector<1x8x128xf32>, vector<31x8x128xf32>, vector<31x8x128xf32>)  : i32 {
      %89 = arith.mulf %arg13, %arg14 : vector<31x8x128xf32>
      %90 = tpu.reciprocal %89 {approx = true} : vector<31x8x128xf32> -> vector<31x8x128xf32>
      %91 = arith.mulf %89, %90 : vector<31x8x128xf32>
      %cst_43 = arith.constant 2.000000e+00 : f32
      %92 = vector.broadcast %cst_43 : f32 to vector<31x8x128xf32>
      %93 = arith.subf %92, %91 : vector<31x8x128xf32>
      %94 = arith.mulf %90, %93 : vector<31x8x128xf32>
      %95 = arith.mulf %arg13, %94 : vector<31x8x128xf32>
      %96 = arith.mulf %arg14, %94 : vector<31x8x128xf32>
      %97 = vector.broadcast %arg10 : vector<1x8x128xf32> to vector<31x8x128xf32>
      %98 = arith.mulf %55, %97 : vector<31x8x128xf32>
      %99 = vector.broadcast %arg11 : vector<1x8x128xf32> to vector<31x8x128xf32>
      %100 = arith.mulf %61, %99 : vector<31x8x128xf32>
      %101 = arith.addf %98, %100 : vector<31x8x128xf32>
      %102 = arith.addf %101, %arg14 : vector<31x8x128xf32>
      %103 = arith.subf %102, %69 : vector<31x8x128xf32>
      %cst_44 = arith.constant dense<0.000000e+00> : vector<8x128xf32>
      %104 = vector.multi_reduction <add>, %89, %cst_44 [0] : vector<31x8x128xf32> to vector<8x128xf32>
      %105 = vector.shape_cast %104 : vector<8x128xf32> to vector<1x8x128xf32>
      %106 = vector.broadcast %cst_37 : f32 to vector<1x8x128xf32>
      %107 = arith.mulf %105, %106 : vector<1x8x128xf32>
      %108 = vector.broadcast %cst_38 : f32 to vector<1x8x128xf32>
      %109 = arith.mulf %108, %107 : vector<1x8x128xf32>
      %110 = vector.broadcast %109 : vector<1x8x128xf32> to vector<31x8x128xf32>
      %111 = arith.mulf %110, %95 : vector<31x8x128xf32>
      %112 = arith.subf %arg13, %111 : vector<31x8x128xf32>
      %113 = arith.mulf %arg13, %95 : vector<31x8x128xf32>
      %114 = vector.broadcast %cst_39 : f32 to vector<31x8x128xf32>
      %115 = arith.minimumf %113, %114 : vector<31x8x128xf32>
      %116 = vector.extract_strided_slice %115 {offsets = [0, 0, 0], sizes = [1, 8, 128], strides = [1, 1, 1]} : vector<31x8x128xf32> to vector<1x8x128xf32>
      %117 = vector.extract_strided_slice %115 {offsets = [1, 0, 0], sizes = [1, 8, 128], strides = [1, 1, 1]} : vector<31x8x128xf32> to vector<1x8x128xf32>
      %118 = arith.mulf %115, %103 : vector<31x8x128xf32>
      %119 = arith.addf %118, %111 : vector<31x8x128xf32>
      %cst_45 = arith.constant 1.000000e+00 : f32
      %120 = vector.broadcast %cst_45 : f32 to vector<1x8x128xf32>
      %121 = arith.mulf %120, %arg10 : vector<1x8x128xf32>
      %122 = arith.mulf %55, %119 : vector<31x8x128xf32>
      %cst_46 = arith.constant dense<0.000000e+00> : vector<8x128xf32>
      %123 = vector.multi_reduction <add>, %122, %cst_46 [0] : vector<31x8x128xf32> to vector<8x128xf32>
      %124 = vector.shape_cast %123 : vector<8x128xf32> to vector<1x8x128xf32>
      %125 = arith.addf %121, %124 : vector<1x8x128xf32>
      %cst_47 = arith.constant 0.000000e+00 : f32
      %126 = vector.broadcast %cst_47 : f32 to vector<1x8x128xf32>
      %127 = arith.subf %126, %125 : vector<1x8x128xf32>
      %128 = arith.mulf %74, %116 : vector<1x8x128xf32>
      %129 = arith.mulf %128, %arg12 : vector<1x8x128xf32>
      %130 = arith.addf %127, %129 : vector<1x8x128xf32>
      %cst_48 = arith.constant 1.000000e+00 : f32
      %131 = vector.broadcast %cst_48 : f32 to vector<1x8x128xf32>
      %132 = arith.mulf %131, %arg11 : vector<1x8x128xf32>
      %133 = arith.mulf %61, %119 : vector<31x8x128xf32>
      %cst_49 = arith.constant dense<0.000000e+00> : vector<8x128xf32>
      %134 = vector.multi_reduction <add>, %133, %cst_49 [0] : vector<31x8x128xf32> to vector<8x128xf32>
      %135 = vector.shape_cast %134 : vector<8x128xf32> to vector<1x8x128xf32>
      %136 = arith.addf %132, %135 : vector<1x8x128xf32>
      %cst_50 = arith.constant 0.000000e+00 : f32
      %137 = vector.broadcast %cst_50 : f32 to vector<1x8x128xf32>
      %138 = arith.subf %137, %136 : vector<1x8x128xf32>
      %139 = arith.mulf %76, %116 : vector<1x8x128xf32>
      %140 = arith.mulf %139, %arg12 : vector<1x8x128xf32>
      %141 = arith.addf %138, %140 : vector<1x8x128xf32>
      %142 = vector.extract_strided_slice %119 {offsets = [0, 0, 0], sizes = [1, 8, 128], strides = [1, 1, 1]} : vector<31x8x128xf32> to vector<1x8x128xf32>
      %143 = vector.extract_strided_slice %119 {offsets = [1, 0, 0], sizes = [1, 8, 128], strides = [1, 1, 1]} : vector<31x8x128xf32> to vector<1x8x128xf32>
      %144 = arith.addf %142, %143 : vector<1x8x128xf32>
      %145 = arith.addf %116, %117 : vector<1x8x128xf32>
      %cst_51 = arith.constant 5.000000e+00 : f32
      %146 = vector.broadcast %cst_51 : f32 to vector<1x8x128xf32>
      %147 = arith.addf %145, %146 : vector<1x8x128xf32>
      %148 = arith.mulf %147, %arg12 : vector<1x8x128xf32>
      %149 = arith.subf %144, %148 : vector<1x8x128xf32>
      %150 = arith.mulf %115, %70 : vector<31x8x128xf32>
      %cst_52 = arith.constant dense<0.000000e+00> : vector<8x128xf32>
      %151 = vector.multi_reduction <add>, %150, %cst_52 [0] : vector<31x8x128xf32> to vector<8x128xf32>
      %152 = vector.shape_cast %151 : vector<8x128xf32> to vector<1x8x128xf32>
      %cst_53 = arith.constant 1.000000e+00 : f32
      %153 = vector.broadcast %cst_53 : f32 to vector<1x8x128xf32>
      %154 = arith.addf %153, %152 : vector<1x8x128xf32>
      %155 = arith.mulf %115, %71 : vector<31x8x128xf32>
      %cst_54 = arith.constant dense<0.000000e+00> : vector<8x128xf32>
      %156 = vector.multi_reduction <add>, %155, %cst_54 [0] : vector<31x8x128xf32> to vector<8x128xf32>
      %157 = vector.shape_cast %156 : vector<8x128xf32> to vector<1x8x128xf32>
      %158 = arith.mulf %115, %72 : vector<31x8x128xf32>
      %cst_55 = arith.constant dense<0.000000e+00> : vector<8x128xf32>
      %159 = vector.multi_reduction <add>, %158, %cst_55 [0] : vector<31x8x128xf32> to vector<8x128xf32>
      %160 = vector.shape_cast %159 : vector<8x128xf32> to vector<1x8x128xf32>
      %cst_56 = arith.constant 1.000000e+00 : f32
      %161 = vector.broadcast %cst_56 : f32 to vector<1x8x128xf32>
      %162 = arith.addf %161, %160 : vector<1x8x128xf32>
      %cst_57 = arith.constant 0.000000e+00 : f32
      %163 = vector.broadcast %cst_57 : f32 to vector<1x8x128xf32>
      %164 = arith.subf %163, %116 : vector<1x8x128xf32>
      %165 = arith.mulf %164, %74 : vector<1x8x128xf32>
      %cst_58 = arith.constant 0.000000e+00 : f32
      %166 = vector.broadcast %cst_58 : f32 to vector<1x8x128xf32>
      %167 = arith.subf %166, %116 : vector<1x8x128xf32>
      %168 = arith.mulf %167, %76 : vector<1x8x128xf32>
      %cst_59 = arith.constant 5.000000e+00 : f32
      %169 = vector.broadcast %cst_59 : f32 to vector<1x8x128xf32>
      %170 = arith.addf %169, %116 : vector<1x8x128xf32>
      %171 = arith.addf %170, %117 : vector<1x8x128xf32>
      %172 = arith.mulf %162, %171 : vector<1x8x128xf32>
      %173 = arith.mulf %168, %168 : vector<1x8x128xf32>
      %174 = arith.subf %172, %173 : vector<1x8x128xf32>
      %175 = arith.mulf %165, %168 : vector<1x8x128xf32>
      %176 = arith.mulf %157, %171 : vector<1x8x128xf32>
      %177 = arith.subf %175, %176 : vector<1x8x128xf32>
      %178 = arith.mulf %157, %168 : vector<1x8x128xf32>
      %179 = arith.mulf %165, %162 : vector<1x8x128xf32>
      %180 = arith.subf %178, %179 : vector<1x8x128xf32>
      %181 = arith.mulf %154, %171 : vector<1x8x128xf32>
      %182 = arith.mulf %165, %165 : vector<1x8x128xf32>
      %183 = arith.subf %181, %182 : vector<1x8x128xf32>
      %184 = arith.mulf %157, %165 : vector<1x8x128xf32>
      %185 = arith.mulf %154, %168 : vector<1x8x128xf32>
      %186 = arith.subf %184, %185 : vector<1x8x128xf32>
      %187 = arith.mulf %154, %162 : vector<1x8x128xf32>
      %188 = arith.mulf %157, %157 : vector<1x8x128xf32>
      %189 = arith.subf %187, %188 : vector<1x8x128xf32>
      %190 = arith.mulf %154, %174 : vector<1x8x128xf32>
      %191 = arith.mulf %157, %177 : vector<1x8x128xf32>
      %192 = arith.addf %190, %191 : vector<1x8x128xf32>
      %193 = arith.mulf %165, %180 : vector<1x8x128xf32>
      %194 = arith.addf %192, %193 : vector<1x8x128xf32>
      %195 = tpu.reciprocal %194 {approx = true} : vector<1x8x128xf32> -> vector<1x8x128xf32>
      %196 = arith.mulf %194, %195 : vector<1x8x128xf32>
      %cst_60 = arith.constant 2.000000e+00 : f32
      %197 = vector.broadcast %cst_60 : f32 to vector<1x8x128xf32>
      %198 = arith.subf %197, %196 : vector<1x8x128xf32>
      %199 = arith.mulf %195, %198 : vector<1x8x128xf32>
      %200 = arith.mulf %174, %130 : vector<1x8x128xf32>
      %201 = arith.mulf %177, %141 : vector<1x8x128xf32>
      %202 = arith.addf %200, %201 : vector<1x8x128xf32>
      %203 = arith.mulf %180, %149 : vector<1x8x128xf32>
      %204 = arith.addf %202, %203 : vector<1x8x128xf32>
      %205 = arith.mulf %204, %199 : vector<1x8x128xf32>
      %206 = arith.mulf %177, %130 : vector<1x8x128xf32>
      %207 = arith.mulf %183, %141 : vector<1x8x128xf32>
      %208 = arith.addf %206, %207 : vector<1x8x128xf32>
      %209 = arith.mulf %186, %149 : vector<1x8x128xf32>
      %210 = arith.addf %208, %209 : vector<1x8x128xf32>
      %211 = arith.mulf %210, %199 : vector<1x8x128xf32>
      %212 = arith.mulf %180, %130 : vector<1x8x128xf32>
      %213 = arith.mulf %186, %141 : vector<1x8x128xf32>
      %214 = arith.addf %212, %213 : vector<1x8x128xf32>
      %215 = arith.mulf %189, %149 : vector<1x8x128xf32>
      %216 = arith.addf %214, %215 : vector<1x8x128xf32>
      %217 = arith.mulf %216, %199 : vector<1x8x128xf32>
      %218 = vector.broadcast %205 : vector<1x8x128xf32> to vector<31x8x128xf32>
      %219 = arith.mulf %55, %218 : vector<31x8x128xf32>
      %220 = vector.broadcast %211 : vector<1x8x128xf32> to vector<31x8x128xf32>
      %221 = arith.mulf %61, %220 : vector<31x8x128xf32>
      %222 = arith.addf %219, %221 : vector<31x8x128xf32>
      %223 = arith.addf %222, %103 : vector<31x8x128xf32>
      %224 = arith.addf %217, %arg12 : vector<1x8x128xf32>
      %225 = vector.broadcast %79 : vector<31x1x1xf32> to vector<31x8x128xf32>
      %226 = vector.broadcast %224 : vector<1x8x128xf32> to vector<31x8x128xf32>
      %227 = arith.mulf %225, %226 : vector<31x8x128xf32>
      %228 = arith.subf %223, %227 : vector<31x8x128xf32>
      %229 = arith.mulf %115, %228 : vector<31x8x128xf32>
      %230 = arith.subf %229, %112 : vector<31x8x128xf32>
      %cst_61 = arith.constant 0.000000e+00 : f32
      %231 = vector.broadcast %cst_61 : f32 to vector<31x8x128xf32>
      %232 = arith.subf %231, %230 : vector<31x8x128xf32>
      %233 = arith.mulf %232, %96 : vector<31x8x128xf32>
      %234 = arith.mulf %228, %95 : vector<31x8x128xf32>
      %235 = arith.maximumf %233, %234 : vector<31x8x128xf32>
      %cst_62 = arith.constant dense<0xFF800000> : vector<8x128xf32>
      %236 = vector.multi_reduction <maximumf>, %235, %cst_62 [0] : vector<31x8x128xf32> to vector<8x128xf32>
      %237 = vector.shape_cast %236 : vector<8x128xf32> to vector<1x8x128xf32>
      %cst_63 = arith.constant 9.99999996E-13 : f32
      %238 = vector.broadcast %cst_63 : f32 to vector<1x8x128xf32>
      %239 = arith.maximumf %237, %238 : vector<1x8x128xf32>
      %240 = tpu.reciprocal %239 {approx = true} : vector<1x8x128xf32> -> vector<1x8x128xf32>
      %cst_64 = arith.constant 9.900000e-01 : f32
      %241 = vector.broadcast %cst_64 : f32 to vector<1x8x128xf32>
      %242 = arith.mulf %241, %240 : vector<1x8x128xf32>
      %cst_65 = arith.constant 1.000000e+00 : f32
      %243 = vector.broadcast %cst_65 : f32 to vector<1x8x128xf32>
      %244 = arith.minimumf %243, %242 : vector<1x8x128xf32>
      %245 = arith.mulf %244, %205 : vector<1x8x128xf32>
      %246 = arith.addf %arg10, %245 : vector<1x8x128xf32>
      %247 = arith.mulf %244, %211 : vector<1x8x128xf32>
      %248 = arith.addf %arg11, %247 : vector<1x8x128xf32>
      %249 = arith.mulf %244, %217 : vector<1x8x128xf32>
      %250 = arith.addf %arg12, %249 : vector<1x8x128xf32>
      %251 = vector.broadcast %244 : vector<1x8x128xf32> to vector<31x8x128xf32>
      %252 = arith.mulf %251, %230 : vector<31x8x128xf32>
      %253 = arith.addf %arg13, %252 : vector<31x8x128xf32>
      %cst_66 = arith.constant 1.000000e-10 : f32
      %254 = vector.broadcast %cst_66 : f32 to vector<31x8x128xf32>
      %255 = arith.maximumf %253, %254 : vector<31x8x128xf32>
      %256 = vector.broadcast %244 : vector<1x8x128xf32> to vector<31x8x128xf32>
      %257 = arith.mulf %256, %228 : vector<31x8x128xf32>
      %258 = arith.subf %arg14, %257 : vector<31x8x128xf32>
      %cst_67 = arith.constant 1.000000e-10 : f32
      %259 = vector.broadcast %cst_67 : f32 to vector<31x8x128xf32>
      %260 = arith.maximumf %258, %259 : vector<31x8x128xf32>
      scf.yield %246, %248, %250, %255, %260 : vector<1x8x128xf32>, vector<1x8x128xf32>, vector<1x8x128xf32>, vector<31x8x128xf32>, vector<31x8x128xf32>
    }
    %87 = tpu.concatenate %86#0, %86#1 in 0 : vector<1x8x128xf32>, vector<1x8x128xf32> -> vector<2x8x128xf32>
    %c0_40 = arith.constant 0 : index
    %c0_41 = arith.constant 0 : index
    %c0_42 = arith.constant 0 : index
    %88 = vector.load %arg7[%c0_40, %c0_41, %c0_42] : memref<2x8x128xf32, #tpu.memory_space<vmem>>, vector<2x8x128xf32>
    tpu.vector_store %arg7[%c0_40, %c0_41, %c0_42], %87 {strides = array<i32>} : memref<2x8x128xf32, #tpu.memory_space<vmem>>, vector<2x8x128xf32>,
    return
  }
  func.func @transform_0(%arg0: i32) -> (i32, i32, i32) {
    %c0_i32 = arith.constant 0 : i32
    %c0_i32_0 = arith.constant 0 : i32
    %c0_i32_1 = arith.constant 0 : i32
    return %c0_i32, %arg0, %c0_i32_0 : i32, i32, i32
  }
  func.func @transform_1(%arg0: i32) -> (i32, i32, i32) {
    %c0_i32 = arith.constant 0 : i32
    %c0_i32_0 = arith.constant 0 : i32
    %c0_i32_1 = arith.constant 0 : i32
    return %c0_i32, %arg0, %c0_i32_0 : i32, i32, i32
  }
  func.func @transform_2(%arg0: i32) -> (i32, i32, i32) {
    %c0_i32 = arith.constant 0 : i32
    %c0_i32_0 = arith.constant 0 : i32
    %c0_i32_1 = arith.constant 0 : i32
    %c0_i32_2 = arith.constant 0 : i32
    return %c0_i32, %c0_i32_0, %c0_i32_1 : i32, i32, i32
  }
  func.func @transform_3(%arg0: i32) -> (i32, i32, i32) {
    %c0_i32 = arith.constant 0 : i32
    %c0_i32_0 = arith.constant 0 : i32
    %c0_i32_1 = arith.constant 0 : i32
    %c0_i32_2 = arith.constant 0 : i32
    return %c0_i32, %c0_i32_0, %c0_i32_1 : i32, i32, i32
  }
  func.func @transform_4(%arg0: i32) -> (i32, i32, i32) {
    %c0_i32 = arith.constant 0 : i32
    %c0_i32_0 = arith.constant 0 : i32
    %c0_i32_1 = arith.constant 0 : i32
    %c0_i32_2 = arith.constant 0 : i32
    return %c0_i32, %c0_i32_0, %c0_i32_1 : i32, i32, i32
  }
  func.func @transform_5(%arg0: i32) -> (i32, i32) {
    %c0_i32 = arith.constant 0 : i32
    %c0_i32_0 = arith.constant 0 : i32
    %c0_i32_1 = arith.constant 0 : i32
    return %c0_i32, %c0_i32_0 : i32, i32
  }
  func.func @transform_6(%arg0: i32) -> (i32, i32, i32) {
    %c0_i32 = arith.constant 0 : i32
    %c0_i32_0 = arith.constant 0 : i32
    %c0_i32_1 = arith.constant 0 : i32
    return %c0_i32, %arg0, %c0_i32_0 : i32, i32, i32
  }
  func.func @transform_7(%arg0: i32) -> (i32, i32, i32) {
    %c0_i32 = arith.constant 0 : i32
    %c0_i32_0 = arith.constant 0 : i32
    %c0_i32_1 = arith.constant 0 : i32
    return %c0_i32, %arg0, %c0_i32_0 : i32, i32, i32
  }
}

</mosaic_0001>

<bundles_post_ra>
// kernel: tpu_custom_call.1
= control target key start
LH: loop header
LB: loop body
LE: loop exit
PB: predicated region body
PF: predicated region fallthrough
CT: control target
= control target key end

     0   :  { %s10374_s0 = inlined_call_operand.vmem [shape: f32[2,16,128], index: 0, kind: input, shape index: {}]   ;;  %s10375_s1 = inlined_call_operand.hbm [shape: f32[2,16,128], index: 1, kind: input, shape index: {}]   ;;  %s10376_s2 = inlined_call_operand.vmem [shape: f32[25,1,2], index: 2, kind: input, shape index: {}]   ;;  %s10377_s3 = inlined_call_operand.vmem [shape: f32[25,1,1], index: 3, kind: input, shape index: {}]   ;;  %s10378_s4 = inlined_call_operand.vmem [shape: f32[4,1,3], index: 4, kind: input, shape index: {}]   ;;  %s10379_s5 = inlined_call_operand.vmem [shape: f32[1,2], index: 5, kind: input, shape index: {}]   ;;  %s10380_s6 = inlined_call_operand.hbm [shape: f32[2,16,128], index: 6, kind: output, shape index: {0}]   ;;  %s10381_s7 = inlined_call_operand.hbm [shape: f32[1,16,128], index: 7, kind: output, shape index: {1}]  }
   0x1   :  { %10979 = sst [smem:[#allocation475_spill]] %s10374_s0 }
   0x2   :  { %10980 = sst [smem:[#allocation476_spill]] %s10375_s1 }
   0x3   :  { %10981 = sst [smem:[#allocation477_spill]] %s10376_s2 }
   0x4   :  { %10982 = sst [smem:[#allocation478_spill]] %s10379_s5 }
   0x5   :  { %13 = vsyncpa [#allocation4], 0 }
   0x6   :  { %15 = vsyncpa [#allocation4 + $0x1], 0 }
   0x7   :  { %16 = vsyncpa [#allocation6], 0 }
   0x8   :  { %17 = vsyncpa [#allocation5], 0 }
   0x9   :  { %19 = vsyncpa [#allocation5 + $0x1], 0 }
   0xa   :  { %20 = vsyncpa [#allocation10], 0 }
   0xb   :  { %22 = vsyncpa [#allocation10 + $0x1], 0  ;;  %s5081_s24 = smov 0   ;;  %s5083_s25 = smov 0  }
   0xc   :  { %s5085_s26 = smov 0   ;;  %s5087_s27 = smov 0  }
   0xd LB: > { %s5102_s28 = sadd.s32 4294967295, %s4762_s27   ;;  %s3558_s29 = sadd.s32 4294967294, %s4762_s27   ;;  %s4762_s27 = sphi %s5087_s27, %s12989_s27   ;;  %s4758_s26 = sphi %s5085_s26, %s12988_s26   ;;  %s4754_s25 = sphi %s5083_s25, %s12987_s25   ;;  %s4750_s24 = sphi %s5081_s24, %s12986_s24  }
   0xe   : > { %s5106_s30 = sadd.s32 1, %s4762_s27   ;;  %s35_s8 = sadd.s32 1, %s4758_s26 }
   0xf   : > { %s32_s9 = ssub.s32 %s4762_s27, %s5106_s30  ;;  %p42_p0 = scmp.ne.s32.totalorder %s4758_s26, %s4754_s25 }
  0x10   : > { %p33_p1 = scmp.eq.s32.totalorder %s32_s9, 0  ;;  %p43_p2 = scmp.eq.s32.totalorder %s4762_s27, 0 }
  0x11   : > { %p74_p3 = scmp.ne.s32.totalorder %s4754_s25, %s4750_s24  ;;  %p10385_p4 = scmp.eq.s32.totalorder %s5102_s28, 0 }
  0x12   : > { %s5118_s10 = scalar_select %p33_p1, %s4758_s26, %s35_s8  }
  0x13   : > { %p5120_p5 = por %p43_p2, %p42_p0  ;;  %p5126_p6 = por %p10385_p4, %p74_p3 }
  0x14   : > { %p182_p7 = scmp.eq.s32.totalorder %s5102_s28, 1  ;;  %p188_p8 = scmp.eq.s32.totalorder %s3558_s29, 1 }
  0x15   : > { %s10984_s12 = scalar_select %p5126_p6, 1, 0 }
  0x16   : > { %p3559_p9 = scmp.ge.s32.totalorder %s4762_s27, 1  ;;  %p221_p10 = scmp.lt.s32.totalorder %s4762_s27, 3 }
  0x17   : > { %p5133_p11 = por %p182_p7, %p42_p0  ;;  %p5137_p12 = por %p188_p8, %p74_p3 }
  0x18   : > { %p5141_p13 = pnand %p3559_p9, %p221_p10  ;;  %s10988_s5 = sld [smem:[#allocation478_spill]] }
  0x19   : > { %s10985_s13 = scalar_select %p5133_p11, 1, 0 }
  0x1a   : > { %s10986_s14 = scalar_select %p5137_p12, 1, 0 }
  0x1b   : > { %p3643_p1 = pneg %p5141_p13 }
  0x1d   : > { %p3644_p0 = pnand %p3643_p1, %p10385_p4 }
  0x1e   : > { %s243_s18 = sshll.u32 %s10988_s5, 4  ;;  %s244_s18 = int_to_ptr.vmem [resolvable:$true] %s243_s18 }
  0x1f   : > { %s4353_s19 = scalar_lea.vmem %s244_s18, 16  ;;  %p4355_p3 = pneg %p3644_p0 }
  0x20   : > { %p4354_p2 = scmp.ne.s32.totalorder %s244_s18, %s4353_s19  ;;  %p4361_p12 = scmp.lt.s32.totalorder %s244_s18, %s244_s18 }
  0x21   : > { %p4362_p9 = scmp.lt.s32.totalorder %s4353_s19, %s4353_s19 }
  0x22   : > { %p4356_p7 = pnand %p4355_p3, %p4354_p2 }
  0x23   : > { %p4363_p10 = por %p4362_p9, %p4361_p12 }
  0x24   : > { %p4357_p8 = pneg %p4356_p7 }
  0x26   : > { %p4364_p11 = pnand %p4363_p10, %p4357_p8 }
  0x28   : > { %4367 = shalt.err (!%p4364_p11)
}
  0x29   : > { %s5028_s20 = smov [#allocation7]   ;;  %p10384_p6 = scmp.ge.s32.totalorder %s4762_s27, 2 }
  0x2a   : > { %3646 = dma.vmem_to_smem (!%p3644_p0), %s244_s18, 16, %s5028_s20, [#allocation6]  }
  0x2b   : > { %250 = sbr.rel (%p10384_p6) target bundleno = 92 (0x5c), region = 32 }
  0x32   : > { %253 = sbr.rel (!%p5120_p5) target bundleno = 61 (0x3d), region = 36  ;;  %s255_s21 = sand.u32 (%p5120_p5), 1, %s4758_s26  }
  0x33   : > { %s3563_s22 = sshll.u32 (%p5120_p5), %s4762_s27, 3  ;;  %s3562_s23 = sshll.u32 (%p5120_p5), %s255_s21, 4 }
  0x34   : > { %s10989_s0 = sld [smem:[#allocation475_spill]] (%p5120_p5)  ;;  %s257_s16 = scalar_lea.vmem (%p5120_p5), [#allocation2], %s3562_s23 }
  0x3a   : > { %s259_s9 = scalar_lea.vmem %s10989_s0, %s3563_s22 }
  0x3b   : > { %v289_v0 = vld [vmem:[%s259_s9] sm:$0xff]  ;;  %v291_v1 = vld [vmem:[%s259_s9 + $0x10] sm:$0xff] }
  0x3c   : > { %290 = vst [vmem:[%s257_s16] sm:$0xff] %v289_v0  ;;  %292 = vst [vmem:[%s257_s16 + $0x8] sm:$0xff] %v291_v1 }
  0x3d PF: > { %s299_s17 = sand.u32 1, %s4758_s26   ;;  %s3565_s18 = sshll.u32 %s4762_s27, 7 }
  0x3e   : > { %s3564_s19 = sshll.u32 %s299_s17, 4  ;;  %s10990_s1 = sld [smem:[#allocation476_spill]] }
  0x3f   : > { %s303_s22 = scalar_lea.vmem [#allocation3], %s3564_s19  ;;  %s5171_s29 = scalar_lea.sflag [#allocation4], %s299_s17 }
  0x40   : > { %s309_s23 = sshll.u32 %s303_s22, 4  ;;  %s5169_s23 = int_to_ptr.vmem [resolvable:$true] %s309_s23 }
  0x44   : > { %s5167_s21 = scalar_lea.hbm %s10990_s1, %s3565_s18  ;;  %s4372_s5 = scalar_lea.hbm %s10990_s1, 512 }
  0x45   : > { %s4368_s8 = scalar_lea.hbm %s5167_s21, 256  ;;  %p4373_p0 = scmp.lt.u32.totalorder %s5167_s21, %s10990_s1 }
  0x46   : > { %p4369_p11 = scmp.ne.s32.totalorder %s5167_s21, %s4368_s8  ;;  %p4374_p2 = scmp.lt.u32.totalorder %s4372_s5, %s4368_s8 }
  0x47   : > { %p4376_p7 = scmp.lt.u32.totalorder %s4368_s8, %s5167_s21 }
  0x48   : > { %p4370_p12 = pnand %p4369_p11, %p5120_p5  ;;  %p4375_p3 = por %p4374_p2, %p4373_p0 }
  0x4a   : > { %p4371_p1 = pneg %p4370_p12  ;;  %p4377_p8 = por %p4376_p7, %p4375_p3 }
  0x4c   : > { %p4378_p9 = pnand %p4377_p8, %p4371_p1 }
  0x4e   : > { %4381 = shalt.err (!%p4378_p9)
}
  0x4f   : > { %s4382_s17 = scalar_lea.vmem %s5169_s23, 256  ;;  %s5029_s19 = smov [#allocation3]  }
  0x50   : > { %p4383_p10 = scmp.ne.s32.totalorder %s5169_s23, %s4382_s17  ;;  %s4386_s22 = sshll.u32 %s5029_s19, 4  ;;  %s4387_s22 = int_to_ptr.vmem [resolvable:$false] %s4386_s22 }
  0x51   : > { %s4388_s9 = scalar_lea.vmem %s4387_s22, 512  ;;  %p4389_p6 = scmp.lt.s32.totalorder %s5169_s23, %s4387_s22 }
  0x52   : > { %p4384_p11 = pnand %p4383_p10, %p5120_p5  ;;  %p4390_p4 = scmp.lt.s32.totalorder %s4388_s9, %s4382_s17 }
  0x54   : > { %p4385_p12 = pneg %p4384_p11  ;;  %p4391_p0 = por %p4390_p4, %p4389_p6 }
  0x56   : > { %p4392_p2 = pnand %p4391_p0, %p4385_p12 }
  0x58   : > { %4395 = shalt.err (!%p4392_p2)
}
  0x59   : > { %s5030_s8 = smov 256   ;;  %s5031_s16 = smov 128  }
  0x5a   : > { %s5032_s5 = smov 8  }
  0x5b   : > { %3635 = dma.hbm_to_vmem [thread:$0]  (%p5120_p5), %s5167_s21, 256, %s5169_s23, %s5171_s29, %s5030_s8, %s5031_s16, %s5032_s5  }
  0x5c PF: > { %321 = sbr.rel (%p5141_p13) target bundleno = 1031 (0x407), region = 78 }
  0x63   : > { %s5198_s18 = sand.u32 1, %s4754_s25   ;;  %p10991_p4 = scmp.ne.s32.totalorder %s10984_s12, 0 }
  0x64   : > { %s5201_s20 = sshll.u32 %s5198_s18, 4  ;;  %s331_s19 = scalar_lea.sflag [#allocation4], %s5198_s18 }
  0x65   : > { %s5204_s17 = scalar_lea.vmem [#allocation2], %s5201_s20  ;;  %s334_s22 = scalar_lea.vmem [#allocation3], %s5201_s20 }
  0x66   : > { %4733 = dma.done.wait (%p10991_p4), %s331_s19, 256  }
  0x67   : > { %4735 = vsyncadd (%p10991_p4), %s331_s19, 4294967040  ;;  %p10992_p5 = scmp.eq.s32.totalorder %s5102_s28, 0 }
  0x69   : > { %4737 = dma.done.wait (%p10992_p5), [#allocation6], 16   ;;  %p10993_p6 = pmov %p10992_p5 }
  0x6b   : > { %4739 = vsyncadd (%p10993_p6), [#allocation6], 4294967280 }
  0x6c   : > { %343 = sfence }
  0x6d   : > { %s10994_s2 = sld [smem:[#allocation477_spill]]  ;;  %v5033_v4 = vmov 1   ;;  %v5034_v5 = vmov 0   ;;  %v5265_v12 = vld [vmem:[%s5204_s17] sm:$0xff]  ;;  %s379_s29 = sld [smem:[#allocation7]]  ;;  %v5273_v15 = vld [vmem:[%s5204_s17 + $0x8] sm:$0xff] }
  0x6e   : > { %4229 = vset.pattern.permute.xlu0 %v5033_v4  ;;  %4227 = vset.pattern.permute.xlu1 %v5034_v5  ;;  %v383_v13 = vld [vmem:[%s334_s22] sm:$0xff]  ;;  %v384_v16 = vld [vmem:[%s334_s22 + $0x8] sm:$0xff]  ;;  %s3572_s23 = sld [smem:[#allocation7 + $0x1]]  ;;  %s6790_s9 = scalar_lea.vmem [#allocation8], %s5201_s20 }
  0x6f   : > { %v385_v14 = vsub.f32 %v5265_v12, %v383_v13  ;;  %v386_v19 = vsub.f32 %v5273_v15, %v384_v16  ;;  %v3599_v45 = vld [vmem:[%s10377_s3 + $0x1] ss:$0 sm:$0xff]  ;;  %v3598_v46 = vld [vmem:[%s10377_s3] ss:$0 sm:$0xff]  ;;  %v3602_v47 = vld [vmem:[%s10377_s3 + $0x4] ss:$0 sm:$0xff] }
  0x70   : > { %v3600_v48 = vld [vmem:[%s10377_s3 + $0x2] ss:$0 sm:$0xff]  ;;  %v3604_v49 = vld [vmem:[%s10377_s3 + $0x6] ss:$0 sm:$0xff]  ;;  %v3601_v50 = vld [vmem:[%s10377_s3 + $0x3] ss:$0 sm:$0xff] }
  0x71   : > { %v387_v20 = vmul.f32 %v385_v14, %v385_v14  ;;  %v5284_v21 = vmul.f32 2.0, %v385_v14  ;;  %v388_v22 = vmul.f32 %v386_v19, %v386_v19  ;;  %v5286_v23 = vmul.f32 2.0, %v386_v19  ;;  %v3606_v51 = vld [vmem:[%s10377_s3 + $0x8] ss:$0 sm:$0xff]  ;;  %v3603_v52 = vld [vmem:[%s10377_s3 + $0x5] ss:$0 sm:$0xff] }
  0x72   : > { %v3608_v53 = vld [vmem:[%s10377_s3 + $0xa] ss:$0 sm:$0xff]  ;;  %v3605_v54 = vld [vmem:[%s10377_s3 + $0x7] ss:$0 sm:$0xff]  ;;  %v3610_v55 = vld [vmem:[%s10377_s3 + $0xc] ss:$0 sm:$0xff] }
  0x73   : > { %v5219_v2 = vld [vmem:[%s10994_s2 + $0x2] ss:$0 sm:$0xff]  ;;  %v5224_v3 = vld [vmem:[%s10994_s2 + $0x1] ss:$0 sm:$0xff]  ;;  %v5233_v6 = vld [vmem:[%s10994_s2 + $0x3] ss:$0 sm:$0xff]  ;;  %v5290_v24 = vmul.f32 %v5284_v21, %v5284_v21  ;;  %v389_v27 = vadd.f32 %v388_v22, %v387_v20  ;;  %v5300_v28 = vmul.f32 %v5286_v23, %v5284_v21  ;;  %v5304_v29 = vmul.f32 %v5286_v23, %v5286_v23 }
  0x74   : > { %574 = vperm.xlu1 %4227, %v5219_v2   ;;  %695 = vperm.xlu0 %4229, %v5224_v3   ;;  %v5238_v7 = vld [vmem:[%s10994_s2 + $0x4] ss:$0 sm:$0xff]  ;;  %v5245_v8 = vld [vmem:[%s10994_s2 + $0x5] ss:$0 sm:$0xff]  ;;  %v5250_v9 = vld [vmem:[%s10994_s2 + $0x6] ss:$0 sm:$0xff] }
  0x75   : > { %v5257_v10 = vld [vmem:[%s10994_s2 + $0x7] ss:$0 sm:$0xff]  ;;  %v5262_v11 = vld [vmem:[%s10994_s2 + $0x8] ss:$0 sm:$0xff]  ;;  %v3582_v17 = vld [vmem:[%s10994_s2 + $0x9] ss:$0 sm:$0xff] }
  0x76   : > { %v3583_v18 = vld [vmem:[%s10994_s2 + $0xa] ss:$0 sm:$0xff]  ;;  %10995 = vst [vmem:[#allocation15_spill] sm:$0xff] %v5284_v21  ;;  %10996 = vst [vmem:[#allocation16_spill] sm:$0xff] %v5286_v23  ;;  %v3584_v25 = vld [vmem:[%s10994_s2 + $0xb] ss:$0 sm:$0xff] }
  0x77   : > { %10997 = vst [vmem:[#allocation17_spill] sm:$0xff] %v5290_v24  ;;  %v3585_v26 = vld [vmem:[%s10994_s2 + $0xc] ss:$0 sm:$0xff]  ;;  %s1439_s21 = ssub.f32 0.0, %s379_s29  ;;  %10998 = vst [vmem:[#allocation18_spill] sm:$0xff] %v5300_v28  ;;  %s6922_s20 = smov 0  }
  0x78   : > { %578 = vperm.xlu1 %4227, %v5233_v6   ;;  %707 = vperm.xlu0 %4229, %v5238_v7   ;;  %10999 = vst [vmem:[#allocation19_spill] sm:$0xff] %v5304_v29  ;;  %v3586_v32 = vld [vmem:[%s10994_s2 + $0xd] ss:$0 sm:$0xff]  ;;  %v3587_v33 = vld [vmem:[%s10994_s2 + $0xe] ss:$0 sm:$0xff] }
  0x79   : > { %v1440_v30 = vstv %s1439_s21  ;;  %v3588_v34 = vld [vmem:[%s10994_s2 + $0xf] ss:$0 sm:$0xff]  ;;  %v3589_v35 = vld [vmem:[%s10994_s2 + $0x10] ss:$0 sm:$0xff]  ;;  %v3590_v36 = vld [vmem:[%s10994_s2 + $0x11] ss:$0 sm:$0xff] }
  0x7a   : > { %v5306_v31 = vmul.f32 %v1440_v30, %v389_v27  ;;  %v3591_v37 = vld [vmem:[%s10994_s2 + $0x12] ss:$0 sm:$0xff]  ;;  %v3592_v38 = vld [vmem:[%s10994_s2 + $0x13] ss:$0 sm:$0xff]  ;;  %v3593_v39 = vld [vmem:[%s10994_s2 + $0x14] ss:$0 sm:$0xff] }
  0x7b   : > { %v3594_v40 = vld [vmem:[%s10994_s2 + $0x15] ss:$0 sm:$0xff]  ;;  %v3595_v41 = vld [vmem:[%s10994_s2 + $0x16] ss:$0 sm:$0xff]  ;;  %v3596_v42 = vld [vmem:[%s10994_s2 + $0x17] ss:$0 sm:$0xff] }
  0x7c   : > { %586 = vperm.xlu1 %4227, %v5245_v8   ;;  %715 = vperm.xlu0 %4229, %v5250_v9   ;;  %11000 = vst [vmem:[#allocation20_spill] sm:$0xff] %v5306_v31  ;;  %v3597_v43 = vld [vmem:[%s10994_s2 + $0x18] ss:$0 sm:$0xff]  ;;  %v3573_v44 = vld [vmem:[%s10994_s2] ss:$0 sm:$0xff] }
  0x7d   : > { %v3607_v56 = vld [vmem:[%s10377_s3 + $0x9] ss:$0 sm:$0xff]  ;;  %v3612_v57 = vld [vmem:[%s10377_s3 + $0xe] ss:$0 sm:$0xff]  ;;  %v3609_v58 = vld [vmem:[%s10377_s3 + $0xb] ss:$0 sm:$0xff] }
  0x7e   : > { %v3614_v59 = vld [vmem:[%s10377_s3 + $0x10] ss:$0 sm:$0xff]  ;;  %v3611_v62 = vld [vmem:[%s10377_s3 + $0xd] ss:$0 sm:$0xff]  ;;  %v3616_v63 = vld [vmem:[%s10377_s3 + $0x12] ss:$0 sm:$0xff] }
  0x7f   : > { %v3622_v13 = vld [vmem:[%s10377_s3 + $0x18] ss:$0 sm:$0xff]  ;;  %v3621_v22 = vld [vmem:[%s10377_s3 + $0x17] ss:$0 sm:$0xff]  ;;  %v3623_v30 = vld [vmem:[%s10378_s4] ss:$0 sm:$0xff] }
  0x80   : > { %594 = vperm.xlu1 %4227, %v5257_v10   ;;  %723 = vperm.xlu0 %4229, %v5262_v11  }
  0x84   : > { %602 = vperm.xlu1 %4227, %v3582_v17   ;;  %731 = vperm.xlu0 %4229, %v3583_v18  }
  0x88   : > { %610 = vperm.xlu1 %4227, %v3584_v25   ;;  %739 = vperm.xlu0 %4229, %v3585_v26  }
  0x8c   : > { %618 = vperm.xlu1 %4227, %v3586_v32   ;;  %747 = vperm.xlu0 %4229, %v3587_v33  }
  0x90   : > { %626 = vperm.xlu1 %4227, %v3588_v34   ;;  %755 = vperm.xlu0 %4229, %v3589_v35  }
  0x94   : > { %634 = vperm.xlu1 %4227, %v3590_v36   ;;  %763 = vperm.xlu0 %4229, %v3591_v37  }
  0x98   : > { %642 = vperm.xlu1 %4227, %v3592_v38   ;;  %771 = vperm.xlu0 %4229, %v3593_v39  }
  0x9c   : > { %650 = vperm.xlu1 %4227, %v3594_v40   ;;  %779 = vperm.xlu0 %4229, %v3595_v41  }
  0xa0   : > { %658 = vperm.xlu1 %4227, %v3596_v42   ;;  %787 = vperm.xlu0 %4229, %v3597_v43  }
  0xa4   : > { %4228 = vset.pattern.permute.xlu1 %v5033_v4  ;;  %4230 = vset.pattern.permute.xlu0 %v5034_v5 }
  0xa5   : > { %566 = vperm.xlu0 %4230, %v3573_v44   ;;  %691 = vperm.xlu1 %4228, %v3573_v44  }
  0xa9   : > { %570 = vperm.xlu0 %4230, %v5224_v3   ;;  %699 = vperm.xlu1 %4228, %v5219_v2   ;;  %v3613_v2 = vld [vmem:[%s10377_s3 + $0xf] ss:$0 sm:$0xff]  ;;  %v3618_v3 = vld [vmem:[%s10377_s3 + $0x14] ss:$0 sm:$0xff] }
  0xad   : > { %582 = vperm.xlu0 %4230, %v5238_v7   ;;  %703 = vperm.xlu1 %4228, %v5233_v6   ;;  %v3615_v7 = vld [vmem:[%s10377_s3 + $0x11] ss:$0 sm:$0xff] }
  0xb1   : > { %590 = vperm.xlu0 %4230, %v5250_v9   ;;  %711 = vperm.xlu1 %4228, %v5245_v8   ;;  %v3620_v8 = vld [vmem:[%s10377_s3 + $0x16] ss:$0 sm:$0xff] }
  0xb5   : > { %598 = vperm.xlu0 %4230, %v5262_v11   ;;  %719 = vperm.xlu1 %4228, %v5257_v10   ;;  %v3617_v11 = vld [vmem:[%s10377_s3 + $0x13] ss:$0 sm:$0xff] }
  0xb9   : > { %606 = vperm.xlu0 %4230, %v3583_v18   ;;  %727 = vperm.xlu1 %4228, %v3582_v17   ;;  %v3619_v17 = vld [vmem:[%s10377_s3 + $0x15] ss:$0 sm:$0xff]  ;;  %v5433_v18 = vld [vmem:[%s10378_s4 + $0x1] ss:$0 sm:$0xff] }
  0xbd   : > { %614 = vperm.xlu0 %4230, %v3585_v26   ;;  %735 = vperm.xlu1 %4228, %v3584_v25   ;;  %v3626_v25 = vld [vmem:[%s10378_s4 + $0x3] ss:$0 sm:$0xff] }
  0xc1   : > { %622 = vperm.xlu0 %4230, %v3587_v33   ;;  %743 = vperm.xlu1 %4228, %v3586_v32  }
  0xc5   : > { %630 = vperm.xlu0 %4230, %v3589_v35   ;;  %751 = vperm.xlu1 %4228, %v3588_v34   ;;  %v5450_v34 = vld [vmem:[%s10378_s4 + $0x2] ss:$0 sm:$0xff] }
  0xc9   : > { %638 = vperm.xlu0 %4230, %v3591_v37   ;;  %759 = vperm.xlu1 %4228, %v3590_v36   ;;  %v5035_v37 = vmov 2  }
  0xcd   : > { %646 = vperm.xlu0 %4230, %v3593_v39   ;;  %767 = vperm.xlu1 %4228, %v3592_v38  }
  0xd1   : > { %654 = vperm.xlu0 %4230, %v3595_v41   ;;  %775 = vperm.xlu1 %4228, %v3594_v40  }
  0xd5   : > { %662 = vperm.xlu0 %4230, %v3597_v43   ;;  %783 = vperm.xlu1 %4228, %v3596_v42  }
  0xd9   : > { %1095 = vperm.xlu0 %4230, %v3599_v45   ;;  %4231 = vset.pattern.permute.xlu1 %v5034_v5 }
  0xda   : > { %1091 = vperm.xlu1 %4231, %v3598_v46  }
  0xdd   : > { %1107 = vperm.xlu0 %4230, %v3602_v47  }
  0xde   : > { %1099 = vperm.xlu1 %4231, %v3600_v48  }
  0xe1   : > { %1115 = vperm.xlu0 %4230, %v3604_v49  }
  0xe2   : > { %1103 = vperm.xlu1 %4231, %v3601_v50  }
  0xe5   : > { %1123 = vperm.xlu0 %4230, %v3606_v51  }
  0xe6   : > { %1111 = vperm.xlu1 %4231, %v3603_v52  }
  0xe9   : > { %1131 = vperm.xlu0 %4230, %v3608_v53  }
  0xea   : > { %1119 = vperm.xlu1 %4231, %v3605_v54  }
  0xed   : > { %1139 = vperm.xlu0 %4230, %v3610_v55  }
  0xee   : > { %1127 = vperm.xlu1 %4231, %v3607_v56  }
  0xf1   : > { %1147 = vperm.xlu0 %4230, %v3612_v57  }
  0xf2   : > { %1135 = vperm.xlu1 %4231, %v3609_v58  }
  0xf3   : > { %v575_v60 = vpop.permute.xlu1 %574  ;;  %v696_v61 = vpop.permute.xlu0 %695 }
  0xf4   : > { %v5465_v40 = vsub.f32 %v5265_v12, %v575_v60  ;;  %v5468_v41 = vsub.f32 %v5273_v15, %v696_v61 }
  0xf5   : > { %1155 = vperm.xlu0 %4230, %v3614_v59  }
  0xf6   : > { %1143 = vperm.xlu1 %4231, %v3611_v62   ;;  %v5486_v46 = vmul.f32 %v5465_v40, %v5465_v40  ;;  %v5491_v48 = vmul.f32 %v5468_v41, %v5468_v41 }
  0xf7   : > { %v579_v0 = vpop.permute.xlu1 %578  ;;  %v708_v1 = vpop.permute.xlu0 %707 }
  0xf8   : > { %v5471_v42 = vsub.f32 %v5265_v12, %v579_v0 }
  0xf9   : > { %1163 = vperm.xlu0 %4230, %v3616_v63   ;;  %v5528_v63 = vstv %s3572_s23 }
  0xfa   : > { %1151 = vperm.xlu1 %4231, %v3613_v2   ;;  %v5499_v51 = vmul.f32 %v5471_v42, %v5471_v42 }
  0xfb   : > { %v587_v5 = vpop.permute.xlu1 %586  ;;  %v716_v6 = vpop.permute.xlu0 %715 }
  0xfc   : > { %v5477_v43 = vsub.f32 %v5265_v12, %v587_v5  ;;  %v5494_v49 = vsub.f32 %v5273_v15, %v716_v6 }
  0xfd   : > { %1171 = vperm.xlu0 %4230, %v3618_v3  }
  0xfe   : > { %1159 = vperm.xlu1 %4231, %v3615_v7   ;;  %v5518_v58 = vmul.f32 %v5477_v43, %v5477_v43 }
  0xff   : > { %v595_v9 = vpop.permute.xlu1 %594  ;;  %v724_v10 = vpop.permute.xlu0 %723 }
 0x100   : > { %v5502_v52 = vsub.f32 %v5265_v12, %v595_v9  ;;  %v5505_v53 = vsub.f32 %v5273_v15, %v724_v10 }
 0x101   : > { %1179 = vperm.xlu0 %4230, %v3620_v8  }
 0x102   : > { %1167 = vperm.xlu1 %4231, %v3617_v11   ;;  %v5541_v5 = vmul.f32 %v5502_v52, %v5502_v52  ;;  %v5546_v7 = vmul.f32 %v5505_v53, %v5505_v53 }
 0x103   : > { %v603_v14 = vpop.permute.xlu1 %602  ;;  %v732_v16 = vpop.permute.xlu0 %731 }
 0x104   : > { %v5514_v57 = vsub.f32 %v5265_v12, %v603_v14  ;;  %v5521_v59 = vsub.f32 %v5273_v15, %v732_v16 }
 0x105   : > { %1187 = vperm.xlu0 %4230, %v3622_v13  }
 0x106   : > { %1175 = vperm.xlu1 %4231, %v3619_v17   ;;  %v5554_v10 = vmul.f32 %v5514_v57, %v5514_v57  ;;  %v5562_v14 = vmul.f32 %v5521_v59, %v5521_v59 }
 0x107   : > { %v611_v19 = vpop.permute.xlu1 %610  ;;  %v740_v20 = vpop.permute.xlu0 %739 }
 0x108   : > { %v5524_v60 = vsub.f32 %v5265_v12, %v611_v19  ;;  %v5537_v3 = vsub.f32 %v5273_v15, %v740_v20 }
 0x109   : > { %1294 = vperm.xlu0 %4230, %v5433_v18  }
 0x10a   : > { %1183 = vperm.xlu1 %4231, %v3621_v22   ;;  %v5567_v17 = vmul.f32 %v5524_v60, %v5524_v60  ;;  %v5575_v22 = vmul.f32 %v5537_v3, %v5537_v3 }
 0x10b   : > { %v619_v26 = vpop.permute.xlu1 %618  ;;  %v748_v27 = vpop.permute.xlu0 %747 }
 0x10c   : > { %v5549_v8 = vsub.f32 %v5265_v12, %v619_v26  ;;  %v5558_v13 = vsub.f32 %v5273_v15, %v748_v27 }
 0x10d   : > { %1302 = vperm.xlu0 %4230, %v3626_v25  }
 0x10e   : > { %1290 = vperm.xlu1 %4231, %v3623_v30  }
 0x10f   : > { %v627_v32 = vpop.permute.xlu1 %626  ;;  %v5445_v33 = vpop.permute.xlu0 %755 }
 0x110   : > { %v5570_v19 = vsub.f32 %v5265_v12, %v627_v32  ;;  %v5580_v26 = vsub.f32 %v5273_v15, %v5445_v33  ;;  %v5585_v32 = vmul.f32 %v5549_v8, %v5549_v8 }
 0x111   : > { %4233 = vset.pattern.permute.xlu0 %v5033_v4 }
 0x112   : > { %1310 = vperm.xlu0 %4233, %v5433_v18   ;;  %1298 = vperm.xlu1 %4231, %v5450_v34  }
 0x113   : > { %v5455_v35 = vpop.permute.xlu1 %634  ;;  %v5457_v36 = vpop.permute.xlu0 %763 }
 0x114   : > { %v5605_v16 = vsub.f32 %v5273_v15, %v5457_v36  ;;  %v5622_v36 = vmul.f32 %v5580_v26, %v5580_v26 }
 0x116   : > { %4232 = vset.pattern.permute.xlu1 %v5033_v4  ;;  %4234 = vset.pattern.permute.xlu0 %v5035_v37  ;;  %v5474_v4 = vsub.f32 %v5273_v15, %v708_v1  ;;  %v5533_v1 = vmul.f32 %v5494_v49, %v5494_v49 }
 0x117   : > { %v5460_v38 = vpop.permute.xlu1 %642  ;;  %v5462_v39 = vpop.permute.xlu0 %771  ;;  %1306 = vperm.xlu1 %4232, %v3623_v30   ;;  %1322 = vperm.xlu0 %4234, %v3623_v30  }
 0x118   : > { %v5510_v55 = vmul.f32 %v5474_v4, %v5474_v4  ;;  %v5627_v9 = vsub.f32 %v5273_v15, %v5462_v39  ;;  %v5645_v39 = vmul.f32 %v5605_v16, %v5605_v16 }
 0x11a   : > { %11002 = vst [vmem:[#allocation22_spill] sm:$0xff] %v5627_v9 }
 0x11b   : > { %v5479_v44 = vpop.permute.xlu1 %650  ;;  %v5481_v45 = vpop.permute.xlu0 %779  ;;  %1314 = vperm.xlu1 %4232, %v5450_v34   ;;  %1334 = vperm.xlu0 %4234, %v3626_v25  }
 0x11c   : > { %v5650_v47 = vsub.f32 %v5265_v12, %v5479_v44  ;;  %v5668_v44 = vsub.f32 %v5273_v15, %v5481_v45 }
 0x11e   : > { %11003 = vst [vmem:[#allocation23_spill] sm:$0xff] %v5650_v47  ;;  %11004 = vst [vmem:[#allocation24_spill] sm:$0xff] %v5668_v44  ;;  %v5685_v45 = vmul.f32 %v5650_v47, %v5650_v47 }
 0x11f   : > { %v659_v61 = vpop.permute.xlu1 %658  ;;  %v5526_v62 = vpop.permute.xlu0 %787  ;;  %1318 = vperm.xlu1 %4232, %v3626_v25  }
 0x120   : > { %v5671_v50 = vsub.f32 %v5265_v12, %v659_v61  ;;  %v5689_v61 = vsub.f32 %v5273_v15, %v5526_v62 }
 0x122   : > { %11005 = vst [vmem:[#allocation25_spill] sm:$0xff] %v5671_v50  ;;  %11007 = vst [vmem:[#allocation27_spill] sm:$0xff] %v5689_v61  ;;  %v5706_v62 = vmul.f32 %v5671_v50, %v5671_v50 }
 0x123   : > { %4235 = vset.pattern.permute.xlu1 %v5035_v37  ;;  %v5589_v37 = vsub.f32 %v5265_v12, %v5455_v35  ;;  %v5609_v35 = vmul.f32 %v5570_v19, %v5570_v19 }
 0x124   : > { %v567_v27 = vpop.permute.xlu0 %566  ;;  %1326 = vperm.xlu1 %4235, %v5433_v18   ;;  %v692_v30 = vpop.permute.xlu1 %691  ;;  %v5600_v18 = vmul.f32 %v5558_v13, %v5558_v13 }
 0x125   : > { %v5592_v20 = vsub.f32 %v5265_v12, %v567_v27  ;;  %v5595_v25 = vsub.f32 %v5273_v15, %v692_v30  ;;  %v5613_v27 = vsub.f32 %v5265_v12, %v5460_v38  ;;  %v5632_v2 = vmul.f32 %v5589_v37, %v5589_v37 }
 0x127   : > { %11001 = vst [vmem:[#allocation21_spill] sm:$0xff] %v5613_v27  ;;  %v815_v30 = vmul.f32 %v5592_v20, %v5592_v20  ;;  %v840_v33 = vmul.f32 %v5595_v25, %v5595_v25  ;;  %v1389_v23 = vsub.f32 0.0, %v5595_v25 }
 0x128   : > { %v571_v38 = vpop.permute.xlu0 %570  ;;  %1330 = vperm.xlu1 %4235, %v5450_v34   ;;  %v700_v0 = vpop.permute.xlu1 %699  ;;  %v5664_v34 = vmul.f32 %v5627_v9, %v5627_v9 }
 0x129   : > { %v5634_v54 = vadd.f32 %v840_v33, %v815_v30  ;;  %v5637_v11 = vsub.f32 %v5265_v12, %v571_v38  ;;  %v5640_v56 = vsub.f32 %v5273_v15, %v700_v0  ;;  %v5654_v33 = vmul.f32 %v5613_v27, %v5613_v27 }
 0x12b   : > { %v890_v30 = vadd.f32 1e-12, %v5634_v54  ;;  %v816_v0 = vmul.f32 %v5637_v11, %v5637_v11  ;;  %v842_v38 = vmul.f32 %v5640_v56, %v5640_v56  ;;  %v1339_v50 = vsub.f32 0.0, %v5637_v11 }
 0x12c   : > { %v583_v29 = vpop.permute.xlu0 %582  ;;  %v704_v28 = vpop.permute.xlu1 %703 }
 0x12d   : > { %4236 = vrsqrt.f32 %v890_v30  ;;  %v5674_v24 = vadd.f32 %v5491_v48, %v816_v0  ;;  %v5677_v31 = vadd.f32 %v842_v38, %v5486_v46  ;;  %v5680_v6 = vsub.f32 %v5265_v12, %v583_v29 }
 0x12e   : > { %v5692_v30 = vsub.f32 %v5273_v15, %v704_v28  ;;  %v5701_v38 = vmul.f32 %v5668_v44, %v5668_v44  ;;  %v5722_v44 = vmul.f32 %v5689_v61, %v5689_v61 }
 0x12f   : > { %11006 = vst [vmem:[#allocation26_spill] sm:$0xff] %v5677_v31  ;;  %v891_v46 = vadd.f32 1e-12, %v5674_v24  ;;  %v892_v29 = vadd.f32 1e-12, %v5677_v31  ;;  %v819_v0 = vmul.f32 %v5680_v6, %v5680_v6  ;;  %v1342_v25 = vsub.f32 0.0, %v5680_v6 }
 0x130   : > { %v843_v28 = vmul.f32 %v5692_v30, %v5692_v30  ;;  %v591_v48 = vpop.permute.xlu0 %590  ;;  %v712_v21 = vpop.permute.xlu1 %711 }
 0x131   : > { %4238 = vrsqrt.f32 %v891_v46  ;;  %v5711_v47 = vadd.f32 %v5510_v55, %v819_v0  ;;  %v5714_v31 = vsub.f32 %v5265_v12, %v591_v48  ;;  %v5717_v27 = vsub.f32 %v5273_v15, %v712_v21 }
 0x132   : > { %4240 = vrsqrt.f32 %v892_v29  ;;  %v5725_v9 = vadd.f32 %v843_v28, %v5499_v51  ;;  %v1338_v0 = vsub.f32 0.0, %v5592_v20  ;;  %v1391_v20 = vsub.f32 0.0, %v5640_v56 }
 0x133   : > { %11008 = vst [vmem:[#allocation28_spill] sm:$0xff] %v5711_v47  ;;  %v894_v55 = vadd.f32 1e-12, %v5711_v47  ;;  %v821_v48 = vmul.f32 %v5714_v31, %v5714_v31  ;;  %v845_v21 = vmul.f32 %v5717_v27, %v5717_v27  ;;  %v1344_v6 = vsub.f32 0.0, %v5714_v31 }
 0x134   : > { %11009 = vst [vmem:[#allocation29_spill] sm:$0xff] %v5725_v9  ;;  %v893_v29 = vadd.f32 1e-12, %v5725_v9  ;;  %v599_v51 = vpop.permute.xlu0 %598  ;;  %v720_v28 = vpop.permute.xlu1 %719 }
 0x135   : > { %4242 = vrsqrt.f32 %v894_v55  ;;  %v5738_v46 = vadd.f32 %v5533_v1, %v821_v48  ;;  %v5741_v61 = vadd.f32 %v845_v21, %v5518_v58  ;;  %v5744_v47 = vsub.f32 %v5265_v12, %v599_v51 }
 0x136   : > { %4244 = vrsqrt.f32 %v893_v29  ;;  %v5749_v11 = vsub.f32 %v5273_v15, %v720_v28  ;;  %v1392_v55 = vsub.f32 0.0, %v5692_v30 }
 0x137   : > { %11010 = vst [vmem:[#allocation30_spill] sm:$0xff] %v5738_v46  ;;  %11011 = vst [vmem:[#allocation31_spill] sm:$0xff] %v5741_v61  ;;  %v5751_v9 = vpop.eup %4236  ;;  %v896_v1 = vadd.f32 1e-12, %v5738_v46  ;;  %v895_v58 = vadd.f32 1e-12, %v5741_v61  ;;  %v823_v48 = vmul.f32 %v5744_v47, %v5744_v47 }
 0x138   : > { %v5759_v21 = vmul.f32 %v5751_v9, %v1338_v0  ;;  %v5762_v56 = vmul.f32 %v5751_v9, %v1389_v23  ;;  %v847_v29 = vmul.f32 %v5749_v11, %v5749_v11  ;;  %v607_v51 = vpop.permute.xlu0 %606  ;;  %v728_v30 = vpop.permute.xlu1 %727 }
 0x139   : > { %4246 = vrsqrt.f32 %v896_v1  ;;  %v5768_v28 = vadd.f32 %v5546_v7, %v823_v48  ;;  %v5771_v61 = vsub.f32 %v5265_v12, %v607_v51  ;;  %v5774_v0 = vsub.f32 %v5273_v15, %v728_v30 }
 0x13a   : > { %11012 = vst [vmem:[#allocation32_spill] sm:$0xff] %v5759_v21  ;;  %11013 = vst [vmem:[#allocation33_spill] sm:$0xff] %v5762_v56  ;;  %v5778_v23 = vmul.f32 %v5759_v21, %v5759_v21  ;;  %v5782_v31 = vmul.f32 %v5762_v56, %v5759_v21  ;;  %v5786_v1 = vmul.f32 %v5762_v56, %v5762_v56  ;;  %4248 = vrsqrt.f32 %v895_v58 }
 0x13b   : > { %11014 = vst [vmem:[#allocation34_spill] sm:$0xff] %v5768_v28  ;;  %v5788_v7 = vpop.eup %4238  ;;  %v1394_v48 = vsub.f32 0.0, %v5717_v27  ;;  %v898_v51 = vadd.f32 1e-12, %v5768_v28  ;;  %v5793_v30 = vadd.f32 %v847_v29, %v5541_v5  ;;  %v1346_v27 = vsub.f32 0.0, %v5744_v47 }
 0x13c   : > { %11015 = vst [vmem:[#allocation35_spill] sm:$0xff] %v5778_v23  ;;  %11016 = vst [vmem:[#allocation36_spill] sm:$0xff] %v5782_v31  ;;  %v825_v23 = vmul.f32 %v5771_v61, %v5771_v61  ;;  %v5797_v46 = vpop.eup %4240  ;;  %v5800_v31 = vmul.f32 %v5788_v7, %v1339_v50  ;;  %v849_v56 = vmul.f32 %v5774_v0, %v5774_v0  ;;  %v615_v5 = vpop.permute.xlu0 %614  ;;  %v11021_v21 = vsub.f32 0.0, %v5465_v40 }
 0x13d   : > { %11017 = vst [vmem:[#allocation37_spill] sm:$0xff] %v5786_v1  ;;  %v11019_v1 = vsub.f32 0.0, %v5468_v41  ;;  %v736_v29 = vpop.permute.xlu1 %735  ;;  %v5816_v50 = vmul.f32 %v5797_v46, %v1391_v20  ;;  %4250 = vrsqrt.f32 %v898_v51  ;;  %v897_v41 = vadd.f32 1e-12, %v5793_v30 }
 0x13e   : > { %11018 = vst [vmem:[#allocation38_spill] sm:$0xff] %v5800_v31  ;;  %v5813_v28 = vmul.f32 %v5797_v46, %v11021_v21  ;;  %v5832_v21 = vadd.f32 %v5562_v14, %v825_v23  ;;  %v11031_v23 = vsub.f32 0.0, %v5474_v4  ;;  %v5871_v4 = vsub.f32 %v5265_v12, %v615_v5 }
 0x13f   : > { %v5805_v58 = vmul.f32 %v5788_v7, %v11019_v1  ;;  %11023 = vst [vmem:[#allocation41_spill] sm:$0xff] %v5816_v50  ;;  %v5821_v1 = vmul.f32 %v5800_v31, %v5800_v31  ;;  %v5834_v20 = vpop.eup %4242  ;;  %4252 = vrsqrt.f32 %v897_v41 }
 0x140   : > { %11022 = vst [vmem:[#allocation40_spill] sm:$0xff] %v5813_v28  ;;  %v5838_v51 = vmul.f32 %v5813_v28, %v5813_v28  ;;  %v5851_v14 = vmul.f32 %v5834_v20, %v1342_v25 }
 0x141   : > { %11020 = vst [vmem:[#allocation39_spill] sm:$0xff] %v5805_v58  ;;  %11024 = vst [vmem:[#allocation42_spill] sm:$0xff] %v5821_v1  ;;  %v5825_v47 = vmul.f32 %v5805_v58, %v5800_v31  ;;  %v5829_v40 = vmul.f32 %v5805_v58, %v5805_v58  ;;  %v5842_v1 = vmul.f32 %v5816_v50, %v5813_v28  ;;  %v5848_v58 = vpop.eup %4244  ;;  %v744_v31 = vpop.permute.xlu1 %743 }
 0x142   : > { %11027 = vst [vmem:[#allocation45_spill] sm:$0xff] %v5838_v51  ;;  %11030 = vst [vmem:[#allocation48_spill] sm:$0xff] %v5851_v14  ;;  %v900_v51 = vadd.f32 1e-12, %v5832_v21  ;;  %v5860_v28 = vadd.f32 %v849_v56, %v5554_v10  ;;  %v5868_v25 = vmul.f32 %v5848_v58, %v1392_v55  ;;  %v5878_v10 = vmul.f32 %v5851_v14, %v5851_v14 }
 0x143   : > { %11025 = vst [vmem:[#allocation43_spill] sm:$0xff] %v5825_v47  ;;  %11026 = vst [vmem:[#allocation44_spill] sm:$0xff] %v5829_v40  ;;  %v5846_v47 = vmul.f32 %v5816_v50, %v5816_v50  ;;  %v5856_v40 = vmul.f32 %v5834_v20, %v11031_v23  ;;  %v5874_v23 = vsub.f32 %v5273_v15, %v736_v29  ;;  %v5888_v55 = vpop.eup %4246 }
 0x144   : > { %11028 = vst [vmem:[#allocation46_spill] sm:$0xff] %v5842_v1  ;;  %v623_v1 = vpop.permute.xlu0 %622  ;;  %11035 = vst [vmem:[#allocation51_spill] sm:$0xff] %v5868_v25  ;;  %4254 = vrsqrt.f32 %v900_v51  ;;  %v5906_v51 = vmul.f32 %v5888_v55, %v1344_v6 }
 0x145   : > { %11029 = vst [vmem:[#allocation47_spill] sm:$0xff] %v5846_v47  ;;  %11032 = vst [vmem:[#allocation49_spill] sm:$0xff] %v5856_v40  ;;  %v11033_v47 = vsub.f32 0.0, %v5471_v42  ;;  %v5882_v56 = vmul.f32 %v5856_v40, %v5851_v14  ;;  %v5886_v42 = vmul.f32 %v5856_v40, %v5856_v40 }
 0x146   : > { %11036 = vst [vmem:[#allocation52_spill] sm:$0xff] %v5878_v10  ;;  %v5903_v10 = vpop.eup %4248  ;;  %11042 = vst [vmem:[#allocation58_spill] sm:$0xff] %v5906_v51 }
 0x147   : > { %v5865_v41 = vmul.f32 %v5848_v58, %v11033_v47  ;;  %11037 = vst [vmem:[#allocation53_spill] sm:$0xff] %v5882_v56  ;;  %11038 = vst [vmem:[#allocation54_spill] sm:$0xff] %v5886_v42  ;;  %v5900_v47 = vmul.f32 %v5868_v25, %v5868_v25  ;;  %v899_v56 = vadd.f32 1e-12, %v5860_v28  ;;  %v11043_v42 = vsub.f32 0.0, %v5494_v49 }
 0x148   : > { %v631_v50 = vpop.permute.xlu0 %630  ;;  %v5922_v6 = vmul.f32 %v5903_v10, %v1394_v48  ;;  %v851_v49 = vmul.f32 %v5874_v23, %v5874_v23  ;;  %v5941_v48 = vpop.eup %4250 }
 0x149   : > { %11034 = vst [vmem:[#allocation50_spill] sm:$0xff] %v5865_v41  ;;  %v5892_v5 = vmul.f32 %v5865_v41, %v5865_v41  ;;  %v5896_v29 = vmul.f32 %v5868_v25, %v5865_v41  ;;  %11041 = vst [vmem:[#allocation57_spill] sm:$0xff] %v5900_v47  ;;  %v5911_v40 = vmul.f32 %v5888_v55, %v11043_v42  ;;  %v752_v25 = vpop.permute.xlu1 %751  ;;  %v11045_v47 = vsub.f32 0.0, %v5477_v43  ;;  %v5968_v41 = vpop.eup %4252 }
 0x14a   : > { %11047 = vst [vmem:[#allocation61_spill] sm:$0xff] %v5922_v6  ;;  %4256 = vrsqrt.f32 %v899_v56 }
 0x14b   : > { %11039 = vst [vmem:[#allocation55_spill] sm:$0xff] %v5892_v5  ;;  %11040 = vst [vmem:[#allocation56_spill] sm:$0xff] %v5896_v29  ;;  %v1396_v5 = vsub.f32 0.0, %v5749_v11  ;;  %v827_v29 = vmul.f32 %v5871_v4, %v5871_v4  ;;  %v5919_v14 = vmul.f32 %v5903_v10, %v11045_v47  ;;  %v5928_v11 = vmul.f32 %v5906_v51, %v5906_v51 }
 0x14c   : > { %11044 = vst [vmem:[#allocation59_spill] sm:$0xff] %v5911_v40  ;;  %v5932_v42 = vmul.f32 %v5911_v40, %v5906_v51  ;;  %v5936_v43 = vmul.f32 %v5911_v40, %v5911_v40  ;;  %v5956_v40 = vadd.f32 %v851_v49, %v5567_v17  ;;  %v5972_v17 = vsub.f32 %v5265_v12, %v623_v1 }
 0x14d   : > { %11046 = vst [vmem:[#allocation60_spill] sm:$0xff] %v5919_v14  ;;  %11048 = vst [vmem:[#allocation62_spill] sm:$0xff] %v5928_v11  ;;  %v5939_v47 = vadd.f32 %v5575_v22, %v827_v29  ;;  %v5945_v56 = vmul.f32 %v5919_v14, %v5919_v14  ;;  %v5949_v11 = vmul.f32 %v5922_v6, %v5919_v14  ;;  %v11056_v29 = vsub.f32 0.0, %v5505_v53  ;;  %v760_v14 = vpop.permute.xlu1 %759 }
 0x14e   : > { %11049 = vst [vmem:[#allocation63_spill] sm:$0xff] %v5932_v42  ;;  %11050 = vst [vmem:[#allocation64_spill] sm:$0xff] %v5936_v43  ;;  %v5953_v42 = vmul.f32 %v5922_v6, %v5922_v6  ;;  %v5959_v22 = vmul.f32 %v5941_v48, %v1346_v27  ;;  %v5975_v27 = vsub.f32 %v5273_v15, %v744_v31  ;;  %v11061_v1 = vsub.f32 0.0, %v5502_v52 }
 0x14f   : > { %11051 = vst [vmem:[#allocation65_spill] sm:$0xff] %v5945_v56  ;;  %11052 = vst [vmem:[#allocation66_spill] sm:$0xff] %v5949_v11  ;;  %v5964_v43 = vmul.f32 %v5941_v48, %v11056_v29  ;;  %v1348_v56 = vsub.f32 0.0, %v5771_v61  ;;  %v902_v51 = vadd.f32 1e-12, %v5939_v47  ;;  %v639_v11 = vpop.permute.xlu0 %638  ;;  %v5978_v53 = vsub.f32 %v5265_v12, %v631_v50 }
 0x150   : > { %11053 = vst [vmem:[#allocation67_spill] sm:$0xff] %v5953_v42  ;;  %11054 = vst [vmem:[#allocation68_spill] sm:$0xff] %v5956_v40  ;;  %v901_v42 = vadd.f32 1e-12, %v5956_v40  ;;  %v5982_v61 = vmul.f32 %v5959_v22, %v5959_v22  ;;  %v5995_v31 = vmul.f32 %v5968_v41, %v11061_v1  ;;  %v5998_v50 = vmul.f32 %v5968_v41, %v1396_v5 }
 0x151   : > { %11055 = vst [vmem:[#allocation69_spill] sm:$0xff] %v5959_v22  ;;  %11057 = vst [vmem:[#allocation70_spill] sm:$0xff] %v5964_v43  ;;  %v5986_v49 = vmul.f32 %v5964_v43, %v5959_v22  ;;  %v5990_v29 = vmul.f32 %v5964_v43, %v5964_v43  ;;  %v1398_v6 = vsub.f32 0.0, %v5774_v0  ;;  %4258 = vrsqrt.f32 %v902_v51  ;;  %v6003_v22 = vpop.eup %4254 }
 0x152   : > { %11058 = vst [vmem:[#allocation71_spill] sm:$0xff] %v5982_v61  ;;  %11062 = vst [vmem:[#allocation74_spill] sm:$0xff] %v5995_v31  ;;  %v829_v61 = vmul.f32 %v5972_v17, %v5972_v17  ;;  %v1350_v52 = vsub.f32 0.0, %v5871_v4  ;;  %4260 = vrsqrt.f32 %v901_v42  ;;  %v853_v1 = vmul.f32 %v5975_v27, %v5975_v27 }
 0x153   : > { %11059 = vst [vmem:[#allocation72_spill] sm:$0xff] %v5986_v49  ;;  %11060 = vst [vmem:[#allocation73_spill] sm:$0xff] %v5990_v29  ;;  %v6007_v49 = vmul.f32 %v5995_v31, %v5995_v31  ;;  %v647_v5 = vpop.permute.xlu0 %646  ;;  %v768_v29 = vpop.permute.xlu1 %767  ;;  %v6014_v0 = vmul.f32 %v5998_v50, %v5995_v31  ;;  %v6018_v51 = vmul.f32 %v5998_v50, %v5998_v50  ;;  %v1400_v42 = vsub.f32 0.0, %v5874_v23 }
 0x154   : > { %11063 = vst [vmem:[#allocation75_spill] sm:$0xff] %v5998_v50  ;;  %v6021_v43 = vmul.f32 %v6003_v22, %v1348_v56  ;;  %v6030_v40 = vadd.f32 %v5600_v18, %v829_v61  ;;  %v6033_v31 = vadd.f32 %v853_v1, %v5585_v32  ;;  %v6052_v32 = vsub.f32 %v5273_v15, %v752_v25 }
 0x155   : > { %11064 = vst [vmem:[#allocation76_spill] sm:$0xff] %v6007_v49  ;;  %11065 = vst [vmem:[#allocation77_spill] sm:$0xff] %v6014_v0  ;;  %v11068_v49 = vsub.f32 0.0, %v5521_v59  ;;  %v831_v0 = vmul.f32 %v5978_v53, %v5978_v53  ;;  %v11073_v23 = vsub.f32 0.0, %v5514_v57  ;;  %v6071_v25 = vsub.f32 %v5265_v12, %v639_v11 }
 0x156   : > { %11066 = vst [vmem:[#allocation78_spill] sm:$0xff] %v6018_v51  ;;  %11067 = vst [vmem:[#allocation79_spill] sm:$0xff] %v6021_v43  ;;  %v6037_v51 = vpop.eup %4256  ;;  %v6041_v56 = vmul.f32 %v6021_v43, %v6021_v43  ;;  %v904_v1 = vadd.f32 1e-12, %v6030_v40  ;;  %v855_v57 = vmul.f32 %v6052_v32, %v6052_v32 }
 0x157   : > { %v6026_v4 = vmul.f32 %v6003_v22, %v11068_v49  ;;  %v6057_v61 = vmul.f32 %v6037_v51, %v11073_v23  ;;  %v6060_v49 = vmul.f32 %v6037_v51, %v1398_v6  ;;  %v776_v50 = vpop.permute.xlu1 %775  ;;  %v833_v11 = vmul.f32 %v6071_v25, %v6071_v25 }
 0x158   : > { %11070 = vst [vmem:[#allocation81_spill] sm:$0xff] %v6041_v56  ;;  %v903_v56 = vadd.f32 1e-12, %v6033_v31  ;;  %4262 = vrsqrt.f32 %v904_v1 }
 0x159   : > { %11069 = vst [vmem:[#allocation80_spill] sm:$0xff] %v6026_v4  ;;  %v6045_v59 = vmul.f32 %v6026_v4, %v6021_v43  ;;  %v6049_v18 = vmul.f32 %v6026_v4, %v6026_v4  ;;  %11074 = vst [vmem:[#allocation84_spill] sm:$0xff] %v6057_v61  ;;  %v1352_v4 = vsub.f32 0.0, %v5972_v17  ;;  %v6075_v6 = vmul.f32 %v6057_v61, %v6057_v61 }
 0x15a   : > { %11075 = vst [vmem:[#allocation85_spill] sm:$0xff] %v6060_v49  ;;  %v6079_v23 = vmul.f32 %v6060_v49, %v6057_v61  ;;  %v6083_v17 = vmul.f32 %v6060_v49, %v6060_v49  ;;  %4264 = vrsqrt.f32 %v903_v56  ;;  %v1354_v43 = vsub.f32 0.0, %v5978_v53 }
 0x15b   : > { %11071 = vst [vmem:[#allocation82_spill] sm:$0xff] %v6045_v59  ;;  %11072 = vst [vmem:[#allocation83_spill] sm:$0xff] %v6049_v18  ;;  %v655_v59 = vpop.permute.xlu0 %654  ;;  %v6066_v18 = vadd.f32 %v5622_v36, %v831_v0  ;;  %v6087_v0 = vadd.f32 %v855_v57, %v5609_v35  ;;  %v6097_v49 = vsub.f32 %v5265_v12, %v647_v5  ;;  %v6101_v56 = vpop.permute.xlu1 %783  ;;  %v11081_v5 = vsub.f32 0.0, %v5537_v3 }
 0x15c   : > { %11076 = vst [vmem:[#allocation86_spill] sm:$0xff] %v6075_v6  ;;  %11077 = vst [vmem:[#allocation87_spill] sm:$0xff] %v6079_v23  ;;  %v1402_v6 = vsub.f32 0.0, %v5975_v27  ;;  %v6094_v23 = vsub.f32 %v5273_v15, %v760_v14  ;;  %v6107_v57 = vadd.f32 %v5645_v39, %v833_v11  ;;  %v6110_v27 = vsub.f32 %v5273_v15, %v768_v29 }
 0x15d   : > { %11078 = vst [vmem:[#allocation88_spill] sm:$0xff] %v6083_v17  ;;  %v906_v36 = vadd.f32 1e-12, %v6066_v18  ;;  %11079 = vst [vmem:[#allocation89_spill] sm:$0xff] %v6087_v0  ;;  %v6103_v17 = vpop.eup %4258  ;;  %v905_v35 = vadd.f32 1e-12, %v6087_v0  ;;  %v6125_v0 = vsub.f32 %v5265_v12, %v655_v59 }
 0x15e   : > { %v6112_v14 = vpop.eup %4260  ;;  %v6115_v53 = vmul.f32 %v6103_v17, %v1350_v52  ;;  %v6120_v61 = vmul.f32 %v6103_v17, %v11081_v5  ;;  %v11083_v39 = vsub.f32 0.0, %v5524_v60  ;;  %v908_v3 = vadd.f32 1e-12, %v6107_v57 }
 0x15f   : > { %v6099_v1 = vpop.permute.xlu0 %662  ;;  %4266 = vrsqrt.f32 %v906_v36  ;;  %v857_v36 = vmul.f32 %v6094_v23, %v6094_v23  ;;  %v6133_v11 = vmul.f32 %v6112_v14, %v1400_v42 }
 0x160   : > { %11080 = vst [vmem:[#allocation90_spill] sm:$0xff] %v6115_v53  ;;  %11082 = vst [vmem:[#allocation91_spill] sm:$0xff] %v6120_v61  ;;  %v6130_v29 = vmul.f32 %v6112_v14, %v11083_v39  ;;  %4268 = vrsqrt.f32 %v905_v35  ;;  %v6138_v52 = vmul.f32 %v6115_v53, %v6115_v53  ;;  %v6142_v5 = vmul.f32 %v6120_v61, %v6115_v53 }
 0x161   : > { %11085 = vst [vmem:[#allocation93_spill] sm:$0xff] %v6133_v11  ;;  %v6146_v60 = vmul.f32 %v6120_v61, %v6120_v61  ;;  %v6149_v59 = vadd.f32 %v857_v36, %v5632_v2  ;;  %4270 = vrsqrt.f32 %v908_v3  ;;  %v1404_v2 = vsub.f32 0.0, %v6052_v32 }
 0x162   : > { %11084 = vst [vmem:[#allocation92_spill] sm:$0xff] %v6130_v29  ;;  %11086 = vst [vmem:[#allocation94_spill] sm:$0xff] %v6138_v52  ;;  %v6155_v35 = vmul.f32 %v6130_v29, %v6130_v29  ;;  %v6159_v39 = vmul.f32 %v6133_v11, %v6130_v29  ;;  %v6165_v52 = vpop.permute.xlu1 %1091  ;;  %v1356_v61 = vsub.f32 0.0, %v6071_v25  ;;  %v6178_v3 = vsub.f32 %v5273_v15, %v776_v50 }
 0x163   : > { %11087 = vst [vmem:[#allocation95_spill] sm:$0xff] %v6142_v5  ;;  %11088 = vst [vmem:[#allocation96_spill] sm:$0xff] %v6146_v60  ;;  %v6151_v42 = vpop.permute.xlu0 %1095  ;;  %v6163_v5 = vmul.f32 %v6133_v11, %v6133_v11  ;;  %v907_v36 = vadd.f32 1e-12, %v6149_v59  ;;  %v835_v60 = vmul.f32 %v6097_v49, %v6097_v49  ;;  %v6180_v11 = vpop.eup %4262  ;;  %v11095_v15 = vsub.f32 0.0, %v5558_v13 }
 0x164   : > { %11089 = vst [vmem:[#allocation97_spill] sm:$0xff] %v6149_v59  ;;  %11090 = vst [vmem:[#allocation98_spill] sm:$0xff] %v6155_v35  ;;  %v859_v35 = vmul.f32 %v6110_v27, %v6110_v27  ;;  %v6194_v59 = vmul.f32 %v6180_v11, %v1352_v4 }
 0x165   : > { %11091 = vst [vmem:[#allocation99_spill] sm:$0xff] %v6159_v39  ;;  %11092 = vst [vmem:[#allocation100_spill] sm:$0xff] %v6163_v5  ;;  %v837_v5 = vmul.f32 %v6125_v0, %v6125_v0  ;;  %4272 = vrsqrt.f32 %v907_v36  ;;  %v6183_v32 = vadd.f32 %v5664_v34, %v835_v60  ;;  %v6191_v39 = vpop.eup %4264  ;;  %v6199_v50 = vmul.f32 %v6180_v11, %v11095_v15 }
 0x166   : > { %v6187_v29 = vadd.f32 %v859_v35, %v5654_v33  ;;  %11094 = vst [vmem:[#allocation102_spill] sm:$0xff] %v6194_v59  ;;  %v861_v60 = vmul.f32 %v6178_v3, %v6178_v3  ;;  %v6206_v33 = vpop.permute.xlu1 %1099  ;;  %v11098_v35 = vsub.f32 0.0, %v5549_v8  ;;  %v6214_v4 = vmul.f32 %v6191_v39, %v1402_v6 }
 0x167   : > { %v6189_v25 = vpop.permute.xlu0 %1107  ;;  %11096 = vst [vmem:[#allocation103_spill] sm:$0xff] %v6199_v50  ;;  %v6202_v34 = vadd.f32 %v5701_v38, %v837_v5  ;;  %v910_v13 = vadd.f32 1e-12, %v6183_v32  ;;  %v6222_v38 = vmul.f32 %v6194_v59, %v6194_v59  ;;  %v6226_v5 = vmul.f32 %v6199_v50, %v6194_v59 }
 0x168   : > { %11093 = vst [vmem:[#allocation101_spill] sm:$0xff] %v6187_v29  ;;  %v6211_v36 = vmul.f32 %v6191_v39, %v11098_v35  ;;  %11100 = vst [vmem:[#allocation106_spill] sm:$0xff] %v6214_v4  ;;  %v909_v15 = vadd.f32 1e-12, %v6187_v29  ;;  %v6230_v8 = vmul.f32 %v6199_v50, %v6199_v50  ;;  %v11108_v50 = vsub.f32 0.0, %v5580_v26 }
 0x169   : > { %11097 = vst [vmem:[#allocation104_spill] sm:$0xff] %v6202_v34  ;;  %v6218_v53 = vpop.eup %4266  ;;  %11101 = vst [vmem:[#allocation107_spill] sm:$0xff] %v6222_v38  ;;  %v912_v6 = vadd.f32 1e-12, %v6202_v34  ;;  %v6243_v38 = vmul.f32 %v6214_v4, %v6214_v4  ;;  %4274 = vrsqrt.f32 %v910_v13 }
 0x16a   : > { %11099 = vst [vmem:[#allocation105_spill] sm:$0xff] %v6211_v36  ;;  %11102 = vst [vmem:[#allocation108_spill] sm:$0xff] %v6226_v5  ;;  %v6235_v35 = vmul.f32 %v6211_v36, %v6211_v36  ;;  %v6239_v29 = vmul.f32 %v6214_v4, %v6211_v36  ;;  %v6246_v5 = vmul.f32 %v6218_v53, %v1354_v43  ;;  %v11111_v4 = vsub.f32 0.0, %v5570_v19 }
 0x16b   : > { %11103 = vst [vmem:[#allocation109_spill] sm:$0xff] %v6230_v8  ;;  %11106 = vst [vmem:[#allocation112_spill] sm:$0xff] %v6243_v38  ;;  %v6248_v59 = vpop.permute.xlu0 %1115  ;;  %v6250_v8 = vpop.eup %4268  ;;  %v6255_v34 = vmul.f32 %v6218_v53, %v11108_v50  ;;  %4276 = vrsqrt.f32 %v909_v15  ;;  %v6918_v36 = vmov 0.0  }
 0x16c   : > { %11104 = vst [vmem:[#allocation110_spill] sm:$0xff] %v6235_v35  ;;  %11105 = vst [vmem:[#allocation111_spill] sm:$0xff] %v6239_v29  ;;  %v6258_v35 = vadd.f32 %v861_v60, %v5685_v45  ;;  %v6262_v29 = vsub.f32 %v5265_v12, %v6099_v1  ;;  %v6264_v38 = vpop.permute.xlu1 %1103  ;;  %v6268_v43 = vmul.f32 %v6246_v5, %v6246_v5  ;;  %v6278_v45 = vpop.eup %4270  ;;  %4278 = vrsqrt.f32 %v912_v6 }
 0x16d   : > { %11107 = vst [vmem:[#allocation113_spill] sm:$0xff] %v6246_v5  ;;  %11109 = vst [vmem:[#allocation114_spill] sm:$0xff] %v6255_v34  ;;  %v6273_v26 = vmul.f32 %v6250_v8, %v11111_v4  ;;  %v6276_v50 = vmul.f32 %v6250_v8, %v1404_v2  ;;  %v6282_v12 = vmul.f32 %v6255_v34, %v6246_v5  ;;  %v11120_v6 = vsub.f32 0.0, %v5605_v16  ;;  %v4286_v16 = vld [vmem:[%s5204_s17 + $0x8] sm:$0xff]  ;;  %s3571_s17 = sshll.u32 %s5198_s18, 3 }
 0x16e   : > { %11110 = vst [vmem:[#allocation115_spill] sm:$0xff] %v6268_v43  ;;  %v6286_v1 = vmul.f32 %v6255_v34, %v6255_v34  ;;  %v911_v19 = vadd.f32 1e-12, %v6258_v35  ;;  %v6302_v13 = vmul.f32 %v6278_v45, %v1356_v61  ;;  %s6784_s12 = scalar_lea.vmem [#allocation9], %s3571_s17  ;;  %11251 = vst [vmem:[#allocation211_spill] sm:$0xff] %v6918_v36 }
 0x16f   : > { %11112 = vst [vmem:[#allocation116_spill] sm:$0xff] %v6273_v26  ;;  %11113 = vst [vmem:[#allocation117_spill] sm:$0xff] %v6276_v50  ;;  %v6291_v60 = vmul.f32 %v6273_v26, %v6273_v26  ;;  %v6295_v2 = vmul.f32 %v6276_v50, %v6273_v26  ;;  %v6299_v4 = vmul.f32 %v6276_v50, %v6276_v50  ;;  %v6304_v15 = vpop.permute.xlu0 %1123  ;;  %v11125_v50 = vsub.f32 0.0, %v5589_v37 }
 0x170   : > { %11114 = vst [vmem:[#allocation118_spill] sm:$0xff] %v6282_v12  ;;  %11115 = vst [vmem:[#allocation119_spill] sm:$0xff] %v6286_v1  ;;  %v6309_v1 = vmul.f32 %v6278_v45, %v11120_v6  ;;  %v1408_v12 = vsub.f32 0.0, %v6110_v27  ;;  %4280 = vrsqrt.f32 %v911_v19  ;;  %v6314_v43 = vpop.permute.xlu1 %1111  ;;  %v6320_v61 = vmul.f32 %v6302_v13, %v6302_v13 }
 0x171   : > { %11116 = vst [vmem:[#allocation120_spill] sm:$0xff] %v6291_v60  ;;  %11117 = vst [vmem:[#allocation121_spill] sm:$0xff] %v6295_v2  ;;  %v839_v2 = vmul.f32 %v6262_v29, %v6262_v29  ;;  %v6316_v60 = vpop.eup %4272  ;;  %v6325_v6 = vsub.f32 %v4286_v16, %v6101_v56  ;;  %v941_v27 = vmul.f32 %v5788_v7, %v5674_v24 }
 0x172   : > { %11118 = vst [vmem:[#allocation122_spill] sm:$0xff] %v6299_v4  ;;  %11119 = vst [vmem:[#allocation123_spill] sm:$0xff] %v6302_v13  ;;  %v1360_v4 = vsub.f32 0.0, %v6125_v0  ;;  %v6331_v19 = vmul.f32 %v6309_v1, %v6302_v13  ;;  %v6335_v34 = vmul.f32 %v6309_v1, %v6309_v1  ;;  %v11127_v0 = vsub.f32 0.0, %v6094_v23 }
 0x173   : > { %11121 = vst [vmem:[#allocation124_spill] sm:$0xff] %v6309_v1  ;;  %11122 = vst [vmem:[#allocation125_spill] sm:$0xff] %v6320_v61  ;;  %v6340_v61 = vmul.f32 %v6316_v60, %v11125_v50  ;;  %v6348_v24 = vadd.f32 %v5722_v44, %v839_v2  ;;  %v863_v7 = vmul.f32 %v6325_v6, %v6325_v6  ;;  %v6355_v37 = vpop.permute.xlu0 %1131  ;;  %v6377_v1 = vpop.eup %4274 }
 0x174   : > { %11123 = vst [vmem:[#allocation126_spill] sm:$0xff] %v6331_v19  ;;  %11124 = vst [vmem:[#allocation127_spill] sm:$0xff] %v6335_v34  ;;  %v6345_v56 = vmul.f32 %v6316_v60, %v11127_v0  ;;  %v1191_v16 = vsub.f32 %v6151_v42, %v941_v27  ;;  %v940_v34 = vmul.f32 %v5751_v9, %v5634_v54  ;;  %v6370_v0 = vpop.permute.xlu1 %1119  ;;  %v1410_v54 = vsub.f32 0.0, %v6178_v3 }
 0x175   : > { %11126 = vst [vmem:[#allocation128_spill] sm:$0xff] %v6340_v61  ;;  %v6359_v50 = vmul.f32 %v6340_v61, %v6340_v61  ;;  %v1443_v2 = vsub.f32 %v941_v27, %v6151_v42  ;;  %v914_v9 = vadd.f32 1e-12, %v6348_v24  ;;  %v6375_v19 = vadd.f32 %v863_v7, %v5706_v62  ;;  %v11133_v42 = vld [vmem:[#allocation28_spill] sm:$0xff]  ;;  %v6386_v13 = vpop.eup %4276  ;;  %v11136_v7 = vld [vmem:[#allocation22_spill] sm:$0xff] }
 0x176   : > { %11128 = vst [vmem:[#allocation129_spill] sm:$0xff] %v6345_v56  ;;  %v6363_v23 = vmul.f32 %v6345_v56, %v6340_v61  ;;  %v6367_v44 = vmul.f32 %v6345_v56, %v6345_v56  ;;  %v1190_v56 = vsub.f32 %v6165_v52, %v940_v34  ;;  %v944_v27 = vmul.f32 %v5834_v20, %v11133_v42  ;;  %v11139_v20 = vld [vmem:[#allocation21_spill] sm:$0xff] }
 0x177   : > { %11129 = vst [vmem:[#allocation130_spill] sm:$0xff] %v6359_v50  ;;  %v1216_v50 = vmax.f32 %v1191_v16, 0.0  ;;  %v11134_v3 = vsub.f32 0.0, %v6097_v49  ;;  %v11137_v16 = vsub.f32 0.0, %v11136_v7  ;;  %4282 = vrsqrt.f32 %v914_v9  ;;  %v11144_v7 = vld [vmem:[#allocation26_spill] sm:$0xff] }
 0x178   : > { %11130 = vst [vmem:[#allocation131_spill] sm:$0xff] %v6363_v23  ;;  %11131 = vst [vmem:[#allocation132_spill] sm:$0xff] %v6367_v44  ;;  %v6380_v23 = vmul.f32 %v5528_v63, %v1443_v2  ;;  %v1442_v44 = vsub.f32 %v940_v34, %v6165_v52  ;;  %v913_v2 = vadd.f32 1e-12, %v6375_v19  ;;  %v6401_v52 = vpop.eup %4278  ;;  %v11140_v34 = vsub.f32 0.0, %v11139_v20 }
 0x179   : > { %v6391_v62 = vmul.f32 %v6377_v1, %v11134_v3  ;;  %v6396_v61 = vmul.f32 %v6377_v1, %v11137_v16  ;;  %v6409_v49 = vmul.f32 %v6386_v13, %v1408_v12  ;;  %v942_v9 = vmul.f32 %v5797_v46, %v11144_v7  ;;  %v6416_v16 = vpop.permute.xlu1 %1127 }
 0x17a   : > { %11132 = vst [vmem:[#allocation133_spill] sm:$0xff] %v6380_v23  ;;  %v6399_v23 = vpop.permute.xlu0 %1139  ;;  %v6406_v42 = vmul.f32 %v6386_v13, %v11140_v34  ;;  %v6412_v3 = vmul.f32 %v5528_v63, %v1442_v44  ;;  %v6431_v44 = vmul.f32 %v6401_v52, %v1360_v4  ;;  %v6433_v34 = vpop.eup %4280  ;;  %4284 = vrsqrt.f32 %v913_v2 }
 0x17b   : > { %11135 = vst [vmem:[#allocation28_spill] sm:$0xff] %v6391_v62  ;;  %11138 = vst [vmem:[#allocation22_spill] sm:$0xff] %v6396_v61  ;;  %v6420_v5 = vmul.f32 %v6391_v62, %v6391_v62  ;;  %v6424_v20 = vmul.f32 %v6396_v61, %v6391_v62  ;;  %v6428_v12 = vmul.f32 %v6396_v61, %v6396_v61  ;;  %v11156_v61 = vld [vmem:[#allocation23_spill] sm:$0xff] }
 0x17c   : > { %11141 = vst [vmem:[#allocation21_spill] sm:$0xff] %v6406_v42  ;;  %11142 = vst [vmem:[#allocation134_spill] sm:$0xff] %v6409_v49  ;;  %v6437_v46 = vmul.f32 %v6406_v42, %v6406_v42  ;;  %v6441_v7 = vmul.f32 %v6409_v49, %v6406_v42  ;;  %v6454_v4 = vmul.f32 %v6431_v44, %v6431_v44  ;;  %v11157_v62 = vsub.f32 0.0, %v11156_v61 }
 0x17d   : > { %11143 = vst [vmem:[#allocation135_spill] sm:$0xff] %v6412_v3  ;;  %11145 = vst [vmem:[#allocation26_spill] sm:$0xff] %v6420_v5  ;;  %v11152_v5 = vld [vmem:[#allocation24_spill] sm:$0xff]  ;;  %v1194_v61 = vsub.f32 %v6189_v25, %v944_v27 }
 0x17e   : > { %11146 = vst [vmem:[#allocation136_spill] sm:$0xff] %v6424_v20  ;;  %11147 = vst [vmem:[#allocation137_spill] sm:$0xff] %v6428_v12  ;;  %v6445_v20 = vmul.f32 %v6409_v49, %v6409_v49  ;;  %v11153_v3 = vsub.f32 0.0, %v11152_v5  ;;  %v6464_v49 = vpop.permute.xlu0 %1147 }
 0x17f   : > { %11148 = vst [vmem:[#allocation138_spill] sm:$0xff] %v6431_v44  ;;  %11149 = vst [vmem:[#allocation139_spill] sm:$0xff] %v6437_v46  ;;  %v6459_v46 = vmul.f32 %v6433_v34, %v11157_v62 }
 0x180   : > { %11150 = vst [vmem:[#allocation140_spill] sm:$0xff] %v6441_v7  ;;  %11151 = vst [vmem:[#allocation141_spill] sm:$0xff] %v6445_v20  ;;  %v6450_v12 = vmul.f32 %v6401_v52, %v11153_v3  ;;  %v6462_v7 = vmul.f32 %v6433_v34, %v1410_v54  ;;  %v1215_v20 = vmax.f32 %v1190_v56, 0.0  ;;  %v1362_v56 = vsub.f32 0.0, %v6262_v29 }
 0x181   : > { %11155 = vst [vmem:[#allocation142_spill] sm:$0xff] %v6454_v4  ;;  %11158 = vst [vmem:[#allocation23_spill] sm:$0xff] %v6459_v46  ;;  %v6475_v4 = vpop.permute.xlu1 %1135  ;;  %v6479_v54 = vmul.f32 %v6459_v46, %v6459_v46 }
 0x182   : > { %11154 = vst [vmem:[#allocation24_spill] sm:$0xff] %v6450_v12  ;;  %11159 = vst [vmem:[#allocation143_spill] sm:$0xff] %v6462_v7  ;;  %v6468_v5 = vmul.f32 %v6450_v12, %v6431_v44  ;;  %v6472_v3 = vmul.f32 %v6450_v12, %v6450_v12  ;;  %v6483_v62 = vmul.f32 %v6462_v7, %v6459_v46  ;;  %v11165_v44 = vld [vmem:[#allocation30_spill] sm:$0xff] }
 0x183   : > { %11162 = vst [vmem:[#allocation146_spill] sm:$0xff] %v6479_v54  ;;  %v6487_v2 = vmul.f32 %v6462_v7, %v6462_v7  ;;  %v1444_v12 = vsub.f32 %v942_v9, %v6206_v33  ;;  %v946_v42 = vmul.f32 %v5888_v55, %v11165_v44  ;;  %v1412_v54 = vsub.f32 0.0, %v6325_v6  ;;  %v6511_v6 = vpop.eup %4282 }
 0x184   : > { %11160 = vst [vmem:[#allocation144_spill] sm:$0xff] %v6468_v5  ;;  %11161 = vst [vmem:[#allocation145_spill] sm:$0xff] %v6472_v3  ;;  %v1446_v5 = vsub.f32 %v944_v27, %v6189_v25  ;;  %v1192_v3 = vsub.f32 %v6206_v33, %v942_v9  ;;  %v6503_v27 = vpop.permute.xlu0 %1155  ;;  %v1240_v29 = vadd.f32 %v1216_v50, %v1215_v20  ;;  %v1219_v44 = vmax.f32 %v1194_v61, 0.0  ;;  %v11171_v50 = vld [vmem:[#allocation27_spill] sm:$0xff] }
 0x185   : > { %11163 = vst [vmem:[#allocation147_spill] sm:$0xff] %v6483_v62  ;;  %11164 = vst [vmem:[#allocation148_spill] sm:$0xff] %v6487_v2  ;;  %v11167_v62 = vld [vmem:[#allocation29_spill] sm:$0xff]  ;;  %v11168_v2 = vld [vmem:[#allocation34_spill] sm:$0xff]  ;;  %v6506_v33 = vmul.f32 %v5528_v63, %v1444_v12  ;;  %v1448_v55 = vsub.f32 %v946_v42, %v6248_v59  ;;  %v6509_v9 = vpop.permute.xlu1 %1143  ;;  %v11172_v20 = vsub.f32 0.0, %v11171_v50  ;;  %v1196_v61 = vsub.f32 %v6248_v59, %v946_v42 }
 0x186   : > { %v6497_v46 = vmul.f32 %v5528_v63, %v1446_v5  ;;  %v943_v7 = vmul.f32 %v5848_v58, %v11167_v62  ;;  %v948_v25 = vmul.f32 %v5941_v48, %v11168_v2  ;;  %v1217_v26 = vmax.f32 %v1192_v3, 0.0  ;;  %v11174_v2 = vld [vmem:[#allocation31_spill] sm:$0xff] }
 0x187   : > { %11169 = vst [vmem:[#allocation29_spill] sm:$0xff] %v6506_v33  ;;  %v6517_v62 = vmul.f32 %v6511_v6, %v1362_v56  ;;  %v6522_v12 = vmul.f32 %v6511_v6, %v11172_v20  ;;  %v6528_v33 = vmul.f32 %v5528_v63, %v1448_v55 }
 0x188   : > { %11166 = vst [vmem:[#allocation30_spill] sm:$0xff] %v6497_v46  ;;  %v1193_v5 = vsub.f32 %v6264_v38, %v943_v7  ;;  %v1445_v58 = vsub.f32 %v943_v7, %v6264_v38  ;;  %v1450_v48 = vsub.f32 %v948_v25, %v6304_v15  ;;  %v1241_v3 = vadd.f32 %v1240_v29, %v1217_v26  ;;  %v6533_v56 = vpop.permute.xlu0 %1163  ;;  %v6552_v29 = vpop.eup %4284 }
 0x189   : > { %11170 = vst [vmem:[#allocation34_spill] sm:$0xff] %v6517_v62  ;;  %11173 = vst [vmem:[#allocation27_spill] sm:$0xff] %v6522_v12  ;;  %v945_v46 = vmul.f32 %v5903_v10, %v11174_v2  ;;  %v6537_v50 = vmul.f32 %v6517_v62, %v6517_v62  ;;  %v6541_v26 = vmul.f32 %v6522_v12, %v6517_v62  ;;  %v6550_v42 = vpop.permute.xlu1 %1151  ;;  %v11181_v2 = vld [vmem:[#allocation25_spill] sm:$0xff]  ;;  %v6914_v62 = vmov 1.0  }
 0x18a   : > { %11175 = vst [vmem:[#allocation31_spill] sm:$0xff] %v6528_v33  ;;  %v1218_v38 = vmax.f32 %v1193_v5, 0.0  ;;  %v6531_v7 = vmul.f32 %v5528_v63, %v1445_v58  ;;  %v6545_v10 = vmul.f32 %v6522_v12, %v6522_v12  ;;  %v6548_v59 = vmul.f32 %v5528_v63, %v1450_v48  ;;  %11249 = vst [vmem:[#allocation209_spill] sm:$0xff] %v6914_v62 }
 0x18b   : > { %11177 = vst [vmem:[#allocation150_spill] sm:$0xff] %v6537_v50  ;;  %11178 = vst [vmem:[#allocation151_spill] sm:$0xff] %v6541_v26  ;;  %v1198_v5 = vsub.f32 %v6304_v15, %v948_v25  ;;  %v1195_v58 = vsub.f32 %v6314_v43, %v945_v46  ;;  %v1447_v20 = vsub.f32 %v945_v46, %v6314_v43  ;;  %v11182_v26 = vsub.f32 0.0, %v11181_v2 }
 0x18c   : > { %11176 = vst [vmem:[#allocation149_spill] sm:$0xff] %v6531_v7  ;;  %11179 = vst [vmem:[#allocation152_spill] sm:$0xff] %v6545_v10  ;;  %v1242_v55 = vadd.f32 %v1241_v3, %v1218_v38  ;;  %v6563_v10 = vmul.f32 %v6552_v29, %v1412_v54  ;;  %v950_v48 = vmul.f32 %v6003_v22, %v5832_v21  ;;  %v6574_v46 = vpop.permute.xlu0 %1171  ;;  %v6888_v33 = vmov 1.0  }
 0x18d   : > { %11180 = vst [vmem:[#allocation153_spill] sm:$0xff] %v6548_v59  ;;  %v6560_v50 = vmul.f32 %v6552_v29, %v11182_v26  ;;  %v947_v3 = vmul.f32 %v5968_v41, %v5793_v30  ;;  %v1220_v38 = vmax.f32 %v1195_v58, 0.0  ;;  %v6570_v25 = vmul.f32 %v5528_v63, %v1447_v20  ;;  %v6589_v22 = vpop.permute.xlu1 %1159 }
 0x18e   : > { %11184 = vst [vmem:[#allocation154_spill] sm:$0xff] %v6563_v10  ;;  %v1243_v15 = vadd.f32 %v1242_v55, %v1219_v44  ;;  %v952_v43 = vmul.f32 %v6103_v17, %v5939_v47  ;;  %v6586_v30 = vmul.f32 %v6563_v10, %v6563_v10  ;;  %v1452_v41 = vsub.f32 %v950_v48, %v6355_v37 }
 0x18f   : > { %11183 = vst [vmem:[#allocation25_spill] sm:$0xff] %v6560_v50  ;;  %11185 = vst [vmem:[#allocation155_spill] sm:$0xff] %v6570_v25  ;;  %v6578_v54 = vmul.f32 %v6560_v50, %v6560_v50  ;;  %v6582_v21 = vmul.f32 %v6563_v10, %v6560_v50  ;;  %v1221_v44 = vmax.f32 %v1196_v61, 0.0  ;;  %v1197_v17 = vsub.f32 %v6370_v0, %v947_v3 }
 0x190   : > { %11188 = vst [vmem:[#allocation158_spill] sm:$0xff] %v6586_v30  ;;  %v1244_v47 = vadd.f32 %v1243_v15, %v1220_v38  ;;  %v1449_v26 = vsub.f32 %v947_v3, %v6370_v0  ;;  %v1200_v55 = vsub.f32 %v6355_v37, %v950_v48  ;;  %v6595_v58 = vmul.f32 %v5528_v63, %v1452_v41  ;;  %v6605_v38 = vpop.permute.xlu0 %1179  ;;  %v11192_v41 = vld [vmem:[#allocation68_spill] sm:$0xff] }
 0x191   : > { %11186 = vst [vmem:[#allocation156_spill] sm:$0xff] %v6578_v54  ;;  %11187 = vst [vmem:[#allocation157_spill] sm:$0xff] %v6582_v21  ;;  %v1454_v20 = vsub.f32 %v952_v43, %v6399_v23  ;;  %v949_v2 = vmul.f32 %v6037_v51, %v5860_v28  ;;  %v1222_v30 = vmax.f32 %v1197_v17, 0.0  ;;  %v954_v61 = vmul.f32 %v6180_v11, %v6030_v40  ;;  %v6612_v3 = vpop.permute.xlu1 %1167 }
 0x192   : > { %11189 = vst [vmem:[#allocation159_spill] sm:$0xff] %v6595_v58  ;;  %v1245_v21 = vadd.f32 %v1244_v47, %v1221_v44  ;;  %v6601_v54 = vmul.f32 %v5528_v63, %v1449_v26  ;;  %v1223_v28 = vmax.f32 %v1198_v5, 0.0  ;;  %v951_v44 = vmul.f32 %v6112_v14, %v11192_v41  ;;  %v11199_v41 = vld [vmem:[#allocation89_spill] sm:$0xff] }
 0x193   : > { %v6608_v37 = vmul.f32 %v5528_v63, %v1454_v20  ;;  %v1199_v0 = vsub.f32 %v6416_v16, %v949_v2  ;;  %v1451_v48 = vsub.f32 %v949_v2, %v6416_v16  ;;  %v1456_v15 = vsub.f32 %v954_v61, %v6464_v49 }
 0x194   : > { %11190 = vst [vmem:[#allocation160_spill] sm:$0xff] %v6601_v54  ;;  %v1246_v51 = vadd.f32 %v1245_v21, %v1222_v30  ;;  %v956_v11 = vmul.f32 %v6218_v53, %v6066_v18  ;;  %v953_v17 = vmul.f32 %v6191_v39, %v6033_v31  ;;  %v1225_v16 = vmax.f32 %v1200_v55, 0.0  ;;  %v6628_v30 = vpop.permute.xlu0 %1187 }
 0x195   : > { %11191 = vst [vmem:[#allocation161_spill] sm:$0xff] %v6608_v37  ;;  %v1224_v47 = vmax.f32 %v1199_v0, 0.0  ;;  %v6618_v40 = vmul.f32 %v5528_v63, %v1451_v48  ;;  %v6625_v5 = vmul.f32 %v5528_v63, %v1456_v15  ;;  %v1201_v21 = vsub.f32 %v6475_v4, %v951_v44  ;;  %v6634_v53 = vpop.permute.xlu1 %1175 }
 0x196   : > { %v1247_v26 = vadd.f32 %v1246_v51, %v1223_v28  ;;  %v1202_v14 = vsub.f32 %v6399_v23, %v952_v43  ;;  %v1453_v20 = vsub.f32 %v951_v44, %v6475_v4  ;;  %v1458_v2 = vsub.f32 %v956_v11, %v6503_v27 }
 0x197   : > { %11193 = vst [vmem:[#allocation68_spill] sm:$0xff] %v6618_v40  ;;  %11194 = vst [vmem:[#allocation162_spill] sm:$0xff] %v6625_v5  ;;  %v1203_v18 = vsub.f32 %v6509_v9, %v953_v17  ;;  %v1226_v39 = vmax.f32 %v1201_v21, 0.0  ;;  %v1455_v55 = vsub.f32 %v953_v17, %v6509_v9  ;;  %v958_v0 = vmul.f32 %v6278_v45, %v6107_v57 }
 0x198   : > { %v1248_v31 = vadd.f32 %v1247_v26, %v1224_v47  ;;  %v6640_v48 = vmul.f32 %v5528_v63, %v1453_v20  ;;  %v6643_v23 = vmul.f32 %v5528_v63, %v1458_v2  ;;  %v1204_v4 = vsub.f32 %v6464_v49, %v954_v61  ;;  %v6650_v15 = vpop.permute.xlu0 %1294  ;;  %v11201_v61 = vld [vmem:[#allocation97_spill] sm:$0xff] }
 0x199   : > { %v6647_v28 = vmul.f32 %v5528_v63, %v1455_v55  ;;  %v1460_v51 = vsub.f32 %v958_v0, %v6533_v56  ;;  %11198 = vst [vmem:[#allocation166_spill] sm:$0xff] %v6650_v15  ;;  %v1227_v9 = vmax.f32 %v1202_v14, 0.0  ;;  %v955_v57 = vmul.f32 %v6250_v8, %v11199_v41  ;;  %v6656_v44 = vpop.permute.xlu1 %1183 }
 0x19a   : > { %11195 = vst [vmem:[#allocation163_spill] sm:$0xff] %v6640_v48  ;;  %11196 = vst [vmem:[#allocation164_spill] sm:$0xff] %v6643_v23  ;;  %v1249_v43 = vadd.f32 %v1248_v31, %v1225_v16  ;;  %v960_v45 = vmul.f32 %v6377_v1, %v6183_v32  ;;  %v1228_v17 = vmax.f32 %v1203_v18, 0.0  ;;  %v957_v16 = vmul.f32 %v6316_v60, %v11201_v61  ;;  %v11205_v60 = vld [vmem:[#allocation104_spill] sm:$0xff] }
 0x19b   : > { %11197 = vst [vmem:[#allocation165_spill] sm:$0xff] %v6647_v28  ;;  %v6659_v49 = vmul.f32 %v5528_v63, %v1460_v51  ;;  %v1206_v26 = vsub.f32 %v6503_v27, %v956_v11  ;;  %v1205_v21 = vsub.f32 %v6550_v42, %v955_v57  ;;  %v1457_v14 = vsub.f32 %v955_v57, %v6550_v42  ;;  %v11206_v11 = vld [vmem:[#allocation101_spill] sm:$0xff] }
 0x19c   : > { %v1250_v47 = vadd.f32 %v1249_v43, %v1226_v39  ;;  %v1462_v8 = vsub.f32 %v960_v45, %v6574_v46  ;;  %v1229_v20 = vmax.f32 %v1204_v4, 0.0  ;;  %v1459_v1 = vsub.f32 %v957_v16, %v6589_v22  ;;  %v6668_v2 = vpop.permute.xlu0 %1302 }
 0x19d   : > { %11200 = vst [vmem:[#allocation89_spill] sm:$0xff] %v6659_v49  ;;  %11202 = vst [vmem:[#allocation97_spill] sm:$0xff] %v6668_v2  ;;  %v6671_v18 = vmul.f32 %v5528_v63, %v1457_v14  ;;  %v962_v27 = vmul.f32 %v6401_v52, %v11205_v60  ;;  %v959_v42 = vmul.f32 %v6386_v13, %v11206_v11  ;;  %v6680_v39 = vpop.permute.xlu1 %1290  ;;  %v1230_v4 = vmax.f32 %v1205_v21, 0.0 }
 0x19e   : > { %v1251_v32 = vadd.f32 %v1250_v47, %v1227_v9  ;;  %v6674_v31 = vmul.f32 %v5528_v63, %v1462_v8  ;;  %11207 = vst [vmem:[#allocation104_spill] sm:$0xff] %v6680_v39  ;;  %v1207_v43 = vsub.f32 %v6589_v22, %v957_v16  ;;  %v6684_v51 = vmul.f32 %v5528_v63, %v1459_v1 }
 0x19f   : > { %11203 = vst [vmem:[#allocation167_spill] sm:$0xff] %v6671_v18  ;;  %v1231_v9 = vmax.f32 %v1206_v26, 0.0  ;;  %v1208_v41 = vsub.f32 %v6533_v56, %v958_v0  ;;  %v1464_v57 = vsub.f32 %v962_v27, %v6605_v38  ;;  %v1461_v47 = vsub.f32 %v959_v42, %v6612_v3 }
 0x1a0   : > { %11204 = vst [vmem:[#allocation168_spill] sm:$0xff] %v6674_v31  ;;  %v1252_v55 = vadd.f32 %v1251_v32, %v1228_v17  ;;  %11208 = vst [vmem:[#allocation101_spill] sm:$0xff] %v6684_v51  ;;  %v964_v13 = vmul.f32 %v6511_v6, %v6348_v24  ;;  %v961_v17 = vmul.f32 %v6433_v34, %v6258_v35  ;;  %v1232_v6 = vmax.f32 %v1207_v43, 0.0  ;;  %v6710_v21 = vpop.permute.xlu0 %1310 }
 0x1a1   : > { %v6695_v22 = vmul.f32 %v6650_v15, %v6650_v15  ;;  %v6698_v61 = vmul.f32 %v5528_v63, %v1464_v57  ;;  %v1209_v56 = vsub.f32 %v6612_v3, %v959_v42  ;;  %v6702_v0 = vmul.f32 %v5528_v63, %v1461_v47  ;;  %v6706_v26 = vpop.permute.xlu1 %1298  ;;  %11213 = vst [vmem:[#allocation173_spill] sm:$0xff] %v6710_v21 }
 0x1a2   : > { %v1253_v52 = vadd.f32 %v1252_v55, %v1229_v20  ;;  %v963_v16 = vmul.f32 %v6552_v29, %v6375_v19  ;;  %11212 = vst [vmem:[#allocation172_spill] sm:$0xff] %v6706_v26  ;;  %v1466_v35 = vsub.f32 %v964_v13, %v6628_v30  ;;  %v1463_v34 = vsub.f32 %v961_v17, %v6634_v53 }
 0x1a3   : > { %11209 = vst [vmem:[#allocation169_spill] sm:$0xff] %v6695_v22  ;;  %11210 = vst [vmem:[#allocation170_spill] sm:$0xff] %v6698_v61  ;;  %v1233_v14 = vmax.f32 %v1208_v41, 0.0  ;;  %v6715_v3 = vmul.f32 %v6668_v2, %v6668_v2  ;;  %v1210_v20 = vsub.f32 %v6574_v46, %v960_v45  ;;  %v1234_v1 = vmax.f32 %v1209_v56, 0.0 }
 0x1a4   : > { %11211 = vst [vmem:[#allocation171_spill] sm:$0xff] %v6702_v0  ;;  %v1254_v24 = vadd.f32 %v1253_v52, %v1230_v4  ;;  %v1465_v8 = vsub.f32 %v963_v16, %v6656_v44  ;;  %v6719_v29 = vmul.f32 %v5528_v63, %v1466_v35  ;;  %v6722_v32 = vmul.f32 %v5528_v63, %v1463_v34  ;;  %v6746_v43 = vpop.permute.xlu0 %1322 }
 0x1a5   : > { %11214 = vst [vmem:[#allocation174_spill] sm:$0xff] %v6715_v3  ;;  %v6729_v11 = vmul.f32 %v6680_v39, %v6680_v39  ;;  %v6733_v42 = vmul.f32 %v6710_v21, %v6650_v15  ;;  %v1211_v45 = vsub.f32 %v6634_v53, %v961_v17  ;;  %v6738_v55 = vmul.f32 %v6710_v21, %v6710_v21 }
 0x1a6   : > { %v1255_v19 = vadd.f32 %v1254_v24, %v1231_v9  ;;  %11215 = vst [vmem:[#allocation175_spill] sm:$0xff] %v6719_v29  ;;  %11216 = vst [vmem:[#allocation176_spill] sm:$0xff] %v6722_v32  ;;  %v6725_v60 = vmul.f32 %v5528_v63, %v1465_v8  ;;  %v6742_v4 = vmul.f32 %v6706_v26, %v6706_v26  ;;  %v6744_v63 = vpop.permute.xlu1 %1306  ;;  %v1235_v47 = vmax.f32 %v1210_v20, 0.0 }
 0x1a7   : > { %11218 = vst [vmem:[#allocation178_spill] sm:$0xff] %v6729_v11  ;;  %11219 = vst [vmem:[#allocation179_spill] sm:$0xff] %v6733_v42  ;;  %v6750_v9 = vmul.f32 %v6744_v63, %v6680_v39  ;;  %v6754_v41 = vmul.f32 %v6744_v63, %v6744_v63  ;;  %v1212_v57 = vsub.f32 %v6605_v38, %v962_v27  ;;  %v1236_v17 = vmax.f32 %v1211_v45, 0.0 }
 0x1a8   : > { %11217 = vst [vmem:[#allocation177_spill] sm:$0xff] %v6725_v60  ;;  %v1256_v46 = vadd.f32 %v1255_v19, %v1232_v6  ;;  %11220 = vst [vmem:[#allocation180_spill] sm:$0xff] %v6738_v55  ;;  %v1213_v56 = vsub.f32 %v6656_v44, %v963_v16  ;;  %v6760_v6 = vpop.permute.xlu0 %1334  ;;  %v1214_v27 = vsub.f32 %v6628_v30, %v964_v13  ;;  %v6792_v13 = vmov 1.0  }
 0x1a9   : > { %11221 = vst [vmem:[#allocation181_spill] sm:$0xff] %v6742_v4  ;;  %11222 = vst [vmem:[#allocation182_spill] sm:$0xff] %v6744_v63  ;;  %v1237_v38 = vmax.f32 %v1212_v57, 0.0  ;;  %v6824_v55 = vmov 1.0   ;;  %v6832_v42 = vmov 1.0   ;;  %v6836_v3 = vmov 1.0  }
 0x1aa   : > { %11223 = vst [vmem:[#allocation183_spill] sm:$0xff] %v6746_v43  ;;  %11224 = vst [vmem:[#allocation184_spill] sm:$0xff] %v6750_v9  ;;  %v1257_v53 = vadd.f32 %v1256_v46, %v1233_v14  ;;  %v6758_v24 = vpop.permute.xlu1 %1314  ;;  %v1238_v20 = vmax.f32 %v1213_v56, 0.0  ;;  %v1239_v46 = vmax.f32 %v1214_v27, 0.0  ;;  %v6800_v56 = vmov 1.0  }
 0x1ab   : > { %11225 = vst [vmem:[#allocation185_spill] sm:$0xff] %v6754_v41  ;;  %11226 = vst [vmem:[#allocation186_spill] sm:$0xff] %v6758_v24  ;;  %v6764_v35 = vmul.f32 %v6758_v24, %v6706_v26  ;;  %v6768_v34 = vmul.f32 %v6758_v24, %v6758_v24  ;;  %v6806_v27 = vmov 1.0   ;;  %v6826_v41 = vmov 1.0  }
 0x1ac   : > { %v1258_v52 = vadd.f32 %v1257_v53, %v1234_v1  ;;  %11227 = vst [vmem:[#allocation187_spill] sm:$0xff] %v6760_v6  ;;  %v6834_v9 = vmov 1.0   ;;  %v6838_v4 = vmov 1.0   ;;  %v6840_v22 = vmov 1.0  }
 0x1ad   : > { %11228 = vst [vmem:[#allocation188_spill] sm:$0xff] %v6764_v35  ;;  %11229 = vst [vmem:[#allocation189_spill] sm:$0xff] %v6768_v34  ;;  %v6822_v34 = vmov 1.0   ;;  %v6830_v35 = vmov 1.0   ;;  %v6842_v11 = vmov 1.0   ;;  %v6844_v6 = vmov 1.0  }
 0x1ae   : > { %v1259_v14 = vadd.f32 %v1258_v52, %v1235_v47  ;;  %v6771_v44 = vpop.permute.xlu1 %1318  ;;  %v6794_v47 = vmov 1.0   ;;  %v6796_v52 = vmov 1.0   ;;  %v6850_v43 = vmov 1.0  }
 0x1af   : > { %11230 = vst [vmem:[#allocation190_spill] sm:$0xff] %v6771_v44  ;;  %v6775_v16 = vmul.f32 %v6771_v44, %v6668_v2  ;;  %v6779_v19 = vmul.f32 %v6771_v44, %v6771_v44  ;;  %v6852_v29 = vmov 1.0   ;;  %v6854_v60 = vmov 1.0  }
 0x1b0   : > { %v1260_v8 = vadd.f32 %v1259_v14, %v1236_v17  ;;  %v6798_v17 = vmov 1.0   ;;  %v6802_v14 = vmov 1.0   ;;  %v6856_v61 = vmov 1.0  }
 0x1b1   : > { %11231 = vst [vmem:[#allocation191_spill] sm:$0xff] %v6775_v16  ;;  %11232 = vst [vmem:[#allocation192_spill] sm:$0xff] %v6779_v19  ;;  %v6820_v19 = vmov 1.0   ;;  %v6828_v16 = vmov 1.0   ;;  %v6858_v32 = vmov 1.0   ;;  %v6860_v31 = vmov 1.0  }
 0x1b2   : > { %v1261_v1 = vadd.f32 %v1260_v8, %v1237_v38  ;;  %v6782_v53 = vpop.permute.xlu1 %1326  ;;  %v6804_v38 = vmov 1.0   ;;  %v6808_v8 = vmov 1.0   ;;  %v6862_v0 = vmov 1.0  }
 0x1b3   : > { %11233 = vst [vmem:[#allocation193_spill] sm:$0xff] %v6782_v53  ;;  %v6848_v53 = vmov 1.0   ;;  %v6864_v49 = vmov 1.0   ;;  %v6866_v51 = vmov 1.0   ;;  %v6868_v23 = vmov 1.0  }
 0x1b4   : > { %v1262_v45 = vadd.f32 %v1261_v1, %v1238_v20  ;;  %v6810_v20 = vmov 1.0   ;;  %v6812_v1 = vmov 1.0   ;;  %v6870_v18 = vmov 1.0  }
 0x1b5   : > { %11235 = vst [vmem:[#allocation195_spill] sm:$0xff] %v6870_v18  ;;  %v6872_v5 = vmov 1.0   ;;  %v6874_v28 = vmov 1.0   ;;  %v6876_v37 = vmov 1.0   ;;  %v6878_v48 = vmov 1.0  }
 0x1b6   : > { %v1263_v57 = vadd.f32 %v1262_v45, %v1239_v46  ;;  %v6787_v30 = vpop.permute.xlu1 %1330  ;;  %v6814_v46 = vmov 1.0   ;;  %v6816_v45 = vmov 1.0   ;;  %11236 = vst [vmem:[#allocation196_spill] sm:$0xff] %v6874_v28  ;;  %11237 = vst [vmem:[#allocation197_spill] sm:$0xff] %v6876_v37  ;;  %v6880_v58 = vmov 1.0  }
 0x1b7   : > { %11234 = vst [vmem:[#allocation194_spill] sm:$0xff] %v6787_v30  ;;  %v6846_v30 = vmov 1.0   ;;  %11238 = vst [vmem:[#allocation198_spill] sm:$0xff] %v6880_v58  ;;  %v6882_v40 = vmov 1.0   ;;  %v6884_v59 = vmov 1.0   ;;  %v6886_v54 = vmov 1.0  }
 0x1b8   : > { %1264 = vst [vmem:[%s6784_s12] sm:$0xff] %v1263_v57  ;;  %v6818_v57 = vmov 1.0   ;;  %11239 = vst [vmem:[#allocation199_spill] sm:$0xff] %v6882_v40  ;;  %v6890_v25 = vmov 1.0   ;;  %v6892_v7 = vmov 1.0   ;;  %v6894_v44 = vmov 1.0  }
 0x1b9   : > { %11240 = vst [vmem:[#allocation200_spill] sm:$0xff] %v6884_v59  ;;  %11241 = vst [vmem:[#allocation201_spill] sm:$0xff] %v6892_v7  ;;  %v6896_v24 = vmov 1.0   ;;  %v6898_v21 = vmov 1.0   ;;  %v6900_v63 = vmov 1.0   ;;  %v6902_v12 = vmov 1.0  }
 0x1ba   : > { %11242 = vst [vmem:[#allocation202_spill] sm:$0xff] %v6896_v24  ;;  %11243 = vst [vmem:[#allocation203_spill] sm:$0xff] %v6898_v21  ;;  %v6904_v10 = vmov 1.0   ;;  %v6906_v2 = vmov 1.0   ;;  %v6908_v26 = vmov 1.0   ;;  %v6910_v15 = vmov 1.0  }
 0x1bb   : > { %11244 = vst [vmem:[#allocation204_spill] sm:$0xff] %v6904_v10  ;;  %11245 = vst [vmem:[#allocation205_spill] sm:$0xff] %v6906_v2  ;;  %v6912_v39 = vmov 1.0   ;;  %v6916_v50 = vmov 0.0   ;;  %v6920_v21 = vmov 0.0  }
 0x1bc   : > { %11246 = vst [vmem:[#allocation206_spill] sm:$0xff] %v6908_v26  ;;  %11247 = vst [vmem:[#allocation207_spill] sm:$0xff] %v6910_v15 }
 0x1bd   : > { %11248 = vst [vmem:[#allocation208_spill] sm:$0xff] %v6912_v39  ;;  %11250 = vst [vmem:[#allocation210_spill] sm:$0xff] %v6916_v50 }
 0x1be   : > { %11252 = vst [vmem:[#allocation212_spill] sm:$0xff] %v6920_v21 }
 0x1bf LB: >> { %11271 = vst [vmem:[#allocation213_spill] sm:$0xff] %v4766_v13  ;;  %11272 = vst [vmem:[#allocation214_spill] sm:$0xff] %v4770_v47  ;;  %v11310_v18 = vld [vmem:[#allocation195_spill] sm:$0xff]  ;;  %v11313_v28 = vld [vmem:[#allocation196_spill] sm:$0xff]  ;;  %s1588_s8 = sadd.s32 1, %s5026_s20   ;;  %s5026_s20 = sphi %s6922_s20, %s12980_s20   ;;  %v4986_v12 = vphi %v6902_v12, %v12955_v12   ;;  %v4982_v63 = vphi %v6900_v63, %v12953_v63   ;;  %v4970_v44 = vphi %v6894_v44, %v12945_v44   ;;  %v4962_v25 = vphi %v6890_v25, %v12940_v25   ;;  %v4958_v33 = vphi %v6888_v33, %v12938_v33   ;;  %v4954_v54 = vphi %v6886_v54, %v12936_v54   ;;  %v4938_v48 = vphi %v6878_v48, %v12925_v48   ;;  %v4926_v5 = vphi %v6872_v5, %v12918_v5   ;;  %v4918_v23 = vphi %v6868_v23, %v12915_v23   ;;  %v4914_v51 = vphi %v6866_v51, %v12914_v51   ;;  %v4910_v49 = vphi %v6864_v49, %v12913_v49   ;;  %v4906_v0 = vphi %v6862_v0, %v12912_v0   ;;  %v4902_v31 = vphi %v6860_v31, %v12911_v31   ;;  %v4898_v32 = vphi %v6858_v32, %v12910_v32   ;;  %v4894_v61 = vphi %v6856_v61, %v12909_v61   ;;  %v4890_v60 = vphi %v6854_v60, %v12908_v60   ;;  %v4886_v29 = vphi %v6852_v29, %v10068_v29   ;;  %v4882_v43 = vphi %v6850_v43, %v12907_v43   ;;  %v4878_v53 = vphi %v6848_v53, %v12906_v53   ;;  %v4874_v30 = vphi %v6846_v30, %v3162_v30   ;;  %v4870_v6 = vphi %v6844_v6, %v3163_v6   ;;  %v4866_v11 = vphi %v6842_v11, %v3164_v11   ;;  %v4862_v22 = vphi %v6840_v22, %v3165_v22   ;;  %v4858_v4 = vphi %v6838_v4, %v3166_v4   ;;  %v4854_v3 = vphi %v6836_v3, %v3167_v3   ;;  %v4850_v9 = vphi %v6834_v9, %v3168_v9   ;;  %v4846_v42 = vphi %v6832_v42, %v3169_v42   ;;  %v4842_v35 = vphi %v6830_v35, %v12905_v35   ;;  %v4838_v16 = vphi %v6828_v16, %v12904_v16   ;;  %v4834_v41 = vphi %v6826_v41, %v3172_v41   ;;  %v4830_v55 = vphi %v6824_v55, %v3173_v55   ;;  %v4826_v34 = vphi %v6822_v34, %v3174_v34   ;;  %v4822_v19 = vphi %v6820_v19, %v12903_v19   ;;  %v4818_v57 = vphi %v6818_v57, %v3176_v57   ;;  %v4814_v45 = vphi %v6816_v45, %v12902_v45   ;;  %v4810_v46 = vphi %v6814_v46, %v3178_v46   ;;  %v4806_v1 = vphi %v6812_v1, %v3179_v1   ;;  %v4802_v20 = vphi %v6810_v20, %v3180_v20   ;;  %v4798_v8 = vphi %v6808_v8, %v3181_v8   ;;  %v4794_v27 = vphi %v6806_v27, %v3182_v27   ;;  %v4790_v38 = vphi %v6804_v38, %v3183_v38   ;;  %v4786_v14 = vphi %v6802_v14, %v12901_v14   ;;  %v4782_v56 = vphi %v6800_v56, %v3185_v56   ;;  %v4778_v17 = vphi %v6798_v17, %v3186_v17   ;;  %v4774_v52 = vphi %v6796_v52, %v3187_v52   ;;  %v4770_v47 = vphi %v6794_v47, %v3188_v47   ;;  %v4766_v13 = vphi %v6792_v13, %v3189_v13  }
 0x1c0   : >> { %11273 = vst [vmem:[#allocation215_spill] sm:$0xff] %v4774_v52  ;;  %11274 = vst [vmem:[#allocation216_spill] sm:$0xff] %v4778_v17  ;;  %v11315_v37 = vld [vmem:[#allocation197_spill] sm:$0xff]  ;;  %v11318_v58 = vld [vmem:[#allocation198_spill] sm:$0xff]  ;;  %p10083_p13 = scmp.ge.s32.totalorder %s1588_s8, 40   ;;  %s12980_s20 = smov %s1588_s8 }
 0x1c1   : >> { %11275 = vst [vmem:[#allocation217_spill] sm:$0xff] %v4782_v56  ;;  %11276 = vst [vmem:[#allocation218_spill] sm:$0xff] %v4786_v14  ;;  %v11320_v40 = vld [vmem:[#allocation199_spill] sm:$0xff]  ;;  %v11322_v59 = vld [vmem:[#allocation200_spill] sm:$0xff]  ;;  %s3629_s16 = sshll.u32 (%p10083_p13), %s5102_s28, 7  ;;  %s3210_s11 = sshll.u32 (%p10083_p13), %s6790_s9, 4  ;;  %s10304_s11 = int_to_ptr.vmem [resolvable:$true] %s3210_s11 }
 0x1c2   : >> { %11277 = vst [vmem:[#allocation219_spill] sm:$0xff] %v4790_v38  ;;  %11278 = vst [vmem:[#allocation220_spill] sm:$0xff] %v4794_v27  ;;  %v11327_v7 = vld [vmem:[#allocation201_spill] sm:$0xff]  ;;  %v11330_v24 = vld [vmem:[#allocation202_spill] sm:$0xff]  ;;  %s10301_s19 = scalar_lea.hbm (%p10083_p13), %s10380_s6, %s3629_s16  ;;  %s3193_s15 = scalar_lea.sflag (%p10083_p13), [#allocation5], %s5198_s18 }
 0x1c3   : >> { %11279 = vst [vmem:[#allocation221_spill] sm:$0xff] %v4798_v8  ;;  %11280 = vst [vmem:[#allocation222_spill] sm:$0xff] %v4802_v20  ;;  %v11332_v13 = vld [vmem:[#allocation203_spill] sm:$0xff]  ;;  %v11336_v10 = vld [vmem:[#allocation204_spill] sm:$0xff]  ;;  %s4396_s21 = scalar_lea.vmem (%p10083_p13), %s10304_s11, 256  ;;  %p12983_p3 = scmp.ne.s32.totalorder (%p10083_p13), %s10985_s13, 0 }
 0x1c4   : >> { %11281 = vst [vmem:[#allocation223_spill] sm:$0xff] %v4806_v1  ;;  %11282 = vst [vmem:[#allocation224_spill] sm:$0xff] %v4810_v46  ;;  %v11338_v2 = vld [vmem:[#allocation205_spill] sm:$0xff]  ;;  %v11340_v26 = vld [vmem:[#allocation206_spill] sm:$0xff]  ;;  %p4397_p1 = scmp.ne.s32.totalorder (%p10083_p13), %s10304_s11, %s4396_s21  ;;  %s5036_s23 = smov (%p10083_p13), [#allocation8]  }
 0x1c5   : >> { %11283 = vst [vmem:[#allocation225_spill] sm:$0xff] %v4814_v45  ;;  %11284 = vst [vmem:[#allocation226_spill] sm:$0xff] %v4818_v57  ;;  %v11342_v15 = vld [vmem:[#allocation207_spill] sm:$0xff]  ;;  %v11344_v39 = vld [vmem:[#allocation208_spill] sm:$0xff]  ;;  %s4400_s17 = sshll.u32 (%p10083_p13), %s5036_s23, 4  ;;  %s4401_s17 = int_to_ptr.vmem [resolvable:$false] %s4400_s17 }
 0x1c6   : >> { %11285 = vst [vmem:[#allocation227_spill] sm:$0xff] %v4822_v19  ;;  %11286 = vst [vmem:[#allocation228_spill] sm:$0xff] %v4826_v34  ;;  %v11346_v62 = vld [vmem:[#allocation209_spill] sm:$0xff]  ;;  %v11348_v50 = vld [vmem:[#allocation210_spill] sm:$0xff]  ;;  %v7128_v47 = vmul.f32 %v4882_v43, %v11344_v39  ;;  %p4398_p7 = pnand (%p10083_p13), %p4397_p1, %p12983_p3  ;;  %s4402_s20 = scalar_lea.vmem (%p10083_p13), %s4401_s17, 512 }
 0x1c7   : >> { %11287 = vst [vmem:[#allocation229_spill] sm:$0xff] %v4830_v55  ;;  %11288 = vst [vmem:[#allocation230_spill] sm:$0xff] %v4834_v41  ;;  %v11350_v36 = vld [vmem:[#allocation211_spill] sm:$0xff]  ;;  %v11352_v21 = vld [vmem:[#allocation212_spill] sm:$0xff]  ;;  %p4403_p9 = scmp.lt.s32.totalorder (%p10083_p13), %s10304_s11, %s4401_s17  ;;  %p4404_p10 = scmp.lt.s32.totalorder (%p10083_p13), %s4402_s20, %s4396_s21 }
 0x1c8   : >> { %11289 = vst [vmem:[#allocation231_spill] sm:$0xff] %v4838_v16  ;;  %11290 = vst [vmem:[#allocation232_spill] sm:$0xff] %v4842_v35  ;;  %p4399_p8 = pneg (%p10083_p13), %p4398_p7 }
 0x1c9   : >> { %11291 = vst [vmem:[#allocation233_spill] sm:$0xff] %v4846_v42  ;;  %11292 = vst [vmem:[#allocation234_spill] sm:$0xff] %v4850_v9  ;;  %p4405_p11 = por (%p10083_p13), %p4404_p10, %p4403_p9 }
 0x1ca   : >> { %11293 = vst [vmem:[#allocation235_spill] sm:$0xff] %v4854_v3  ;;  %11294 = vst [vmem:[#allocation236_spill] sm:$0xff] %v4858_v4 }
 0x1cb   : >> { %11295 = vst [vmem:[#allocation237_spill] sm:$0xff] %v4862_v22  ;;  %11296 = vst [vmem:[#allocation238_spill] sm:$0xff] %v4866_v11  ;;  %p4406_p12 = pnand (%p10083_p13), %p4405_p11, %p4399_p8 }
 0x1cc   : >> { %11297 = vst [vmem:[#allocation239_spill] sm:$0xff] %v4870_v6  ;;  %11298 = vst [vmem:[#allocation240_spill] sm:$0xff] %v4874_v30 }
 0x1cd   : >> { %11299 = vst [vmem:[#allocation241_spill] sm:$0xff] %v4878_v53  ;;  %11300 = vst [vmem:[#allocation242_spill] sm:$0xff] %v4882_v43  ;;  %v7149_v43 = vmul.f32 %v4862_v22, %v4986_v12  ;;  %v7170_v22 = vmul.f32 %v4842_v35, %v11327_v7  ;;  %v7188_v35 = vmul.f32 %v4826_v34, %v11322_v59 }
 0x1ce   : >> { %11301 = vst [vmem:[#allocation243_spill] sm:$0xff] %v4886_v29  ;;  %11302 = vst [vmem:[#allocation244_spill] sm:$0xff] %v4890_v60  ;;  %v7124_v60 = vmul.f32 %v4886_v29, %v11346_v62  ;;  %v7144_v29 = vmul.f32 %v4866_v11, %v11336_v10  ;;  %v7162_v11 = vmul.f32 %v4850_v9, %v11330_v24 }
 0x1cf   : >> { %11303 = vst [vmem:[#allocation245_spill] sm:$0xff] %v4894_v61  ;;  %11304 = vst [vmem:[#allocation246_spill] sm:$0xff] %v4898_v32  ;;  %v7132_v61 = vmul.f32 %v4878_v53, %v11342_v15  ;;  %v7153_v53 = vmul.f32 %v4858_v4, %v4982_v63  ;;  %v7179_v4 = vmul.f32 %v4834_v41, %v4958_v33 }
 0x1d0   : >> { %11305 = vst [vmem:[#allocation247_spill] sm:$0xff] %v4902_v31  ;;  %11306 = vst [vmem:[#allocation248_spill] sm:$0xff] %v4906_v0  ;;  %4287 = vrcp.f32 %v7124_v60  ;;  %v7183_v9 = vmul.f32 %v4830_v55, %v4954_v54  ;;  %v7201_v55 = vmul.f32 %v4814_v45, %v4938_v48  ;;  %v7205_v41 = vmul.f32 %v4810_v46, %v11315_v37 }
 0x1d1   : >> { %11307 = vst [vmem:[#allocation249_spill] sm:$0xff] %v4910_v49  ;;  %11308 = vst [vmem:[#allocation250_spill] sm:$0xff] %v4914_v51  ;;  %4289 = vrcp.f32 %v7128_v47  ;;  %v7209_v34 = vmul.f32 %v4806_v1, %v11313_v28  ;;  %v7222_v45 = vmul.f32 %v4794_v27, %v4918_v23  ;;  %v7227_v1 = vmul.f32 %v4790_v38, %v4914_v51  ;;  %v11379_v51 = vld [vmem:[#allocation214_spill] sm:$0xff] }
 0x1d2   : >> { %11309 = vst [vmem:[#allocation251_spill] sm:$0xff] %v4918_v23  ;;  %11311 = vst [vmem:[#allocation195_spill] sm:$0xff] %v11310_v18  ;;  %4291 = vrcp.f32 %v7132_v61  ;;  %v7231_v46 = vmul.f32 %v4786_v14, %v4910_v49  ;;  %v7240_v27 = vmul.f32 %v4778_v17, %v4902_v31  ;;  %v11382_v49 = vld [vmem:[#allocation213_spill] sm:$0xff] }
 0x1d3   : >> { %11312 = vst [vmem:[#allocation252_spill] sm:$0xff] %v4926_v5  ;;  %11314 = vst [vmem:[#allocation196_spill] sm:$0xff] %v11313_v28  ;;  %v11446_v28 = vld [vmem:[#allocation166_spill] sm:$0xff] }
 0x1d4   : >> { %11316 = vst [vmem:[#allocation197_spill] sm:$0xff] %v11315_v37  ;;  %11317 = vst [vmem:[#allocation253_spill] sm:$0xff] %v4938_v48 }
 0x1d5   : >> { %11319 = vst [vmem:[#allocation198_spill] sm:$0xff] %v11318_v58  ;;  %11321 = vst [vmem:[#allocation199_spill] sm:$0xff] %v11320_v40  ;;  %v11381_v14 = vld [vmem:[#allocation244_spill] sm:$0xff] }
 0x1d6   : >> { %11323 = vst [vmem:[#allocation200_spill] sm:$0xff] %v11322_v59  ;;  %11324 = vst [vmem:[#allocation254_spill] sm:$0xff] %v4954_v54  ;;  %v11378_v38 = vld [vmem:[#allocation245_spill] sm:$0xff] }
 0x1d7   : >> { %11325 = vst [vmem:[#allocation255_spill] sm:$0xff] %v4958_v33  ;;  %11326 = vst [vmem:[#allocation256_spill] sm:$0xff] %v4962_v25  ;;  %v7248_v23 = vmul.f32 %v11379_v51, %v11378_v38  ;;  %v11388_v51 = vld [vmem:[#allocation32_spill] sm:$0xff] }
 0x1d8   : >> { %11328 = vst [vmem:[#allocation201_spill] sm:$0xff] %v11327_v7  ;;  %11329 = vst [vmem:[#allocation257_spill] sm:$0xff] %v4970_v44 }
 0x1d9   : >> { %11331 = vst [vmem:[#allocation202_spill] sm:$0xff] %v11330_v24  ;;  %11333 = vst [vmem:[#allocation203_spill] sm:$0xff] %v11332_v13 }
 0x1da   : >> { %11334 = vst [vmem:[#allocation258_spill] sm:$0xff] %v4982_v63  ;;  %11335 = vst [vmem:[#allocation259_spill] sm:$0xff] %v4986_v12 }
 0x1db   : >> { %11337 = vst [vmem:[#allocation204_spill] sm:$0xff] %v11336_v10  ;;  %11339 = vst [vmem:[#allocation205_spill] sm:$0xff] %v11338_v2 }
 0x1dc   : >> { %11341 = vst [vmem:[#allocation206_spill] sm:$0xff] %v11340_v26  ;;  %11343 = vst [vmem:[#allocation207_spill] sm:$0xff] %v11342_v15 }
 0x1dd   : >> { %11345 = vst [vmem:[#allocation208_spill] sm:$0xff] %v11344_v39  ;;  %11347 = vst [vmem:[#allocation209_spill] sm:$0xff] %v11346_v62  ;;  %v11403_v39 = vld [vmem:[#allocation74_spill] sm:$0xff] }
 0x1de   : >> { %11349 = vst [vmem:[#allocation210_spill] sm:$0xff] %v11348_v50  ;;  %11351 = vst [vmem:[#allocation211_spill] sm:$0xff] %v11350_v36  ;;  %v7136_v50 = vmul.f32 %v4874_v30, %v11340_v26  ;;  %v7140_v36 = vmul.f32 %v4870_v6, %v11338_v2  ;;  %v7157_v30 = vmul.f32 %v4854_v3, %v11332_v13  ;;  %v11425_v26 = vld [vmem:[#allocation128_spill] sm:$0xff] }
 0x1df   : >> { %11353 = vst [vmem:[#allocation212_spill] sm:$0xff] %v11352_v21  ;;  %11354 = vst [vmem:[#allocation260_spill] sm:$0xff] %v7124_v60  ;;  %v7166_v6 = vmul.f32 %v4846_v42, %v4970_v44  ;;  %v7175_v3 = vmul.f32 %v4838_v16, %v4962_v25  ;;  %v7192_v42 = vmul.f32 %v4822_v19, %v11320_v40  ;;  %v11465_v40 = vld [vmem:[#allocation41_spill] sm:$0xff] }
 0x1e0   : >> { %11355 = vst [vmem:[#allocation261_spill] sm:$0xff] %v7128_v47  ;;  %11356 = vst [vmem:[#allocation262_spill] sm:$0xff] %v7132_v61  ;;  %4293 = vrcp.f32 %v7136_v50  ;;  %v7196_v16 = vmul.f32 %v4818_v57, %v11318_v58  ;;  %v7214_v57 = vmul.f32 %v4802_v20, %v4926_v5  ;;  %v7218_v19 = vmul.f32 %v4798_v8, %v11310_v18 }
 0x1e1   : >> { %11357 = vst [vmem:[#allocation263_spill] sm:$0xff] %v7136_v50  ;;  %11358 = vst [vmem:[#allocation264_spill] sm:$0xff] %v7140_v36  ;;  %4295 = vrcp.f32 %v7140_v36  ;;  %v7235_v20 = vmul.f32 %v4782_v56, %v4906_v0  ;;  %v7244_v8 = vmul.f32 %v4774_v52, %v4898_v32  ;;  %v7253_v56 = vmul.f32 %v11382_v49, %v11381_v14  ;;  %v11384_v0 = vld [vmem:[#allocation15_spill] sm:$0xff]  ;;  %v7263_v52 = vpop.eup %4287  ;;  %v11390_v32 = vld [vmem:[#allocation38_spill] sm:$0xff] }
 0x1e2   : >> { %11359 = vst [vmem:[#allocation265_spill] sm:$0xff] %v7144_v29  ;;  %11360 = vst [vmem:[#allocation266_spill] sm:$0xff] %v7149_v43  ;;  %4297 = vrcp.f32 %v7144_v29  ;;  %v11385_v18 = vmov %v11352_v21  ;;  %v11392_v14 = vld [vmem:[#allocation40_spill] sm:$0xff] }
 0x1e3   : >> { %11361 = vst [vmem:[#allocation267_spill] sm:$0xff] %v7153_v53  ;;  %11362 = vst [vmem:[#allocation268_spill] sm:$0xff] %v7157_v30  ;;  %4299 = vrcp.f32 %v7149_v43  ;;  %v7258_v17 = vmul.f32 %v11385_v18, %v11384_v0  ;;  %v7261_v31 = vmul.f32 0.0, %v11385_v18  ;;  %v7268_v38 = vmul.f32 %v11385_v18, %v11388_v51  ;;  %v7278_v0 = vpop.eup %4289  ;;  %v11396_v36 = vld [vmem:[#allocation48_spill] sm:$0xff] }
 0x1e4   : >> { %11363 = vst [vmem:[#allocation269_spill] sm:$0xff] %v7162_v11  ;;  %11364 = vst [vmem:[#allocation270_spill] sm:$0xff] %v7166_v6  ;;  %4301 = vrcp.f32 %v7153_v53  ;;  %v7272_v49 = vmul.f32 %v11385_v18, %v11390_v32  ;;  %v7276_v21 = vmul.f32 %v11385_v18, %v11392_v14  ;;  %v7287_v51 = vmul.f32 %v11385_v18, %v11396_v36  ;;  %v11398_v50 = vld [vmem:[#allocation60_spill] sm:$0xff]  ;;  %v7293_v62 = vpop.eup %4291  ;;  %v11401_v14 = vld [vmem:[#allocation58_spill] sm:$0xff] }
 0x1e5   : >> { %11365 = vst [vmem:[#allocation271_spill] sm:$0xff] %v7170_v22  ;;  %11366 = vst [vmem:[#allocation272_spill] sm:$0xff] %v7175_v3  ;;  %4303 = vrcp.f32 %v7157_v30  ;;  %v7291_v32 = vmul.f32 %v11385_v18, %v11398_v50  ;;  %v11407_v50 = vld [vmem:[#allocation84_spill] sm:$0xff]  ;;  %v7405_v37 = vmul.f32 %v11385_v18, %v11446_v28 }
 0x1e6   : >> { %11367 = vst [vmem:[#allocation273_spill] sm:$0xff] %v7179_v4  ;;  %11368 = vst [vmem:[#allocation274_spill] sm:$0xff] %v7183_v9  ;;  %4305 = vrcp.f32 %v7162_v11 }
 0x1e7   : >> { %11369 = vst [vmem:[#allocation275_spill] sm:$0xff] %v7188_v35  ;;  %11370 = vst [vmem:[#allocation276_spill] sm:$0xff] %v7192_v42  ;;  %4307 = vrcp.f32 %v7166_v6 }
 0x1e8   : >> { %11371 = vst [vmem:[#allocation277_spill] sm:$0xff] %v7218_v19  ;;  %11372 = vst [vmem:[#allocation278_spill] sm:$0xff] %v7222_v45  ;;  %4309 = vrcp.f32 %v7170_v22  ;;  %v11457_v28 = vld [vmem:[#allocation263_spill] sm:$0xff] }
 0x1e9   : >> { %11373 = vst [vmem:[#allocation279_spill] sm:$0xff] %v7227_v1  ;;  %11374 = vst [vmem:[#allocation280_spill] sm:$0xff] %v7231_v46  ;;  %4311 = vrcp.f32 %v7175_v3 }
 0x1ea   : >> { %11375 = vst [vmem:[#allocation281_spill] sm:$0xff] %v7235_v20  ;;  %11376 = vst [vmem:[#allocation282_spill] sm:$0xff] %v7240_v27  ;;  %4313 = vrcp.f32 %v7179_v4 }
 0x1eb   : >> { %11377 = vst [vmem:[#allocation283_spill] sm:$0xff] %v7244_v8  ;;  %11380 = vst [vmem:[#allocation284_spill] sm:$0xff] %v7248_v23  ;;  %4315 = vrcp.f32 %v7183_v9 }
 0x1ec   : >> { %11383 = vst [vmem:[#allocation285_spill] sm:$0xff] %v7253_v56  ;;  %11386 = vst [vmem:[#allocation286_spill] sm:$0xff] %v7258_v17  ;;  %4317 = vrcp.f32 %v7188_v35 }
 0x1ed   : >> { %11387 = vst [vmem:[#allocation287_spill] sm:$0xff] %v7261_v31  ;;  %11389 = vst [vmem:[#allocation288_spill] sm:$0xff] %v7268_v38  ;;  %v11394_v31 = vld [vmem:[#allocation50_spill] sm:$0xff]  ;;  %v11416_v38 = vld [vmem:[#allocation105_spill] sm:$0xff]  ;;  %4319 = vrcp.f32 %v7192_v42 }
 0x1ee   : >> { %11391 = vst [vmem:[#allocation289_spill] sm:$0xff] %v7272_v49  ;;  %11393 = vst [vmem:[#allocation290_spill] sm:$0xff] %v7276_v21  ;;  %v7283_v17 = vmul.f32 %v11385_v18, %v11394_v31  ;;  %v7298_v49 = vmul.f32 %v11385_v18, %v11401_v14  ;;  %v7302_v31 = vmul.f32 %v11385_v18, %v11403_v39  ;;  %v11409_v21 = vld [vmem:[#allocation79_spill] sm:$0xff]  ;;  %4321 = vrcp.f32 %v7196_v16 }
 0x1ef   : >> { %11397 = vst [vmem:[#allocation292_spill] sm:$0xff] %v7287_v51  ;;  %11399 = vst [vmem:[#allocation293_spill] sm:$0xff] %v7291_v32  ;;  %v7308_v51 = vpop.eup %4293  ;;  %v7313_v32 = vmul.f32 %v11385_v18, %v11407_v50  ;;  %v7317_v14 = vmul.f32 %v11385_v18, %v11409_v21  ;;  %v7332_v50 = vmul.f32 %v11385_v18, %v11416_v38  ;;  %4323 = vrcp.f32 %v7201_v55 }
 0x1f0   : >> { %11395 = vst [vmem:[#allocation291_spill] sm:$0xff] %v7283_v17  ;;  %11400 = vst [vmem:[#allocation294_spill] sm:$0xff] %v7293_v62  ;;  %v11405_v17 = vld [vmem:[#allocation69_spill] sm:$0xff]  ;;  %v7323_v15 = vpop.eup %4295  ;;  %v7351_v38 = vmul.f32 %v11385_v18, %v11425_v26  ;;  %v1716_v26 = vmul.f32 %v7263_v52, %v7124_v60  ;;  %4325 = vrcp.f32 %v7205_v41 }
 0x1f1   : >> { %11402 = vst [vmem:[#allocation295_spill] sm:$0xff] %v7298_v49  ;;  %11404 = vst [vmem:[#allocation296_spill] sm:$0xff] %v7302_v31  ;;  %v7306_v36 = vmul.f32 %v11385_v18, %v11405_v17  ;;  %v11411_v49 = vld [vmem:[#allocation92_spill] sm:$0xff]  ;;  %v11414_v17 = vld [vmem:[#allocation90_spill] sm:$0xff]  ;;  %v7338_v62 = vpop.eup %4297  ;;  %4327 = vrcp.f32 %v7209_v34 }
 0x1f2   : >> { %11408 = vst [vmem:[#allocation298_spill] sm:$0xff] %v7313_v32  ;;  %11410 = vst [vmem:[#allocation299_spill] sm:$0xff] %v7317_v14  ;;  %v7321_v39 = vmul.f32 %v11385_v18, %v11411_v49  ;;  %v7328_v31 = vmul.f32 %v11385_v18, %v11414_v17  ;;  %v11418_v32 = vld [vmem:[#allocation102_spill] sm:$0xff]  ;;  %v11421_v49 = vld [vmem:[#allocation116_spill] sm:$0xff]  ;;  %v7353_v2 = vpop.eup %4299  ;;  %4329 = vrcp.f32 %v7214_v57 }
 0x1f3   : >> { %11406 = vst [vmem:[#allocation297_spill] sm:$0xff] %v7306_v36  ;;  %11413 = vst [vmem:[#allocation301_spill] sm:$0xff] %v7323_v15  ;;  %v7336_v21 = vmul.f32 %v11385_v18, %v11418_v32  ;;  %v7343_v14 = vmul.f32 %v11385_v18, %v11421_v49  ;;  %v11423_v36 = vld [vmem:[#allocation113_spill] sm:$0xff]  ;;  %v11428_v32 = vld [vmem:[#allocation123_spill] sm:$0xff]  ;;  %4331 = vrcp.f32 %v7218_v19 }
 0x1f4   : >> { %11412 = vst [vmem:[#allocation300_spill] sm:$0xff] %v7321_v39  ;;  %11415 = vst [vmem:[#allocation302_spill] sm:$0xff] %v7328_v31  ;;  %v7347_v17 = vmul.f32 %v11385_v18, %v11423_v36  ;;  %v11430_v39 = vld [vmem:[#allocation21_spill] sm:$0xff] }
 0x1f5   : >> { %11417 = vst [vmem:[#allocation303_spill] sm:$0xff] %v7332_v50  ;;  %11419 = vst [vmem:[#allocation304_spill] sm:$0xff] %v7336_v21  ;;  %v7358_v50 = vmul.f32 %v11385_v18, %v11428_v32  ;;  %v7362_v49 = vmul.f32 %v11385_v18, %v11430_v39  ;;  %v11436_v32 = vld [vmem:[#allocation138_spill] sm:$0xff] }
 0x1f6   : >> { %11420 = vst [vmem:[#allocation305_spill] sm:$0xff] %v7338_v62  ;;  %11422 = vst [vmem:[#allocation306_spill] sm:$0xff] %v7343_v14  ;;  %v11432_v14 = vld [vmem:[#allocation28_spill] sm:$0xff]  ;;  %v7379_v31 = vmul.f32 %v11385_v18, %v11436_v32  ;;  %v11439_v62 = vld [vmem:[#allocation25_spill] sm:$0xff] }
 0x1f7   : >> { %11424 = vst [vmem:[#allocation307_spill] sm:$0xff] %v7347_v17  ;;  %11426 = vst [vmem:[#allocation308_spill] sm:$0xff] %v7351_v38  ;;  %v7366_v36 = vmul.f32 %v11385_v18, %v11432_v14  ;;  %v7368_v17 = vpop.eup %4301  ;;  %v11434_v38 = vld [vmem:[#allocation23_spill] sm:$0xff]  ;;  %v1717_v14 = vmul.f32 %v7278_v0, %v7128_v47  ;;  %v11443_v32 = vld [vmem:[#allocation294_spill] sm:$0xff]  ;;  %4333 = vrcp.f32 %v7222_v45 }
 0x1f8   : >> { %11427 = vst [vmem:[#allocation309_spill] sm:$0xff] %v7353_v2  ;;  %11429 = vst [vmem:[#allocation310_spill] sm:$0xff] %v7358_v50  ;;  %v7375_v21 = vmul.f32 %v11385_v18, %v11434_v38  ;;  %v7381_v39 = vpop.eup %4303  ;;  %v1718_v50 = vmul.f32 %v11443_v32, %v7132_v61  ;;  %v11454_v61 = vld [vmem:[#allocation211_spill] sm:$0xff]  ;;  %4335 = vrcp.f32 %v7227_v1 }
 0x1f9   : >> { %11431 = vst [vmem:[#allocation311_spill] sm:$0xff] %v7362_v49  ;;  %11433 = vst [vmem:[#allocation312_spill] sm:$0xff] %v7366_v36  ;;  %v7388_v36 = vmul.f32 %v11385_v18, %v11439_v62  ;;  %v11441_v49 = vld [vmem:[#allocation34_spill] sm:$0xff]  ;;  %v7394_v38 = vpop.eup %4305  ;;  %v7428_v15 = vmul.f32 0.0, %v11454_v61  ;;  %v7448_v59 = vmul.f32 %v11454_v61, %v11465_v40  ;;  %4337 = vrcp.f32 %v7231_v46 }
 0x1fa   : >> { %11435 = vst [vmem:[#allocation313_spill] sm:$0xff] %v7375_v21  ;;  %11437 = vst [vmem:[#allocation314_spill] sm:$0xff] %v7379_v31  ;;  %v7392_v2 = vmul.f32 %v11385_v18, %v11441_v49  ;;  %v11444_v31 = vld [vmem:[#allocation104_spill] sm:$0xff]  ;;  %v7407_v62 = vpop.eup %4307  ;;  %4339 = vrcp.f32 %v7235_v20 }
 0x1fb   : >> { %11438 = vst [vmem:[#allocation315_spill] sm:$0xff] %v7381_v39  ;;  %11440 = vst [vmem:[#allocation316_spill] sm:$0xff] %v7388_v36  ;;  %v7401_v5 = vmul.f32 %v11385_v18, %v11444_v31  ;;  %v11449_v49 = vld [vmem:[#allocation172_spill] sm:$0xff]  ;;  %v11451_v36 = vld [vmem:[#allocation97_spill] sm:$0xff]  ;;  %v7422_v39 = vpop.eup %4309  ;;  %4341 = vrcp.f32 %v7240_v27 }
 0x1fc   : >> { %11442 = vst [vmem:[#allocation317_spill] sm:$0xff] %v7392_v2  ;;  %11447 = vst [vmem:[#allocation318_spill] sm:$0xff] %v7405_v37  ;;  %v7412_v2 = vmul.f32 %v11385_v18, %v11449_v49  ;;  %v7416_v48 = vmul.f32 %v11385_v18, %v11451_v36  ;;  %v11453_v21 = vld [vmem:[#allocation16_spill] sm:$0xff]  ;;  %v1719_v37 = vmul.f32 %v7308_v51, %v11457_v28  ;;  %v7430_v49 = vpop.eup %4311  ;;  %v11459_v18 = vld [vmem:[#allocation264_spill] sm:$0xff]  ;;  %4343 = vrcp.f32 %v7244_v8 }
 0x1fd   : >> { %11445 = vst [vmem:[#allocation294_spill] sm:$0xff] %v7401_v5  ;;  %11448 = vst [vmem:[#allocation319_spill] sm:$0xff] %v7407_v62  ;;  %v7420_v31 = vmul.f32 %v11454_v61, %v11453_v21  ;;  %v1747_v5 = vsub.f32 2.0, %v1716_v26  ;;  %v11460_v36 = vld [vmem:[#allocation301_spill] sm:$0xff]  ;;  %v1748_v21 = vsub.f32 2.0, %v1717_v14  ;;  %v7439_v58 = vpop.eup %4313  ;;  %v1749_v26 = vsub.f32 2.0, %v1718_v50 }
 0x1fe   : >> { %11450 = vst [vmem:[#allocation320_spill] sm:$0xff] %v7412_v2  ;;  %11452 = vst [vmem:[#allocation321_spill] sm:$0xff] %v7416_v48  ;;  %v1720_v48 = vmul.f32 %v11460_v36, %v11459_v18  ;;  %v11461_v2 = vld [vmem:[#allocation33_spill] sm:$0xff]  ;;  %v11463_v28 = vld [vmem:[#allocation39_spill] sm:$0xff]  ;;  %v7450_v47 = vpop.eup %4315  ;;  %4345 = vrcp.f32 %v7248_v23 }
 0x1ff   : >> { %11455 = vst [vmem:[#allocation322_spill] sm:$0xff] %v7420_v31  ;;  %11456 = vst [vmem:[#allocation323_spill] sm:$0xff] %v7422_v39  ;;  %v7437_v31 = vmul.f32 %v11454_v61, %v11461_v2  ;;  %v11467_v14 = vld [vmem:[#allocation305_spill] sm:$0xff]  ;;  %v11470_v50 = vld [vmem:[#allocation49_spill] sm:$0xff]  ;;  %v7477_v36 = vmul.f32 %v7278_v0, %v1748_v21  ;;  %4347 = vrcp.f32 %v7253_v56 }
 0x200   : >> { %11458 = vst [vmem:[#allocation324_spill] sm:$0xff] %v7428_v15  ;;  %v7444_v15 = vmul.f32 %v11454_v61, %v11463_v28  ;;  %11466 = vst [vmem:[#allocation327_spill] sm:$0xff] %v7448_v59  ;;  %v1721_v2 = vmul.f32 %v11467_v14, %v7144_v29  ;;  %v7461_v39 = vmul.f32 %v11454_v61, %v11470_v50  ;;  %v7463_v28 = vpop.eup %4317  ;;  %v11472_v40 = vld [vmem:[#allocation309_spill] sm:$0xff]  ;;  %v1750_v59 = vsub.f32 2.0, %v1719_v37 }
 0x201   : >> { %11462 = vst [vmem:[#allocation325_spill] sm:$0xff] %v7437_v31  ;;  %v11468_v31 = vld [vmem:[#allocation51_spill] sm:$0xff]  ;;  %v1722_v62 = vmul.f32 %v11472_v40, %v7149_v43  ;;  %v7471_v29 = vpop.eup %4319  ;;  %v1751_v50 = vsub.f32 2.0, %v1720_v48  ;;  %11474 = vst [vmem:[#allocation329_spill] sm:$0xff] %v7477_v36  ;;  %v11480_v24 = vld [vmem:[#allocation301_spill] sm:$0xff] }
 0x202   : >> { %11464 = vst [vmem:[#allocation326_spill] sm:$0xff] %v7444_v15  ;;  %v7457_v18 = vmul.f32 %v11454_v61, %v11468_v31  ;;  %11471 = vst [vmem:[#allocation328_spill] sm:$0xff] %v7461_v39  ;;  %v7469_v15 = vmul.f32 %v7263_v52, %v1747_v5  ;;  %v1723_v31 = vmul.f32 %v7368_v17, %v7153_v53  ;;  %v7479_v39 = vpop.eup %4321  ;;  %v11475_v37 = vld [vmem:[#allocation315_spill] sm:$0xff]  ;;  %v1752_v61 = vsub.f32 2.0, %v1721_v2 }
 0x203   : >> { %v1725_v5 = vmul.f32 %v7394_v38, %v7162_v11  ;;  %v7487_v52 = vmul.f32 %v11443_v32, %v1749_v26  ;;  %v7489_v43 = vpop.eup %4323  ;;  %v1728_v11 = vmul.f32 %v7430_v49, %v7175_v3  ;;  %v1729_v32 = vmul.f32 %v7439_v58, %v7179_v4 }
 0x204   : >> { %11469 = vst [vmem:[#allocation305_spill] sm:$0xff] %v7457_v18  ;;  %11473 = vst [vmem:[#allocation309_spill] sm:$0xff] %v7469_v15  ;;  %v1724_v18 = vmul.f32 %v11475_v37, %v7157_v30  ;;  %v11477_v48 = vld [vmem:[#allocation319_spill] sm:$0xff]  ;;  %v7496_v60 = vpop.eup %4325  ;;  %v1753_v26 = vsub.f32 2.0, %v1722_v62  ;;  %v1731_v2 = vmul.f32 %v7463_v28, %v7188_v35  ;;  %v1732_v3 = vmul.f32 %v7471_v29, %v7192_v42 }
 0x205   : >> { %11476 = vst [vmem:[#allocation315_spill] sm:$0xff] %v7487_v52  ;;  %v1726_v21 = vmul.f32 %v11477_v48, %v7166_v6  ;;  %v7503_v30 = vpop.eup %4327  ;;  %v1730_v6 = vmul.f32 %v7450_v47, %v7183_v9  ;;  %v1756_v25 = vsub.f32 2.0, %v1725_v5  ;;  %v7515_v62 = vmul.f32 %v7308_v51, %v1750_v59 }
 0x206   : >> { %v11478_v0 = vld [vmem:[#allocation323_spill] sm:$0xff]  ;;  %v7510_v54 = vpop.eup %4329  ;;  %v1755_v33 = vsub.f32 2.0, %v1724_v18  ;;  %v1733_v7 = vmul.f32 %v7479_v39, %v7196_v16  ;;  %v7522_v35 = vmul.f32 %v11480_v24, %v1751_v50  ;;  %v1734_v13 = vmul.f32 %v7489_v43, %v7201_v55 }
 0x207   : >> { %v1727_v53 = vmul.f32 %v11478_v0, %v7170_v22  ;;  %v1754_v22 = vsub.f32 2.0, %v1723_v31  ;;  %11479 = vst [vmem:[#allocation319_spill] sm:$0xff] %v7515_v62  ;;  %v7517_v4 = vpop.eup %4331  ;;  %v1757_v9 = vsub.f32 2.0, %v1726_v21  ;;  %v1759_v42 = vsub.f32 2.0, %v1728_v11 }
 0x208   : >> { %11481 = vst [vmem:[#allocation323_spill] sm:$0xff] %v7522_v35  ;;  %v4334_v31 = vpop.eup %4333  ;;  %v1760_v18 = vsub.f32 2.0, %v1729_v32  ;;  %v7527_v5 = vmul.f32 %v11467_v14, %v1752_v61  ;;  %v1761_v51 = vsub.f32 2.0, %v1730_v6  ;;  %v1762_v63 = vsub.f32 2.0, %v1731_v2 }
 0x209   : >> { %v1758_v44 = vsub.f32 2.0, %v1727_v53  ;;  %v4336_v59 = vpop.eup %4335  ;;  %v7530_v12 = vmul.f32 %v11472_v40, %v1753_v26  ;;  %v7533_v53 = vmul.f32 %v7368_v17, %v1754_v22  ;;  %v1735_v50 = vmul.f32 %v7496_v60, %v7205_v41 }
 0x20a   : >> { %11482 = vst [vmem:[#allocation301_spill] sm:$0xff] %v7527_v5  ;;  %v4338_v24 = vpop.eup %4337  ;;  %v1763_v21 = vsub.f32 2.0, %v1732_v3  ;;  %v7538_v11 = vmul.f32 %v11475_v37, %v1755_v33  ;;  %v7541_v61 = vmul.f32 %v7394_v38, %v1756_v25  ;;  %v1736_v6 = vmul.f32 %v7503_v30, %v7209_v34 }
 0x20b   : >> { %11483 = vst [vmem:[#allocation330_spill] sm:$0xff] %v7530_v12  ;;  %11484 = vst [vmem:[#allocation331_spill] sm:$0xff] %v7533_v53  ;;  %v4340_v14 = vpop.eup %4339  ;;  %v1764_v40 = vsub.f32 2.0, %v1733_v7  ;;  %v7546_v32 = vmul.f32 %v11477_v48, %v1757_v9  ;;  %v7549_v22 = vmul.f32 %v11478_v0, %v1758_v44  ;;  %v1737_v3 = vmul.f32 %v7510_v54, %v7214_v57 }
 0x20c   : >> { %11485 = vst [vmem:[#allocation332_spill] sm:$0xff] %v7538_v11  ;;  %11486 = vst [vmem:[#allocation333_spill] sm:$0xff] %v7541_v61  ;;  %v4342_v17 = vpop.eup %4341  ;;  %v1765_v33 = vsub.f32 2.0, %v1734_v13  ;;  %v7554_v37 = vmul.f32 %v7430_v49, %v1759_v42  ;;  %v7557_v25 = vmul.f32 %v7439_v58, %v1760_v18  ;;  %v1738_v7 = vmul.f32 %v7517_v4, %v7218_v19  ;;  %v11494_v58 = vld [vmem:[#allocation209_spill] sm:$0xff]  ;;  %v11622_v19 = vld [vmem:[#allocation299_spill] sm:$0xff] }
 0x20d   : >> { %11487 = vst [vmem:[#allocation334_spill] sm:$0xff] %v7546_v32  ;;  %11488 = vst [vmem:[#allocation335_spill] sm:$0xff] %v7549_v22  ;;  %v4344_v38 = vpop.eup %4343  ;;  %v1739_v9 = vmul.f32 %v4334_v31, %v7222_v45  ;;  %v7563_v44 = vmul.f32 %v7450_v47, %v1761_v51  ;;  %v7566_v48 = vmul.f32 %v7463_v28, %v1762_v63  ;;  %v1766_v42 = vsub.f32 2.0, %v1735_v50 }
 0x20e   : >> { %11489 = vst [vmem:[#allocation336_spill] sm:$0xff] %v7554_v37  ;;  %11490 = vst [vmem:[#allocation337_spill] sm:$0xff] %v7557_v25  ;;  %v4346_v0 = vpop.eup %4345  ;;  %v1740_v13 = vmul.f32 %v4336_v59, %v7227_v1  ;;  %v7570_v49 = vmul.f32 %v7471_v29, %v1763_v21  ;;  %v7574_v26 = vmul.f32 %v11494_v58, %v7469_v15  ;;  %v1767_v51 = vsub.f32 2.0, %v1736_v6  ;;  %v11498_v29 = vld [vmem:[#allocation208_spill] sm:$0xff]  ;;  %v11602_v58 = vld [vmem:[#allocation286_spill] sm:$0xff] }
 0x20f   : >> { %11491 = vst [vmem:[#allocation338_spill] sm:$0xff] %v7563_v44  ;;  %11492 = vst [vmem:[#allocation339_spill] sm:$0xff] %v7566_v48  ;;  %v4348_v2 = vpop.eup %4347  ;;  %v1741_v18 = vmul.f32 %v4338_v24, %v7231_v46  ;;  %v1742_v47 = vmul.f32 %v4340_v14, %v7235_v20  ;;  %v7579_v63 = vmul.f32 %v7479_v39, %v1764_v40  ;;  %v1768_v1 = vsub.f32 2.0, %v1737_v3  ;;  %v11500_v20 = vld [vmem:[#allocation207_spill] sm:$0xff] }
 0x210   : >> { %11493 = vst [vmem:[#allocation340_spill] sm:$0xff] %v7570_v49  ;;  %11495 = vst [vmem:[#allocation341_spill] sm:$0xff] %v7574_v26  ;;  %v1743_v28 = vmul.f32 %v4342_v17, %v7240_v27  ;;  %v7583_v50 = vmul.f32 %v7489_v43, %v1765_v33  ;;  %v7587_v21 = vmul.f32 %v11498_v29, %v7477_v36  ;;  %v1769_v45 = vsub.f32 2.0, %v1738_v7  ;;  %v11504_v7 = vld [vmem:[#allocation206_spill] sm:$0xff]  ;;  %v11588_v26 = vld [vmem:[#allocation129_spill] sm:$0xff] }
 0x211   : >> { %11496 = vst [vmem:[#allocation342_spill] sm:$0xff] %v7579_v63  ;;  %v1744_v15 = vmul.f32 %v4344_v38, %v7244_v8  ;;  %v1770_v46 = vsub.f32 2.0, %v1739_v9  ;;  %v7592_v6 = vmul.f32 %v11500_v20, %v7487_v52  ;;  %v1745_v39 = vmul.f32 %v4346_v0, %v7248_v23  ;;  %v11507_v23 = vld [vmem:[#allocation205_spill] sm:$0xff] }
 0x212   : >> { %11497 = vst [vmem:[#allocation343_spill] sm:$0xff] %v7583_v50  ;;  %11499 = vst [vmem:[#allocation344_spill] sm:$0xff] %v7587_v21  ;;  %v1746_v40 = vmul.f32 %v4348_v2, %v7253_v56  ;;  %v1771_v3 = vsub.f32 2.0, %v1740_v13  ;;  %v7597_v43 = vmul.f32 %v7496_v60, %v1766_v42  ;;  %v1772_v33 = vsub.f32 2.0, %v1741_v18  ;;  %v11512_v18 = vld [vmem:[#allocation259_spill] sm:$0xff] }
 0x213   : >> { %11501 = vst [vmem:[#allocation345_spill] sm:$0xff] %v7592_v6  ;;  %v1773_v27 = vsub.f32 2.0, %v1742_v47  ;;  %v7600_v36 = vmul.f32 %v7503_v30, %v1767_v51  ;;  %v7604_v9 = vmul.f32 %v11504_v7, %v7515_v62  ;;  %v1774_v8 = vsub.f32 2.0, %v1743_v28  ;;  %v11515_v28 = vld [vmem:[#allocation258_spill] sm:$0xff]  ;;  %v11587_v21 = vld [vmem:[#allocation114_spill] sm:$0xff]  ;;  %v11596_v7 = vld [vmem:[#allocation27_spill] sm:$0xff] }
 0x214   : >> { %11502 = vst [vmem:[#allocation346_spill] sm:$0xff] %v7597_v43  ;;  %v7607_v52 = vmul.f32 %v7510_v54, %v1768_v1  ;;  %v7611_v56 = vmul.f32 %v11507_v23, %v7522_v35  ;;  %v7615_v60 = vmul.f32 %v11336_v10, %v7527_v5  ;;  %v1775_v13 = vsub.f32 2.0, %v1744_v15  ;;  %v11590_v10 = vld [vmem:[#allocation134_spill] sm:$0xff] }
 0x215   : >> { %11503 = vst [vmem:[#allocation347_spill] sm:$0xff] %v7600_v36  ;;  %11505 = vst [vmem:[#allocation348_spill] sm:$0xff] %v7604_v9  ;;  %v7618_v30 = vmul.f32 %v7517_v4, %v1769_v45  ;;  %v7620_v42 = vmul.f32 %v4334_v31, %v1770_v46  ;;  %v7624_v47 = vmul.f32 %v11512_v18, %v7530_v12  ;;  %v1776_v54 = vsub.f32 2.0, %v1745_v39  ;;  %v11519_v4 = vld [vmem:[#allocation203_spill] sm:$0xff]  ;;  %v11521_v45 = vld [vmem:[#allocation202_spill] sm:$0xff] }
 0x216   : >> { %11506 = vst [vmem:[#allocation349_spill] sm:$0xff] %v7607_v52  ;;  %11508 = vst [vmem:[#allocation350_spill] sm:$0xff] %v7611_v56  ;;  %v1777_v1 = vsub.f32 2.0, %v1746_v40  ;;  %v7626_v51 = vmul.f32 %v4336_v59, %v1771_v3  ;;  %v7630_v35 = vmul.f32 %v11515_v28, %v7533_v53  ;;  %v7632_v5 = vmul.f32 %v4338_v24, %v1772_v33  ;;  %v11524_v59 = vld [vmem:[#allocation257_spill] sm:$0xff]  ;;  %v11526_v3 = vld [vmem:[#allocation201_spill] sm:$0xff] }
 0x217   : >> { %11509 = vst [vmem:[#allocation351_spill] sm:$0xff] %v7615_v60  ;;  %11510 = vst [vmem:[#allocation352_spill] sm:$0xff] %v7618_v30  ;;  %v7634_v15 = vmul.f32 %v4340_v14, %v1773_v27  ;;  %v7638_v46 = vmul.f32 %v11519_v4, %v7538_v11  ;;  %v7642_v31 = vmul.f32 %v11521_v45, %v7541_v61  ;;  %v11528_v27 = vld [vmem:[#allocation256_spill] sm:$0xff]  ;;  %v11531_v11 = vld [vmem:[#allocation255_spill] sm:$0xff] }
 0x218   : >> { %11511 = vst [vmem:[#allocation353_spill] sm:$0xff] %v7620_v42  ;;  %11513 = vst [vmem:[#allocation354_spill] sm:$0xff] %v7624_v47  ;;  %v7644_v39 = vmul.f32 %v4342_v17, %v1774_v8  ;;  %v7648_v40 = vmul.f32 %v11524_v59, %v7546_v32  ;;  %v7652_v24 = vmul.f32 %v11526_v3, %v7549_v22  ;;  %v11533_v8 = vld [vmem:[#allocation254_spill] sm:$0xff]  ;;  %v11535_v32 = vld [vmem:[#allocation260_spill] sm:$0xff] }
 0x219   : >> { %11514 = vst [vmem:[#allocation355_spill] sm:$0xff] %v7626_v51  ;;  %11516 = vst [vmem:[#allocation356_spill] sm:$0xff] %v7630_v35  ;;  %v7656_v14 = vmul.f32 %v11528_v27, %v7554_v37  ;;  %v7658_v33 = vmul.f32 %v4344_v38, %v1775_v13  ;;  %v7662_v61 = vmul.f32 %v11531_v11, %v7557_v25  ;;  %v11536_v53 = vld [vmem:[#allocation261_spill] sm:$0xff]  ;;  %v11541_v38 = vld [vmem:[#allocation199_spill] sm:$0xff] }
 0x21a   : >> { %11517 = vst [vmem:[#allocation357_spill] sm:$0xff] %v7632_v5  ;;  %11518 = vst [vmem:[#allocation358_spill] sm:$0xff] %v7634_v15  ;;  %v7666_v17 = vmul.f32 %v11533_v8, %v7563_v44  ;;  %v2025_v12 = vadd.f32 %v11536_v53, %v11535_v32  ;;  %v7670_v62 = vmul.f32 %v4346_v0, %v1776_v54  ;;  %v11539_v37 = vld [vmem:[#allocation200_spill] sm:$0xff]  ;;  %v11543_v25 = vld [vmem:[#allocation198_spill] sm:$0xff] }
 0x21b   : >> { %11520 = vst [vmem:[#allocation359_spill] sm:$0xff] %v7638_v46  ;;  %11522 = vst [vmem:[#allocation360_spill] sm:$0xff] %v7642_v31  ;;  %v7672_v22 = vmul.f32 %v4348_v2, %v1777_v1  ;;  %v7676_v27 = vmul.f32 %v11539_v37, %v7566_v48  ;;  %v7680_v13 = vmul.f32 %v11541_v38, %v7570_v49  ;;  %v11545_v44 = vld [vmem:[#allocation253_spill] sm:$0xff]  ;;  %v11547_v53 = vld [vmem:[#allocation197_spill] sm:$0xff] }
 0x21c   : >> { %11523 = vst [vmem:[#allocation361_spill] sm:$0xff] %v7644_v39  ;;  %11525 = vst [vmem:[#allocation362_spill] sm:$0xff] %v7648_v40  ;;  %v7684_v11 = vmul.f32 %v11543_v25, %v7579_v63  ;;  %v7688_v8 = vmul.f32 %v11545_v44, %v7583_v50  ;;  %v7692_v32 = vmul.f32 %v11547_v53, %v7597_v43  ;;  %v11549_v0 = vld [vmem:[#allocation262_spill] sm:$0xff]  ;;  %v11550_v54 = vld [vmem:[#allocation196_spill] sm:$0xff] }
 0x21d   : >> { %11527 = vst [vmem:[#allocation363_spill] sm:$0xff] %v7652_v24  ;;  %11529 = vst [vmem:[#allocation364_spill] sm:$0xff] %v7656_v14  ;;  %v2026_v2 = vadd.f32 %v2025_v12, %v11549_v0  ;;  %v7697_v1 = vmul.f32 %v11550_v54, %v7600_v36  ;;  %v11552_v49 = vld [vmem:[#allocation252_spill] sm:$0xff]  ;;  %v11556_v50 = vld [vmem:[#allocation251_spill] sm:$0xff] }
 0x21e   : >> { %11530 = vst [vmem:[#allocation365_spill] sm:$0xff] %v7658_v33  ;;  %11532 = vst [vmem:[#allocation366_spill] sm:$0xff] %v7662_v61  ;;  %v7701_v48 = vmul.f32 %v11552_v49, %v7607_v52  ;;  %v11554_v63 = vld [vmem:[#allocation195_spill] sm:$0xff]  ;;  %v7709_v44 = vmul.f32 %v11556_v50, %v7620_v42  ;;  %v11558_v43 = vld [vmem:[#allocation250_spill] sm:$0xff] }
 0x21f   : >> { %11534 = vst [vmem:[#allocation367_spill] sm:$0xff] %v7666_v17  ;;  %11537 = vst [vmem:[#allocation260_spill] sm:$0xff] %v7670_v62  ;;  %v7705_v25 = vmul.f32 %v11554_v63, %v7618_v30  ;;  %v7713_v53 = vmul.f32 %v11558_v43, %v7626_v51  ;;  %v11560_v12 = vld [vmem:[#allocation249_spill] sm:$0xff]  ;;  %v11562_v36 = vld [vmem:[#allocation248_spill] sm:$0xff] }
 0x220   : >> { %11538 = vst [vmem:[#allocation261_spill] sm:$0xff] %v7672_v22  ;;  %11540 = vst [vmem:[#allocation368_spill] sm:$0xff] %v7676_v27  ;;  %v7717_v0 = vmul.f32 %v11560_v12, %v7632_v5  ;;  %v7721_v52 = vmul.f32 %v11562_v36, %v7634_v15  ;;  %v11564_v49 = vld [vmem:[#allocation263_spill] sm:$0xff]  ;;  %v11567_v42 = vld [vmem:[#allocation246_spill] sm:$0xff] }
 0x221   : >> { %11542 = vst [vmem:[#allocation369_spill] sm:$0xff] %v7680_v13  ;;  %11544 = vst [vmem:[#allocation370_spill] sm:$0xff] %v7684_v11  ;;  %v11565_v30 = vld [vmem:[#allocation247_spill] sm:$0xff]  ;;  %v7730_v50 = vmul.f32 %v11567_v42, %v7658_v33  ;;  %v11569_v51 = vld [vmem:[#allocation245_spill] sm:$0xff] }
 0x222   : >> { %11546 = vst [vmem:[#allocation371_spill] sm:$0xff] %v7688_v8  ;;  %11548 = vst [vmem:[#allocation372_spill] sm:$0xff] %v7692_v32  ;;  %v7726_v63 = vmul.f32 %v11565_v30, %v7644_v39  ;;  %v7734_v43 = vmul.f32 %v11569_v51, %v7670_v62  ;;  %v11571_v5 = vld [vmem:[#allocation244_spill] sm:$0xff]  ;;  %v11573_v15 = vld [vmem:[#allocation61_spill] sm:$0xff] }
 0x223   : >> { %11551 = vst [vmem:[#allocation262_spill] sm:$0xff] %v7697_v1  ;;  %11553 = vst [vmem:[#allocation373_spill] sm:$0xff] %v7701_v48  ;;  %v2027_v48 = vadd.f32 %v2026_v2, %v11564_v49  ;;  %v7738_v12 = vmul.f32 %v11571_v5, %v7672_v22  ;;  %v11574_v36 = vld [vmem:[#allocation211_spill] sm:$0xff]  ;;  %v11578_v42 = vld [vmem:[#allocation70_spill] sm:$0xff] }
 0x224   : >> { %11555 = vst [vmem:[#allocation374_spill] sm:$0xff] %v7705_v25  ;;  %11557 = vst [vmem:[#allocation375_spill] sm:$0xff] %v7709_v44  ;;  %v11575_v49 = vld [vmem:[#allocation59_spill] sm:$0xff]  ;;  %v11579_v62 = vld [vmem:[#allocation85_spill] sm:$0xff] }
 0x225   : >> { %11559 = vst [vmem:[#allocation376_spill] sm:$0xff] %v7713_v53  ;;  %11561 = vst [vmem:[#allocation377_spill] sm:$0xff] %v7717_v0  ;;  %v1910_v0 = vmul.f32 %v11574_v36, %v11575_v49  ;;  %v11576_v39 = vld [vmem:[#allocation75_spill] sm:$0xff]  ;;  %v1912_v53 = vmul.f32 %v11574_v36, %v11578_v42  ;;  %v1913_v51 = vmul.f32 %v11574_v36, %v11579_v62  ;;  %v11581_v5 = vld [vmem:[#allocation93_spill] sm:$0xff] }
 0x226   : >> { %11563 = vst [vmem:[#allocation378_spill] sm:$0xff] %v7721_v52  ;;  %11566 = vst [vmem:[#allocation263_spill] sm:$0xff] %v7726_v63  ;;  %v1909_v52 = vmul.f32 %v11574_v36, %v11573_v15  ;;  %v1911_v30 = vmul.f32 %v11574_v36, %v11576_v39  ;;  %v11577_v63 = vld [vmem:[#allocation264_spill] sm:$0xff]  ;;  %v1915_v15 = vmul.f32 %v11574_v36, %v11581_v5  ;;  %v11589_v25 = vld [vmem:[#allocation124_spill] sm:$0xff] }
 0x227   : >> { %11568 = vst [vmem:[#allocation379_spill] sm:$0xff] %v7730_v50  ;;  %11570 = vst [vmem:[#allocation380_spill] sm:$0xff] %v7734_v43  ;;  %v2028_v33 = vadd.f32 %v2027_v48, %v11577_v63  ;;  %v11580_v43 = vld [vmem:[#allocation80_spill] sm:$0xff]  ;;  %v11582_v2 = vld [vmem:[#allocation91_spill] sm:$0xff]  ;;  %v1921_v5 = vmul.f32 %v11574_v36, %v11588_v26 }
 0x228   : >> { %11572 = vst [vmem:[#allocation381_spill] sm:$0xff] %v7738_v12  ;;  %v1914_v22 = vmul.f32 %v11574_v36, %v11580_v43  ;;  %v1916_v49 = vmul.f32 %v11574_v36, %v11582_v2  ;;  %v11583_v12 = vld [vmem:[#allocation106_spill] sm:$0xff]  ;;  %v11584_v44 = vld [vmem:[#allocation103_spill] sm:$0xff]  ;;  %v11585_v63 = vld [vmem:[#allocation265_spill] sm:$0xff]  ;;  %v1920_v43 = vmul.f32 %v11574_v36, %v11587_v21  ;;  %v1922_v2 = vmul.f32 %v11574_v36, %v11589_v25 }
 0x229   : >> { %v1917_v39 = vmul.f32 %v11574_v36, %v11583_v12  ;;  %v1918_v48 = vmul.f32 %v11574_v36, %v11584_v44  ;;  %v2029_v42 = vadd.f32 %v2028_v33, %v11585_v63  ;;  %v11586_v50 = vld [vmem:[#allocation117_spill] sm:$0xff]  ;;  %v1923_v12 = vmul.f32 %v11574_v36, %v11590_v10  ;;  %v11591_v24 = vld [vmem:[#allocation22_spill] sm:$0xff]  ;;  %v11592_v54 = vld [vmem:[#allocation143_spill] sm:$0xff] }
 0x22a   : >> { %v1919_v62 = vmul.f32 %v11574_v36, %v11586_v50  ;;  %v1924_v44 = vmul.f32 %v11574_v36, %v11591_v24  ;;  %v1925_v33 = vmul.f32 %v11574_v36, %v11592_v54  ;;  %v11593_v63 = vld [vmem:[#allocation266_spill] sm:$0xff]  ;;  %v11594_v1 = vld [vmem:[#allocation24_spill] sm:$0xff]  ;;  %v11595_v32 = vld [vmem:[#allocation154_spill] sm:$0xff]  ;;  %v1928_v25 = vmul.f32 %v11574_v36, %v11596_v7 }
 0x22b   : >> { %v2030_v50 = vadd.f32 %v2029_v42, %v11593_v63  ;;  %v1926_v21 = vmul.f32 %v11574_v36, %v11594_v1  ;;  %v1927_v26 = vmul.f32 %v11574_v36, %v11595_v32  ;;  %v11597_v8 = vld [vmem:[#allocation182_spill] sm:$0xff]  ;;  %v11598_v11 = vld [vmem:[#allocation173_spill] sm:$0xff]  ;;  %v11605_v27 = vld [vmem:[#allocation324_spill] sm:$0xff] }
 0x22c   : >> { %v1929_v10 = vmul.f32 %v11574_v36, %v11597_v8  ;;  %v1930_v24 = vmul.f32 %v11574_v36, %v11598_v11  ;;  %v11599_v59 = vld [vmem:[#allocation186_spill] sm:$0xff]  ;;  %v11603_v40 = vld [vmem:[#allocation322_spill] sm:$0xff]  ;;  %v11606_v37 = vld [vmem:[#allocation288_spill] sm:$0xff] }
 0x22d   : >> { %v1931_v54 = vmul.f32 %v11574_v36, %v11599_v59  ;;  %v11600_v38 = vld [vmem:[#allocation190_spill] sm:$0xff]  ;;  %v1933_v32 = vadd.f32 %v11603_v40, %v11602_v58  ;;  %v11607_v17 = vld [vmem:[#allocation325_spill] sm:$0xff]  ;;  %v11609_v61 = vld [vmem:[#allocation326_spill] sm:$0xff] }
 0x22e   : >> { %v1932_v42 = vmul.f32 %v11574_v36, %v11600_v38  ;;  %v11601_v63 = vld [vmem:[#allocation267_spill] sm:$0xff]  ;;  %v1935_v8 = vadd.f32 %v11607_v17, %v11606_v37  ;;  %v11608_v28 = vld [vmem:[#allocation289_spill] sm:$0xff]  ;;  %v11610_v14 = vld [vmem:[#allocation290_spill] sm:$0xff] }
 0x22f   : >> { %v2031_v1 = vadd.f32 %v2030_v50, %v11601_v63  ;;  %v11604_v13 = vld [vmem:[#allocation287_spill] sm:$0xff]  ;;  %v1936_v11 = vadd.f32 %v11609_v61, %v11608_v28  ;;  %v11613_v45 = vld [vmem:[#allocation305_spill] sm:$0xff]  ;;  %v11614_v36 = vld [vmem:[#allocation292_spill] sm:$0xff] }
 0x230   : >> { %v1934_v7 = vadd.f32 %v11605_v27, %v11604_v13  ;;  %v11611_v3 = vld [vmem:[#allocation327_spill] sm:$0xff]  ;;  %v11615_v50 = vld [vmem:[#allocation328_spill] sm:$0xff]  ;;  %v11617_v40 = vld [vmem:[#allocation293_spill] sm:$0xff] }
 0x231   : >> { %v1937_v59 = vadd.f32 %v11611_v3, %v11610_v14  ;;  %v11612_v18 = vld [vmem:[#allocation291_spill] sm:$0xff]  ;;  %v1939_v63 = vadd.f32 %v11615_v50, %v11614_v36  ;;  %v11616_v31 = vld [vmem:[#allocation268_spill] sm:$0xff]  ;;  %v1940_v4 = vadd.f32 %v1909_v52, %v11617_v40  ;;  %v11620_v17 = vld [vmem:[#allocation297_spill] sm:$0xff]  ;;  %v1945_v3 = vadd.f32 %v1914_v22, %v11622_v19 }
 0x232   : >> { %v1938_v38 = vadd.f32 %v11613_v45, %v11612_v18  ;;  %v2032_v58 = vadd.f32 %v2031_v1, %v11616_v31  ;;  %v11618_v27 = vld [vmem:[#allocation295_spill] sm:$0xff]  ;;  %v11619_v46 = vld [vmem:[#allocation296_spill] sm:$0xff]  ;;  %v1943_v35 = vadd.f32 %v1912_v53, %v11620_v17  ;;  %v11621_v61 = vld [vmem:[#allocation298_spill] sm:$0xff] }
 0x233   : >> { %v1941_v13 = vadd.f32 %v1910_v0, %v11618_v27  ;;  %v1942_v37 = vadd.f32 %v1911_v30, %v11619_v46  ;;  %v1944_v28 = vadd.f32 %v1913_v51, %v11621_v61  ;;  %v11623_v14 = vld [vmem:[#allocation300_spill] sm:$0xff]  ;;  %v11624_v18 = vld [vmem:[#allocation269_spill] sm:$0xff]  ;;  %v11625_v60 = vld [vmem:[#allocation302_spill] sm:$0xff] }
 0x234   : >> { %v1946_v47 = vadd.f32 %v1915_v15, %v11623_v14  ;;  %v2033_v45 = vadd.f32 %v2032_v58, %v11624_v18  ;;  %v1947_v36 = vadd.f32 %v1916_v49, %v11625_v60  ;;  %v11626_v50 = vld [vmem:[#allocation303_spill] sm:$0xff]  ;;  %v11627_v1 = vld [vmem:[#allocation304_spill] sm:$0xff]  ;;  %v11628_v40 = vld [vmem:[#allocation306_spill] sm:$0xff] }
 0x235   : >> { %v1948_v31 = vadd.f32 %v1917_v39, %v11626_v50  ;;  %v1949_v52 = vadd.f32 %v1918_v48, %v11627_v1  ;;  %v1950_v0 = vadd.f32 %v1919_v62, %v11628_v40  ;;  %v11629_v27 = vld [vmem:[#allocation307_spill] sm:$0xff]  ;;  %v11630_v46 = vld [vmem:[#allocation308_spill] sm:$0xff]  ;;  %v11631_v17 = vld [vmem:[#allocation310_spill] sm:$0xff] }
 0x236   : >> { %v1951_v30 = vadd.f32 %v1920_v43, %v11629_v27  ;;  %v1952_v53 = vadd.f32 %v1921_v5, %v11630_v46  ;;  %v1953_v51 = vadd.f32 %v1922_v2, %v11631_v17  ;;  %v11632_v61 = vld [vmem:[#allocation270_spill] sm:$0xff]  ;;  %v11633_v22 = vld [vmem:[#allocation311_spill] sm:$0xff]  ;;  %v11634_v14 = vld [vmem:[#allocation312_spill] sm:$0xff] }
 0x237   : >> { %v2034_v19 = vadd.f32 %v2033_v45, %v11632_v61  ;;  %v1954_v15 = vadd.f32 %v1923_v12, %v11633_v22  ;;  %v1955_v58 = vadd.f32 %v1924_v44, %v11634_v14  ;;  %v11635_v18 = vld [vmem:[#allocation313_spill] sm:$0xff]  ;;  %v11636_v49 = vld [vmem:[#allocation314_spill] sm:$0xff]  ;;  %v11637_v50 = vld [vmem:[#allocation316_spill] sm:$0xff] }
 0x238   : >> { %v1956_v60 = vadd.f32 %v1925_v33, %v11635_v18  ;;  %v1957_v39 = vadd.f32 %v1926_v21, %v11636_v49  ;;  %v1958_v48 = vadd.f32 %v1927_v26, %v11637_v50  ;;  %v11638_v1 = vld [vmem:[#allocation317_spill] sm:$0xff]  ;;  %v11639_v40 = vld [vmem:[#allocation294_spill] sm:$0xff]  ;;  %v11640_v27 = vld [vmem:[#allocation271_spill] sm:$0xff] }
 0x239   : >> { %v1959_v62 = vadd.f32 %v1928_v25, %v11638_v1  ;;  %v1960_v43 = vadd.f32 %v1929_v10, %v11639_v40  ;;  %v2035_v5 = vadd.f32 %v2034_v19, %v11640_v27  ;;  %v11641_v46 = vld [vmem:[#allocation318_spill] sm:$0xff]  ;;  %v11642_v17 = vld [vmem:[#allocation320_spill] sm:$0xff]  ;;  %v11643_v61 = vld [vmem:[#allocation321_spill] sm:$0xff] }
 0x23a   : >> { %v1961_v2 = vadd.f32 %v1930_v24, %v11641_v46  ;;  %v1962_v45 = vadd.f32 %v1931_v54, %v11642_v17  ;;  %v1963_v12 = vadd.f32 %v1932_v42, %v11643_v61  ;;  %v11644_v22 = vld [vmem:[#allocation243_spill] sm:$0xff]  ;;  %v11645_v14 = vld [vmem:[#allocation242_spill] sm:$0xff]  ;;  %v11647_v21 = vld [vmem:[#allocation241_spill] sm:$0xff] }
 0x23b   : >> { %v1964_v44 = vadd.f32 %v11644_v22, %v1933_v32  ;;  %v7836_v33 = vadd.f32 %v11645_v14, %v1934_v7  ;;  %v1966_v18 = vadd.f32 %v11647_v21, %v1935_v8  ;;  %v11648_v26 = vld [vmem:[#allocation240_spill] sm:$0xff]  ;;  %v11650_v10 = vld [vmem:[#allocation239_spill] sm:$0xff]  ;;  %v11651_v19 = vld [vmem:[#allocation238_spill] sm:$0xff] }
 0x23c   : >> { %v1967_v49 = vadd.f32 %v11648_v26, %v1936_v11  ;;  %v11649_v25 = vld [vmem:[#allocation272_spill] sm:$0xff]  ;;  %v1968_v1 = vadd.f32 %v11650_v10, %v1937_v59  ;;  %v1969_v40 = vadd.f32 %v11651_v19, %v1938_v38  ;;  %v11652_v24 = vld [vmem:[#allocation237_spill] sm:$0xff]  ;;  %v11654_v42 = vld [vmem:[#allocation235_spill] sm:$0xff] }
 0x23d   : >> { %11646 = vst [vmem:[#allocation264_spill] sm:$0xff] %v7836_v33  ;;  %v2036_v50 = vadd.f32 %v2035_v5, %v11649_v25  ;;  %v1970_v27 = vadd.f32 %v11652_v24, %v1939_v63  ;;  %v11653_v54 = vld [vmem:[#allocation236_spill] sm:$0xff]  ;;  %v1972_v17 = vadd.f32 %v11654_v42, %v1941_v13  ;;  %v11655_v32 = vld [vmem:[#allocation234_spill] sm:$0xff]  ;;  %v11656_v7 = vld [vmem:[#allocation233_spill] sm:$0xff] }
 0x23e   : >> { %v1971_v46 = vadd.f32 %v11653_v54, %v1940_v4  ;;  %v1973_v61 = vadd.f32 %v11655_v32, %v1942_v37  ;;  %v1974_v14 = vadd.f32 %v11656_v7, %v1943_v35  ;;  %v11657_v22 = vld [vmem:[#allocation273_spill] sm:$0xff]  ;;  %v11658_v21 = vld [vmem:[#allocation232_spill] sm:$0xff]  ;;  %v11659_v26 = vld [vmem:[#allocation231_spill] sm:$0xff] }
 0x23f   : >> { %v2037_v8 = vadd.f32 %v2036_v50, %v11657_v22  ;;  %v1975_v11 = vadd.f32 %v11658_v21, %v1944_v28  ;;  %v1976_v5 = vadd.f32 %v11659_v26, %v1945_v3  ;;  %v11660_v25 = vld [vmem:[#allocation230_spill] sm:$0xff]  ;;  %v11661_v10 = vld [vmem:[#allocation229_spill] sm:$0xff]  ;;  %v11662_v19 = vld [vmem:[#allocation228_spill] sm:$0xff] }
 0x240   : >> { %v1977_v59 = vadd.f32 %v11660_v25, %v1946_v47  ;;  %v1978_v38 = vadd.f32 %v11661_v10, %v1947_v36  ;;  %v1979_v63 = vadd.f32 %v11662_v19, %v1948_v31  ;;  %v11663_v24 = vld [vmem:[#allocation227_spill] sm:$0xff]  ;;  %v11664_v54 = vld [vmem:[#allocation226_spill] sm:$0xff]  ;;  %v11666_v32 = vld [vmem:[#allocation225_spill] sm:$0xff] }
 0x241   : >> { %v1980_v4 = vadd.f32 %v11663_v24, %v1949_v52  ;;  %v1981_v13 = vadd.f32 %v11664_v54, %v1950_v0  ;;  %v11665_v42 = vld [vmem:[#allocation274_spill] sm:$0xff]  ;;  %v1982_v35 = vadd.f32 %v11666_v32, %v1951_v30  ;;  %v11667_v7 = vld [vmem:[#allocation224_spill] sm:$0xff]  ;;  %v11668_v50 = vld [vmem:[#allocation223_spill] sm:$0xff] }
 0x242   : >> { %v2038_v37 = vadd.f32 %v2037_v8, %v11665_v42  ;;  %v1983_v22 = vadd.f32 %v11667_v7, %v1952_v53  ;;  %v1984_v28 = vadd.f32 %v11668_v50, %v1953_v51  ;;  %v11669_v21 = vld [vmem:[#allocation222_spill] sm:$0xff]  ;;  %v11670_v26 = vld [vmem:[#allocation221_spill] sm:$0xff]  ;;  %v11671_v25 = vld [vmem:[#allocation220_spill] sm:$0xff] }
 0x243   : >> { %v1985_v3 = vadd.f32 %v11669_v21, %v1954_v15  ;;  %v1986_v47 = vadd.f32 %v11670_v26, %v1955_v58  ;;  %v1987_v36 = vadd.f32 %v11671_v25, %v1956_v60  ;;  %v11672_v10 = vld [vmem:[#allocation219_spill] sm:$0xff]  ;;  %v11674_v24 = vld [vmem:[#allocation218_spill] sm:$0xff]  ;;  %v11675_v54 = vld [vmem:[#allocation217_spill] sm:$0xff] }
 0x244   : >> { %v1988_v31 = vadd.f32 %v11672_v10, %v1957_v39  ;;  %v11673_v19 = vld [vmem:[#allocation275_spill] sm:$0xff]  ;;  %v1989_v0 = vadd.f32 %v11674_v24, %v1958_v48  ;;  %v1990_v42 = vadd.f32 %v11675_v54, %v1959_v62  ;;  %v11676_v8 = vld [vmem:[#allocation216_spill] sm:$0xff]  ;;  %v11678_v7 = vld [vmem:[#allocation214_spill] sm:$0xff] }
 0x245   : >> { %v2039_v52 = vadd.f32 %v2038_v37, %v11673_v19  ;;  %v1991_v30 = vadd.f32 %v11676_v8, %v1960_v43  ;;  %v11677_v32 = vld [vmem:[#allocation215_spill] sm:$0xff]  ;;  %v1993_v51 = vadd.f32 %v11678_v7, %v1962_v45  ;;  %v11679_v50 = vld [vmem:[#allocation213_spill] sm:$0xff]  ;;  %v11682_v60 = vld [vmem:[#allocation276_spill] sm:$0xff] }
 0x246   : >> { %v1992_v53 = vadd.f32 %v11677_v32, %v1961_v2  ;;  %v1994_v15 = vadd.f32 %v11679_v50, %v1963_v12  ;;  %v11680_v21 = vld [vmem:[#allocation20_spill] sm:$0xff]  ;;  %v11683_v39 = vld [vmem:[#allocation135_spill] sm:$0xff]  ;;  %v11685_v19 = vld [vmem:[#allocation133_spill] sm:$0xff] }
 0x247   : >> { %v7872_v58 = vsub.f32 %v1964_v44, %v11680_v21  ;;  %v2040_v25 = vadd.f32 %v2039_v52, %v11682_v60  ;;  %v7876_v10 = vsub.f32 %v1966_v18, %v11683_v39  ;;  %v7879_v48 = vsub.f32 %v1967_v49, %v11685_v19  ;;  %v11687_v62 = vld [vmem:[#allocation29_spill] sm:$0xff]  ;;  %v11691_v45 = vld [vmem:[#allocation30_spill] sm:$0xff]  ;;  %v11693_v12 = vld [vmem:[#allocation155_spill] sm:$0xff] }
 0x248   : >> { %v7882_v37 = vsub.f32 %v1968_v1, %v11687_v62  ;;  %v11689_v43 = vld [vmem:[#allocation149_spill] sm:$0xff]  ;;  %v7888_v7 = vsub.f32 %v1970_v27, %v11691_v45  ;;  %v7891_v44 = vsub.f32 %v1971_v46, %v11693_v12  ;;  %v11695_v21 = vld [vmem:[#allocation31_spill] sm:$0xff]  ;;  %v11697_v60 = vld [vmem:[#allocation160_spill] sm:$0xff] }
 0x249   : >> { %11681 = vst [vmem:[#allocation265_spill] sm:$0xff] %v7872_v58  ;;  %11684 = vst [vmem:[#allocation266_spill] sm:$0xff] %v7876_v10  ;;  %v7885_v2 = vsub.f32 %v1969_v40, %v11689_v43  ;;  %v7894_v52 = vsub.f32 %v1972_v17, %v11695_v21  ;;  %v2041_v18 = vadd.f32 %v2040_v25, %v7196_v16  ;;  %v11699_v39 = vld [vmem:[#allocation153_spill] sm:$0xff]  ;;  %v11701_v19 = vld [vmem:[#allocation68_spill] sm:$0xff] }
 0x24a   : >> { %11686 = vst [vmem:[#allocation267_spill] sm:$0xff] %v7879_v48  ;;  %11688 = vst [vmem:[#allocation286_spill] sm:$0xff] %v7882_v37  ;;  %v7898_v49 = vsub.f32 %v1973_v61, %v11697_v60  ;;  %v7901_v1 = vsub.f32 %v1974_v14, %v11699_v39  ;;  %v7904_v40 = vsub.f32 %v1975_v11, %v11701_v19  ;;  %v11703_v62 = vld [vmem:[#allocation159_spill] sm:$0xff]  ;;  %v11707_v45 = vld [vmem:[#allocation341_spill] sm:$0xff] }
 0x24b   : >> { %11690 = vst [vmem:[#allocation322_spill] sm:$0xff] %v7885_v2  ;;  %11692 = vst [vmem:[#allocation287_spill] sm:$0xff] %v7888_v7  ;;  %v7907_v27 = vsub.f32 %v1976_v5, %v11703_v62  ;;  %v11705_v43 = vld [vmem:[#allocation163_spill] sm:$0xff]  ;;  %v2042_v17 = vadd.f32 %v2041_v18, %v7201_v55  ;;  %v11708_v12 = vld [vmem:[#allocation209_spill] sm:$0xff] }
 0x24c   : >> { %11694 = vst [vmem:[#allocation324_spill] sm:$0xff] %v7891_v44  ;;  %11696 = vst [vmem:[#allocation288_spill] sm:$0xff] %v7894_v52  ;;  %v7910_v46 = vsub.f32 %v1977_v59, %v11705_v43  ;;  %v2119_v16 = vmul.f32 %v11708_v12, %v11707_v45  ;;  %v11709_v25 = vld [vmem:[#allocation344_spill] sm:$0xff]  ;;  %v11710_v21 = vld [vmem:[#allocation161_spill] sm:$0xff] }
 0x24d   : >> { %11698 = vst [vmem:[#allocation325_spill] sm:$0xff] %v7898_v49  ;;  %11700 = vst [vmem:[#allocation289_spill] sm:$0xff] %v7901_v1  ;;  %v2120_v61 = vmul.f32 %v11498_v29, %v11709_v25  ;;  %v7918_v14 = vsub.f32 %v1978_v38, %v11710_v21  ;;  %v11712_v60 = vld [vmem:[#allocation165_spill] sm:$0xff]  ;;  %v11714_v39 = vld [vmem:[#allocation162_spill] sm:$0xff]  ;;  %v2043_v38 = vadd.f32 %v2042_v17, %v7205_v41 }
 0x24e   : >> { %11702 = vst [vmem:[#allocation326_spill] sm:$0xff] %v7904_v40  ;;  %11704 = vst [vmem:[#allocation290_spill] sm:$0xff] %v7907_v27  ;;  %v7921_v11 = vsub.f32 %v1979_v63, %v11712_v60  ;;  %v7924_v5 = vsub.f32 %v1980_v4, %v11714_v39  ;;  %v11716_v19 = vld [vmem:[#allocation167_spill] sm:$0xff]  ;;  %v11718_v62 = vld [vmem:[#allocation164_spill] sm:$0xff] }
 0x24f   : >> { %11706 = vst [vmem:[#allocation327_spill] sm:$0xff] %v7910_v46  ;;  %11711 = vst [vmem:[#allocation291_spill] sm:$0xff] %v7918_v14  ;;  %v7927_v59 = vsub.f32 %v1981_v13, %v11716_v19  ;;  %v7930_v55 = vsub.f32 %v1982_v35, %v11718_v62  ;;  %v11720_v18 = vld [vmem:[#allocation101_spill] sm:$0xff]  ;;  %v11724_v21 = vld [vmem:[#allocation171_spill] sm:$0xff]  ;;  %v7956_v41 = vmin.f32 %v2120_v61, 1000000.0 }
 0x250   : >> { %11713 = vst [vmem:[#allocation305_spill] sm:$0xff] %v7921_v11  ;;  %11715 = vst [vmem:[#allocation292_spill] sm:$0xff] %v7924_v5  ;;  %v7933_v43 = vsub.f32 %v1983_v22, %v11720_v18  ;;  %v11722_v12 = vld [vmem:[#allocation89_spill] sm:$0xff]  ;;  %v7940_v63 = vsub.f32 %v1985_v3, %v11724_v21  ;;  %v11726_v60 = vld [vmem:[#allocation168_spill] sm:$0xff]  ;;  %v2044_v22 = vadd.f32 %v2043_v38, %v7209_v34 }
 0x251   : >> { %11717 = vst [vmem:[#allocation328_spill] sm:$0xff] %v7927_v59  ;;  %11719 = vst [vmem:[#allocation268_spill] sm:$0xff] %v7930_v55  ;;  %v7936_v29 = vsub.f32 %v1984_v28, %v11722_v12  ;;  %v7943_v4 = vsub.f32 %v1986_v47, %v11726_v60  ;;  %v11728_v39 = vld [vmem:[#allocation176_spill] sm:$0xff]  ;;  %v11730_v19 = vld [vmem:[#allocation170_spill] sm:$0xff]  ;;  %v2121_v28 = vmul.f32 %v11500_v20, %v7592_v6  ;;  %v7954_v12 = vmin.f32 %v2119_v16, 1000000.0 }
 0x252   : >> { %11721 = vst [vmem:[#allocation293_spill] sm:$0xff] %v7933_v43  ;;  %11725 = vst [vmem:[#allocation296_spill] sm:$0xff] %v7940_v63  ;;  %v7946_v13 = vsub.f32 %v1987_v36, %v11728_v39  ;;  %v7949_v35 = vsub.f32 %v1988_v31, %v11730_v19  ;;  %v11734_v3 = vld [vmem:[#allocation177_spill] sm:$0xff]  ;;  %v11736_v47 = vld [vmem:[#allocation175_spill] sm:$0xff]  ;;  %v2045_v61 = vadd.f32 %v2044_v22, %v7214_v57 }
 0x253   : >> { %11723 = vst [vmem:[#allocation295_spill] sm:$0xff] %v7936_v29  ;;  %11727 = vst [vmem:[#allocation297_spill] sm:$0xff] %v7943_v4  ;;  %v7959_v17 = vsub.f32 %v1989_v0, %v11734_v3  ;;  %v7962_v62 = vsub.f32 %v1990_v42, %v11736_v47  ;;  %v11738_v36 = vld [vmem:[#allocation183_spill] sm:$0xff]  ;;  %v11740_v31 = vld [vmem:[#allocation193_spill] sm:$0xff]  ;;  %v7990_v22 = vmin.f32 %v2121_v28, 1000000.0 }
 0x254   : >> { %11729 = vst [vmem:[#allocation298_spill] sm:$0xff] %v7946_v13  ;;  %11731 = vst [vmem:[#allocation299_spill] sm:$0xff] %v7949_v35  ;;  %v7965_v18 = vsub.f32 %v1991_v30, %v11738_v36  ;;  %v7968_v21 = vsub.f32 %v1992_v53, %v11740_v31  ;;  %v11742_v34 = vld [vmem:[#allocation194_spill] sm:$0xff]  ;;  %v11744_v60 = vld [vmem:[#allocation187_spill] sm:$0xff]  ;;  %v2123_v30 = vmul.f32 %v11507_v23, %v7611_v56 }
 0x255   : >> { %11732 = vst [vmem:[#allocation300_spill] sm:$0xff] %v7954_v12  ;;  %11733 = vst [vmem:[#allocation269_spill] sm:$0xff] %v7956_v41  ;;  %v7971_v38 = vsub.f32 %v1993_v51, %v11742_v34  ;;  %v7974_v16 = vsub.f32 %v1994_v15, %v11744_v60  ;;  %v11746_v39 = vld [vmem:[#allocation17_spill] sm:$0xff]  ;;  %v11747_v42 = vld [vmem:[#allocation206_spill] sm:$0xff] }
 0x256   : >> { %11735 = vst [vmem:[#allocation302_spill] sm:$0xff] %v7959_v17  ;;  %11737 = vst [vmem:[#allocation303_spill] sm:$0xff] %v7962_v62  ;;  %v2379_v0 = vmul.f32 %v7954_v12, %v11746_v39  ;;  %v2122_v19 = vmul.f32 %v11747_v42, %v7604_v9  ;;  %v11748_v3 = vld [vmem:[#allocation351_spill] sm:$0xff]  ;;  %v11749_v53 = vld [vmem:[#allocation204_spill] sm:$0xff]  ;;  %v7993_v39 = vmul.f32 0.0, %v7956_v41 }
 0x257   : >> { %11739 = vst [vmem:[#allocation304_spill] sm:$0xff] %v7965_v18  ;;  %11741 = vst [vmem:[#allocation306_spill] sm:$0xff] %v7968_v21  ;;  %v2124_v47 = vmul.f32 %v11749_v53, %v11748_v3  ;;  %v11750_v36 = vld [vmem:[#allocation354_spill] sm:$0xff]  ;;  %v11751_v51 = vld [vmem:[#allocation259_spill] sm:$0xff] }
 0x258   : >> { %11743 = vst [vmem:[#allocation307_spill] sm:$0xff] %v7971_v38  ;;  %11745 = vst [vmem:[#allocation308_spill] sm:$0xff] %v7974_v16  ;;  %v2125_v31 = vmul.f32 %v11751_v51, %v11750_v36  ;;  %v11752_v34 = vld [vmem:[#allocation277_spill] sm:$0xff]  ;;  %v11753_v60 = vld [vmem:[#allocation356_spill] sm:$0xff]  ;;  %v2410_v6 = vadd.f32 %v7993_v39, %v2379_v0  ;;  %v8023_v17 = vmin.f32 %v2122_v19, 1000000.0 }
 0x259   : >> { %v2046_v15 = vadd.f32 %v2045_v61, %v11752_v34  ;;  %v11754_v20 = vld [vmem:[#allocation258_spill] sm:$0xff]  ;;  %11755 = vst [vmem:[#allocation310_spill] sm:$0xff] %v7990_v22  ;;  %11756 = vst [vmem:[#allocation270_spill] sm:$0xff] %v7993_v39  ;;  %v11757_v42 = vld [vmem:[#allocation359_spill] sm:$0xff] }
 0x25a   : >> { %v2126_v57 = vmul.f32 %v11754_v20, %v11753_v60  ;;  %v11758_v50 = vld [vmem:[#allocation203_spill] sm:$0xff]  ;;  %v11760_v8 = vld [vmem:[#allocation202_spill] sm:$0xff]  ;;  %v11761_v53 = vld [vmem:[#allocation362_spill] sm:$0xff]  ;;  %11783 = vst [vmem:[#allocation311_spill] sm:$0xff] %v8023_v17 }
 0x25b   : >> { %v2127_v32 = vmul.f32 %v11758_v50, %v11757_v42  ;;  %v11759_v23 = vld [vmem:[#allocation360_spill] sm:$0xff]  ;;  %v11762_v24 = vld [vmem:[#allocation257_spill] sm:$0xff]  ;;  %v11763_v51 = vld [vmem:[#allocation363_spill] sm:$0xff] }
 0x25c   : >> { %v2128_v54 = vmul.f32 %v11760_v8, %v11759_v23  ;;  %v2129_v26 = vmul.f32 %v11762_v24, %v11761_v53  ;;  %v11764_v36 = vld [vmem:[#allocation201_spill] sm:$0xff]  ;;  %v11766_v20 = vld [vmem:[#allocation364_spill] sm:$0xff]  ;;  %v11770_v42 = vld [vmem:[#allocation255_spill] sm:$0xff] }
 0x25d   : >> { %v2130_v61 = vmul.f32 %v11764_v36, %v11763_v51  ;;  %v11765_v34 = vld [vmem:[#allocation278_spill] sm:$0xff]  ;;  %v11767_v28 = vld [vmem:[#allocation256_spill] sm:$0xff]  ;;  %v11771_v8 = vld [vmem:[#allocation367_spill] sm:$0xff] }
 0x25e   : >> { %v2047_v3 = vadd.f32 %v2046_v15, %v11765_v34  ;;  %v2131_v60 = vmul.f32 %v11767_v28, %v11766_v20  ;;  %v11768_v56 = vld [vmem:[#allocation35_spill] sm:$0xff]  ;;  %v11769_v50 = vld [vmem:[#allocation366_spill] sm:$0xff]  ;;  %v11774_v53 = vld [vmem:[#allocation200_spill] sm:$0xff] }
 0x25f   : >> { %v2381_v9 = vmul.f32 %v7990_v22, %v11768_v56  ;;  %v2132_v25 = vmul.f32 %v11770_v42, %v11769_v50  ;;  %v11772_v23 = vld [vmem:[#allocation254_spill] sm:$0xff]  ;;  %v11773_v24 = vld [vmem:[#allocation368_spill] sm:$0xff]  ;;  %v11775_v36 = vld [vmem:[#allocation369_spill] sm:$0xff] }
 0x260   : >> { %v2133_v45 = vmul.f32 %v11772_v23, %v11771_v8  ;;  %v2134_v16 = vmul.f32 %v11774_v53, %v11773_v24  ;;  %v11776_v51 = vld [vmem:[#allocation199_spill] sm:$0xff]  ;;  %v11777_v34 = vld [vmem:[#allocation370_spill] sm:$0xff]  ;;  %v11778_v38 = vld [vmem:[#allocation198_spill] sm:$0xff] }
 0x261   : >> { %v2135_v15 = vmul.f32 %v11776_v51, %v11775_v36  ;;  %v2136_v28 = vmul.f32 %v11778_v38, %v11777_v34  ;;  %v11779_v20 = vld [vmem:[#allocation371_spill] sm:$0xff]  ;;  %v11780_v21 = vld [vmem:[#allocation253_spill] sm:$0xff]  ;;  %v11781_v18 = vld [vmem:[#allocation372_spill] sm:$0xff] }
 0x262   : >> { %v2137_v56 = vmul.f32 %v11780_v21, %v11779_v20  ;;  %v11782_v0 = vld [vmem:[#allocation197_spill] sm:$0xff]  ;;  %v11784_v42 = vld [vmem:[#allocation279_spill] sm:$0xff]  ;;  %v11786_v8 = vld [vmem:[#allocation196_spill] sm:$0xff] }
 0x263   : >> { %v2138_v62 = vmul.f32 %v11782_v0, %v11781_v18  ;;  %v2048_v50 = vadd.f32 %v2047_v3, %v11784_v42  ;;  %v11785_v23 = vld [vmem:[#allocation262_spill] sm:$0xff]  ;;  %v11787_v53 = vld [vmem:[#allocation373_spill] sm:$0xff]  ;;  %v11788_v24 = vld [vmem:[#allocation252_spill] sm:$0xff]  ;;  %v2411_v18 = vadd.f32 %v2410_v6, %v2381_v9  ;;  %v8052_v6 = vmin.f32 %v2124_v47, 1000000.0 }
 0x264   : >> { %v2139_v35 = vmul.f32 %v11786_v8, %v11785_v23  ;;  %v2140_v39 = vmul.f32 %v11788_v24, %v11787_v53  ;;  %v11789_v51 = vld [vmem:[#allocation374_spill] sm:$0xff]  ;;  %v11790_v36 = vld [vmem:[#allocation195_spill] sm:$0xff]  ;;  %v11791_v38 = vld [vmem:[#allocation375_spill] sm:$0xff]  ;;  %v8069_v47 = vmin.f32 %v2131_v60, 1000000.0 }
 0x265   : >> { %v2141_v13 = vmul.f32 %v11790_v36, %v11789_v51  ;;  %v11792_v34 = vld [vmem:[#allocation251_spill] sm:$0xff]  ;;  %v11793_v21 = vld [vmem:[#allocation376_spill] sm:$0xff]  ;;  %v11794_v20 = vld [vmem:[#allocation250_spill] sm:$0xff]  ;;  %11809 = vst [vmem:[#allocation313_spill] sm:$0xff] %v8052_v6  ;;  %v8088_v60 = vmin.f32 %v2136_v28, 1000000.0  ;;  %v8108_v28 = vmul.f32 %v7990_v22, %v7876_v10 }
 0x266   : >> { %v2142_v4 = vmul.f32 %v11792_v34, %v11791_v38  ;;  %v2143_v63 = vmul.f32 %v11794_v20, %v11793_v21  ;;  %v11795_v0 = vld [vmem:[#allocation42_spill] sm:$0xff]  ;;  %v11796_v42 = vld [vmem:[#allocation377_spill] sm:$0xff]  ;;  %v11798_v8 = vld [vmem:[#allocation378_spill] sm:$0xff]  ;;  %11818 = vst [vmem:[#allocation320_spill] sm:$0xff] %v8069_v47 }
 0x267   : >> { %v2382_v19 = vmul.f32 %v8023_v17, %v11795_v0  ;;  %v11797_v3 = vld [vmem:[#allocation249_spill] sm:$0xff]  ;;  %v11799_v23 = vld [vmem:[#allocation248_spill] sm:$0xff]  ;;  %v11800_v24 = vld [vmem:[#allocation263_spill] sm:$0xff]  ;;  %v8050_v0 = vmin.f32 %v2123_v30, 1000000.0  ;;  %11824 = vst [vmem:[#allocation275_spill] sm:$0xff] %v8088_v60 }
 0x268   : >> { %v2144_v29 = vmul.f32 %v11797_v3, %v11796_v42  ;;  %v2145_v43 = vmul.f32 %v11799_v23, %v11798_v8  ;;  %v11801_v53 = vld [vmem:[#allocation247_spill] sm:$0xff]  ;;  %v11803_v51 = vld [vmem:[#allocation246_spill] sm:$0xff]  ;;  %v11804_v34 = vld [vmem:[#allocation380_spill] sm:$0xff]  ;;  %v8055_v42 = vmin.f32 %v2125_v31, 1000000.0 }
 0x269   : >> { %v2146_v55 = vmul.f32 %v11801_v53, %v11800_v24  ;;  %v11802_v36 = vld [vmem:[#allocation379_spill] sm:$0xff]  ;;  %v11805_v38 = vld [vmem:[#allocation245_spill] sm:$0xff]  ;;  %v11807_v21 = vld [vmem:[#allocation244_spill] sm:$0xff]  ;;  %11808 = vst [vmem:[#allocation312_spill] sm:$0xff] %v8050_v0  ;;  %v8057_v23 = vmin.f32 %v2126_v57, 1000000.0 }
 0x26a   : >> { %v2147_v59 = vmul.f32 %v11803_v51, %v11802_v36  ;;  %v2148_v5 = vmul.f32 %v11805_v38, %v11804_v34  ;;  %v11806_v20 = vld [vmem:[#allocation381_spill] sm:$0xff]  ;;  %v11810_v9 = vld [vmem:[#allocation280_spill] sm:$0xff]  ;;  %11811 = vst [vmem:[#allocation314_spill] sm:$0xff] %v8055_v42  ;;  %v8059_v53 = vmin.f32 %v2127_v32, 1000000.0  ;;  %v11816_v38 = vld [vmem:[#allocation45_spill] sm:$0xff] }
 0x26b   : >> { %v2149_v11 = vmul.f32 %v11807_v21, %v11806_v20  ;;  %v2049_v3 = vadd.f32 %v2048_v50, %v11810_v9  ;;  %11812 = vst [vmem:[#allocation316_spill] sm:$0xff] %v8057_v23  ;;  %v8061_v24 = vmin.f32 %v2128_v54, 1000000.0  ;;  %v8063_v51 = vmin.f32 %v2129_v26, 1000000.0  ;;  %v11856_v10 = vld [vmem:[#allocation268_spill] sm:$0xff] }
 0x26c   : >> { %11813 = vst [vmem:[#allocation317_spill] sm:$0xff] %v8059_v53  ;;  %v2383_v34 = vmul.f32 %v8050_v0, %v11816_v38  ;;  %v2412_v21 = vadd.f32 %v2411_v18, %v2382_v19  ;;  %v8067_v30 = vmin.f32 %v2130_v61, 1000000.0  ;;  %v8071_v20 = vmin.f32 %v2132_v25, 1000000.0  ;;  %v11823_v18 = vld [vmem:[#allocation281_spill] sm:$0xff] }
 0x26d   : >> { %11814 = vst [vmem:[#allocation294_spill] sm:$0xff] %v8061_v24  ;;  %11815 = vst [vmem:[#allocation271_spill] sm:$0xff] %v8063_v51  ;;  %v8075_v50 = vmul.f32 %v7954_v12, %v7872_v58  ;;  %v8077_v32 = vmin.f32 %v2133_v45, 1000000.0  ;;  %v8079_v54 = vmin.f32 %v2134_v16, 1000000.0  ;;  %v8085_v38 = vmul.f32 %v7956_v41, %v7836_v33 }
 0x26e   : >> { %11817 = vst [vmem:[#allocation318_spill] sm:$0xff] %v8067_v30  ;;  %11819 = vst [vmem:[#allocation321_spill] sm:$0xff] %v8071_v20  ;;  %v8081_v26 = vmin.f32 %v2135_v15, 1000000.0  ;;  %v2050_v31 = vadd.f32 %v2049_v3, %v11823_v18  ;;  %v8090_v25 = vmin.f32 %v2137_v56, 1000000.0  ;;  %v2413_v19 = vadd.f32 %v2412_v21, %v2383_v34 }
 0x26f   : >> { %11820 = vst [vmem:[#allocation272_spill] sm:$0xff] %v8077_v32  ;;  %11821 = vst [vmem:[#allocation273_spill] sm:$0xff] %v8079_v54  ;;  %v8092_v57 = vmin.f32 %v2138_v62, 1000000.0  ;;  %v8094_v61 = vmin.f32 %v2139_v35, 1000000.0  ;;  %v8118_v56 = vmul.f32 %v8023_v17, %v7879_v48 }
 0x270   : >> { %11822 = vst [vmem:[#allocation274_spill] sm:$0xff] %v8081_v26  ;;  %11825 = vst [vmem:[#allocation276_spill] sm:$0xff] %v8090_v25  ;;  %v8096_v45 = vmin.f32 %v2140_v39, 1000000.0  ;;  %v11829_v16 = vld [vmem:[#allocation55_spill] sm:$0xff]  ;;  %v11860_v41 = vld [vmem:[#allocation295_spill] sm:$0xff] }
 0x271   : >> { %11826 = vst [vmem:[#allocation277_spill] sm:$0xff] %v8092_v57  ;;  %11827 = vst [vmem:[#allocation278_spill] sm:$0xff] %v8094_v61  ;;  %v2384_v15 = vmul.f32 %v8052_v6, %v11829_v16  ;;  %v8100_v9 = vmin.f32 %v2141_v13, 1000000.0  ;;  %v8102_v33 = vmin.f32 %v2142_v4, 1000000.0  ;;  %v8155_v16 = vmul.f32 %v8063_v51, %v7901_v1 }
 0x272   : >> { %11828 = vst [vmem:[#allocation279_spill] sm:$0xff] %v8096_v45  ;;  %v8104_v58 = vmin.f32 %v2143_v63, 1000000.0  ;;  %v8110_v62 = vmin.f32 %v2144_v29, 1000000.0  ;;  %v11836_v13 = vld [vmem:[#allocation282_spill] sm:$0xff]  ;;  %v8129_v29 = vmul.f32 %v8050_v0, %v7882_v37  ;;  %v8174_v1 = vmul.f32 %v8077_v32, %v7918_v14 }
 0x273   : >> { %11830 = vst [vmem:[#allocation280_spill] sm:$0xff] %v8100_v9  ;;  %11831 = vst [vmem:[#allocation281_spill] sm:$0xff] %v8102_v33  ;;  %v8112_v35 = vmin.f32 %v2145_v43, 1000000.0  ;;  %v8114_v39 = vmin.f32 %v2146_v55, 1000000.0  ;;  %v2051_v21 = vadd.f32 %v2050_v31, %v11836_v13  ;;  %v8133_v55 = vmul.f32 %v8052_v6, %v7885_v2 }
 0x274   : >> { %11832 = vst [vmem:[#allocation382_spill] sm:$0xff] %v8104_v58  ;;  %11833 = vst [vmem:[#allocation383_spill] sm:$0xff] %v8110_v62  ;;  %v8121_v4 = vmin.f32 %v2147_v59, 1000000.0  ;;  %v8123_v63 = vmin.f32 %v2148_v5, 1000000.0  ;;  %v2414_v18 = vadd.f32 %v2413_v19, %v2384_v15  ;;  %v8139_v59 = vmul.f32 %v8055_v42, %v7888_v7 }
 0x275   : >> { %11834 = vst [vmem:[#allocation384_spill] sm:$0xff] %v8112_v35  ;;  %11835 = vst [vmem:[#allocation385_spill] sm:$0xff] %v8114_v39  ;;  %v8125_v34 = vmin.f32 %v2149_v11, 1000000.0  ;;  %v11840_v43 = vld [vmem:[#allocation52_spill] sm:$0xff]  ;;  %v8143_v11 = vmul.f32 %v8057_v23, %v7891_v44  ;;  %v8147_v5 = vmul.f32 %v8059_v53, %v7894_v52  ;;  %v8151_v31 = vmul.f32 %v8061_v24, %v7898_v49  ;;  %v11845_v13 = vld [vmem:[#allocation18_spill] sm:$0xff] }
 0x276   : >> { %11837 = vst [vmem:[#allocation282_spill] sm:$0xff] %v8121_v4  ;;  %11838 = vst [vmem:[#allocation386_spill] sm:$0xff] %v8123_v63  ;;  %v2385_v3 = vmul.f32 %v8055_v42, %v11840_v43  ;;  %v8159_v15 = vmul.f32 %v8067_v30, %v7904_v40  ;;  %v8163_v19 = vmul.f32 %v8069_v47, %v7907_v27  ;;  %v11846_v52 = vld [vmem:[#allocation283_spill] sm:$0xff]  ;;  %v11849_v7 = vld [vmem:[#allocation305_spill] sm:$0xff] }
 0x277   : >> { %11839 = vst [vmem:[#allocation387_spill] sm:$0xff] %v8125_v34  ;;  %11841 = vst [vmem:[#allocation388_spill] sm:$0xff] %v8151_v31  ;;  %v2441_v43 = vmul.f32 %v7954_v12, %v11845_v13  ;;  %v2052_v44 = vadd.f32 %v2051_v21, %v11846_v52  ;;  %v8170_v49 = vmul.f32 %v8071_v20, %v7910_v46  ;;  %v11851_v2 = vld [vmem:[#allocation292_spill] sm:$0xff]  ;;  %v11855_v52 = vld [vmem:[#allocation65_spill] sm:$0xff] }
 0x278   : >> { %11842 = vst [vmem:[#allocation389_spill] sm:$0xff] %v8155_v16  ;;  %11843 = vst [vmem:[#allocation390_spill] sm:$0xff] %v8159_v15  ;;  %v8178_v40 = vmul.f32 %v8079_v54, %v11849_v7  ;;  %v8182_v27 = vmul.f32 %v8081_v26, %v11851_v2  ;;  %v11853_v37 = vld [vmem:[#allocation328_spill] sm:$0xff]  ;;  %v2386_v21 = vmul.f32 %v8057_v23, %v11855_v52  ;;  %v11858_v46 = vld [vmem:[#allocation293_spill] sm:$0xff] }
 0x279   : >> { %11844 = vst [vmem:[#allocation391_spill] sm:$0xff] %v8163_v19  ;;  %11847 = vst [vmem:[#allocation283_spill] sm:$0xff] %v8170_v49  ;;  %v8186_v13 = vmul.f32 %v8088_v60, %v11853_v37  ;;  %v2415_v48 = vadd.f32 %v2414_v18, %v2385_v3  ;;  %v8192_v14 = vmul.f32 %v8090_v25, %v11856_v10  ;;  %v11862_v36 = vld [vmem:[#allocation296_spill] sm:$0xff]  ;;  %v11864_v8 = vld [vmem:[#allocation297_spill] sm:$0xff] }
 0x27a   : >> { %11848 = vst [vmem:[#allocation392_spill] sm:$0xff] %v8174_v1  ;;  %11850 = vst [vmem:[#allocation393_spill] sm:$0xff] %v8178_v40  ;;  %v8196_v7 = vmul.f32 %v8092_v57, %v11858_v46  ;;  %v8200_v2 = vmul.f32 %v8094_v61, %v11860_v41  ;;  %v8204_v37 = vmul.f32 %v8096_v45, %v11862_v36  ;;  %v11866_v3 = vld [vmem:[#allocation298_spill] sm:$0xff]  ;;  %v11868_v10 = vld [vmem:[#allocation36_spill] sm:$0xff] }
 0x27b   : >> { %11852 = vst [vmem:[#allocation394_spill] sm:$0xff] %v8182_v27  ;;  %11854 = vst [vmem:[#allocation395_spill] sm:$0xff] %v8186_v13  ;;  %v8208_v52 = vmul.f32 %v8100_v9, %v11864_v8  ;;  %v8212_v18 = vmul.f32 %v8102_v33, %v11866_v3  ;;  %v2442_v46 = vmul.f32 %v7990_v22, %v11868_v10  ;;  %v11870_v13 = vld [vmem:[#allocation284_spill] sm:$0xff]  ;;  %v11873_v36 = vld [vmem:[#allocation302_spill] sm:$0xff] }
 0x27c   : >> { %11857 = vst [vmem:[#allocation396_spill] sm:$0xff] %v8192_v14  ;;  %11859 = vst [vmem:[#allocation397_spill] sm:$0xff] %v8196_v7  ;;  %v11869_v7 = vld [vmem:[#allocation270_spill] sm:$0xff]  ;;  %v2053_v41 = vadd.f32 %v2052_v44, %v11870_v13  ;;  %v11875_v8 = vld [vmem:[#allocation303_spill] sm:$0xff] }
 0x27d   : >> { %11861 = vst [vmem:[#allocation398_spill] sm:$0xff] %v8200_v2  ;;  %11863 = vst [vmem:[#allocation399_spill] sm:$0xff] %v8204_v37  ;;  %v2471_v14 = vadd.f32 %v2441_v43, %v11869_v7  ;;  %v11871_v2 = vld [vmem:[#allocation299_spill] sm:$0xff]  ;;  %v8224_v37 = vmul.f32 %v8110_v62, %v11873_v36  ;;  %v11877_v3 = vld [vmem:[#allocation304_spill] sm:$0xff] }
 0x27e   : >> { %11865 = vst [vmem:[#allocation400_spill] sm:$0xff] %v8208_v52  ;;  %11867 = vst [vmem:[#allocation401_spill] sm:$0xff] %v8212_v18  ;;  %v8220_v27 = vmul.f32 %v8104_v58, %v11871_v2  ;;  %v8228_v52 = vmul.f32 %v8112_v35, %v11875_v8  ;;  %v8232_v18 = vmul.f32 %v8114_v39, %v11877_v3  ;;  %v11879_v10 = vld [vmem:[#allocation306_spill] sm:$0xff]  ;;  %v11881_v44 = vld [vmem:[#allocation62_spill] sm:$0xff] }
 0x27f   : >> { %11874 = vst [vmem:[#allocation284_spill] sm:$0xff] %v8224_v37  ;;  %v8236_v43 = vmul.f32 %v8121_v4, %v11879_v10  ;;  %v2387_v13 = vmul.f32 %v8059_v53, %v11881_v44  ;;  %v2416_v2 = vadd.f32 %v2415_v48, %v2386_v21  ;;  %v11884_v37 = vld [vmem:[#allocation308_spill] sm:$0xff]  ;;  %v11888_v10 = vld [vmem:[#allocation86_spill] sm:$0xff]  ;;  %v11889_v1 = vld [vmem:[#allocation81_spill] sm:$0xff] }
 0x280   : >> { %11872 = vst [vmem:[#allocation270_spill] sm:$0xff] %v8220_v27  ;;  %11876 = vst [vmem:[#allocation402_spill] sm:$0xff] %v8228_v52  ;;  %v11882_v27 = vld [vmem:[#allocation307_spill] sm:$0xff]  ;;  %v8246_v8 = vmul.f32 %v8125_v34, %v11884_v37  ;;  %v11886_v52 = vld [vmem:[#allocation76_spill] sm:$0xff]  ;;  %v8256_v48 = vmul.f32 %v8069_v47, %v11889_v1 }
 0x281   : >> { %11878 = vst [vmem:[#allocation403_spill] sm:$0xff] %v8232_v18  ;;  %11880 = vst [vmem:[#allocation404_spill] sm:$0xff] %v8236_v43  ;;  %v8242_v36 = vmul.f32 %v8123_v63, %v11882_v27  ;;  %v2388_v3 = vmul.f32 %v8061_v24, %v11886_v52  ;;  %v11887_v18 = vld [vmem:[#allocation71_spill] sm:$0xff]  ;;  %v2390_v43 = vmul.f32 %v8067_v30, %v11888_v10  ;;  %v11893_v52 = vld [vmem:[#allocation94_spill] sm:$0xff] }
 0x282   : >> { %11885 = vst [vmem:[#allocation406_spill] sm:$0xff] %v8246_v8  ;;  %v2389_v40 = vmul.f32 %v8063_v51, %v11887_v18  ;;  %v11890_v21 = vld [vmem:[#allocation43_spill] sm:$0xff]  ;;  %v2472_v27 = vadd.f32 %v2471_v14, %v2442_v46  ;;  %v11892_v8 = vld [vmem:[#allocation98_spill] sm:$0xff]  ;;  %v8267_v18 = vmul.f32 %v8077_v32, %v11893_v52  ;;  %v11904_v16 = vld [vmem:[#allocation125_spill] sm:$0xff] }
 0x283   : >> { %11883 = vst [vmem:[#allocation405_spill] sm:$0xff] %v8242_v36  ;;  %v2443_v44 = vmul.f32 %v8023_v17, %v11890_v21  ;;  %v11891_v36 = vld [vmem:[#allocation285_spill] sm:$0xff]  ;;  %v8263_v49 = vmul.f32 %v8071_v20, %v11892_v8  ;;  %v11894_v19 = vld [vmem:[#allocation110_spill] sm:$0xff]  ;;  %v11896_v1 = vld [vmem:[#allocation107_spill] sm:$0xff] }
 0x284   : >> { %v2054_v37 = vadd.f32 %v2053_v41, %v11891_v36  ;;  %v8271_v10 = vmul.f32 %v8079_v54, %v11894_v19  ;;  %v8275_v15 = vmul.f32 %v8081_v26, %v11896_v1  ;;  %v11898_v21 = vld [vmem:[#allocation120_spill] sm:$0xff]  ;;  %v11900_v14 = vld [vmem:[#allocation115_spill] sm:$0xff]  ;;  %v2417_v41 = vadd.f32 %v2416_v2, %v2387_v13  ;;  %v11902_v36 = vld [vmem:[#allocation130_spill] sm:$0xff] }
 0x285   : >> { %v8279_v46 = vmul.f32 %v8088_v60, %v11898_v21  ;;  %v8283_v8 = vmul.f32 %v8090_v25, %v11900_v14  ;;  %v8287_v52 = vmul.f32 %v8092_v57, %v11902_v36  ;;  %v8291_v19 = vmul.f32 %v8094_v61, %v11904_v16  ;;  %v11912_v2 = vld [vmem:[#allocation142_spill] sm:$0xff] }
 0x286   : >> { %11895 = vst [vmem:[#allocation285_spill] sm:$0xff] %v8271_v10  ;;  %11897 = vst [vmem:[#allocation407_spill] sm:$0xff] %v8275_v15  ;;  %v11906_v10 = vld [vmem:[#allocation139_spill] sm:$0xff]  ;;  %v11908_v15 = vld [vmem:[#allocation26_spill] sm:$0xff]  ;;  %v8307_v13 = vmul.f32 %v8104_v58, %v11912_v2 }
 0x287   : >> { %11899 = vst [vmem:[#allocation408_spill] sm:$0xff] %v8279_v46  ;;  %11901 = vst [vmem:[#allocation409_spill] sm:$0xff] %v8283_v8  ;;  %v8295_v1 = vmul.f32 %v8096_v45, %v11906_v10  ;;  %v8299_v21 = vmul.f32 %v8100_v9, %v11908_v15  ;;  %v11910_v46 = vld [vmem:[#allocation146_spill] sm:$0xff]  ;;  %v11915_v8 = vld [vmem:[#allocation156_spill] sm:$0xff] }
 0x288   : >> { %11903 = vst [vmem:[#allocation410_spill] sm:$0xff] %v8287_v52  ;;  %11905 = vst [vmem:[#allocation411_spill] sm:$0xff] %v8291_v19  ;;  %v8303_v14 = vmul.f32 %v8102_v33, %v11910_v46  ;;  %v11914_v36 = vld [vmem:[#allocation46_spill] sm:$0xff]  ;;  %v2473_v19 = vadd.f32 %v2472_v27, %v2443_v44  ;;  %v2055_v52 = vmul.f32 0.032258064, %v2054_v37  ;;  %v8313_v10 = vmul.f32 %v8110_v62, %v11915_v8 }
 0x289   : >> { %11907 = vst [vmem:[#allocation412_spill] sm:$0xff] %v8295_v1  ;;  %11909 = vst [vmem:[#allocation413_spill] sm:$0xff] %v8299_v21  ;;  %v2444_v16 = vmul.f32 %v8050_v0, %v11914_v36  ;;  %v11917_v1 = vld [vmem:[#allocation150_spill] sm:$0xff]  ;;  %v2418_v8 = vadd.f32 %v2417_v41, %v2388_v3  ;;  %v11927_v36 = vld [vmem:[#allocation56_spill] sm:$0xff] }
 0x28a   : >> { %11911 = vst [vmem:[#allocation414_spill] sm:$0xff] %v8303_v14  ;;  %11913 = vst [vmem:[#allocation415_spill] sm:$0xff] %v8307_v13  ;;  %v8317_v15 = vmul.f32 %v8112_v35, %v11917_v1  ;;  %v11919_v21 = vld [vmem:[#allocation178_spill] sm:$0xff]  ;;  %v11921_v14 = vld [vmem:[#allocation169_spill] sm:$0xff]  ;;  %v2445_v1 = vmul.f32 %v8052_v6, %v11927_v36 }
 0x28b   : >> { %11916 = vst [vmem:[#allocation416_spill] sm:$0xff] %v8313_v10  ;;  %v8321_v46 = vmul.f32 %v8114_v39, %v11919_v21  ;;  %v8325_v2 = vmul.f32 %v8121_v4, %v11921_v14  ;;  %v11923_v13 = vld [vmem:[#allocation181_spill] sm:$0xff]  ;;  %v11925_v37 = vld [vmem:[#allocation174_spill] sm:$0xff]  ;;  %v11930_v14 = vld [vmem:[#allocation63_spill] sm:$0xff] }
 0x28c   : >> { %11918 = vst [vmem:[#allocation417_spill] sm:$0xff] %v8317_v15  ;;  %v8329_v27 = vmul.f32 %v8123_v63, %v11923_v13  ;;  %v8333_v44 = vmul.f32 %v8125_v34, %v11925_v37  ;;  %v11928_v15 = vld [vmem:[#allocation53_spill] sm:$0xff]  ;;  %v11933_v37 = vld [vmem:[#allocation72_spill] sm:$0xff]  ;;  %v11935_v41 = vld [vmem:[#allocation87_spill] sm:$0xff] }
 0x28d   : >> { %11920 = vst [vmem:[#allocation418_spill] sm:$0xff] %v8321_v46  ;;  %11922 = vst [vmem:[#allocation419_spill] sm:$0xff] %v8325_v2  ;;  %v2446_v21 = vmul.f32 %v8055_v42, %v11928_v15  ;;  %v11929_v46 = vld [vmem:[#allocation66_spill] sm:$0xff]  ;;  %v8343_v2 = vmul.f32 %v8059_v53, %v11930_v14  ;;  %v11931_v13 = vld [vmem:[#allocation77_spill] sm:$0xff]  ;;  %v8351_v3 = vmul.f32 %v8063_v51, %v11933_v37 }
 0x28e   : >> { %11924 = vst [vmem:[#allocation420_spill] sm:$0xff] %v8329_v27  ;;  %11926 = vst [vmem:[#allocation421_spill] sm:$0xff] %v8333_v44  ;;  %v2447_v10 = vmul.f32 %v8057_v23, %v11929_v46  ;;  %v8347_v27 = vmul.f32 %v8061_v24, %v11931_v13  ;;  %v8355_v36 = vmul.f32 %v8067_v30, %v11935_v41  ;;  %v8357_v44 = vmul.f32 0.1, %v2055_v52  ;;  %v11936_v46 = vld [vmem:[#allocation82_spill] sm:$0xff]  ;;  %v11938_v14 = vld [vmem:[#allocation99_spill] sm:$0xff] }
 0x28f   : >> { %11934 = vst [vmem:[#allocation423_spill] sm:$0xff] %v8351_v3  ;;  %v2474_v15 = vadd.f32 %v2473_v19, %v2444_v16  ;;  %v8361_v34 = vmul.f32 %v8069_v47, %v11936_v46  ;;  %v8365_v31 = vmul.f32 %v8071_v20, %v11938_v14  ;;  %v11940_v13 = vld [vmem:[#allocation95_spill] sm:$0xff]  ;;  %v2419_v37 = vadd.f32 %v2418_v8, %v2389_v40  ;;  %v11943_v19 = vld [vmem:[#allocation108_spill] sm:$0xff]  ;;  %v11945_v16 = vld [vmem:[#allocation121_spill] sm:$0xff] }
 0x290   : >> { %11932 = vst [vmem:[#allocation422_spill] sm:$0xff] %v8347_v27  ;;  %v8369_v27 = vmul.f32 %v8077_v32, %v11940_v13  ;;  %v11941_v3 = vld [vmem:[#allocation111_spill] sm:$0xff]  ;;  %v8377_v52 = vmul.f32 %v8081_v26, %v11943_v19  ;;  %v8381_v46 = vmul.f32 %v8088_v60, %v11945_v16  ;;  %v11951_v40 = vld [vmem:[#allocation126_spill] sm:$0xff] }
 0x291   : >> { %11937 = vst [vmem:[#allocation424_spill] sm:$0xff] %v8361_v34  ;;  %11939 = vst [vmem:[#allocation425_spill] sm:$0xff] %v8365_v31  ;;  %v8373_v41 = vmul.f32 %v8079_v54, %v11941_v3  ;;  %v11947_v34 = vld [vmem:[#allocation118_spill] sm:$0xff]  ;;  %v11949_v31 = vld [vmem:[#allocation131_spill] sm:$0xff]  ;;  %v8393_v8 = vmul.f32 %v8094_v61, %v11951_v40 }
 0x292   : >> { %11944 = vst [vmem:[#allocation427_spill] sm:$0xff] %v8377_v52  ;;  %11946 = vst [vmem:[#allocation428_spill] sm:$0xff] %v8381_v46  ;;  %v8385_v14 = vmul.f32 %v8090_v25, %v11947_v34  ;;  %v8389_v13 = vmul.f32 %v8092_v57, %v11949_v31  ;;  %v11953_v3 = vld [vmem:[#allocation140_spill] sm:$0xff]  ;;  %v11956_v46 = vld [vmem:[#allocation147_spill] sm:$0xff] }
 0x293   : >> { %11942 = vst [vmem:[#allocation426_spill] sm:$0xff] %v8373_v41  ;;  %11952 = vst [vmem:[#allocation431_spill] sm:$0xff] %v8393_v8  ;;  %v8397_v19 = vmul.f32 %v8096_v45, %v11953_v3  ;;  %v11955_v52 = vld [vmem:[#allocation136_spill] sm:$0xff]  ;;  %v8405_v34 = vmul.f32 %v8102_v33, %v11956_v46  ;;  %v11962_v8 = vld [vmem:[#allocation344_spill] sm:$0xff]  ;;  %v2420_v33 = vadd.f32 %v2419_v37, %v2390_v43 }
 0x294   : >> { %11948 = vst [vmem:[#allocation429_spill] sm:$0xff] %v8385_v14  ;;  %11950 = vst [vmem:[#allocation430_spill] sm:$0xff] %v8389_v13  ;;  %v8401_v16 = vmul.f32 %v8100_v9, %v11955_v52  ;;  %v11958_v14 = vld [vmem:[#allocation144_spill] sm:$0xff]  ;;  %v2475_v13 = vadd.f32 %v2474_v15, %v2445_v1  ;;  %v8417_v3 = vmul.f32 %v8357_v44, %v11962_v8  ;;  %v11966_v9 = vld [vmem:[#allocation151_spill] sm:$0xff] }
 0x295   : >> { %11954 = vst [vmem:[#allocation432_spill] sm:$0xff] %v8397_v19  ;;  %11957 = vst [vmem:[#allocation433_spill] sm:$0xff] %v8405_v34  ;;  %v8409_v31 = vmul.f32 %v8104_v58, %v11958_v14  ;;  %v11960_v41 = vld [vmem:[#allocation341_spill] sm:$0xff]  ;;  %v11964_v19 = vld [vmem:[#allocation157_spill] sm:$0xff]  ;;  %v8425_v46 = vmul.f32 %v8112_v35, %v11966_v9 }
 0x296   : >> { %v8413_v40 = vmul.f32 %v8357_v44, %v11960_v41  ;;  %11963 = vst [vmem:[#allocation436_spill] sm:$0xff] %v8417_v3  ;;  %v8421_v52 = vmul.f32 %v8110_v62, %v11964_v19  ;;  %v11968_v14 = vld [vmem:[#allocation184_spill] sm:$0xff]  ;;  %v11970_v15 = vld [vmem:[#allocation179_spill] sm:$0xff]  ;;  %v11977_v43 = vld [vmem:[#allocation37_spill] sm:$0xff] }
 0x297   : >> { %11959 = vst [vmem:[#allocation434_spill] sm:$0xff] %v8409_v31  ;;  %11967 = vst [vmem:[#allocation438_spill] sm:$0xff] %v8425_v46  ;;  %v8429_v1 = vmul.f32 %v8114_v39, %v11968_v14  ;;  %v8433_v41 = vmul.f32 %v8121_v4, %v11970_v15  ;;  %v11972_v58 = vld [vmem:[#allocation188_spill] sm:$0xff]  ;;  %v11976_v62 = vld [vmem:[#allocation19_spill] sm:$0xff]  ;;  %v2502_v37 = vmul.f32 %v7990_v22, %v11977_v43 }
 0x298   : >> { %11961 = vst [vmem:[#allocation435_spill] sm:$0xff] %v8413_v40  ;;  %11965 = vst [vmem:[#allocation437_spill] sm:$0xff] %v8421_v52  ;;  %v8437_v8 = vmul.f32 %v8123_v63, %v11972_v58  ;;  %v11974_v31 = vld [vmem:[#allocation345_spill] sm:$0xff]  ;;  %v2501_v9 = vmul.f32 %v7954_v12, %v11976_v62  ;;  %v2476_v15 = vadd.f32 %v2475_v13, %v2446_v21  ;;  %v11979_v4 = vld [vmem:[#allocation47_spill] sm:$0xff] }
 0x299   : >> { %11969 = vst [vmem:[#allocation439_spill] sm:$0xff] %v8429_v1  ;;  %11971 = vst [vmem:[#allocation440_spill] sm:$0xff] %v8433_v41  ;;  %v8441_v19 = vmul.f32 %v8357_v44, %v11974_v31  ;;  %v11978_v14 = vld [vmem:[#allocation44_spill] sm:$0xff]  ;;  %v8453_v35 = vmul.f32 %v8050_v0, %v11979_v4  ;;  %v11980_v58 = vld [vmem:[#allocation57_spill] sm:$0xff]  ;;  %v8473_v4 = vadd.f32 %v8085_v38, %v8417_v3 }
 0x29a   : >> { %11973 = vst [vmem:[#allocation441_spill] sm:$0xff] %v8437_v8  ;;  %v8449_v39 = vmul.f32 %v8023_v17, %v11978_v14  ;;  %v8457_v63 = vmul.f32 %v8052_v6, %v11980_v58  ;;  %v11981_v31 = vld [vmem:[#allocation54_spill] sm:$0xff]  ;;  %v11982_v62 = vld [vmem:[#allocation348_spill] sm:$0xff]  ;;  %v8469_v14 = vadd.f32 %v8075_v50, %v8413_v40  ;;  %v2421_v58 = vadd.f32 %v2420_v33, %v8256_v48  ;;  %v11987_v50 = vld [vmem:[#allocation73_spill] sm:$0xff] }
 0x29b   : >> { %11975 = vst [vmem:[#allocation442_spill] sm:$0xff] %v8441_v19  ;;  %v8461_v8 = vmul.f32 %v8055_v42, %v11981_v31  ;;  %v8465_v43 = vmul.f32 %v8357_v44, %v11982_v62  ;;  %v11984_v21 = vld [vmem:[#allocation67_spill] sm:$0xff]  ;;  %v11985_v31 = vld [vmem:[#allocation64_spill] sm:$0xff]  ;;  %v11986_v62 = vld [vmem:[#allocation78_spill] sm:$0xff]  ;;  %v8490_v0 = vmul.f32 %v8063_v51, %v11987_v50 }
 0x29c   : >> { %v8477_v13 = vmul.f32 %v8057_v23, %v11984_v21  ;;  %v8482_v42 = vmul.f32 %v8059_v53, %v11985_v31  ;;  %v8486_v6 = vmul.f32 %v8061_v24, %v11986_v62  ;;  %v11988_v38 = vld [vmem:[#allocation350_spill] sm:$0xff]  ;;  %v2214_v21 = vadd.f32 %v8108_v28, %v8441_v19  ;;  %v11990_v33 = vld [vmem:[#allocation88_spill] sm:$0xff]  ;;  %v11991_v31 = vld [vmem:[#allocation83_spill] sm:$0xff] }
 0x29d   : >> { %11983 = vst [vmem:[#allocation443_spill] sm:$0xff] %v8465_v43  ;;  %v8494_v17 = vmul.f32 %v8357_v44, %v11988_v38  ;;  %v8500_v48 = vmul.f32 %v8067_v30, %v11990_v33  ;;  %v8504_v53 = vmul.f32 %v8069_v47, %v11991_v31  ;;  %v2477_v62 = vadd.f32 %v2476_v15, %v2447_v10  ;;  %v11992_v24 = vld [vmem:[#allocation100_spill] sm:$0xff]  ;;  %v11997_v22 = vld [vmem:[#allocation351_spill] sm:$0xff]  ;;  %v11999_v10 = vld [vmem:[#allocation15_spill] sm:$0xff] }
 0x29e   : >> { %v8508_v50 = vmul.f32 %v8071_v20, %v11992_v24  ;;  %v11994_v51 = vld [vmem:[#allocation96_spill] sm:$0xff]  ;;  %v8520_v33 = vmul.f32 %v8357_v44, %v11997_v22  ;;  %v2215_v31 = vadd.f32 %v8118_v56, %v8465_v43  ;;  %v2243_v15 = vmul.f32 %v8469_v14, %v11999_v10  ;;  %v12003_v47 = vld [vmem:[#allocation354_spill] sm:$0xff]  ;;  %v12026_v3 = vld [vmem:[#allocation364_spill] sm:$0xff] }
 0x29f   : >> { %11989 = vst [vmem:[#allocation444_spill] sm:$0xff] %v8494_v17  ;;  %v8512_v38 = vmul.f32 %v8077_v32, %v11994_v51  ;;  %v11995_v23 = vld [vmem:[#allocation112_spill] sm:$0xff]  ;;  %v2244_v24 = vmul.f32 0.0, %v8473_v4  ;;  %v2422_v20 = vadd.f32 %v2421_v58, %v8263_v49  ;;  %v12000_v51 = vld [vmem:[#allocation109_spill] sm:$0xff]  ;;  %v2531_v22 = vadd.f32 %v2501_v9, %v11869_v7  ;;  %v12006_v49 = vld [vmem:[#allocation119_spill] sm:$0xff] }
 0x2a0   : >> { %11993 = vst [vmem:[#allocation445_spill] sm:$0xff] %v8508_v50  ;;  %v8516_v28 = vmul.f32 %v8079_v54, %v11995_v23  ;;  %11998 = vst [vmem:[#allocation447_spill] sm:$0xff] %v8520_v33  ;;  %v8530_v32 = vmul.f32 %v8081_v26, %v12000_v51  ;;  %v12001_v23 = vld [vmem:[#allocation122_spill] sm:$0xff]  ;;  %v8539_v56 = vmul.f32 %v8357_v44, %v12003_v47  ;;  %v12005_v43 = vld [vmem:[#allocation32_spill] sm:$0xff] }
 0x2a1   : >> { %v8534_v54 = vmul.f32 %v8088_v60, %v12001_v23  ;;  %v2216_v30 = vadd.f32 %v8129_v29, %v8494_v17  ;;  %v2245_v19 = vmul.f32 %v2214_v21, %v12005_v43  ;;  %v8546_v58 = vmul.f32 %v8090_v25, %v12006_v49  ;;  %v12008_v26 = vld [vmem:[#allocation132_spill] sm:$0xff]  ;;  %v12010_v7 = vld [vmem:[#allocation127_spill] sm:$0xff]  ;;  %v12012_v47 = vld [vmem:[#allocation141_spill] sm:$0xff] }
 0x2a2   : >> { %11996 = vst [vmem:[#allocation446_spill] sm:$0xff] %v8516_v28  ;;  %12004 = vst [vmem:[#allocation449_spill] sm:$0xff] %v8539_v56  ;;  %v2478_v51 = vadd.f32 %v2477_v62, %v8343_v2  ;;  %v8551_v23 = vmul.f32 %v8092_v57, %v12008_v26  ;;  %v8555_v9 = vmul.f32 %v8094_v61, %v12010_v7  ;;  %v12014_v29 = vld [vmem:[#allocation356_spill] sm:$0xff]  ;;  %v12016_v2 = vld [vmem:[#allocation38_spill] sm:$0xff] }
 0x2a3   : >> { %12002 = vst [vmem:[#allocation448_spill] sm:$0xff] %v8534_v54  ;;  %12007 = vst [vmem:[#allocation450_spill] sm:$0xff] %v8546_v58  ;;  %v8559_v60 = vmul.f32 %v8096_v45, %v12012_v47  ;;  %v8563_v43 = vmul.f32 %v8357_v44, %v12014_v29  ;;  %v2217_v49 = vadd.f32 %v8133_v55, %v8520_v33  ;;  %v12017_v26 = vld [vmem:[#allocation359_spill] sm:$0xff]  ;;  %v12019_v7 = vld [vmem:[#allocation360_spill] sm:$0xff] }
 0x2a4   : >> { %12009 = vst [vmem:[#allocation451_spill] sm:$0xff] %v8551_v23  ;;  %12011 = vst [vmem:[#allocation452_spill] sm:$0xff] %v8555_v9  ;;  %v2246_v62 = vmul.f32 %v2215_v31, %v12016_v2  ;;  %v2274_v25 = vadd.f32 %v2244_v24, %v2243_v15  ;;  %v8570_v57 = vmul.f32 %v8357_v44, %v12017_v26  ;;  %v12021_v40 = vld [vmem:[#allocation362_spill] sm:$0xff]  ;;  %v12023_v2 = vld [vmem:[#allocation40_spill] sm:$0xff] }
 0x2a5   : >> { %12013 = vst [vmem:[#allocation453_spill] sm:$0xff] %v8559_v60  ;;  %12015 = vst [vmem:[#allocation454_spill] sm:$0xff] %v8563_v43  ;;  %v8574_v61 = vmul.f32 %v8357_v44, %v12019_v7  ;;  %v2423_v47 = vadd.f32 %v2422_v20, %v8267_v18  ;;  %v2532_v45 = vadd.f32 %v2531_v22, %v2502_v37  ;;  %v12024_v17 = vld [vmem:[#allocation363_spill] sm:$0xff]  ;;  %v12028_v20 = vld [vmem:[#allocation366_spill] sm:$0xff] }
 0x2a6   : >> { %12018 = vst [vmem:[#allocation455_spill] sm:$0xff] %v8570_v57  ;;  %v8579_v29 = vmul.f32 %v8357_v44, %v12021_v40  ;;  %v2218_v55 = vadd.f32 %v8139_v59, %v8539_v56  ;;  %v2247_v15 = vmul.f32 %v2216_v30, %v12023_v2  ;;  %v2275_v33 = vadd.f32 %v2274_v25, %v2245_v19  ;;  %v12030_v18 = vld [vmem:[#allocation367_spill] sm:$0xff]  ;;  %v12034_v12 = vld [vmem:[#allocation368_spill] sm:$0xff]  ;;  %v12036_v41 = vld [vmem:[#allocation369_spill] sm:$0xff] }
 0x2a7   : >> { %12020 = vst [vmem:[#allocation456_spill] sm:$0xff] %v8574_v61  ;;  %v8586_v26 = vmul.f32 %v8357_v44, %v12024_v17  ;;  %v8590_v7 = vmul.f32 %v8357_v44, %v12026_v3  ;;  %v8594_v22 = vmul.f32 %v8357_v44, %v12028_v20  ;;  %v8598_v37 = vmul.f32 %v8357_v44, %v12030_v18  ;;  %v12032_v25 = vld [vmem:[#allocation50_spill] sm:$0xff]  ;;  %v12033_v17 = vld [vmem:[#allocation16_spill] sm:$0xff]  ;;  %v12038_v60 = vld [vmem:[#allocation370_spill] sm:$0xff] }
 0x2a8   : >> { %12022 = vst [vmem:[#allocation457_spill] sm:$0xff] %v8579_v29  ;;  %v2219_v59 = vadd.f32 %v8143_v11, %v8563_v43  ;;  %v2248_v19 = vmul.f32 %v2217_v49, %v12032_v25  ;;  %v2276_v2 = vadd.f32 %v2275_v33, %v2246_v62  ;;  %v2309_v56 = vmul.f32 %v8469_v14, %v12033_v17  ;;  %v12040_v1 = vld [vmem:[#allocation371_spill] sm:$0xff]  ;;  %v12042_v17 = vld [vmem:[#allocation48_spill] sm:$0xff]  ;;  %v12044_v9 = vld [vmem:[#allocation372_spill] sm:$0xff] }
 0x2a9   : >> { %12025 = vst [vmem:[#allocation458_spill] sm:$0xff] %v8586_v26  ;;  %12027 = vst [vmem:[#allocation459_spill] sm:$0xff] %v8590_v7  ;;  %v8607_v3 = vmul.f32 %v8357_v44, %v12034_v12  ;;  %v8611_v20 = vmul.f32 %v8357_v44, %v12036_v41  ;;  %v8615_v18 = vmul.f32 %v8357_v44, %v12038_v60  ;;  %v12043_v12 = vld [vmem:[#allocation33_spill] sm:$0xff]  ;;  %v12048_v23 = vld [vmem:[#allocation388_spill] sm:$0xff] }
 0x2aa   : >> { %12029 = vst [vmem:[#allocation460_spill] sm:$0xff] %v8594_v22  ;;  %12031 = vst [vmem:[#allocation461_spill] sm:$0xff] %v8598_v37  ;;  %v8619_v11 = vmul.f32 %v8357_v44, %v12040_v1  ;;  %v2220_v33 = vadd.f32 %v8147_v5, %v8570_v57  ;;  %v2249_v25 = vmul.f32 %v2218_v55, %v12042_v17  ;;  %v12046_v46 = vld [vmem:[#allocation262_spill] sm:$0xff]  ;;  %v12049_v52 = vld [vmem:[#allocation389_spill] sm:$0xff] }
 0x2ab   : >> { %12035 = vst [vmem:[#allocation462_spill] sm:$0xff] %v8607_v3  ;;  %12037 = vst [vmem:[#allocation463_spill] sm:$0xff] %v8611_v20  ;;  %v2277_v40 = vadd.f32 %v2276_v2, %v2247_v15  ;;  %v2310_v43 = vmul.f32 %v2214_v21, %v12043_v12  ;;  %v8627_v41 = vmul.f32 %v8357_v44, %v12044_v9  ;;  %v12050_v5 = vld [vmem:[#allocation60_spill] sm:$0xff]  ;;  %v12051_v2 = vld [vmem:[#allocation39_spill] sm:$0xff] }
 0x2ac   : >> { %12039 = vst [vmem:[#allocation464_spill] sm:$0xff] %v8615_v18  ;;  %12041 = vst [vmem:[#allocation465_spill] sm:$0xff] %v8619_v11  ;;  %v8631_v60 = vmul.f32 %v8357_v44, %v12046_v46  ;;  %v2221_v1 = vadd.f32 %v12048_v23, %v8574_v61  ;;  %v2222_v58 = vadd.f32 %v12049_v52, %v8579_v29  ;;  %v12053_v9 = vld [vmem:[#allocation285_spill] sm:$0xff]  ;;  %v12054_v46 = vld [vmem:[#allocation422_spill] sm:$0xff] }
 0x2ad   : >> { %12045 = vst [vmem:[#allocation466_spill] sm:$0xff] %v8627_v41  ;;  %v2250_v62 = vmul.f32 %v2219_v59, %v12050_v5  ;;  %v2278_v17 = vadd.f32 %v2277_v40, %v2248_v19  ;;  %v2311_v15 = vmul.f32 %v2215_v31, %v12051_v2  ;;  %v2339_v12 = vadd.f32 %v2309_v56, %v2244_v24  ;;  %v12055_v23 = vld [vmem:[#allocation58_spill] sm:$0xff]  ;;  %v12056_v52 = vld [vmem:[#allocation41_spill] sm:$0xff]  ;;  %v12363_v29 = vld [vmem:[#allocation79_spill] sm:$0xff] }
 0x2ae   : >> { %12047 = vst [vmem:[#allocation467_spill] sm:$0xff] %v8631_v60  ;;  %v8641_v21 = vadd.f32 %v8473_v4, %v8469_v14  ;;  %v2424_v10 = vadd.f32 %v2423_v47, %v12053_v9  ;;  %v2479_v57 = vadd.f32 %v2478_v51, %v12054_v46  ;;  %v2533_v54 = vadd.f32 %v2532_v45, %v8449_v39  ;;  %v12057_v40 = vld [vmem:[#allocation390_spill] sm:$0xff]  ;;  %v12058_v24 = vld [vmem:[#allocation407_spill] sm:$0xff]  ;;  %v12061_v51 = vld [vmem:[#allocation51_spill] sm:$0xff] }
 0x2af   : >> { %v2251_v61 = vmul.f32 %v2220_v33, %v12055_v23  ;;  %v2279_v34 = vadd.f32 %v2278_v17, %v2249_v25  ;;  %v2312_v28 = vmul.f32 %v2216_v30, %v12056_v52  ;;  %v2340_v5 = vadd.f32 %v2339_v12, %v2310_v43  ;;  %v12059_v19 = vld [vmem:[#allocation423_spill] sm:$0xff]  ;;  %v12063_v30 = vld [vmem:[#allocation408_spill] sm:$0xff] }
 0x2b0   : >> { %12052 = vst [vmem:[#allocation388_spill] sm:$0xff] %v8641_v21  ;;  %v2223_v31 = vadd.f32 %v12057_v40, %v8586_v26  ;;  %v2425_v56 = vadd.f32 %v2424_v10, %v12058_v24  ;;  %v2480_v14 = vadd.f32 %v2479_v57, %v12059_v19  ;;  %v2534_v4 = vadd.f32 %v2533_v54, %v8453_v35  ;;  %v12060_v9 = vld [vmem:[#allocation74_spill] sm:$0xff]  ;;  %v12064_v10 = vld [vmem:[#allocation69_spill] sm:$0xff] }
 0x2b1   : >> { %v2252_v47 = vmul.f32 %v2221_v1, %v12060_v9  ;;  %v2280_v46 = vadd.f32 %v2279_v34, %v2250_v62  ;;  %v2313_v45 = vmul.f32 %v2217_v49, %v12061_v51  ;;  %v2341_v39 = vadd.f32 %v2340_v5, %v2311_v15  ;;  %v12062_v25 = vld [vmem:[#allocation391_spill] sm:$0xff]  ;;  %v12065_v40 = vld [vmem:[#allocation49_spill] sm:$0xff]  ;;  %v12067_v49 = vld [vmem:[#allocation409_spill] sm:$0xff] }
 0x2b2   : >> { %v2224_v17 = vadd.f32 %v12062_v25, %v8590_v7  ;;  %v2426_v43 = vadd.f32 %v2425_v56, %v12063_v30  ;;  %v2481_v12 = vadd.f32 %v2480_v14, %v8355_v36  ;;  %v2535_v23 = vadd.f32 %v2534_v4, %v8457_v63  ;;  %v12066_v34 = vld [vmem:[#allocation283_spill] sm:$0xff]  ;;  %v12068_v5 = vld [vmem:[#allocation424_spill] sm:$0xff]  ;;  %v12069_v56 = vld [vmem:[#allocation84_spill] sm:$0xff] }
 0x2b3   : >> { %v2253_v52 = vmul.f32 %v2222_v58, %v12064_v10  ;;  %v2281_v57 = vadd.f32 %v2280_v46, %v2251_v61  ;;  %v2314_v54 = vmul.f32 %v2218_v55, %v12065_v40  ;;  %v2342_v35 = vadd.f32 %v2341_v39, %v2312_v28  ;;  %v12070_v14 = vld [vmem:[#allocation61_spill] sm:$0xff]  ;;  %v12071_v61 = vld [vmem:[#allocation392_spill] sm:$0xff]  ;;  %v12073_v51 = vld [vmem:[#allocation425_spill] sm:$0xff] }
 0x2b4   : >> { %v2225_v62 = vadd.f32 %v12066_v34, %v8594_v22  ;;  %v2427_v15 = vadd.f32 %v2426_v43, %v12067_v49  ;;  %v2482_v24 = vadd.f32 %v2481_v12, %v12068_v5  ;;  %v2536_v19 = vadd.f32 %v2535_v23, %v8461_v8  ;;  %v12072_v55 = vld [vmem:[#allocation79_spill] sm:$0xff]  ;;  %v12075_v8 = vld [vmem:[#allocation410_spill] sm:$0xff]  ;;  %v12076_v49 = vld [vmem:[#allocation373_spill] sm:$0xff] }
 0x2b5   : >> { %v2254_v9 = vmul.f32 %v2223_v31, %v12069_v56  ;;  %v2282_v36 = vadd.f32 %v2281_v57, %v2252_v47  ;;  %v2315_v63 = vmul.f32 %v2219_v59, %v12070_v14  ;;  %v2343_v4 = vadd.f32 %v2342_v35, %v2313_v45  ;;  %v12074_v43 = vld [vmem:[#allocation59_spill] sm:$0xff]  ;;  %v12078_v59 = vld [vmem:[#allocation393_spill] sm:$0xff]  ;;  %v12082_v14 = vld [vmem:[#allocation90_spill] sm:$0xff] }
 0x2b6   : >> { %v2226_v46 = vadd.f32 %v12071_v61, %v8598_v37  ;;  %v2255_v28 = vmul.f32 %v2224_v17, %v12072_v55  ;;  %v2483_v39 = vadd.f32 %v2482_v24, %v12073_v51  ;;  %v2537_v25 = vadd.f32 %v2536_v19, %v8477_v13  ;;  %v12079_v5 = vld [vmem:[#allocation92_spill] sm:$0xff]  ;;  %v12083_v61 = vld [vmem:[#allocation426_spill] sm:$0xff] }
 0x2b7   : >> { %v2283_v30 = vadd.f32 %v2282_v36, %v2253_v52  ;;  %v2316_v12 = vmul.f32 %v2220_v33, %v12074_v43  ;;  %v2344_v34 = vadd.f32 %v2343_v4, %v2314_v54  ;;  %v2428_v23 = vadd.f32 %v2427_v15, %v12075_v8  ;;  %v12080_v52 = vld [vmem:[#allocation75_spill] sm:$0xff]  ;;  %v12081_v54 = vld [vmem:[#allocation394_spill] sm:$0xff]  ;;  %v12084_v8 = vld [vmem:[#allocation70_spill] sm:$0xff] }
 0x2b8   : >> { %v8678_v47 = vmul.f32 %v8357_v44, %v12076_v49  ;;  %v2227_v45 = vadd.f32 %v12078_v59, %v8607_v3  ;;  %v2484_v57 = vadd.f32 %v2483_v39, %v8369_v27  ;;  %v2538_v35 = vadd.f32 %v2537_v25, %v8482_v42  ;;  %v12085_v42 = vld [vmem:[#allocation411_spill] sm:$0xff]  ;;  %v12145_v36 = vld [vmem:[#allocation124_spill] sm:$0xff]  ;;  %v12195_v40 = vld [vmem:[#allocation386_spill] sm:$0xff] }
 0x2b9   : >> { %v2256_v56 = vmul.f32 %v2225_v62, %v12079_v5  ;;  %v2284_v13 = vadd.f32 %v2283_v30, %v2254_v9  ;;  %v2317_v19 = vmul.f32 %v2221_v1, %v12080_v52  ;;  %v2345_v33 = vadd.f32 %v2344_v34, %v2315_v63  ;;  %v12086_v5 = vld [vmem:[#allocation374_spill] sm:$0xff]  ;;  %v12089_v63 = vld [vmem:[#allocation395_spill] sm:$0xff]  ;;  %v12184_v24 = vld [vmem:[#allocation441_spill] sm:$0xff] }
 0x2ba   : >> { %12077 = vst [vmem:[#allocation389_spill] sm:$0xff] %v8678_v47  ;;  %v2228_v15 = vadd.f32 %v12081_v54, %v8611_v20  ;;  %v2257_v4 = vmul.f32 %v2226_v46, %v12082_v14  ;;  %v2485_v55 = vadd.f32 %v2484_v57, %v12083_v61  ;;  %v2539_v51 = vadd.f32 %v2538_v35, %v8486_v6  ;;  %v12090_v34 = vld [vmem:[#allocation427_spill] sm:$0xff]  ;;  %v12091_v57 = vld [vmem:[#allocation105_spill] sm:$0xff]  ;;  %v12095_v61 = vld [vmem:[#allocation428_spill] sm:$0xff] }
 0x2bb   : >> { %v2285_v43 = vadd.f32 %v2284_v13, %v2255_v28  ;;  %v2318_v27 = vmul.f32 %v2222_v58, %v12084_v8  ;;  %v2346_v39 = vadd.f32 %v2345_v33, %v2316_v12  ;;  %v2429_v25 = vadd.f32 %v2428_v23, %v12085_v42  ;;  %v12092_v28 = vld [vmem:[#allocation85_spill] sm:$0xff]  ;;  %v12093_v12 = vld [vmem:[#allocation396_spill] sm:$0xff]  ;;  %v12094_v13 = vld [vmem:[#allocation102_spill] sm:$0xff] }
 0x2bc   : >> { %v8695_v9 = vmul.f32 %v8357_v44, %v12086_v5  ;;  %v12088_v1 = vmov %v8615_v18  ;;  %v2486_v52 = vadd.f32 %v2485_v55, %v12090_v34  ;;  %v2540_v54 = vadd.f32 %v2539_v51, %v8490_v0  ;;  %v12096_v5 = vld [vmem:[#allocation80_spill] sm:$0xff]  ;;  %v12097_v0 = vld [vmem:[#allocation412_spill] sm:$0xff]  ;;  %v12144_v59 = vld [vmem:[#allocation451_spill] sm:$0xff] }
 0x2bd   : >> { %v2229_v30 = vadd.f32 %v12089_v63, %v12088_v1  ;;  %v2258_v14 = vmul.f32 %v2227_v45, %v12091_v57  ;;  %v2286_v6 = vadd.f32 %v2285_v43, %v2256_v56  ;;  %v2319_v35 = vmul.f32 %v2223_v31, %v12092_v28  ;;  %v12098_v57 = vld [vmem:[#allocation375_spill] sm:$0xff]  ;;  %v12100_v31 = vld [vmem:[#allocation397_spill] sm:$0xff]  ;;  %v12108_v18 = vld [vmem:[#allocation91_spill] sm:$0xff] }
 0x2be   : >> { %12087 = vst [vmem:[#allocation285_spill] sm:$0xff] %v8695_v9  ;;  %v2347_v58 = vadd.f32 %v2346_v39, %v2317_v19  ;;  %v2230_v23 = vadd.f32 %v12093_v12, %v8619_v11  ;;  %v2259_v33 = vmul.f32 %v2228_v15, %v12094_v13  ;;  %v2487_v8 = vadd.f32 %v2486_v52, %v12095_v61  ;;  %v12101_v43 = vld [vmem:[#allocation429_spill] sm:$0xff]  ;;  %v12106_v61 = vld [vmem:[#allocation430_spill] sm:$0xff]  ;;  %v12360_v20 = vld [vmem:[#allocation74_spill] sm:$0xff] }
 0x2bf   : >> { %v2541_v42 = vadd.f32 %v2540_v54, %v8500_v48  ;;  %v2287_v63 = vadd.f32 %v2286_v6, %v2257_v4  ;;  %v2320_v55 = vmul.f32 %v2224_v17, %v12096_v5  ;;  %v2430_v51 = vadd.f32 %v2429_v25, %v12097_v0  ;;  %v12102_v52 = vld [vmem:[#allocation116_spill] sm:$0xff]  ;;  %v12103_v4 = vld [vmem:[#allocation93_spill] sm:$0xff]  ;;  %v12375_v1 = vld [vmem:[#allocation138_spill] sm:$0xff] }
 0x2c0   : >> { %v2348_v34 = vadd.f32 %v2347_v58, %v2318_v27  ;;  %v8712_v56 = vmul.f32 %v8357_v44, %v12098_v57  ;;  %v2231_v19 = vadd.f32 %v12100_v31, %v8627_v41  ;;  %v2488_v39 = vadd.f32 %v2487_v8, %v12101_v43  ;;  %v12104_v27 = vld [vmem:[#allocation398_spill] sm:$0xff]  ;;  %v12120_v58 = vld [vmem:[#allocation103_spill] sm:$0xff]  ;;  %v12370_v22 = vld [vmem:[#allocation128_spill] sm:$0xff] }
 0x2c1   : >> { %v2542_v12 = vadd.f32 %v2541_v42, %v8504_v53  ;;  %v2260_v13 = vmul.f32 %v2229_v30, %v12102_v52  ;;  %v2288_v48 = vadd.f32 %v2287_v63, %v2258_v14  ;;  %v2321_v54 = vmul.f32 %v2225_v62, %v12103_v4  ;;  %v12105_v5 = vld [vmem:[#allocation113_spill] sm:$0xff]  ;;  %v12109_v53 = vld [vmem:[#allocation413_spill] sm:$0xff]  ;;  %v12110_v52 = vld [vmem:[#allocation376_spill] sm:$0xff] }
 0x2c2   : >> { %12099 = vst [vmem:[#allocation422_spill] sm:$0xff] %v8712_v56  ;;  %v2349_v17 = vadd.f32 %v2348_v34, %v2319_v35  ;;  %v2232_v25 = vadd.f32 %v12104_v27, %v8631_v60  ;;  %v2261_v6 = vmul.f32 %v2230_v23, %v12105_v5  ;;  %v2489_v0 = vadd.f32 %v2488_v39, %v12106_v61  ;;  %v12112_v62 = vld [vmem:[#allocation399_spill] sm:$0xff]  ;;  %v12114_v39 = vld [vmem:[#allocation128_spill] sm:$0xff]  ;;  %v12118_v5 = vld [vmem:[#allocation432_spill] sm:$0xff] }
 0x2c3   : >> { %v12107_v57 = vmov %v8508_v50  ;;  %v2289_v31 = vadd.f32 %v2288_v48, %v2259_v33  ;;  %v2322_v8 = vmul.f32 %v2226_v46, %v12108_v18  ;;  %v2431_v42 = vadd.f32 %v2430_v51, %v12109_v53  ;;  %v12113_v63 = vld [vmem:[#allocation431_spill] sm:$0xff]  ;;  %v12117_v48 = vld [vmem:[#allocation123_spill] sm:$0xff]  ;;  %v12119_v53 = vld [vmem:[#allocation446_spill] sm:$0xff] }
 0x2c4   : >> { %v2543_v49 = vadd.f32 %v2542_v12, %v12107_v57  ;;  %v2350_v43 = vadd.f32 %v2349_v17, %v2320_v55  ;;  %v8729_v14 = vmul.f32 %v8357_v44, %v12110_v52  ;;  %v2233_v35 = vadd.f32 %v12112_v62, %v8678_v47  ;;  %v12115_v33 = vld [vmem:[#allocation106_spill] sm:$0xff]  ;;  %v12116_v55 = vld [vmem:[#allocation400_spill] sm:$0xff]  ;;  %v12361_v3 = vld [vmem:[#allocation69_spill] sm:$0xff] }
 0x2c5   : >> { %v2490_v34 = vadd.f32 %v2489_v0, %v12113_v63  ;;  %v2262_v27 = vmul.f32 %v2231_v19, %v12114_v39  ;;  %v2290_v57 = vadd.f32 %v2289_v31, %v2260_v13  ;;  %v2323_v12 = vmul.f32 %v2227_v45, %v12115_v33  ;;  %v12122_v39 = vld [vmem:[#allocation377_spill] sm:$0xff]  ;;  %v12371_v41 = vld [vmem:[#allocation123_spill] sm:$0xff]  ;;  %v12372_v7 = vld [vmem:[#allocation21_spill] sm:$0xff] }
 0x2c6   : >> { %12111 = vst [vmem:[#allocation390_spill] sm:$0xff] %v8729_v14  ;;  %v2544_v4 = vadd.f32 %v2543_v49, %v8512_v38  ;;  %v2351_v46 = vadd.f32 %v2350_v43, %v2321_v54  ;;  %v2234_v51 = vadd.f32 %v12116_v55, %v8695_v9  ;;  %v2263_v17 = vmul.f32 %v2232_v25, %v12117_v48  ;;  %v12121_v38 = vld [vmem:[#allocation414_spill] sm:$0xff]  ;;  %v12124_v45 = vld [vmem:[#allocation401_spill] sm:$0xff]  ;;  %v12401_v50 = vld [vmem:[#allocation143_spill] sm:$0xff] }
 0x2c7   : >> { %v2491_v61 = vadd.f32 %v2490_v34, %v12118_v5  ;;  %v2291_v62 = vadd.f32 %v2290_v57, %v2261_v6  ;;  %v2324_v0 = vmul.f32 %v2228_v15, %v12120_v58  ;;  %v2432_v49 = vadd.f32 %v2431_v42, %v12121_v38  ;;  %v12125_v34 = vld [vmem:[#allocation21_spill] sm:$0xff]  ;;  %v12129_v48 = vld [vmem:[#allocation433_spill] sm:$0xff] }
 0x2c8   : >> { %v2545_v52 = vadd.f32 %v2544_v4, %v12119_v53  ;;  %v2352_v63 = vadd.f32 %v2351_v46, %v2322_v8  ;;  %v8746_v13 = vmul.f32 %v8357_v44, %v12122_v39  ;;  %v2235_v54 = vadd.f32 %v12124_v45, %v8712_v56  ;;  %v12126_v6 = vld [vmem:[#allocation117_spill] sm:$0xff]  ;;  %v12128_v46 = vld [vmem:[#allocation28_spill] sm:$0xff]  ;;  %v12130_v53 = vld [vmem:[#allocation448_spill] sm:$0xff] }
 0x2c9   : >> { %v2492_v31 = vadd.f32 %v2491_v61, %v8401_v16  ;;  %v2264_v33 = vmul.f32 %v2233_v35, %v12125_v34  ;;  %v2292_v4 = vadd.f32 %v2291_v62, %v2262_v27  ;;  %v2325_v57 = vmul.f32 %v2229_v30, %v12126_v6  ;;  %v12127_v8 = vld [vmem:[#allocation270_spill] sm:$0xff]  ;;  %v12131_v39 = vld [vmem:[#allocation114_spill] sm:$0xff]  ;;  %v12135_v30 = vld [vmem:[#allocation284_spill] sm:$0xff] }
 0x2ca   : >> { %12123 = vst [vmem:[#allocation407_spill] sm:$0xff] %v8746_v13  ;;  %v2546_v43 = vadd.f32 %v2545_v52, %v8530_v32  ;;  %v2353_v15 = vadd.f32 %v2352_v63, %v2323_v12  ;;  %v2236_v42 = vadd.f32 %v12127_v8, %v8729_v14  ;;  %v2265_v55 = vmul.f32 %v2234_v51, %v12128_v46  ;;  %v12132_v32 = vld [vmem:[#allocation415_spill] sm:$0xff]  ;;  %v12133_v34 = vld [vmem:[#allocation378_spill] sm:$0xff]  ;;  %v12357_v56 = vld [vmem:[#allocation48_spill] sm:$0xff] }
 0x2cb   : >> { %v2493_v5 = vadd.f32 %v2492_v31, %v12129_v48  ;;  %v2293_v45 = vadd.f32 %v2292_v4, %v2263_v17  ;;  %v2326_v16 = vmul.f32 %v2230_v23, %v12131_v39  ;;  %v2433_v52 = vadd.f32 %v2432_v49, %v12132_v32  ;;  %v12136_v62 = vld [vmem:[#allocation434_spill] sm:$0xff]  ;;  %v12138_v31 = vld [vmem:[#allocation23_spill] sm:$0xff]  ;;  %v12141_v49 = vld [vmem:[#allocation437_spill] sm:$0xff] }
 0x2cc   : >> { %v2547_v38 = vadd.f32 %v2546_v43, %v12130_v53  ;;  %v2354_v61 = vadd.f32 %v2353_v15, %v2324_v0  ;;  %v8763_v27 = vmul.f32 %v8357_v44, %v12133_v34  ;;  %v2237_v12 = vadd.f32 %v12135_v30, %v8746_v13  ;;  %v12137_v6 = vld [vmem:[#allocation450_spill] sm:$0xff]  ;;  %v12140_v0 = vld [vmem:[#allocation138_spill] sm:$0xff]  ;;  %v12143_v34 = vld [vmem:[#allocation280_spill] sm:$0xff] }
 0x2cd   : >> { %v2494_v63 = vadd.f32 %v2493_v5, %v12136_v62  ;;  %v2266_v46 = vmul.f32 %v2235_v54, %v12138_v31  ;;  %v2294_v43 = vadd.f32 %v2293_v45, %v2264_v33  ;;  %v12139_v17 = vld [vmem:[#allocation129_spill] sm:$0xff]  ;;  %v2267_v48 = vmul.f32 %v2236_v42, %v12140_v0  ;;  %v12147_v31 = vld [vmem:[#allocation263_spill] sm:$0xff]  ;;  %v12364_v13 = vld [vmem:[#allocation92_spill] sm:$0xff] }
 0x2ce   : >> { %12134 = vst [vmem:[#allocation423_spill] sm:$0xff] %v8763_v27  ;;  %v2548_v8 = vadd.f32 %v2547_v38, %v12137_v6  ;;  %v2327_v4 = vmul.f32 %v2231_v19, %v12139_v17  ;;  %v2355_v23 = vadd.f32 %v2354_v61, %v2325_v57  ;;  %v12142_v32 = vld [vmem:[#allocation137_spill] sm:$0xff]  ;;  %v2328_v5 = vmul.f32 %v2232_v25, %v12145_v36  ;;  %v12146_v38 = vld [vmem:[#allocation416_spill] sm:$0xff]  ;;  %v12159_v36 = vld [vmem:[#allocation453_spill] sm:$0xff] }
 0x2cf   : >> { %v2495_v53 = vadd.f32 %v2494_v63, %v12141_v49  ;;  %v2522_v39 = vmul.f32 %v12143_v34, %v12142_v32  ;;  %v2295_v30 = vadd.f32 %v2294_v43, %v2265_v55  ;;  %v2434_v6 = vadd.f32 %v2433_v52, %v12146_v38  ;;  %v12149_v19 = vld [vmem:[#allocation402_spill] sm:$0xff]  ;;  %v12151_v63 = vld [vmem:[#allocation452_spill] sm:$0xff]  ;;  %v12153_v55 = vld [vmem:[#allocation134_spill] sm:$0xff] }
 0x2d0   : >> { %v2549_v28 = vadd.f32 %v2548_v8, %v12144_v59  ;;  %v2356_v62 = vadd.f32 %v2355_v23, %v2326_v16  ;;  %v8780_v33 = vmul.f32 %v8357_v44, %v12147_v31  ;;  %v2238_v57 = vadd.f32 %v12149_v19, %v8763_v27  ;;  %v12150_v45 = vld [vmem:[#allocation438_spill] sm:$0xff]  ;;  %v12154_v16 = vld [vmem:[#allocation439_spill] sm:$0xff]  ;;  %v12155_v52 = vld [vmem:[#allocation148_spill] sm:$0xff] }
 0x2d1   : >> { %v2496_v61 = vadd.f32 %v2495_v53, %v12150_v45  ;;  %v12152_v0 = vld [vmem:[#allocation25_spill] sm:$0xff]  ;;  %v2296_v59 = vadd.f32 %v2295_v30, %v2266_v46  ;;  %v2329_v8 = vmul.f32 %v2233_v35, %v12153_v55  ;;  %v12156_v23 = vld [vmem:[#allocation281_spill] sm:$0xff]  ;;  %v12160_v53 = vld [vmem:[#allocation22_spill] sm:$0xff] }
 0x2d2   : >> { %12148 = vst [vmem:[#allocation391_spill] sm:$0xff] %v8780_v33  ;;  %v2550_v17 = vadd.f32 %v2549_v28, %v12151_v63  ;;  %v2268_v49 = vmul.f32 %v2237_v12, %v12152_v0  ;;  %v2357_v25 = vadd.f32 %v2356_v62, %v2327_v4  ;;  %v2523_v32 = vmul.f32 %v12156_v23, %v12155_v52  ;;  %v12157_v38 = vld [vmem:[#allocation145_spill] sm:$0xff]  ;;  %v12161_v63 = vld [vmem:[#allocation417_spill] sm:$0xff]  ;;  %v12162_v46 = vld [vmem:[#allocation379_spill] sm:$0xff] }
 0x2d3   : >> { %v2497_v43 = vadd.f32 %v2496_v61, %v12154_v16  ;;  %v12158_v31 = vld [vmem:[#allocation382_spill] sm:$0xff]  ;;  %v2297_v18 = vadd.f32 %v2296_v59, %v2267_v48  ;;  %v2330_v45 = vmul.f32 %v2234_v51, %v12160_v53  ;;  %v2435_v0 = vadd.f32 %v2434_v6, %v12161_v63  ;;  %v12164_v4 = vld [vmem:[#allocation403_spill] sm:$0xff]  ;;  %v12166_v52 = vld [vmem:[#allocation143_spill] sm:$0xff] }
 0x2d4   : >> { %v2524_v34 = vmul.f32 %v12158_v31, %v12157_v38  ;;  %v2551_v19 = vadd.f32 %v2550_v17, %v12159_v36  ;;  %v2358_v28 = vadd.f32 %v2357_v25, %v2328_v5  ;;  %v8798_v35 = vmul.f32 %v8357_v44, %v12162_v46  ;;  %v12165_v62 = vld [vmem:[#allocation34_spill] sm:$0xff]  ;;  %v12167_v48 = vld [vmem:[#allocation191_spill] sm:$0xff]  ;;  %v12172_v63 = vld [vmem:[#allocation152_spill] sm:$0xff] }
 0x2d5   : >> { %v2239_v30 = vadd.f32 %v12164_v4, %v8780_v33  ;;  %v2269_v61 = vmul.f32 %v2238_v57, %v12165_v62  ;;  %v2298_v16 = vadd.f32 %v2297_v18, %v2268_v49  ;;  %v2331_v38 = vmul.f32 %v2235_v54, %v12166_v52  ;;  %v12168_v17 = vld [vmem:[#allocation387_spill] sm:$0xff]  ;;  %v12169_v5 = vld [vmem:[#allocation440_spill] sm:$0xff]  ;;  %v12176_v18 = vld [vmem:[#allocation24_spill] sm:$0xff] }
 0x2d6   : >> { %12163 = vst [vmem:[#allocation408_spill] sm:$0xff] %v8798_v35  ;;  %v2552_v55 = vadd.f32 %v2551_v19, %v2522_v39  ;;  %v2359_v36 = vadd.f32 %v2358_v28, %v2329_v8  ;;  %v2470_v51 = vmul.f32 %v12168_v17, %v12167_v48  ;;  %v2498_v59 = vadd.f32 %v2497_v43, %v12169_v5  ;;  %v12170_v6 = vld [vmem:[#allocation158_spill] sm:$0xff]  ;;  %v12173_v46 = vld [vmem:[#allocation384_spill] sm:$0xff]  ;;  %v12177_v49 = vld [vmem:[#allocation418_spill] sm:$0xff] }
 0x2d7   : >> { %v12171_v25 = vld [vmem:[#allocation383_spill] sm:$0xff]  ;;  %v2526_v31 = vmul.f32 %v12173_v46, %v12172_v63  ;;  %v12174_v4 = vld [vmem:[#allocation380_spill] sm:$0xff]  ;;  %v2332_v39 = vmul.f32 %v2236_v42, %v12176_v18  ;;  %v2436_v8 = vadd.f32 %v2435_v0, %v12177_v49  ;;  %v12179_v43 = vld [vmem:[#allocation104_spill] sm:$0xff]  ;;  %v2299_v48 = vadd.f32 %v2298_v16, %v2269_v61 }
 0x2d8   : >> { %v2525_v53 = vmul.f32 %v12171_v25, %v12170_v6  ;;  %v2553_v23 = vadd.f32 %v2552_v55, %v2523_v32  ;;  %v8813_v10 = vmul.f32 %v8357_v44, %v12174_v4  ;;  %v2360_v54 = vadd.f32 %v2359_v36, %v2330_v45  ;;  %v12178_v19 = vld [vmem:[#allocation404_spill] sm:$0xff]  ;;  %v12180_v6 = vld [vmem:[#allocation154_spill] sm:$0xff]  ;;  %v12181_v32 = vld [vmem:[#allocation185_spill] sm:$0xff] }
 0x2d9   : >> { %v2240_v28 = vadd.f32 %v12178_v19, %v8798_v35  ;;  %v2270_v52 = vmul.f32 %v2239_v30, %v12179_v43  ;;  %v2333_v25 = vmul.f32 %v2237_v12, %v12180_v6  ;;  %v12182_v55 = vld [vmem:[#allocation385_spill] sm:$0xff]  ;;  %v12183_v4 = vld [vmem:[#allocation300_spill] sm:$0xff]  ;;  %v2499_v42 = vadd.f32 %v2498_v59, %v12184_v24  ;;  %v12186_v36 = vld [vmem:[#allocation282_spill] sm:$0xff] }
 0x2da   : >> { %12175 = vst [vmem:[#allocation283_spill] sm:$0xff] %v8813_v10  ;;  %v2554_v5 = vadd.f32 %v2553_v23, %v2524_v34  ;;  %v2361_v63 = vadd.f32 %v2360_v54, %v2331_v38  ;;  %v2527_v46 = vmul.f32 %v12182_v55, %v12181_v32  ;;  %v2562_v58 = vsub.f32 0.0, %v12183_v4  ;;  %v12185_v45 = vld [vmem:[#allocation180_spill] sm:$0xff]  ;;  %v12189_v34 = vld [vmem:[#allocation27_spill] sm:$0xff]  ;;  %v12190_v16 = vld [vmem:[#allocation419_spill] sm:$0xff] }
 0x2db   : >> { %v2528_v0 = vmul.f32 %v12186_v36, %v12185_v45  ;;  %v2565_v19 = vadd.f32 5.0, %v12183_v4  ;;  %v12187_v18 = vld [vmem:[#allocation381_spill] sm:$0xff]  ;;  %v2334_v12 = vmul.f32 %v2238_v57, %v12189_v34  ;;  %v2437_v38 = vadd.f32 %v2436_v8, %v12190_v16  ;;  %v12192_v6 = vld [vmem:[#allocation166_spill] sm:$0xff]  ;;  %v12194_v55 = vld [vmem:[#allocation189_spill] sm:$0xff] }
 0x2dc   : >> { %v2555_v49 = vadd.f32 %v2554_v5, %v2525_v53  ;;  %v8830_v61 = vmul.f32 %v8357_v44, %v12187_v18  ;;  %v2362_v23 = vadd.f32 %v2361_v63, %v2332_v39  ;;  %v12191_v54 = vld [vmem:[#allocation405_spill] sm:$0xff]  ;;  %v2271_v24 = vmul.f32 %v2240_v28, %v12192_v6  ;;  %v12193_v45 = vld [vmem:[#allocation182_spill] sm:$0xff]  ;;  %v12196_v44 = vld [vmem:[#allocation15_spill] sm:$0xff] }
 0x2dd   : >> { %v2241_v43 = vadd.f32 %v12191_v54, %v8813_v10  ;;  %v2300_v59 = vadd.f32 %v2299_v48, %v2270_v52  ;;  %v2335_v53 = vmul.f32 %v2239_v30, %v12193_v45  ;;  %v2529_v21 = vmul.f32 %v12195_v40, %v12194_v55  ;;  %v12198_v8 = vld [vmem:[#allocation16_spill] sm:$0xff]  ;;  %v12201_v54 = vld [vmem:[#allocation173_spill] sm:$0xff]  ;;  %v12202_v48 = vld [vmem:[#allocation420_spill] sm:$0xff] }
 0x2de   : >> { %12188 = vst [vmem:[#allocation409_spill] sm:$0xff] %v8830_v61  ;;  %v2556_v32 = vadd.f32 %v2555_v49, %v2526_v31  ;;  %v2363_v5 = vadd.f32 %v2362_v23, %v2333_v25  ;;  %v12197_v18 = vmov %v12196_v44  ;;  %v8841_v2 = vmul.f32 %v2562_v58, %v12196_v44  ;;  %v12200_v34 = vld [vmem:[#allocation269_spill] sm:$0xff]  ;;  %v12204_v55 = vld [vmem:[#allocation406_spill] sm:$0xff]  ;;  %v12354_v33 = vld [vmem:[#allocation38_spill] sm:$0xff] }
 0x2df   : >> { %v8843_v57 = vadd.f32 %v2499_v42, %v2470_v51  ;;  %v12199_v62 = vmov %v12198_v8  ;;  %v8846_v63 = vmul.f32 %v2562_v58, %v12198_v8  ;;  %v2566_v16 = vadd.f32 %v2565_v19, %v12200_v34  ;;  %v12203_v25 = vld [vmem:[#allocation192_spill] sm:$0xff]  ;;  %v12209_v8 = vld [vmem:[#allocation97_spill] sm:$0xff]  ;;  %v12356_v10 = vld [vmem:[#allocation50_spill] sm:$0xff] }
 0x2e0   : >> { %v2557_v39 = vadd.f32 %v2556_v32, %v2527_v46  ;;  %v2336_v52 = vmul.f32 %v2240_v28, %v12201_v54  ;;  %v2364_v31 = vadd.f32 %v2363_v5, %v2334_v12  ;;  %v2438_v30 = vadd.f32 %v2437_v38, %v12202_v48  ;;  %v12205_v6 = vld [vmem:[#allocation172_spill] sm:$0xff]  ;;  %v12207_v32 = vld [vmem:[#allocation186_spill] sm:$0xff]  ;;  %v12366_v14 = vld [vmem:[#allocation105_spill] sm:$0xff] }
 0x2e1   : >> { %v2530_v49 = vmul.f32 %v12168_v17, %v12203_v25  ;;  %v2242_v23 = vadd.f32 %v12204_v55, %v8830_v61  ;;  %v12206_v40 = vmov %v12205_v6  ;;  %v2272_v51 = vmul.f32 %v2241_v43, %v12205_v6  ;;  %v12208_v38 = vld [vmem:[#allocation421_spill] sm:$0xff]  ;;  %v12211_v25 = vld [vmem:[#allocation190_spill] sm:$0xff]  ;;  %v12382_v26 = vld [vmem:[#allocation41_spill] sm:$0xff] }
 0x2e2   : >> { %v2301_v42 = vadd.f32 %v2300_v59, %v2271_v24  ;;  %v2558_v46 = vadd.f32 %v2557_v39, %v2528_v0  ;;  %v2337_v58 = vmul.f32 %v2241_v43, %v12207_v32  ;;  %v2365_v45 = vadd.f32 %v2364_v31, %v2335_v53  ;;  %v12230_v17 = vld [vmem:[#allocation301_spill] sm:$0xff]  ;;  %v12359_v61 = vld [vmem:[#allocation58_spill] sm:$0xff] }
 0x2e3   : >> { %v2570_v28 = vmul.f32 %v8846_v63, %v8841_v2  ;;  %v2571_v19 = vmul.f32 %v2566_v16, %v8843_v57  ;;  %v2439_v5 = vadd.f32 %v2438_v30, %v12208_v38  ;;  %v12210_v15 = vmov %v12209_v8  ;;  %v12214_v38 = vld [vmem:[#allocation309_spill] sm:$0xff] }
 0x2e4   : >> { %v2559_v44 = vadd.f32 %v2558_v46, %v2529_v21  ;;  %v2366_v12 = vadd.f32 %v2365_v45, %v2336_v52  ;;  %v2273_v54 = vmul.f32 %v2242_v23, %v12209_v8  ;;  %v2302_v48 = vadd.f32 %v2301_v42, %v2272_v51  ;;  %v12353_v27 = vld [vmem:[#allocation32_spill] sm:$0xff] }
 0x2e5   : >> { %v2338_v55 = vmul.f32 %v2242_v23, %v12211_v25  ;;  %v2568_v43 = vmul.f32 %v8846_v63, %v8846_v63  ;;  %v8865_v21 = vsub.f32 %v2570_v28, %v2571_v19  ;;  %v2573_v59 = vmul.f32 %v8846_v63, %v8843_v57  ;;  %v12355_v35 = vld [vmem:[#allocation40_spill] sm:$0xff] }
 0x2e6   : >> { %v2560_v6 = vadd.f32 %v2559_v44, %v2530_v49  ;;  %v2367_v24 = vadd.f32 %v2366_v12, %v2337_v58  ;;  %v2440_v53 = vadd.f32 1.0, %v2439_v5  ;;  %v2303_v39 = vadd.f32 %v2302_v48, %v2273_v54  ;;  %v12212_v58 = vld [vmem:[#allocation212_spill] sm:$0xff]  ;;  %v12213_v44 = vld [vmem:[#allocation211_spill] sm:$0xff]  ;;  %v12215_v5 = vld [vmem:[#allocation243_spill] sm:$0xff] }
 0x2e7   : >> { %v2586_v49 = vmul.f32 %v8865_v21, %v8843_v57  ;;  %v2306_v23 = vmul.f32 %v12183_v4, %v12197_v18  ;;  %v2371_v46 = vmul.f32 %v12183_v4, %v12199_v62  ;;  %v2375_v32 = vadd.f32 %v12200_v34, %v12183_v4  ;;  %v12217_v54 = vld [vmem:[#allocation329_spill] sm:$0xff]  ;;  %v12218_v48 = vld [vmem:[#allocation242_spill] sm:$0xff] }
 0x2e8   : >> { %v2561_v0 = vadd.f32 1.0, %v2560_v6  ;;  %v2368_v52 = vadd.f32 %v2367_v24, %v2338_v55  ;;  %v2304_v45 = vadd.f32 %v12212_v58, %v2303_v39  ;;  %v8886_v8 = vmul.f32 %v12215_v5, %v12214_v38  ;;  %v12220_v55 = vld [vmem:[#allocation315_spill] sm:$0xff]  ;;  %v12221_v6 = vld [vmem:[#allocation241_spill] sm:$0xff]  ;;  %v12224_v39 = vld [vmem:[#allocation240_spill] sm:$0xff] }
 0x2e9   : >> { %v8890_v25 = vmul.f32 %v12218_v48, %v12217_v54  ;;  %v8894_v24 = vmul.f32 %v12221_v6, %v12220_v55  ;;  %v12229_v58 = vld [vmem:[#allocation210_spill] sm:$0xff]  ;;  %v2376_v48 = vadd.f32 5.0, %v2375_v32  ;;  %v12231_v55 = vld [vmem:[#allocation238_spill] sm:$0xff]  ;;  %v12373_v11 = vld [vmem:[#allocation28_spill] sm:$0xff] }
 0x2ea   : >> { %v2567_v31 = vmul.f32 %v2566_v16, %v2561_v0  ;;  %v2574_v30 = vmul.f32 %v8841_v2, %v2561_v0  ;;  %v2369_v28 = vadd.f32 %v12213_v44, %v2368_v52  ;;  %12216 = vst [vmem:[#allocation424_spill] sm:$0xff] %v8886_v8  ;;  %v2307_v38 = vmul.f32 %v12229_v58, %v2306_v23  ;;  %v12240_v23 = vld [vmem:[#allocation235_spill] sm:$0xff]  ;;  %v12397_v34 = vld [vmem:[#allocation129_spill] sm:$0xff]  ;;  %v12398_v4 = vld [vmem:[#allocation124_spill] sm:$0xff] }
 0x2eb   : >> { %12219 = vst [vmem:[#allocation392_spill] sm:$0xff] %v8890_v25  ;;  %12222 = vst [vmem:[#allocation425_spill] sm:$0xff] %v8894_v24  ;;  %v2372_v5 = vmul.f32 %v12229_v58, %v2371_v46  ;;  %v2305_v8 = vsub.f32 0.0, %v2304_v45  ;;  %v8908_v6 = vmul.f32 %v12231_v55, %v12230_v17  ;;  %v12242_v46 = vld [vmem:[#allocation333_spill] sm:$0xff]  ;;  %v12243_v45 = vld [vmem:[#allocation234_spill] sm:$0xff] }
 0x2ec   : >> { %v2569_v51 = vsub.f32 %v2567_v31, %v2568_v43  ;;  %v8870_v42 = vsub.f32 %v2573_v59, %v2574_v30  ;;  %v12223_v59 = vld [vmem:[#allocation319_spill] sm:$0xff]  ;;  %v2370_v54 = vsub.f32 0.0, %v2369_v28  ;;  %v8924_v32 = vmul.f32 %v12243_v45, %v12242_v46  ;;  %v12245_v28 = vld [vmem:[#allocation334_spill] sm:$0xff]  ;;  %v12249_v55 = vld [vmem:[#allocation232_spill] sm:$0xff] }
 0x2ed   : >> { %v8898_v52 = vmul.f32 %v12224_v39, %v12223_v59  ;;  %v12226_v31 = vld [vmem:[#allocation323_spill] sm:$0xff]  ;;  %12232 = vst [vmem:[#allocation394_spill] sm:$0xff] %v8908_v6  ;;  %v12251_v46 = vld [vmem:[#allocation336_spill] sm:$0xff]  ;;  %v12402_v36 = vld [vmem:[#allocation24_spill] sm:$0xff] }
 0x2ee   : >> { %v2585_v19 = vmul.f32 %v2569_v51, %v2440_v53  ;;  %v2588_v12 = vmul.f32 %v8870_v42, %v8841_v2  ;;  %v12227_v30 = vld [vmem:[#allocation239_spill] sm:$0xff]  ;;  %12244 = vst [vmem:[#allocation427_spill] sm:$0xff] %v8924_v32  ;;  %v12258_v32 = vld [vmem:[#allocation229_spill] sm:$0xff] }
 0x2ef   : >> { %12225 = vst [vmem:[#allocation410_spill] sm:$0xff] %v8898_v52  ;;  %v8902_v44 = vmul.f32 %v12227_v30, %v12226_v31  ;;  %v12236_v39 = vld [vmem:[#allocation331_spill] sm:$0xff]  ;;  %v12237_v52 = vld [vmem:[#allocation236_spill] sm:$0xff] }
 0x2f0   : >> { %v2587_v43 = vadd.f32 %v2586_v49, %v2585_v19  ;;  %v12233_v49 = vld [vmem:[#allocation330_spill] sm:$0xff]  ;;  %v12234_v19 = vld [vmem:[#allocation237_spill] sm:$0xff]  ;;  %v8916_v31 = vmul.f32 %v12237_v52, %v12236_v39  ;;  %v12239_v30 = vld [vmem:[#allocation332_spill] sm:$0xff]  ;;  %v2577_v39 = vmul.f32 %v8841_v2, %v8841_v2 }
 0x2f1   : >> { %12228 = vst [vmem:[#allocation393_spill] sm:$0xff] %v8902_v44  ;;  %v8912_v59 = vmul.f32 %v12234_v19, %v12233_v49  ;;  %v8920_v44 = vmul.f32 %v12240_v23, %v12239_v30  ;;  %v2576_v19 = vmul.f32 %v2566_v16, %v2440_v53  ;;  %v2579_v30 = vmul.f32 %v8841_v2, %v8843_v57  ;;  %v12252_v45 = vld [vmem:[#allocation231_spill] sm:$0xff]  ;;  %v12257_v16 = vld [vmem:[#allocation338_spill] sm:$0xff]  ;;  %v12261_v2 = vld [vmem:[#allocation228_spill] sm:$0xff] }
 0x2f2   : >> { %v2589_v25 = vadd.f32 %v2588_v12, %v2587_v43  ;;  %12238 = vst [vmem:[#allocation411_spill] sm:$0xff] %v8916_v31  ;;  %v12246_v12 = vld [vmem:[#allocation233_spill] sm:$0xff]  ;;  %v12248_v43 = vld [vmem:[#allocation335_spill] sm:$0xff]  ;;  %v2580_v23 = vmul.f32 %v8846_v63, %v2440_v53  ;;  %v8941_v52 = vmul.f32 %v12252_v45, %v12251_v46  ;;  %v12263_v63 = vld [vmem:[#allocation340_spill] sm:$0xff] }
 0x2f3   : >> { %12235 = vst [vmem:[#allocation426_spill] sm:$0xff] %v8912_v59  ;;  %12241 = vst [vmem:[#allocation395_spill] sm:$0xff] %v8920_v44  ;;  %v8928_v17 = vmul.f32 %v12246_v12, %v12245_v28  ;;  %v8932_v49 = vmul.f32 %v12249_v55, %v12248_v43  ;;  %v2308_v28 = vadd.f32 %v2307_v38, %v2305_v8  ;;  %v12254_v43 = vld [vmem:[#allocation337_spill] sm:$0xff]  ;;  %v12255_v55 = vld [vmem:[#allocation230_spill] sm:$0xff] }
 0x2f4   : >> { %4349 = vrcp.f32 %v2589_v25  ;;  %12253 = vst [vmem:[#allocation412_spill] sm:$0xff] %v8941_v52  ;;  %v2373_v12 = vadd.f32 %v2372_v5, %v2370_v54  ;;  %v8950_v44 = vmul.f32 %v12258_v32, %v12257_v16  ;;  %v12260_v31 = vld [vmem:[#allocation339_spill] sm:$0xff]  ;;  %v12266_v8 = vld [vmem:[#allocation342_spill] sm:$0xff]  ;;  %v12270_v54 = vld [vmem:[#allocation225_spill] sm:$0xff] }
 0x2f5   : >> { %12247 = vst [vmem:[#allocation396_spill] sm:$0xff] %v8928_v17  ;;  %12250 = vst [vmem:[#allocation428_spill] sm:$0xff] %v8932_v49  ;;  %v2377_v17 = vmul.f32 %v12229_v58, %v2376_v48  ;;  %v8946_v49 = vmul.f32 %v12255_v55, %v12254_v43  ;;  %v8954_v59 = vmul.f32 %v12261_v2, %v12260_v31  ;;  %v12264_v6 = vld [vmem:[#allocation227_spill] sm:$0xff]  ;;  %v12267_v5 = vld [vmem:[#allocation226_spill] sm:$0xff] }
 0x2f6   : >> { %12259 = vst [vmem:[#allocation429_spill] sm:$0xff] %v8950_v44  ;;  %v8958_v46 = vmul.f32 %v12264_v6, %v12263_v63  ;;  %v8962_v38 = vmul.f32 %v12267_v5, %v12266_v8  ;;  %v12269_v48 = vld [vmem:[#allocation343_spill] sm:$0xff]  ;;  %v12272_v55 = vld [vmem:[#allocation346_spill] sm:$0xff]  ;;  %v12273_v45 = vld [vmem:[#allocation224_spill] sm:$0xff]  ;;  %v2578_v2 = vsub.f32 %v2576_v19, %v2577_v39  ;;  %v2582_v63 = vmul.f32 %v2561_v0, %v2440_v53 }
 0x2f7   : >> { %12256 = vst [vmem:[#allocation397_spill] sm:$0xff] %v8946_v49  ;;  %12262 = vst [vmem:[#allocation398_spill] sm:$0xff] %v8954_v59  ;;  %v8966_v43 = vmul.f32 %v12270_v54, %v12269_v48  ;;  %v8970_v16 = vmul.f32 %v12273_v45, %v12272_v55  ;;  %v12275_v32 = vld [vmem:[#allocation347_spill] sm:$0xff]  ;;  %v2581_v59 = vsub.f32 %v2579_v30, %v2580_v23  ;;  %v12278_v8 = vld [vmem:[#allocation349_spill] sm:$0xff] }
 0x2f8   : >> { %12265 = vst [vmem:[#allocation430_spill] sm:$0xff] %v8958_v46  ;;  %12268 = vst [vmem:[#allocation445_spill] sm:$0xff] %v8962_v38  ;;  %v12276_v44 = vld [vmem:[#allocation223_spill] sm:$0xff]  ;;  %v2583_v6 = vmul.f32 %v8843_v57, %v8843_v57  ;;  %v12279_v5 = vld [vmem:[#allocation222_spill] sm:$0xff]  ;;  %v2595_v55 = vmul.f32 %v8865_v21, %v2373_v12 }
 0x2f9   : >> { %12271 = vst [vmem:[#allocation413_spill] sm:$0xff] %v8966_v43  ;;  %12274 = vst [vmem:[#allocation399_spill] sm:$0xff] %v8970_v16  ;;  %v8974_v31 = vmul.f32 %v12276_v44, %v12275_v32  ;;  %v8980_v38 = vmul.f32 %v12279_v5, %v12278_v8  ;;  %v12281_v48 = vld [vmem:[#allocation388_spill] sm:$0xff]  ;;  %v2594_v43 = vmul.f32 %v2569_v51, %v2308_v28  ;;  %v12283_v16 = vld [vmem:[#allocation221_spill] sm:$0xff] }
 0x2fa   : >> { %v2378_v54 = vsub.f32 %v12281_v48, %v2377_v17  ;;  %v12282_v45 = vld [vmem:[#allocation352_spill] sm:$0xff]  ;;  %v12285_v32 = vld [vmem:[#allocation353_spill] sm:$0xff]  ;;  %v12288_v0 = vld [vmem:[#allocation355_spill] sm:$0xff] }
 0x2fb   : >> { %12277 = vst [vmem:[#allocation431_spill] sm:$0xff] %v8974_v31  ;;  %12280 = vst [vmem:[#allocation400_spill] sm:$0xff] %v8980_v38  ;;  %v8986_v46 = vmul.f32 %v12283_v16, %v12282_v45  ;;  %v12286_v19 = vld [vmem:[#allocation220_spill] sm:$0xff]  ;;  %v12289_v53 = vld [vmem:[#allocation219_spill] sm:$0xff] }
 0x2fc   : >> { %v8990_v23 = vmul.f32 %v12286_v19, %v12285_v32  ;;  %v8994_v57 = vmul.f32 %v12289_v53, %v12288_v0  ;;  %v12291_v39 = vld [vmem:[#allocation357_spill] sm:$0xff]  ;;  %v12292_v30 = vld [vmem:[#allocation218_spill] sm:$0xff]  ;;  %v12298_v44 = vld [vmem:[#allocation216_spill] sm:$0xff]  ;;  %v2600_v19 = vmul.f32 %v8865_v21, %v2308_v28  ;;  %v2584_v0 = vsub.f32 %v2582_v63, %v2583_v6 }
 0x2fd   : >> { %12284 = vst [vmem:[#allocation432_spill] sm:$0xff] %v8986_v46  ;;  %v8998_v8 = vmul.f32 %v12292_v30, %v12291_v39  ;;  %v12294_v17 = vld [vmem:[#allocation358_spill] sm:$0xff]  ;;  %v12295_v51 = vld [vmem:[#allocation217_spill] sm:$0xff]  ;;  %v12301_v46 = vld [vmem:[#allocation215_spill] sm:$0xff]  ;;  %v2601_v53 = vmul.f32 %v2578_v2, %v2373_v12  ;;  %v2607_v39 = vmul.f32 %v2581_v59, %v2373_v12 }
 0x2fe   : >> { %12287 = vst [vmem:[#allocation446_spill] sm:$0xff] %v8990_v23  ;;  %12290 = vst [vmem:[#allocation414_spill] sm:$0xff] %v8994_v57  ;;  %v9002_v48 = vmul.f32 %v12295_v51, %v12294_v17  ;;  %v12297_v5 = vld [vmem:[#allocation361_spill] sm:$0xff]  ;;  %v2606_v57 = vmul.f32 %v8870_v42, %v2308_v28  ;;  %v4350_v30 = vpop.eup %4349  ;;  %v12304_v23 = vld [vmem:[#allocation214_spill] sm:$0xff]  ;;  %v2609_v24 = vmul.f32 %v2584_v0, %v2378_v54 }
 0x2ff   : >> { %12293 = vst [vmem:[#allocation401_spill] sm:$0xff] %v8998_v8  ;;  %v9006_v45 = vmul.f32 %v12298_v44, %v12297_v5  ;;  %v12300_v16 = vld [vmem:[#allocation365_spill] sm:$0xff]  ;;  %v12303_v8 = vld [vmem:[#allocation260_spill] sm:$0xff]  ;;  %v2596_v44 = vadd.f32 %v2595_v55, %v2594_v43  ;;  %v2591_v38 = vmul.f32 %v4350_v30, %v2589_v25  ;;  %v2602_v52 = vadd.f32 %v2601_v53, %v2600_v19  ;;  %v12379_v25 = vld [vmem:[#allocation166_spill] sm:$0xff] }
 0x300   : >> { %12296 = vst [vmem:[#allocation270_spill] sm:$0xff] %v9002_v48  ;;  %v9010_v32 = vmul.f32 %v12301_v46, %v12300_v16  ;;  %v9016_v17 = vmul.f32 %v12304_v23, %v12303_v8  ;;  %v12306_v51 = vld [vmem:[#allocation261_spill] sm:$0xff]  ;;  %v2597_v16 = vmul.f32 %v8870_v42, %v2378_v54  ;;  %v2603_v42 = vmul.f32 %v2581_v59, %v2378_v54  ;;  %v12376_v59 = vld [vmem:[#allocation25_spill] sm:$0xff]  ;;  %v12381_v53 = vld [vmem:[#allocation39_spill] sm:$0xff] }
 0x301   : >> { %12299 = vst [vmem:[#allocation433_spill] sm:$0xff] %v9006_v45  ;;  %v12307_v48 = vld [vmem:[#allocation213_spill] sm:$0xff]  ;;  %v2608_v21 = vadd.f32 %v2607_v39, %v2606_v57  ;;  %v12365_v57 = vld [vmem:[#allocation90_spill] sm:$0xff]  ;;  %v12380_v0 = vld [vmem:[#allocation33_spill] sm:$0xff] }
 0x302   : >> { %12302 = vst [vmem:[#allocation448_spill] sm:$0xff] %v9010_v32  ;;  %12305 = vst [vmem:[#allocation415_spill] sm:$0xff] %v9016_v17  ;;  %v9020_v5 = vmul.f32 %v12307_v48, %v12306_v51  ;;  %v2598_v31 = vadd.f32 %v2597_v16, %v2596_v44  ;;  %v2604_v19 = vadd.f32 %v2603_v42, %v2602_v52  ;;  %v12368_v6 = vld [vmem:[#allocation116_spill] sm:$0xff]  ;;  %v12369_v16 = vld [vmem:[#allocation113_spill] sm:$0xff] }
 0x303   : >> { %v12377_v17 = vld [vmem:[#allocation34_spill] sm:$0xff]  ;;  %v12378_v44 = vld [vmem:[#allocation104_spill] sm:$0xff]  ;;  %v12384_v55 = vld [vmem:[#allocation49_spill] sm:$0xff] }
 0x304   : >> { %12308 = vst [vmem:[#allocation284_spill] sm:$0xff] %v9020_v5  ;;  %v2592_v5 = vsub.f32 2.0, %v2591_v38  ;;  %v12383_v38 = vld [vmem:[#allocation51_spill] sm:$0xff]  ;;  %v12388_v12 = vld [vmem:[#allocation70_spill] sm:$0xff]  ;;  %v12389_v2 = vld [vmem:[#allocation85_spill] sm:$0xff] }
 0x305   : >> { %v12386_v8 = vld [vmem:[#allocation59_spill] sm:$0xff]  ;;  %v12390_v45 = vld [vmem:[#allocation80_spill] sm:$0xff]  ;;  %v12391_v46 = vld [vmem:[#allocation93_spill] sm:$0xff] }
 0x306   : >> { %v2593_v54 = vmul.f32 %v4350_v30, %v2592_v5  ;;  %v2610_v30 = vadd.f32 %v2609_v24, %v2608_v21  ;;  %v12367_v21 = vld [vmem:[#allocation102_spill] sm:$0xff]  ;;  %v12374_v5 = vld [vmem:[#allocation23_spill] sm:$0xff]  ;;  %v12395_v49 = vld [vmem:[#allocation117_spill] sm:$0xff] }
 0x307   : >> { %v12387_v28 = vld [vmem:[#allocation75_spill] sm:$0xff]  ;;  %v12393_v48 = vld [vmem:[#allocation106_spill] sm:$0xff] }
 0x308   : >> { %v9065_v37 = vmul.f32 %v2598_v31, %v2593_v54  ;;  %v9087_v52 = vmul.f32 %v2604_v19, %v2593_v54  ;;  %v9089_v42 = vmul.f32 %v2610_v30, %v2593_v54  ;;  %v12358_v30 = vld [vmem:[#allocation60_spill] sm:$0xff]  ;;  %v12392_v63 = vld [vmem:[#allocation91_spill] sm:$0xff]  ;;  %v12396_v32 = vld [vmem:[#allocation114_spill] sm:$0xff] }
 0x309   : >> { %v12362_v31 = vld [vmem:[#allocation84_spill] sm:$0xff]  ;;  %v12394_v43 = vld [vmem:[#allocation103_spill] sm:$0xff]  ;;  %v12399_v58 = vld [vmem:[#allocation134_spill] sm:$0xff] }
 0x30a   : >> { %12340 = vst [vmem:[#allocation434_spill] sm:$0xff] %v9065_v37  ;;  %12351 = vst [vmem:[#allocation450_spill] sm:$0xff] %v9087_v52  ;;  %v2612_v39 = vmul.f32 %v9065_v37, %v12197_v18  ;;  %v2613_v23 = vmul.f32 0.0, %v9065_v37  ;;  %v2614_v60 = vmul.f32 %v9065_v37, %v12353_v27  ;;  %v2615_v47 = vmul.f32 %v9065_v37, %v12354_v33 }
 0x30b   : >> { %12352 = vst [vmem:[#allocation437_spill] sm:$0xff] %v9089_v42  ;;  %v2616_v9 = vmul.f32 %v9065_v37, %v12355_v35  ;;  %v2617_v19 = vmul.f32 %v9065_v37, %v12356_v10  ;;  %v2618_v54 = vmul.f32 %v9065_v37, %v12357_v56  ;;  %v2619_v18 = vmul.f32 %v9065_v37, %v12358_v30  ;;  %v12400_v42 = vld [vmem:[#allocation22_spill] sm:$0xff] }
 0x30c   : >> { %v2620_v24 = vmul.f32 %v9065_v37, %v12359_v61  ;;  %v2621_v27 = vmul.f32 %v9065_v37, %v12360_v20  ;;  %v2622_v33 = vmul.f32 %v9065_v37, %v12361_v3  ;;  %v2623_v35 = vmul.f32 %v9065_v37, %v12362_v31 }
 0x30d   : >> { %v2624_v10 = vmul.f32 %v9065_v37, %v12363_v29  ;;  %v2625_v56 = vmul.f32 %v9065_v37, %v12364_v13  ;;  %v2626_v30 = vmul.f32 %v9065_v37, %v12365_v57  ;;  %v2627_v61 = vmul.f32 %v9065_v37, %v12366_v14 }
 0x30e   : >> { %v2628_v20 = vmul.f32 %v9065_v37, %v12367_v21  ;;  %v2629_v3 = vmul.f32 %v9065_v37, %v12368_v6  ;;  %v2630_v31 = vmul.f32 %v9065_v37, %v12369_v16  ;;  %v2631_v29 = vmul.f32 %v9065_v37, %v12370_v22 }
 0x30f   : >> { %v2632_v13 = vmul.f32 %v9065_v37, %v12371_v41  ;;  %v2633_v57 = vmul.f32 %v9065_v37, %v12372_v7  ;;  %v2634_v14 = vmul.f32 %v9065_v37, %v12373_v11  ;;  %v2635_v21 = vmul.f32 %v9065_v37, %v12374_v5 }
 0x310   : >> { %v2636_v6 = vmul.f32 %v9065_v37, %v12375_v1  ;;  %v2637_v16 = vmul.f32 %v9065_v37, %v12376_v59  ;;  %v2638_v22 = vmul.f32 %v9065_v37, %v12377_v17  ;;  %v2639_v41 = vmul.f32 %v9065_v37, %v12378_v44 }
 0x311   : >> { %v2640_v7 = vmul.f32 %v9065_v37, %v12379_v25  ;;  %v2641_v11 = vmul.f32 %v9065_v37, %v12206_v40  ;;  %v2642_v5 = vmul.f32 %v9065_v37, %v12210_v15  ;;  %v2643_v1 = vmul.f32 %v9087_v52, %v12199_v62  ;;  %v12385_v37 = vld [vmem:[#allocation61_spill] sm:$0xff] }
 0x312   : >> { %v2644_v59 = vmul.f32 0.0, %v9087_v52  ;;  %v2645_v17 = vmul.f32 %v9087_v52, %v12380_v0  ;;  %v2646_v44 = vmul.f32 %v9087_v52, %v12381_v53  ;;  %v2647_v25 = vmul.f32 %v9087_v52, %v12382_v26 }
 0x313   : >> { %v2648_v40 = vmul.f32 %v9087_v52, %v12383_v38  ;;  %v2649_v15 = vmul.f32 %v9087_v52, %v12384_v55  ;;  %v2650_v62 = vmul.f32 %v9087_v52, %v12385_v37  ;;  %v2651_v51 = vmul.f32 %v9087_v52, %v12386_v8 }
 0x314   : >> { %v2652_v0 = vmul.f32 %v9087_v52, %v12387_v28  ;;  %v2653_v53 = vmul.f32 %v9087_v52, %v12388_v12  ;;  %v2654_v26 = vmul.f32 %v9087_v52, %v12389_v2  ;;  %v2655_v38 = vmul.f32 %v9087_v52, %v12390_v45 }
 0x315   : >> { %v2656_v55 = vmul.f32 %v9087_v52, %v12391_v46  ;;  %v2657_v37 = vmul.f32 %v9087_v52, %v12392_v63  ;;  %v2658_v8 = vmul.f32 %v9087_v52, %v12393_v48  ;;  %v2659_v28 = vmul.f32 %v9087_v52, %v12394_v43 }
 0x316   : >> { %v2660_v12 = vmul.f32 %v9087_v52, %v12395_v49  ;;  %v2661_v2 = vmul.f32 %v9087_v52, %v12396_v32  ;;  %v2662_v45 = vmul.f32 %v9087_v52, %v12397_v34  ;;  %v2663_v46 = vmul.f32 %v9087_v52, %v12398_v4  ;;  %v12403_v32 = vld [vmem:[#allocation154_spill] sm:$0xff]  ;;  %v12404_v4 = vld [vmem:[#allocation27_spill] sm:$0xff] }
 0x317   : >> { %v2664_v63 = vmul.f32 %v9087_v52, %v12399_v58  ;;  %v2665_v48 = vmul.f32 %v9087_v52, %v12400_v42  ;;  %v2666_v43 = vmul.f32 %v9087_v52, %v12401_v50  ;;  %v2667_v49 = vmul.f32 %v9087_v52, %v12402_v36  ;;  %v12405_v42 = vld [vmem:[#allocation182_spill] sm:$0xff]  ;;  %v12406_v36 = vld [vmem:[#allocation173_spill] sm:$0xff] }
 0x318   : >> { %v2668_v34 = vmul.f32 %v9087_v52, %v12403_v32  ;;  %v2669_v58 = vmul.f32 %v9087_v52, %v12404_v4  ;;  %v2670_v50 = vmul.f32 %v9087_v52, %v12405_v42  ;;  %v2671_v32 = vmul.f32 %v9087_v52, %v12406_v36  ;;  %v12407_v4 = vld [vmem:[#allocation186_spill] sm:$0xff] }
 0x319   : >> { %v2672_v42 = vmul.f32 %v9087_v52, %v12407_v4  ;;  %v12408_v36 = vld [vmem:[#allocation190_spill] sm:$0xff] }
 0x31a   : >> { %v2673_v4 = vmul.f32 %v9087_v52, %v12408_v36  ;;  %v2674_v36 = vadd.f32 %v2643_v1, %v2612_v39  ;;  %v2675_v52 = vadd.f32 %v2644_v59, %v2613_v23  ;;  %v2676_v1 = vadd.f32 %v2645_v17, %v2614_v60 }
 0x31b   : >> { %v2677_v39 = vadd.f32 %v2646_v44, %v2615_v47  ;;  %v2678_v23 = vadd.f32 %v2647_v25, %v2616_v9  ;;  %v2679_v59 = vadd.f32 %v2648_v40, %v2617_v19  ;;  %v2680_v17 = vadd.f32 %v2649_v15, %v2618_v54 }
 0x31c   : >> { %v2681_v60 = vadd.f32 %v2650_v62, %v2619_v18  ;;  %v2682_v44 = vadd.f32 %v2651_v51, %v2620_v24  ;;  %v2683_v47 = vadd.f32 %v2652_v0, %v2621_v27  ;;  %v2684_v9 = vadd.f32 %v2653_v53, %v2622_v33 }
 0x31d   : >> { %v2685_v25 = vadd.f32 %v2654_v26, %v2623_v35  ;;  %v2686_v19 = vadd.f32 %v2655_v38, %v2624_v10  ;;  %v2687_v40 = vadd.f32 %v2656_v55, %v2625_v56  ;;  %v2688_v15 = vadd.f32 %v2657_v37, %v2626_v30  ;;  %v12409_v37 = vld [vmem:[#allocation265_spill] sm:$0xff] }
 0x31e   : >> { %v2689_v54 = vadd.f32 %v2658_v8, %v2627_v61  ;;  %v2690_v18 = vadd.f32 %v2659_v28, %v2628_v20  ;;  %v2691_v62 = vadd.f32 %v2660_v12, %v2629_v3  ;;  %v2692_v24 = vadd.f32 %v2661_v2, %v2630_v31  ;;  %v12410_v61 = vld [vmem:[#allocation264_spill] sm:$0xff]  ;;  %v12411_v28 = vld [vmem:[#allocation327_spill] sm:$0xff]  ;;  %v12412_v12 = vld [vmem:[#allocation266_spill] sm:$0xff] }
 0x31f   : >> { %v2693_v51 = vadd.f32 %v2662_v45, %v2631_v29  ;;  %v2694_v0 = vadd.f32 %v2663_v46, %v2632_v13  ;;  %v2695_v27 = vadd.f32 %v2664_v63, %v2633_v57  ;;  %v2696_v33 = vadd.f32 %v2665_v48, %v2634_v14  ;;  %v12413_v29 = vld [vmem:[#allocation267_spill] sm:$0xff]  ;;  %v12414_v57 = vld [vmem:[#allocation286_spill] sm:$0xff]  ;;  %v12419_v2 = vld [vmem:[#allocation325_spill] sm:$0xff] }
 0x320   : >> { %v2697_v53 = vadd.f32 %v2666_v43, %v2635_v21  ;;  %v2698_v26 = vadd.f32 %v2667_v49, %v2636_v6  ;;  %v2699_v35 = vadd.f32 %v2668_v34, %v2637_v16  ;;  %v2700_v10 = vadd.f32 %v2669_v58, %v2638_v22  ;;  %v12415_v21 = vld [vmem:[#allocation322_spill] sm:$0xff]  ;;  %v12416_v16 = vld [vmem:[#allocation287_spill] sm:$0xff]  ;;  %v12420_v46 = vld [vmem:[#allocation289_spill] sm:$0xff] }
 0x321   : >> { %v2701_v38 = vadd.f32 %v2670_v50, %v2639_v41  ;;  %v2702_v55 = vadd.f32 %v2671_v32, %v2640_v7  ;;  %v2703_v56 = vadd.f32 %v2672_v42, %v2641_v11  ;;  %v2704_v30 = vadd.f32 %v2673_v4, %v2642_v5  ;;  %v12417_v41 = vld [vmem:[#allocation324_spill] sm:$0xff]  ;;  %v12421_v63 = vld [vmem:[#allocation326_spill] sm:$0xff]  ;;  %v12423_v34 = vld [vmem:[#allocation291_spill] sm:$0xff] }
 0x322   : >> { %v2705_v8 = vadd.f32 %v2674_v36, %v12409_v37  ;;  %v2706_v20 = vadd.f32 %v2675_v52, %v12410_v61  ;;  %v2718_v3 = vadd.f32 %v2687_v40, %v12411_v28  ;;  %v2707_v31 = vadd.f32 %v2676_v1, %v12412_v12  ;;  %v12418_v11 = vld [vmem:[#allocation288_spill] sm:$0xff]  ;;  %v12422_v43 = vld [vmem:[#allocation290_spill] sm:$0xff]  ;;  %v12424_v50 = vld [vmem:[#allocation305_spill] sm:$0xff] }
 0x323   : >> { %v2708_v13 = vadd.f32 %v2677_v39, %v12413_v29  ;;  %v2709_v14 = vadd.f32 %v2678_v23, %v12414_v57  ;;  %v2710_v6 = vadd.f32 %v2679_v59, %v12415_v21  ;;  %v2711_v22 = vadd.f32 %v2680_v17, %v12416_v16  ;;  %v12425_v42 = vld [vmem:[#allocation292_spill] sm:$0xff]  ;;  %v12428_v59 = vld [vmem:[#allocation293_spill] sm:$0xff] }
 0x324   : >> { %v2712_v7 = vadd.f32 %v2681_v60, %v12417_v41  ;;  %v2713_v5 = vadd.f32 %v2682_v44, %v12418_v11  ;;  %v2714_v45 = vadd.f32 %v2683_v47, %v12419_v2  ;;  %v2715_v52 = vadd.f32 %v2684_v9, %v12420_v46  ;;  %v12426_v36 = vld [vmem:[#allocation328_spill] sm:$0xff]  ;;  %v12429_v60 = vld [vmem:[#allocation295_spill] sm:$0xff]  ;;  %v12431_v40 = vld [vmem:[#allocation437_spill] sm:$0xff] }
 0x325   : >> { %v2716_v48 = vadd.f32 %v2685_v25, %v12421_v63  ;;  %v2717_v49 = vadd.f32 %v2686_v19, %v12422_v43  ;;  %v2719_v58 = vadd.f32 %v2688_v15, %v12423_v34  ;;  %v2720_v32 = vadd.f32 %v2689_v54, %v12424_v50  ;;  %v12427_v39 = vld [vmem:[#allocation268_spill] sm:$0xff]  ;;  %v12432_v25 = vld [vmem:[#allocation210_spill] sm:$0xff]  ;;  %v12433_v19 = vld [vmem:[#allocation297_spill] sm:$0xff] }
 0x326   : >> { %v2721_v4 = vadd.f32 %v2690_v18, %v12425_v42  ;;  %v2722_v1 = vadd.f32 %v2691_v62, %v12426_v36  ;;  %v2723_v23 = vadd.f32 %v2692_v24, %v12427_v39  ;;  %v2724_v17 = vadd.f32 %v2693_v51, %v12428_v59  ;;  %v12430_v47 = vld [vmem:[#allocation296_spill] sm:$0xff]  ;;  %v12434_v15 = vld [vmem:[#allocation298_spill] sm:$0xff]  ;;  %v12435_v54 = vld [vmem:[#allocation299_spill] sm:$0xff] }
 0x327   : >> { %v2725_v44 = vadd.f32 %v2694_v0, %v12429_v60  ;;  %v2726_v9 = vadd.f32 %v2695_v27, %v12430_v47  ;;  %v2736_v37 = vadd.f32 %v12432_v25, %v12431_v40  ;;  %v2727_v61 = vadd.f32 %v2696_v33, %v12433_v19  ;;  %v12436_v18 = vld [vmem:[#allocation302_spill] sm:$0xff]  ;;  %v12437_v62 = vld [vmem:[#allocation303_spill] sm:$0xff]  ;;  %v12438_v24 = vld [vmem:[#allocation304_spill] sm:$0xff] }
 0x328   : >> { %v2728_v28 = vadd.f32 %v2697_v53, %v12434_v15  ;;  %v2729_v12 = vadd.f32 %v2698_v26, %v12435_v54  ;;  %v2730_v29 = vadd.f32 %v2699_v35, %v12436_v18  ;;  %v2731_v57 = vadd.f32 %v2700_v10, %v12437_v62  ;;  %v12439_v51 = vld [vmem:[#allocation306_spill] sm:$0xff]  ;;  %v12440_v41 = vld [vmem:[#allocation307_spill] sm:$0xff]  ;;  %v12441_v11 = vld [vmem:[#allocation308_spill] sm:$0xff] }
 0x329   : >> { %v2732_v21 = vadd.f32 %v2701_v38, %v12438_v24  ;;  %v2733_v16 = vadd.f32 %v2702_v55, %v12439_v51  ;;  %v2746_v0 = vmul.f32 0.0, %v2736_v37  ;;  %v2734_v27 = vadd.f32 %v2703_v56, %v12440_v41  ;;  %v12479_v19 = vld [vmem:[#allocation314_spill] sm:$0xff]  ;;  %v12480_v15 = vld [vmem:[#allocation316_spill] sm:$0xff]  ;;  %v12481_v54 = vld [vmem:[#allocation317_spill] sm:$0xff] }
 0x32a   : >> { %v2735_v2 = vadd.f32 %v2704_v30, %v12441_v11  ;;  %v9246_v46 = vsub.f32 %v2705_v8, %v2736_v37  ;;  %v9248_v33 = vsub.f32 %v2706_v20, %v2736_v37  ;;  %v12482_v18 = vld [vmem:[#allocation294_spill] sm:$0xff]  ;;  %v12483_v62 = vld [vmem:[#allocation271_spill] sm:$0xff]  ;;  %v12485_v51 = vld [vmem:[#allocation320_spill] sm:$0xff] }
 0x32b   : >> { %v9250_v53 = vsub.f32 %v2707_v31, %v2746_v0  ;;  %v9252_v26 = vsub.f32 %v2708_v13, %v2746_v0  ;;  %v9254_v35 = vsub.f32 %v2709_v14, %v2746_v0  ;;  %v9256_v10 = vsub.f32 %v2710_v6, %v2746_v0  ;;  %v12484_v24 = vld [vmem:[#allocation318_spill] sm:$0xff]  ;;  %v12498_v40 = vld [vmem:[#allocation383_spill] sm:$0xff] }
 0x32c   : >> { %12442 = vst [vmem:[#allocation451_spill] sm:$0xff] %v9246_v46  ;;  %12443 = vst [vmem:[#allocation416_spill] sm:$0xff] %v9248_v33  ;;  %v9258_v38 = vsub.f32 %v2711_v22, %v2746_v0  ;;  %v9260_v55 = vsub.f32 %v2712_v7, %v2746_v0  ;;  %v9262_v63 = vsub.f32 %v2713_v5, %v2746_v0  ;;  %v12497_v25 = vld [vmem:[#allocation382_spill] sm:$0xff] }
 0x32d   : >> { %12444 = vst [vmem:[#allocation402_spill] sm:$0xff] %v9250_v53  ;;  %12445 = vst [vmem:[#allocation438_spill] sm:$0xff] %v9252_v26  ;;  %v9264_v56 = vsub.f32 %v2714_v45, %v2746_v0  ;;  %v9266_v30 = vsub.f32 %v2715_v52, %v2746_v0  ;;  %v9268_v8 = vsub.f32 %v2716_v48, %v2746_v0 }
 0x32e   : >> { %12446 = vst [vmem:[#allocation452_spill] sm:$0xff] %v9254_v35  ;;  %12447 = vst [vmem:[#allocation439_spill] sm:$0xff] %v9256_v10  ;;  %v9270_v20 = vsub.f32 %v2717_v49, %v2746_v0  ;;  %v9272_v31 = vsub.f32 %v2718_v3, %v2746_v0  ;;  %v9274_v13 = vsub.f32 %v2719_v58, %v2746_v0 }
 0x32f   : >> { %12448 = vst [vmem:[#allocation453_spill] sm:$0xff] %v9258_v38  ;;  %12449 = vst [vmem:[#allocation417_spill] sm:$0xff] %v9260_v55  ;;  %v9276_v14 = vsub.f32 %v2720_v32, %v2746_v0  ;;  %v9278_v6 = vsub.f32 %v2721_v4, %v2746_v0  ;;  %v9280_v22 = vsub.f32 %v2722_v1, %v2746_v0  ;;  %v12473_v4 = vld [vmem:[#allocation300_spill] sm:$0xff]  ;;  %v12474_v1 = vld [vmem:[#allocation269_spill] sm:$0xff] }
 0x330   : >> { %12450 = vst [vmem:[#allocation403_spill] sm:$0xff] %v9262_v63  ;;  %12451 = vst [vmem:[#allocation440_spill] sm:$0xff] %v9264_v56  ;;  %v9282_v7 = vsub.f32 %v2723_v23, %v2746_v0  ;;  %v9284_v5 = vsub.f32 %v2724_v17, %v2746_v0  ;;  %v9286_v45 = vsub.f32 %v2725_v44, %v2746_v0  ;;  %v12475_v23 = vld [vmem:[#allocation310_spill] sm:$0xff]  ;;  %v12476_v17 = vld [vmem:[#allocation311_spill] sm:$0xff] }
 0x331   : >> { %12452 = vst [vmem:[#allocation418_spill] sm:$0xff] %v9266_v30  ;;  %12453 = vst [vmem:[#allocation404_spill] sm:$0xff] %v9268_v8  ;;  %v9288_v52 = vsub.f32 %v2726_v9, %v2746_v0  ;;  %v9290_v48 = vsub.f32 %v2727_v61, %v2746_v0  ;;  %v9292_v3 = vsub.f32 %v2728_v28, %v2746_v0  ;;  %v12477_v44 = vld [vmem:[#allocation312_spill] sm:$0xff]  ;;  %v12478_v9 = vld [vmem:[#allocation313_spill] sm:$0xff] }
 0x332   : >> { %12454 = vst [vmem:[#allocation441_spill] sm:$0xff] %v9270_v20  ;;  %12455 = vst [vmem:[#allocation419_spill] sm:$0xff] %v9272_v31  ;;  %v9294_v43 = vsub.f32 %v2729_v12, %v2746_v0  ;;  %v9296_v49 = vsub.f32 %v2730_v29, %v2746_v0  ;;  %v9298_v34 = vsub.f32 %v2731_v57, %v2746_v0 }
 0x333   : >> { %12456 = vst [vmem:[#allocation405_spill] sm:$0xff] %v9274_v13  ;;  %12457 = vst [vmem:[#allocation420_spill] sm:$0xff] %v9276_v14  ;;  %v9300_v58 = vsub.f32 %v2732_v21, %v2746_v0  ;;  %v9302_v50 = vsub.f32 %v2733_v16, %v2746_v0  ;;  %v9304_v32 = vsub.f32 %v2734_v27, %v2746_v0  ;;  %v12487_v27 = vld [vmem:[#allocation272_spill] sm:$0xff] }
 0x334   : >> { %12458 = vst [vmem:[#allocation406_spill] sm:$0xff] %v9278_v6  ;;  %12459 = vst [vmem:[#allocation421_spill] sm:$0xff] %v9280_v22  ;;  %v9306_v42 = vsub.f32 %v2735_v2, %v2746_v0  ;;  %v2778_v36 = vmul.f32 %v9246_v46, %v12473_v4  ;;  %v2779_v39 = vmul.f32 %v9248_v33, %v12474_v1  ;;  %v12486_v0 = vld [vmem:[#allocation321_spill] sm:$0xff]  ;;  %v12489_v1 = vld [vmem:[#allocation274_spill] sm:$0xff] }
 0x335   : >> { %12460 = vst [vmem:[#allocation309_spill] sm:$0xff] %v9282_v7  ;;  %12461 = vst [vmem:[#allocation329_spill] sm:$0xff] %v9284_v5  ;;  %v2780_v59 = vmul.f32 %v9250_v53, %v12475_v23  ;;  %v2781_v60 = vmul.f32 %v9252_v26, %v12476_v17  ;;  %v2782_v47 = vmul.f32 %v9254_v35, %v12477_v44  ;;  %v12488_v2 = vld [vmem:[#allocation273_spill] sm:$0xff]  ;;  %v12490_v17 = vld [vmem:[#allocation275_spill] sm:$0xff] }
 0x336   : >> { %12462 = vst [vmem:[#allocation315_spill] sm:$0xff] %v9286_v45  ;;  %12463 = vst [vmem:[#allocation319_spill] sm:$0xff] %v9288_v52  ;;  %v2783_v37 = vmul.f32 %v9256_v10, %v12478_v9  ;;  %v2784_v61 = vmul.f32 %v9258_v38, %v12479_v19  ;;  %v2785_v28 = vmul.f32 %v9260_v55, %v12480_v15  ;;  %v12491_v9 = vld [vmem:[#allocation276_spill] sm:$0xff]  ;;  %v12492_v15 = vld [vmem:[#allocation277_spill] sm:$0xff] }
 0x337   : >> { %12464 = vst [vmem:[#allocation323_spill] sm:$0xff] %v9290_v48  ;;  %12465 = vst [vmem:[#allocation301_spill] sm:$0xff] %v9292_v3  ;;  %v2786_v12 = vmul.f32 %v9262_v63, %v12481_v54  ;;  %v2787_v29 = vmul.f32 %v9264_v56, %v12482_v18  ;;  %v2788_v57 = vmul.f32 %v9266_v30, %v12483_v62  ;;  %v12493_v18 = vld [vmem:[#allocation278_spill] sm:$0xff] }
 0x338   : >> { %12466 = vst [vmem:[#allocation330_spill] sm:$0xff] %v9294_v43  ;;  %12467 = vst [vmem:[#allocation331_spill] sm:$0xff] %v9296_v49  ;;  %v2789_v21 = vmul.f32 %v9268_v8, %v12484_v24  ;;  %v2790_v16 = vmul.f32 %v9270_v20, %v12485_v51  ;;  %v2791_v41 = vmul.f32 %v9272_v31, %v12486_v0  ;;  %v12494_v24 = vld [vmem:[#allocation279_spill] sm:$0xff]  ;;  %v12495_v0 = vld [vmem:[#allocation280_spill] sm:$0xff] }
 0x339   : >> { %12468 = vst [vmem:[#allocation332_spill] sm:$0xff] %v9298_v34  ;;  %12469 = vst [vmem:[#allocation333_spill] sm:$0xff] %v9300_v58  ;;  %v2792_v11 = vmul.f32 %v9274_v13, %v12487_v27  ;;  %v2793_v4 = vmul.f32 %v9276_v14, %v12488_v2  ;;  %v2794_v23 = vmul.f32 %v9278_v6, %v12489_v1  ;;  %v12496_v2 = vld [vmem:[#allocation281_spill] sm:$0xff] }
 0x33a   : >> { %12470 = vst [vmem:[#allocation334_spill] sm:$0xff] %v9302_v50  ;;  %12471 = vst [vmem:[#allocation335_spill] sm:$0xff] %v9304_v32  ;;  %v2795_v44 = vmul.f32 %v9280_v22, %v12490_v17  ;;  %v2796_v19 = vmul.f32 %v9282_v7, %v12491_v9  ;;  %v2797_v54 = vmul.f32 %v9284_v5, %v12492_v15  ;;  %v12499_v7 = vld [vmem:[#allocation384_spill] sm:$0xff]  ;;  %v12500_v5 = vld [vmem:[#allocation385_spill] sm:$0xff] }
 0x33b   : >> { %12472 = vst [vmem:[#allocation336_spill] sm:$0xff] %v9306_v42  ;;  %v2798_v62 = vmul.f32 %v9286_v45, %v12493_v18  ;;  %v2799_v51 = vmul.f32 %v9288_v52, %v12494_v24  ;;  %v2800_v27 = vmul.f32 %v9290_v48, %v12495_v0  ;;  %v2801_v1 = vmul.f32 %v9292_v3, %v12496_v2  ;;  %v12501_v45 = vld [vmem:[#allocation282_spill] sm:$0xff]  ;;  %v12503_v48 = vld [vmem:[#allocation387_spill] sm:$0xff] }
 0x33c   : >> { %v2802_v17 = vmul.f32 %v9294_v43, %v12497_v25  ;;  %v2803_v9 = vmul.f32 %v9296_v49, %v12498_v40  ;;  %v2804_v15 = vmul.f32 %v9298_v34, %v12499_v7  ;;  %v2805_v18 = vmul.f32 %v9300_v58, %v12500_v5  ;;  %v12502_v52 = vld [vmem:[#allocation386_spill] sm:$0xff]  ;;  %v12505_v25 = vld [vmem:[#allocation435_spill] sm:$0xff]  ;;  %v12508_v40 = vld [vmem:[#allocation208_spill] sm:$0xff] }
 0x33d   : >> { %v2806_v24 = vmul.f32 %v9302_v50, %v12501_v45  ;;  %v2807_v0 = vmul.f32 %v9304_v32, %v12502_v52  ;;  %v2808_v2 = vmul.f32 %v9306_v42, %v12503_v48  ;;  %v12504_v3 = vld [vmem:[#allocation209_spill] sm:$0xff]  ;;  %v12509_v49 = vld [vmem:[#allocation436_spill] sm:$0xff]  ;;  %v12516_v50 = vld [vmem:[#allocation206_spill] sm:$0xff] }
 0x33e   : >> { %v12506_v43 = vsub.f32 %v12504_v3, %v12505_v25  ;;  %v12510_v7 = vsub.f32 %v12508_v40, %v12509_v49  ;;  %v12512_v5 = vld [vmem:[#allocation207_spill] sm:$0xff]  ;;  %v12513_v58 = vld [vmem:[#allocation442_spill] sm:$0xff]  ;;  %v12517_v52 = vld [vmem:[#allocation443_spill] sm:$0xff] }
 0x33f   : >> { %v12514_v6 = vsub.f32 %v12512_v5, %v12513_v58  ;;  %v12518_v32 = vsub.f32 %v12516_v50, %v12517_v52  ;;  %v12520_v48 = vld [vmem:[#allocation205_spill] sm:$0xff]  ;;  %v12521_v42 = vld [vmem:[#allocation444_spill] sm:$0xff]  ;;  %v12525_v3 = vld [vmem:[#allocation447_spill] sm:$0xff] }
 0x340   : >> { %v9373_v22 = vsub.f32 %v2778_v36, %v12506_v43  ;;  %v9378_v34 = vsub.f32 %v2779_v39, %v12510_v7  ;;  %v12522_v25 = vsub.f32 %v12520_v48, %v12521_v42  ;;  %v12524_v36 = vld [vmem:[#allocation204_spill] sm:$0xff]  ;;  %v12528_v7 = vld [vmem:[#allocation259_spill] sm:$0xff]  ;;  %v12533_v5 = vld [vmem:[#allocation454_spill] sm:$0xff] }
 0x341   : >> { %v9383_v45 = vsub.f32 %v2780_v59, %v12514_v6  ;;  %v9388_v14 = vsub.f32 %v2781_v60, %v12518_v32  ;;  %v12526_v49 = vsub.f32 %v12524_v36, %v12525_v3  ;;  %v12529_v40 = vld [vmem:[#allocation449_spill] sm:$0xff]  ;;  %v12532_v59 = vld [vmem:[#allocation258_spill] sm:$0xff]  ;;  %v12536_v60 = vld [vmem:[#allocation203_spill] sm:$0xff] }
 0x342   : >> { %12507 = vst [vmem:[#allocation337_spill] sm:$0xff] %v9373_v22  ;;  %12511 = vst [vmem:[#allocation338_spill] sm:$0xff] %v9378_v34  ;;  %v9393_v43 = vsub.f32 %v2782_v47, %v12522_v25  ;;  %v12530_v58 = vsub.f32 %v12528_v7, %v12529_v40  ;;  %v12534_v52 = vsub.f32 %v12532_v59, %v12533_v5  ;;  %v12537_v50 = vld [vmem:[#allocation455_spill] sm:$0xff]  ;;  %v12541_v48 = vld [vmem:[#allocation456_spill] sm:$0xff] }
 0x343   : >> { %12515 = vst [vmem:[#allocation339_spill] sm:$0xff] %v9383_v45  ;;  %12519 = vst [vmem:[#allocation340_spill] sm:$0xff] %v9388_v14  ;;  %v9398_v39 = vsub.f32 %v2783_v37, %v12526_v49  ;;  %v12538_v42 = vsub.f32 %v12536_v60, %v12537_v50  ;;  %v12540_v25 = vld [vmem:[#allocation202_spill] sm:$0xff]  ;;  %v12544_v49 = vld [vmem:[#allocation257_spill] sm:$0xff] }
 0x344   : >> { %12523 = vst [vmem:[#allocation342_spill] sm:$0xff] %v9393_v43  ;;  %v9403_v6 = vsub.f32 %v2784_v61, %v12530_v58  ;;  %v9408_v32 = vsub.f32 %v2785_v28, %v12534_v52  ;;  %v12542_v3 = vsub.f32 %v12540_v25, %v12541_v48  ;;  %v12545_v36 = vld [vmem:[#allocation457_spill] sm:$0xff]  ;;  %v12548_v58 = vld [vmem:[#allocation201_spill] sm:$0xff]  ;;  %v12552_v52 = vld [vmem:[#allocation256_spill] sm:$0xff] }
 0x345   : >> { %12527 = vst [vmem:[#allocation343_spill] sm:$0xff] %v9398_v39  ;;  %v9413_v47 = vsub.f32 %v2786_v12, %v12538_v42  ;;  %v12546_v40 = vsub.f32 %v12544_v49, %v12545_v36  ;;  %v12549_v7 = vld [vmem:[#allocation458_spill] sm:$0xff]  ;;  %v12553_v59 = vld [vmem:[#allocation459_spill] sm:$0xff]  ;;  %v12557_v60 = vld [vmem:[#allocation460_spill] sm:$0xff] }
 0x346   : >> { %12531 = vst [vmem:[#allocation346_spill] sm:$0xff] %v9403_v6  ;;  %12535 = vst [vmem:[#allocation347_spill] sm:$0xff] %v9408_v32  ;;  %v9418_v37 = vsub.f32 %v2787_v29, %v12542_v3  ;;  %v12550_v5 = vsub.f32 %v12548_v58, %v12549_v7  ;;  %v12554_v50 = vsub.f32 %v12552_v52, %v12553_v59  ;;  %v12556_v42 = vld [vmem:[#allocation255_spill] sm:$0xff]  ;;  %v12560_v3 = vld [vmem:[#allocation254_spill] sm:$0xff] }
 0x347   : >> { %12539 = vst [vmem:[#allocation349_spill] sm:$0xff] %v9413_v47  ;;  %v9423_v61 = vsub.f32 %v2788_v57, %v12546_v40  ;;  %v12558_v48 = vsub.f32 %v12556_v42, %v12557_v60  ;;  %v12561_v25 = vld [vmem:[#allocation461_spill] sm:$0xff]  ;;  %v12565_v49 = vld [vmem:[#allocation462_spill] sm:$0xff]  ;;  %v12569_v58 = vld [vmem:[#allocation463_spill] sm:$0xff] }
 0x348   : >> { %12543 = vst [vmem:[#allocation388_spill] sm:$0xff] %v9418_v37  ;;  %v9428_v28 = vsub.f32 %v2789_v21, %v12550_v5  ;;  %v9433_v12 = vsub.f32 %v2790_v16, %v12554_v50  ;;  %v12562_v36 = vsub.f32 %v12560_v3, %v12561_v25  ;;  %v12564_v40 = vld [vmem:[#allocation200_spill] sm:$0xff]  ;;  %v12568_v5 = vld [vmem:[#allocation199_spill] sm:$0xff]  ;;  %v12572_v50 = vld [vmem:[#allocation198_spill] sm:$0xff] }
 0x349   : >> { %12547 = vst [vmem:[#allocation352_spill] sm:$0xff] %v9423_v61  ;;  %v9438_v29 = vsub.f32 %v2791_v41, %v12558_v48  ;;  %v12566_v7 = vsub.f32 %v12564_v40, %v12565_v49  ;;  %v12570_v59 = vsub.f32 %v12568_v5, %v12569_v58  ;;  %v12573_v52 = vld [vmem:[#allocation464_spill] sm:$0xff]  ;;  %v12576_v48 = vld [vmem:[#allocation253_spill] sm:$0xff]  ;;  %v12581_v3 = vld [vmem:[#allocation466_spill] sm:$0xff] }
 0x34a   : >> { %12551 = vst [vmem:[#allocation353_spill] sm:$0xff] %v9428_v28  ;;  %12555 = vst [vmem:[#allocation355_spill] sm:$0xff] %v9433_v12  ;;  %v9443_v57 = vsub.f32 %v2792_v11, %v12562_v36  ;;  %v12574_v60 = vsub.f32 %v12572_v50, %v12573_v52  ;;  %v12577_v42 = vld [vmem:[#allocation465_spill] sm:$0xff]  ;;  %v12580_v36 = vld [vmem:[#allocation197_spill] sm:$0xff] }
 0x34b   : >> { %12559 = vst [vmem:[#allocation357_spill] sm:$0xff] %v9438_v29  ;;  %v9448_v21 = vsub.f32 %v2793_v4, %v12566_v7  ;;  %v9453_v16 = vsub.f32 %v2794_v23, %v12570_v59  ;;  %v12578_v25 = vsub.f32 %v12576_v48, %v12577_v42  ;;  %v12582_v49 = vsub.f32 %v12580_v36, %v12581_v3  ;;  %v12584_v7 = vld [vmem:[#allocation196_spill] sm:$0xff]  ;;  %v12585_v40 = vld [vmem:[#allocation467_spill] sm:$0xff]  ;;  %v12588_v59 = vld [vmem:[#allocation252_spill] sm:$0xff] }
 0x34c   : >> { %12563 = vst [vmem:[#allocation358_spill] sm:$0xff] %v9443_v57  ;;  %v9458_v41 = vsub.f32 %v2795_v44, %v12574_v60  ;;  %v12586_v58 = vsub.f32 %v12584_v7, %v12585_v40  ;;  %v12589_v5 = vld [vmem:[#allocation389_spill] sm:$0xff]  ;;  %v12592_v60 = vld [vmem:[#allocation195_spill] sm:$0xff]  ;;  %v12597_v48 = vld [vmem:[#allocation422_spill] sm:$0xff] }
 0x34d   : >> { %12567 = vst [vmem:[#allocation361_spill] sm:$0xff] %v9448_v21  ;;  %12571 = vst [vmem:[#allocation365_spill] sm:$0xff] %v9453_v16  ;;  %v9463_v11 = vsub.f32 %v2796_v19, %v12578_v25  ;;  %v9468_v4 = vsub.f32 %v2797_v54, %v12582_v49  ;;  %v12590_v52 = vsub.f32 %v12588_v59, %v12589_v5  ;;  %v12593_v50 = vld [vmem:[#allocation285_spill] sm:$0xff]  ;;  %v12596_v25 = vld [vmem:[#allocation251_spill] sm:$0xff] }
 0x34e   : >> { %12575 = vst [vmem:[#allocation260_spill] sm:$0xff] %v9458_v41  ;;  %v9473_v23 = vsub.f32 %v2798_v62, %v12586_v58  ;;  %v12594_v42 = vsub.f32 %v12592_v60, %v12593_v50  ;;  %v12598_v3 = vsub.f32 %v12596_v25, %v12597_v48  ;;  %v12600_v49 = vld [vmem:[#allocation250_spill] sm:$0xff]  ;;  %v12604_v58 = vld [vmem:[#allocation249_spill] sm:$0xff]  ;;  %v12605_v7 = vld [vmem:[#allocation407_spill] sm:$0xff] }
 0x34f   : >> { %12579 = vst [vmem:[#allocation261_spill] sm:$0xff] %v9463_v11  ;;  %12583 = vst [vmem:[#allocation265_spill] sm:$0xff] %v9468_v4  ;;  %v9478_v44 = vsub.f32 %v2799_v51, %v12590_v52  ;;  %v12601_v36 = vld [vmem:[#allocation390_spill] sm:$0xff]  ;;  %v12606_v5 = vsub.f32 %v12604_v58, %v12605_v7  ;;  %v12608_v52 = vld [vmem:[#allocation248_spill] sm:$0xff] }
 0x350   : >> { %12587 = vst [vmem:[#allocation264_spill] sm:$0xff] %v9473_v23  ;;  %v9483_v19 = vsub.f32 %v2800_v27, %v12594_v42  ;;  %v9488_v54 = vsub.f32 %v2801_v1, %v12598_v3  ;;  %v12602_v40 = vsub.f32 %v12600_v49, %v12601_v36  ;;  %v12609_v59 = vld [vmem:[#allocation423_spill] sm:$0xff]  ;;  %v12616_v3 = vld [vmem:[#allocation246_spill] sm:$0xff]  ;;  %v12617_v25 = vld [vmem:[#allocation408_spill] sm:$0xff] }
 0x351   : >> { %12591 = vst [vmem:[#allocation327_spill] sm:$0xff] %v9478_v44  ;;  %v9498_v51 = vsub.f32 %v2803_v9, %v12606_v5  ;;  %v12610_v50 = vsub.f32 %v12608_v52, %v12609_v59  ;;  %v12612_v42 = vld [vmem:[#allocation247_spill] sm:$0xff]  ;;  %v12618_v36 = vsub.f32 %v12616_v3, %v12617_v25  ;;  %v12624_v5 = vld [vmem:[#allocation244_spill] sm:$0xff]  ;;  %v12625_v58 = vld [vmem:[#allocation409_spill] sm:$0xff]  ;;  %v2843_v25 = vsub.f32 0.0, %v9388_v14 }
 0x352   : >> { %12595 = vst [vmem:[#allocation266_spill] sm:$0xff] %v9483_v19  ;;  %12599 = vst [vmem:[#allocation267_spill] sm:$0xff] %v9488_v54  ;;  %v9493_v62 = vsub.f32 %v2802_v17, %v12602_v40  ;;  %v12613_v60 = vld [vmem:[#allocation391_spill] sm:$0xff]  ;;  %v12620_v40 = vld [vmem:[#allocation245_spill] sm:$0xff]  ;;  %v12626_v59 = vsub.f32 %v12624_v5, %v12625_v58  ;;  %v2848_v58 = vsub.f32 0.0, %v9413_v47  ;;  %v2853_v5 = vsub.f32 0.0, %v9438_v29 }
 0x353   : >> { %12607 = vst [vmem:[#allocation322_spill] sm:$0xff] %v9498_v51  ;;  %v9503_v27 = vsub.f32 %v2804_v15, %v12610_v50  ;;  %v12614_v48 = vsub.f32 %v12612_v42, %v12613_v60  ;;  %v9513_v17 = vsub.f32 %v2806_v24, %v12618_v36  ;;  %v12621_v49 = vld [vmem:[#allocation283_spill] sm:$0xff]  ;;  %v2840_v50 = vsub.f32 0.0, %v9373_v22 }
 0x354   : >> { %12603 = vst [vmem:[#allocation286_spill] sm:$0xff] %v9493_v62  ;;  %v12622_v7 = vsub.f32 %v12620_v40, %v12621_v49  ;;  %v9523_v15 = vsub.f32 %v2808_v2, %v12626_v59  ;;  %v2842_v60 = vsub.f32 0.0, %v9383_v45  ;;  %v2844_v24 = vsub.f32 0.0, %v9393_v43  ;;  %v12682_v14 = vld [vmem:[#allocation363_spill] sm:$0xff]  ;;  %v12688_v45 = vld [vmem:[#allocation369_spill] sm:$0xff] }
 0x355   : >> { %12611 = vst [vmem:[#allocation287_spill] sm:$0xff] %v9503_v27  ;;  %v9508_v1 = vsub.f32 %v2805_v18, %v12614_v48  ;;  %12619 = vst [vmem:[#allocation288_spill] sm:$0xff] %v9513_v17  ;;  %v2841_v18 = vsub.f32 0.0, %v9378_v34  ;;  %v2845_v48 = vsub.f32 0.0, %v9398_v39  ;;  %v2847_v49 = vsub.f32 0.0, %v9408_v32  ;;  %v12628_v32 = vld [vmem:[#allocation424_spill] sm:$0xff] }
 0x356   : >> { %v9518_v9 = vsub.f32 %v2807_v0, %v12622_v7  ;;  %12627 = vst [vmem:[#allocation289_spill] sm:$0xff] %v9523_v15  ;;  %v2846_v0 = vsub.f32 0.0, %v9403_v6  ;;  %v2849_v2 = vsub.f32 0.0, %v9418_v37  ;;  %v2850_v36 = vsub.f32 0.0, %v9423_v61  ;;  %v12690_v34 = vld [vmem:[#allocation370_spill] sm:$0xff]  ;;  %v12692_v22 = vld [vmem:[#allocation371_spill] sm:$0xff] }
 0x357   : >> { %12615 = vst [vmem:[#allocation324_spill] sm:$0xff] %v9508_v1  ;;  %v2851_v7 = vsub.f32 0.0, %v9428_v28  ;;  %v2852_v59 = vsub.f32 0.0, %v9433_v12  ;;  %v2854_v40 = vsub.f32 0.0, %v9443_v57  ;;  %v2855_v3 = vsub.f32 0.0, %v9448_v21 }
 0x358   : >> { %12623 = vst [vmem:[#allocation325_spill] sm:$0xff] %v9518_v9  ;;  %v2856_v42 = vsub.f32 0.0, %v9453_v16  ;;  %v2857_v52 = vsub.f32 0.0, %v9458_v41  ;;  %v2858_v47 = vsub.f32 0.0, %v9463_v11  ;;  %v2859_v37 = vsub.f32 0.0, %v9468_v4 }
 0x359   : >> { %v2860_v61 = vsub.f32 0.0, %v9473_v23  ;;  %v2861_v28 = vsub.f32 0.0, %v9478_v44  ;;  %v2862_v12 = vsub.f32 0.0, %v9483_v19  ;;  %v2863_v29 = vsub.f32 0.0, %v9488_v54  ;;  %v12629_v19 = vld [vmem:[#allocation392_spill] sm:$0xff]  ;;  %v12630_v54 = vld [vmem:[#allocation425_spill] sm:$0xff] }
 0x35a   : >> { %v2864_v57 = vsub.f32 0.0, %v9493_v62  ;;  %v2865_v21 = vsub.f32 0.0, %v9498_v51  ;;  %v2866_v16 = vsub.f32 0.0, %v9503_v27  ;;  %v2867_v41 = vsub.f32 0.0, %v9508_v1  ;;  %v12631_v51 = vld [vmem:[#allocation410_spill] sm:$0xff]  ;;  %v12632_v27 = vld [vmem:[#allocation393_spill] sm:$0xff] }
 0x35b   : >> { %v2868_v11 = vsub.f32 0.0, %v9513_v17  ;;  %v2869_v4 = vsub.f32 0.0, %v9518_v9  ;;  %v2870_v23 = vsub.f32 0.0, %v9523_v15  ;;  %v9557_v44 = vmul.f32 %v2840_v50, %v12628_v32  ;;  %v12633_v17 = vld [vmem:[#allocation394_spill] sm:$0xff]  ;;  %v12635_v32 = vld [vmem:[#allocation411_spill] sm:$0xff] }
 0x35c   : >> { %v9560_v6 = vmul.f32 %v2841_v18, %v12629_v19  ;;  %v9563_v62 = vmul.f32 %v2842_v60, %v12630_v54  ;;  %v9566_v39 = vmul.f32 %v2843_v25, %v12631_v51  ;;  %v9569_v1 = vmul.f32 %v2844_v24, %v12632_v27  ;;  %v12634_v9 = vld [vmem:[#allocation426_spill] sm:$0xff]  ;;  %v12636_v19 = vld [vmem:[#allocation395_spill] sm:$0xff]  ;;  %v12638_v51 = vld [vmem:[#allocation396_spill] sm:$0xff] }
 0x35d   : >> { %v9572_v43 = vmul.f32 %v2845_v48, %v12633_v17  ;;  %v9575_v15 = vmul.f32 %v2846_v0, %v12634_v9  ;;  %v9578_v50 = vmul.f32 %v2847_v49, %v12635_v32  ;;  %v9581_v18 = vmul.f32 %v2848_v58, %v12636_v19  ;;  %v12637_v54 = vld [vmem:[#allocation427_spill] sm:$0xff]  ;;  %v12639_v27 = vld [vmem:[#allocation428_spill] sm:$0xff]  ;;  %v12641_v9 = vld [vmem:[#allocation397_spill] sm:$0xff] }
 0x35e   : >> { %v9584_v60 = vmul.f32 %v2849_v2, %v12637_v54  ;;  %v9587_v25 = vmul.f32 %v2850_v36, %v12638_v51  ;;  %v9590_v24 = vmul.f32 %v2851_v7, %v12639_v27  ;;  %v12640_v17 = vld [vmem:[#allocation412_spill] sm:$0xff]  ;;  %v9596_v0 = vmul.f32 %v2853_v5, %v12641_v9  ;;  %v12642_v49 = vld [vmem:[#allocation429_spill] sm:$0xff]  ;;  %v12643_v58 = vld [vmem:[#allocation398_spill] sm:$0xff] }
 0x35f   : >> { %v9593_v48 = vmul.f32 %v2852_v59, %v12640_v17  ;;  %v9599_v32 = vmul.f32 %v2854_v40, %v12642_v49  ;;  %v9602_v19 = vmul.f32 %v2855_v3, %v12643_v58  ;;  %v12644_v2 = vld [vmem:[#allocation430_spill] sm:$0xff]  ;;  %v12645_v36 = vld [vmem:[#allocation445_spill] sm:$0xff]  ;;  %v12647_v59 = vld [vmem:[#allocation399_spill] sm:$0xff] }
 0x360   : >> { %v9605_v54 = vmul.f32 %v2856_v42, %v12644_v2  ;;  %v9608_v51 = vmul.f32 %v2857_v52, %v12645_v36  ;;  %v12646_v7 = vld [vmem:[#allocation413_spill] sm:$0xff]  ;;  %v9614_v17 = vmul.f32 %v2859_v37, %v12647_v59  ;;  %v12649_v5 = vld [vmem:[#allocation431_spill] sm:$0xff]  ;;  %v12651_v40 = vld [vmem:[#allocation400_spill] sm:$0xff] }
 0x361   : >> { %v9611_v27 = vmul.f32 %v2858_v47, %v12646_v7  ;;  %v9617_v9 = vmul.f32 %v2860_v61, %v12649_v5  ;;  %v9620_v49 = vmul.f32 %v2861_v28, %v12651_v40  ;;  %v12653_v3 = vld [vmem:[#allocation432_spill] sm:$0xff]  ;;  %v12655_v42 = vld [vmem:[#allocation446_spill] sm:$0xff]  ;;  %v12659_v47 = vld [vmem:[#allocation401_spill] sm:$0xff] }
 0x362   : >> { %12648 = vst [vmem:[#allocation326_spill] sm:$0xff] %v9614_v17  ;;  %v9623_v58 = vmul.f32 %v2862_v12, %v12653_v3  ;;  %v9626_v2 = vmul.f32 %v2863_v29, %v12655_v42  ;;  %v12657_v52 = vld [vmem:[#allocation414_spill] sm:$0xff]  ;;  %v9632_v7 = vmul.f32 %v2865_v21, %v12659_v47  ;;  %v12663_v61 = vld [vmem:[#allocation433_spill] sm:$0xff]  ;;  %v12665_v28 = vld [vmem:[#allocation448_spill] sm:$0xff] }
 0x363   : >> { %12650 = vst [vmem:[#allocation290_spill] sm:$0xff] %v9617_v9  ;;  %12652 = vst [vmem:[#allocation291_spill] sm:$0xff] %v9620_v49  ;;  %v9629_v36 = vmul.f32 %v2864_v57, %v12657_v52  ;;  %v12661_v37 = vld [vmem:[#allocation270_spill] sm:$0xff]  ;;  %v9638_v5 = vmul.f32 %v2867_v41, %v12663_v61  ;;  %v9641_v40 = vmul.f32 %v2868_v11, %v12665_v28  ;;  %v12667_v12 = vld [vmem:[#allocation415_spill] sm:$0xff] }
 0x364   : >> { %12654 = vst [vmem:[#allocation305_spill] sm:$0xff] %v9623_v58  ;;  %12656 = vst [vmem:[#allocation292_spill] sm:$0xff] %v9626_v2  ;;  %v9635_v59 = vmul.f32 %v2866_v16, %v12661_v37  ;;  %v9644_v3 = vmul.f32 %v2869_v4, %v12667_v12  ;;  %v12669_v29 = vld [vmem:[#allocation284_spill] sm:$0xff]  ;;  %v12671_v57 = vld [vmem:[#allocation341_spill] sm:$0xff] }
 0x365   : >> { %12658 = vst [vmem:[#allocation328_spill] sm:$0xff] %v9629_v36  ;;  %12660 = vst [vmem:[#allocation268_spill] sm:$0xff] %v9632_v7  ;;  %v9647_v42 = vmul.f32 %v2870_v23, %v12669_v29  ;;  %v9651_v52 = vmul.f32 %v9246_v46, %v12671_v57  ;;  %v12672_v21 = vld [vmem:[#allocation344_spill] sm:$0xff]  ;;  %v12673_v47 = vld [vmem:[#allocation345_spill] sm:$0xff] }
 0x366   : >> { %12662 = vst [vmem:[#allocation293_spill] sm:$0xff] %v9635_v59  ;;  %12664 = vst [vmem:[#allocation295_spill] sm:$0xff] %v9638_v5  ;;  %v9655_v16 = vmul.f32 %v9248_v33, %v12672_v21  ;;  %v9659_v41 = vmul.f32 %v9250_v53, %v12673_v47  ;;  %v12674_v11 = vld [vmem:[#allocation348_spill] sm:$0xff]  ;;  %v12675_v4 = vld [vmem:[#allocation350_spill] sm:$0xff] }
 0x367   : >> { %12666 = vst [vmem:[#allocation296_spill] sm:$0xff] %v9641_v40  ;;  %12668 = vst [vmem:[#allocation297_spill] sm:$0xff] %v9644_v3  ;;  %v9663_v37 = vmul.f32 %v9252_v26, %v12674_v11  ;;  %v2906_v23 = vmul.f32 %v9254_v35, %v12675_v4  ;;  %v12676_v61 = vld [vmem:[#allocation351_spill] sm:$0xff]  ;;  %v12677_v12 = vld [vmem:[#allocation354_spill] sm:$0xff]  ;;  %v2913_v4 = vmul.f32 %v9268_v8, %v12682_v14 }
 0x368   : >> { %12670 = vst [vmem:[#allocation298_spill] sm:$0xff] %v9647_v42  ;;  %v2907_v28 = vmul.f32 %v9256_v10, %v12676_v61  ;;  %v2908_v29 = vmul.f32 %v9258_v38, %v12677_v12  ;;  %v12678_v57 = vld [vmem:[#allocation356_spill] sm:$0xff]  ;;  %v12679_v33 = vld [vmem:[#allocation359_spill] sm:$0xff]  ;;  %v12681_v11 = vld [vmem:[#allocation362_spill] sm:$0xff] }
 0x369   : >> { %v2909_v21 = vmul.f32 %v9260_v55, %v12678_v57  ;;  %v2910_v47 = vmul.f32 %v9262_v63, %v12679_v33  ;;  %v12680_v53 = vld [vmem:[#allocation360_spill] sm:$0xff]  ;;  %v2912_v26 = vmul.f32 %v9266_v30, %v12681_v11  ;;  %v12684_v10 = vld [vmem:[#allocation366_spill] sm:$0xff]  ;;  %v12685_v38 = vld [vmem:[#allocation367_spill] sm:$0xff] }
 0x36a   : >> { %v2911_v46 = vmul.f32 %v9264_v56, %v12680_v53  ;;  %v12683_v35 = vld [vmem:[#allocation364_spill] sm:$0xff]  ;;  %v2915_v12 = vmul.f32 %v9272_v31, %v12684_v10  ;;  %v2916_v57 = vmul.f32 %v9274_v13, %v12685_v38  ;;  %v12689_v53 = vld [vmem:[#allocation406_spill] sm:$0xff]  ;;  %v12691_v11 = vld [vmem:[#allocation421_spill] sm:$0xff] }
 0x36b   : >> { %v2914_v61 = vmul.f32 %v9270_v20, %v12683_v35  ;;  %v12686_v55 = vld [vmem:[#allocation368_spill] sm:$0xff]  ;;  %v2918_v56 = vmul.f32 %v12689_v53, %v12688_v45  ;;  %v2919_v30 = vmul.f32 %v12691_v11, %v12690_v34  ;;  %v12693_v14 = vld [vmem:[#allocation309_spill] sm:$0xff]  ;;  %v12696_v3 = vld [vmem:[#allocation262_spill] sm:$0xff] }
 0x36c   : >> { %v12687_v33 = vld [vmem:[#allocation420_spill] sm:$0xff]  ;;  %v2920_v8 = vmul.f32 %v12693_v14, %v12692_v22  ;;  %v12695_v35 = vld [vmem:[#allocation329_spill] sm:$0xff]  ;;  %v12697_v10 = vld [vmem:[#allocation315_spill] sm:$0xff] }
 0x36d   : >> { %v2917_v63 = vmul.f32 %v12687_v33, %v12686_v55  ;;  %v12694_v42 = vld [vmem:[#allocation372_spill] sm:$0xff]  ;;  %v2922_v31 = vmul.f32 %v12697_v10, %v12696_v3  ;;  %v12698_v40 = vld [vmem:[#allocation373_spill] sm:$0xff]  ;;  %v12699_v38 = vld [vmem:[#allocation319_spill] sm:$0xff] }
 0x36e   : >> { %v2921_v20 = vmul.f32 %v12695_v35, %v12694_v42  ;;  %v2923_v13 = vmul.f32 %v12699_v38, %v12698_v40  ;;  %v12700_v5 = vld [vmem:[#allocation374_spill] sm:$0xff]  ;;  %v12701_v55 = vld [vmem:[#allocation323_spill] sm:$0xff]  ;;  %v12703_v45 = vld [vmem:[#allocation301_spill] sm:$0xff] }
 0x36f   : >> { %v2924_v33 = vmul.f32 %v12701_v55, %v12700_v5  ;;  %v12702_v59 = vld [vmem:[#allocation375_spill] sm:$0xff]  ;;  %v12704_v7 = vld [vmem:[#allocation376_spill] sm:$0xff]  ;;  %v12705_v34 = vld [vmem:[#allocation330_spill] sm:$0xff] }
 0x370   : >> { %v2925_v53 = vmul.f32 %v12703_v45, %v12702_v59  ;;  %v2926_v11 = vmul.f32 %v12705_v34, %v12704_v7  ;;  %v12706_v36 = vld [vmem:[#allocation377_spill] sm:$0xff]  ;;  %v12707_v22 = vld [vmem:[#allocation331_spill] sm:$0xff]  ;;  %v12708_v2 = vld [vmem:[#allocation378_spill] sm:$0xff]  ;;  %v2933_v7 = vmax.f32 %v9557_v44, %v9651_v52  ;;  %v2942_v44 = vmax.f32 %v9584_v60, %v2911_v46 }
 0x371   : >> { %v2927_v14 = vmul.f32 %v12707_v22, %v12706_v36  ;;  %v12709_v42 = vld [vmem:[#allocation332_spill] sm:$0xff]  ;;  %v12710_v58 = vld [vmem:[#allocation263_spill] sm:$0xff]  ;;  %v12711_v3 = vld [vmem:[#allocation333_spill] sm:$0xff]  ;;  %v2934_v36 = vmax.f32 %v9560_v6, %v9655_v16  ;;  %v2943_v6 = vmax.f32 %v9587_v25, %v2912_v26  ;;  %v2944_v52 = vmax.f32 %v9590_v24, %v2913_v4 }
 0x372   : >> { %v2928_v35 = vmul.f32 %v12709_v42, %v12708_v2  ;;  %v2929_v10 = vmul.f32 %v12711_v3, %v12710_v58  ;;  %v12712_v49 = vld [vmem:[#allocation379_spill] sm:$0xff]  ;;  %v12713_v40 = vld [vmem:[#allocation334_spill] sm:$0xff]  ;;  %v12714_v9 = vld [vmem:[#allocation380_spill] sm:$0xff]  ;;  %v2935_v2 = vmax.f32 %v9563_v62, %v9659_v41  ;;  %v2936_v58 = vmax.f32 %v9566_v39, %v9663_v37 }
 0x373   : >> { %v2930_v38 = vmul.f32 %v12713_v40, %v12712_v49  ;;  %v12715_v5 = vld [vmem:[#allocation335_spill] sm:$0xff]  ;;  %v12716_v17 = vld [vmem:[#allocation381_spill] sm:$0xff]  ;;  %v12717_v59 = vld [vmem:[#allocation336_spill] sm:$0xff]  ;;  %v2937_v49 = vmax.f32 %v9569_v1, %v2906_v23  ;;  %v2938_v40 = vmax.f32 %v9572_v43, %v2907_v28  ;;  %v2945_v62 = vmax.f32 %v9593_v48, %v2914_v61 }
 0x374   : >> { %v2931_v55 = vmul.f32 %v12715_v5, %v12714_v9  ;;  %v2932_v45 = vmul.f32 %v12717_v59, %v12716_v17  ;;  %v2939_v9 = vmax.f32 %v9575_v15, %v2908_v29  ;;  %v2940_v17 = vmax.f32 %v9578_v50, %v2909_v21  ;;  %v12718_v16 = vld [vmem:[#allocation326_spill] sm:$0xff]  ;;  %v12720_v25 = vld [vmem:[#allocation291_spill] sm:$0xff]  ;;  %v12721_v41 = vld [vmem:[#allocation305_spill] sm:$0xff] }
 0x375   : >> { %v2941_v59 = vmax.f32 %v9581_v18, %v2910_v47  ;;  %v2946_v39 = vmax.f32 %v9596_v0, %v2915_v12  ;;  %v2947_v1 = vmax.f32 %v9599_v32, %v2916_v57  ;;  %v2948_v43 = vmax.f32 %v9602_v19, %v2917_v63  ;;  %v12719_v60 = vld [vmem:[#allocation290_spill] sm:$0xff]  ;;  %v12722_v37 = vld [vmem:[#allocation292_spill] sm:$0xff]  ;;  %v12725_v19 = vld [vmem:[#allocation293_spill] sm:$0xff] }
 0x376   : >> { %v2949_v15 = vmax.f32 %v9605_v54, %v2918_v56  ;;  %v2950_v50 = vmax.f32 %v9608_v51, %v2919_v30  ;;  %v2951_v18 = vmax.f32 %v9611_v27, %v2920_v8  ;;  %v2952_v46 = vmax.f32 %v12718_v16, %v2921_v20  ;;  %v12723_v23 = vld [vmem:[#allocation328_spill] sm:$0xff]  ;;  %v12726_v54 = vld [vmem:[#allocation295_spill] sm:$0xff]  ;;  %v12728_v27 = vld [vmem:[#allocation297_spill] sm:$0xff] }
 0x377   : >> { %v2953_v26 = vmax.f32 %v12719_v60, %v2922_v31  ;;  %v2954_v24 = vmax.f32 %v12720_v25, %v2923_v13  ;;  %v2955_v48 = vmax.f32 %v12721_v41, %v2924_v33  ;;  %v2956_v0 = vmax.f32 %v12722_v37, %v2925_v53  ;;  %v12724_v28 = vld [vmem:[#allocation268_spill] sm:$0xff]  ;;  %v12729_v29 = vld [vmem:[#allocation298_spill] sm:$0xff] }
 0x378   : >> { %v2957_v32 = vmax.f32 %v12723_v23, %v2926_v11  ;;  %v2958_v63 = vmax.f32 %v12724_v28, %v2927_v14  ;;  %v2959_v56 = vmax.f32 %v12725_v19, %v2928_v35  ;;  %v2960_v30 = vmax.f32 %v12726_v54, %v2929_v10  ;;  %v12727_v51 = vld [vmem:[#allocation296_spill] sm:$0xff] }
 0x379   : >> { %v2961_v8 = vmax.f32 %v12727_v51, %v2930_v38  ;;  %v2962_v20 = vmax.f32 %v12728_v27, %v2931_v55  ;;  %v2963_v31 = vmax.f32 %v12729_v29, %v2932_v45  ;;  %v2964_v21 = vmax.f32 %v2933_v7, %v2937_v49  ;;  %v12740_v54 = vld [vmem:[#allocation211_spill] sm:$0xff]  ;;  %v12744_v51 = vld [vmem:[#allocation343_spill] sm:$0xff]  ;;  %v12745_v27 = vld [vmem:[#allocation346_spill] sm:$0xff] }
 0x37a   : >> { %v2965_v13 = vmax.f32 %v2934_v36, %v2938_v40  ;;  %v2966_v47 = vmax.f32 %v2935_v2, %v2939_v9  ;;  %v2967_v4 = vmax.f32 %v2936_v58, %v2940_v17  ;;  %v12746_v29 = vld [vmem:[#allocation347_spill] sm:$0xff] }
 0x37b   : >> { %v2968_v61 = vmax.f32 %v2964_v21, %v2941_v59 }
 0x37c   : >> { %v2969_v12 = vmax.f32 %v2965_v13, %v2942_v44  ;;  %v2970_v57 = vmax.f32 %v2966_v47, %v2943_v6  ;;  %v2971_v33 = vmax.f32 %v2967_v4, %v2944_v52  ;;  %v12747_v13 = vld [vmem:[#allocation349_spill] sm:$0xff]  ;;  %v12748_v4 = vld [vmem:[#allocation388_spill] sm:$0xff] }
 0x37d   : >> { %v2972_v53 = vmax.f32 %v2968_v61, %v2945_v62 }
 0x37e   : >> { %v2973_v11 = vmax.f32 %v2969_v12, %v2946_v39  ;;  %v2974_v14 = vmax.f32 %v2970_v57, %v2947_v1  ;;  %v2975_v35 = vmax.f32 %v2971_v33, %v2948_v43  ;;  %v12730_v1 = vld [vmem:[#allocation434_spill] sm:$0xff]  ;;  %v12749_v12 = vld [vmem:[#allocation352_spill] sm:$0xff]  ;;  %v12750_v33 = vld [vmem:[#allocation353_spill] sm:$0xff] }
 0x37f   : >> { %v2976_v16 = vmax.f32 %v2972_v53, %v2949_v15  ;;  %v12731_v15 = vld [vmem:[#allocation450_spill] sm:$0xff] }
 0x380   : >> { %v2977_v10 = vmax.f32 %v2973_v11, %v2950_v50  ;;  %v2978_v60 = vmax.f32 %v2974_v14, %v2951_v18  ;;  %v2979_v38 = vmax.f32 %v2975_v35, %v2952_v46  ;;  %v12732_v18 = vld [vmem:[#allocation437_spill] sm:$0xff]  ;;  %v12751_v11 = vld [vmem:[#allocation355_spill] sm:$0xff] }
 0x381   : >> { %v2980_v25 = vmax.f32 %v2976_v16, %v2953_v26  ;;  %v12733_v26 = vld [vmem:[#allocation337_spill] sm:$0xff] }
 0x382   : >> { %v2981_v55 = vmax.f32 %v2977_v10, %v2954_v24  ;;  %v2982_v41 = vmax.f32 %v2978_v60, %v2955_v48  ;;  %v2983_v45 = vmax.f32 %v2979_v38, %v2956_v0  ;;  %v12734_v48 = vld [vmem:[#allocation338_spill] sm:$0xff]  ;;  %v12735_v0 = vld [vmem:[#allocation339_spill] sm:$0xff]  ;;  %v12752_v35 = vld [vmem:[#allocation357_spill] sm:$0xff] }
 0x383   : >> { %v2984_v7 = vmax.f32 %v2980_v25, %v2957_v32  ;;  %v12736_v32 = vld [vmem:[#allocation340_spill] sm:$0xff]  ;;  %v12753_v10 = vld [vmem:[#allocation358_spill] sm:$0xff]  ;;  %v12754_v38 = vld [vmem:[#allocation361_spill] sm:$0xff] }
 0x384   : >> { %v2985_v40 = vmax.f32 %v2981_v55, %v2958_v63  ;;  %v2986_v36 = vmax.f32 %v2982_v41, %v2959_v56  ;;  %v2987_v2 = vmax.f32 %v2983_v45, %v2960_v30  ;;  %v12737_v63 = vld [vmem:[#allocation342_spill] sm:$0xff]  ;;  %v12738_v56 = vld [vmem:[#allocation212_spill] sm:$0xff]  ;;  %v12742_v30 = vld [vmem:[#allocation210_spill] sm:$0xff] }
 0x385   : >> { %v2988_v59 = vmax.f32 %v2984_v7, %v2961_v8  ;;  %v12755_v55 = vld [vmem:[#allocation365_spill] sm:$0xff]  ;;  %v12756_v45 = vld [vmem:[#allocation260_spill] sm:$0xff] }
 0x386   : >> { %v2989_v58 = vmax.f32 %v2985_v40, %v2962_v20  ;;  %v2990_v49 = vmax.f32 %v2986_v36, %v2963_v31  ;;  %v12757_v40 = vld [vmem:[#allocation261_spill] sm:$0xff] }
 0x388   : >> { %v2991_v9 = vmax.f32 %v2988_v59, %v2989_v58  ;;  %v2992_v17 = vmax.f32 %v2990_v49, %v2987_v2  ;;  %v12758_v59 = vld [vmem:[#allocation265_spill] sm:$0xff]  ;;  %v12759_v49 = vld [vmem:[#allocation264_spill] sm:$0xff] }
 0x38a   : >> { %v2993_v44 = vmax.f32 %v2991_v9, %v2992_v17  ;;  %v12760_v17 = vld [vmem:[#allocation327_spill] sm:$0xff] }
 0x38c   : >> { %v2994_v6 = vmax.f32 %v2993_v44, 1e-12 }
 0x38e   : >> { %4351 = vrcp.f32 %v2994_v6  ;;  %v12761_v6 = vld [vmem:[#allocation266_spill] sm:$0xff] }
 0x398   : >> { %v4352_v52 = vpop.eup %4351 }
 0x399   : >> { %v2996_v62 = vmul.f32 0.99, %v4352_v52 }
 0x39b   : >> { %v9754_v39 = vmin.f32 %v2996_v62, 1.0  ;;  %v12762_v62 = vld [vmem:[#allocation267_spill] sm:$0xff] }
 0x39d   : >> { %v2998_v43 = vmul.f32 %v9754_v39, %v12730_v1  ;;  %v3000_v50 = vmul.f32 %v9754_v39, %v12731_v15  ;;  %v3002_v46 = vmul.f32 %v9754_v39, %v12732_v18  ;;  %v3004_v24 = vmul.f32 %v9754_v39, %v12733_v26  ;;  %v12764_v18 = vld [vmem:[#allocation322_spill] sm:$0xff]  ;;  %v12765_v26 = vld [vmem:[#allocation287_spill] sm:$0xff] }
 0x39e   : >> { %v3005_v37 = vmul.f32 %v9754_v39, %v12734_v48  ;;  %v3006_v23 = vmul.f32 %v9754_v39, %v12735_v0  ;;  %v3007_v28 = vmul.f32 %v9754_v39, %v12736_v32  ;;  %v3008_v19 = vmul.f32 %v9754_v39, %v12737_v63  ;;  %v12766_v0 = vld [vmem:[#allocation324_spill] sm:$0xff] }
 0x39f   : >> { %v9773_v21 = vadd.f32 %v12738_v56, %v2998_v43   ;;  %v9776_v36 = vadd.f32 %v12740_v54, %v3000_v50   ;;  %v9779_v50 = vadd.f32 %v12742_v30, %v3002_v46   ;;  %v3009_v8 = vmul.f32 %v9754_v39, %v12744_v51  ;;  %v12763_v43 = vld [vmem:[#allocation286_spill] sm:$0xff]  ;;  %v12767_v63 = vld [vmem:[#allocation288_spill] sm:$0xff]  ;;  %v12768_v54 = vld [vmem:[#allocation325_spill] sm:$0xff] }
 0x3a0   : >> { %v3010_v20 = vmul.f32 %v9754_v39, %v12745_v27  ;;  %v3011_v31 = vmul.f32 %v9754_v39, %v12746_v29  ;;  %v3012_v47 = vmul.f32 %v9754_v39, %v12747_v13  ;;  %v3013_v61 = vmul.f32 %v9754_v39, %v12748_v4  ;;  %v12769_v51 = vld [vmem:[#allocation289_spill] sm:$0xff]  ;;  %v12770_v29 = vld [vmem:[#allocation209_spill] sm:$0xff] }
 0x3a1   : >> { %12739 = vst [vmem:[#allocation468_spill] sm:$0xff] %v9773_v21  ;;  %12741 = vst [vmem:[#allocation469_spill] sm:$0xff] %v9776_v36  ;;  %v3014_v57 = vmul.f32 %v9754_v39, %v12749_v12  ;;  %v3015_v53 = vmul.f32 %v9754_v39, %v12750_v33  ;;  %v3016_v14 = vmul.f32 %v9754_v39, %v12751_v11  ;;  %v12772_v13 = vld [vmem:[#allocation208_spill] sm:$0xff]  ;;  %v12775_v12 = vld [vmem:[#allocation207_spill] sm:$0xff] }
 0x3a2   : >> { %12743 = vst [vmem:[#allocation210_spill] sm:$0xff] %v9779_v50  ;;  %v3017_v16 = vmul.f32 %v9754_v39, %v12752_v35  ;;  %v3018_v60 = vmul.f32 %v9754_v39, %v12753_v10  ;;  %v3019_v25 = vmul.f32 %v9754_v39, %v12754_v38  ;;  %v3020_v41 = vmul.f32 %v9754_v39, %v12755_v55  ;;  %v12778_v11 = vld [vmem:[#allocation206_spill] sm:$0xff]  ;;  %v12780_v35 = vld [vmem:[#allocation205_spill] sm:$0xff]  ;;  %v12783_v55 = vld [vmem:[#allocation204_spill] sm:$0xff] }
 0x3a3   : >> { %v3021_v7 = vmul.f32 %v9754_v39, %v12756_v45  ;;  %v3022_v2 = vmul.f32 %v9754_v39, %v12757_v40  ;;  %v3023_v58 = vmul.f32 %v9754_v39, %v12758_v59  ;;  %v3024_v9 = vmul.f32 %v9754_v39, %v12759_v49  ;;  %v12785_v49 = vld [vmem:[#allocation259_spill] sm:$0xff] }
 0x3a4   : >> { %v3025_v44 = vmul.f32 %v9754_v39, %v12760_v17  ;;  %v3026_v52 = vmul.f32 %v9754_v39, %v12761_v6  ;;  %v3027_v1 = vmul.f32 %v9754_v39, %v12762_v62  ;;  %v3028_v15 = vmul.f32 %v9754_v39, %v12763_v43 }
 0x3a5   : >> { %v3029_v46 = vmul.f32 %v9754_v39, %v12764_v18  ;;  %v3030_v48 = vmul.f32 %v9754_v39, %v12765_v26  ;;  %v3031_v32 = vmul.f32 %v9754_v39, %v12766_v0  ;;  %v3032_v56 = vmul.f32 %v9754_v39, %v12767_v63 }
 0x3a6   : >> { %v3033_v30 = vmul.f32 %v9754_v39, %v12768_v54  ;;  %v3034_v27 = vmul.f32 %v9754_v39, %v12769_v51  ;;  %v9834_v62 = vadd.f32 %v12770_v29, %v3004_v24  ;;  %v9837_v4 = vadd.f32 %v12772_v13, %v3005_v37  ;;  %v12787_v24 = vld [vmem:[#allocation258_spill] sm:$0xff]  ;;  %v12789_v37 = vld [vmem:[#allocation203_spill] sm:$0xff] }
 0x3a7   : >> { %v9840_v33 = vadd.f32 %v12775_v12, %v3006_v23  ;;  %v9843_v26 = vadd.f32 %v12778_v11, %v3007_v28  ;;  %v9846_v38 = vadd.f32 %v12780_v35, %v3008_v19  ;;  %v9849_v45 = vadd.f32 %v12783_v55, %v3009_v8  ;;  %v12792_v23 = vld [vmem:[#allocation202_spill] sm:$0xff]  ;;  %v12794_v28 = vld [vmem:[#allocation257_spill] sm:$0xff]  ;;  %v12797_v19 = vld [vmem:[#allocation201_spill] sm:$0xff] }
 0x3a8   : >> { %12771 = vst [vmem:[#allocation211_spill] sm:$0xff] %v9834_v62  ;;  %12773 = vst [vmem:[#allocation212_spill] sm:$0xff] %v9837_v4  ;;  %v9852_v12 = vadd.f32 %v12785_v49, %v3010_v20  ;;  %v9855_v63 = vadd.f32 %v12787_v24, %v3011_v31  ;;  %v9858_v13 = vadd.f32 %v12789_v37, %v3012_v47  ;;  %v12799_v8 = vld [vmem:[#allocation256_spill] sm:$0xff]  ;;  %v12801_v20 = vld [vmem:[#allocation255_spill] sm:$0xff] }
 0x3a9   : >> { %12776 = vst [vmem:[#allocation207_spill] sm:$0xff] %v9840_v33  ;;  %12779 = vst [vmem:[#allocation206_spill] sm:$0xff] %v9843_v26  ;;  %v9861_v24 = vadd.f32 %v12792_v23, %v3013_v61  ;;  %v9864_v17 = vadd.f32 %v12794_v28, %v3014_v57  ;;  %v9867_v6 = vadd.f32 %v12797_v19, %v3015_v53  ;;  %v12803_v31 = vld [vmem:[#allocation254_spill] sm:$0xff]  ;;  %v12805_v47 = vld [vmem:[#allocation200_spill] sm:$0xff] }
 0x3aa   : >> { %12781 = vst [vmem:[#allocation205_spill] sm:$0xff] %v9846_v38  ;;  %12784 = vst [vmem:[#allocation204_spill] sm:$0xff] %v9849_v45  ;;  %v9870_v43 = vadd.f32 %v12799_v8, %v3016_v14  ;;  %v9873_v33 = vadd.f32 %v12801_v20, %v3017_v16  ;;  %v9876_v54 = vadd.f32 %v12803_v31, %v3018_v60  ;;  %v12807_v61 = vld [vmem:[#allocation199_spill] sm:$0xff]  ;;  %v12810_v57 = vld [vmem:[#allocation198_spill] sm:$0xff] }
 0x3ab   : >> { %12786 = vst [vmem:[#allocation208_spill] sm:$0xff] %v9852_v12  ;;  %12788 = vst [vmem:[#allocation209_spill] sm:$0xff] %v9855_v63  ;;  %v9879_v0 = vadd.f32 %v12805_v47, %v3019_v25  ;;  %v9882_v51 = vadd.f32 %v12807_v61, %v3020_v41  ;;  %v9885_v29 = vadd.f32 %v12810_v57, %v3021_v7  ;;  %v12813_v53 = vld [vmem:[#allocation253_spill] sm:$0xff]  ;;  %v12815_v14 = vld [vmem:[#allocation197_spill] sm:$0xff] }
 0x3ac   : >> { %12790 = vst [vmem:[#allocation203_spill] sm:$0xff] %v9858_v13  ;;  %12793 = vst [vmem:[#allocation202_spill] sm:$0xff] %v9861_v24  ;;  %v9888_v13 = vadd.f32 %v12813_v53, %v3022_v2  ;;  %v9891_v4 = vadd.f32 %v12815_v14, %v3023_v58  ;;  %v12817_v16 = vld [vmem:[#allocation196_spill] sm:$0xff]  ;;  %v12819_v60 = vld [vmem:[#allocation252_spill] sm:$0xff] }
 0x3ad   : >> { %12795 = vst [vmem:[#allocation470_spill] sm:$0xff] %v9864_v17  ;;  %12798 = vst [vmem:[#allocation201_spill] sm:$0xff] %v9867_v6  ;;  %v9894_v11 = vadd.f32 %v12817_v16, %v3024_v9  ;;  %v9897_v35 = vadd.f32 %v12819_v60, %v3025_v44  ;;  %v12821_v25 = vld [vmem:[#allocation195_spill] sm:$0xff]  ;;  %v12823_v41 = vld [vmem:[#allocation251_spill] sm:$0xff] }
 0x3ae   : >> { %12800 = vst [vmem:[#allocation471_spill] sm:$0xff] %v9870_v43  ;;  %12802 = vst [vmem:[#allocation472_spill] sm:$0xff] %v9873_v33  ;;  %v9900_v38 = vadd.f32 %v12821_v25, %v3026_v52  ;;  %v9903_v23 = vadd.f32 %v12823_v41, %v3027_v1  ;;  %v12824_v7 = vld [vmem:[#allocation250_spill] sm:$0xff]  ;;  %v12825_v2 = vld [vmem:[#allocation249_spill] sm:$0xff] }
 0x3af   : >> { %12804 = vst [vmem:[#allocation473_spill] sm:$0xff] %v9876_v54  ;;  %12806 = vst [vmem:[#allocation200_spill] sm:$0xff] %v9879_v0  ;;  %v12818_v33 = vmov %v9894_v11  ;;  %v12820_v5 = vmov %v9897_v35  ;;  %v9909_v49 = vadd.f32 %v12825_v2, %v3029_v46  ;;  %v12826_v58 = vld [vmem:[#allocation248_spill] sm:$0xff]  ;;  %v12827_v9 = vld [vmem:[#allocation247_spill] sm:$0xff] }
 0x3b0   : >> { %12808 = vst [vmem:[#allocation199_spill] sm:$0xff] %v9882_v51  ;;  %12811 = vst [vmem:[#allocation198_spill] sm:$0xff] %v9885_v29  ;;  %v9906_v51 = vadd.f32 %v12824_v7, %v3028_v15  ;;  %v9912_v0 = vadd.f32 %v12826_v58, %v3030_v48  ;;  %v9915_v31 = vadd.f32 %v12827_v9, %v3031_v32  ;;  %v12828_v44 = vld [vmem:[#allocation246_spill] sm:$0xff]  ;;  %v12829_v52 = vld [vmem:[#allocation245_spill] sm:$0xff]  ;;  %v12845_v11 = vmov %v9900_v38 }
 0x3b1   : >> { %12814 = vst [vmem:[#allocation474_spill] sm:$0xff] %v9888_v13  ;;  %12816 = vst [vmem:[#allocation197_spill] sm:$0xff] %v9891_v4  ;;  %v9918_v32 = vadd.f32 %v12828_v44, %v3032_v56  ;;  %v9921_v61 = vadd.f32 %v12829_v52, %v3033_v30  ;;  %v12830_v1 = vld [vmem:[#allocation244_spill] sm:$0xff]  ;;  %v12831_v46 = vld [vmem:[#allocation451_spill] sm:$0xff]  ;;  %v12846_v18 = vmov %v12845_v11  ;;  %v12913_v49 = vmax.f32 %v9909_v49, 1e-10  }
 0x3b2   : >> { %12822 = vst [vmem:[#allocation195_spill] sm:$0xff] %v9900_v38  ;;  %v9924_v60 = vadd.f32 %v12830_v1, %v3034_v27  ;;  %v9931_v48 = vmul.f32 %v9754_v39, %v12831_v46  ;;  %v12833_v30 = vld [vmem:[#allocation416_spill] sm:$0xff]  ;;  %v12834_v55 = vld [vmem:[#allocation402_spill] sm:$0xff]  ;;  %v12842_v29 = vld [vmem:[#allocation439_spill] sm:$0xff]  ;;  %v12911_v31 = vmax.f32 %v9915_v31, 1e-10  }
 0x3b3   : >> { %v9938_v27 = vmul.f32 %v9754_v39, %v12833_v30  ;;  %v9945_v45 = vmul.f32 %v9754_v39, %v12834_v55  ;;  %v12837_v6 = vld [vmem:[#allocation438_spill] sm:$0xff]  ;;  %v12840_v20 = vld [vmem:[#allocation452_spill] sm:$0xff]  ;;  %v9966_v53 = vmul.f32 %v9754_v39, %v12842_v29  ;;  %v12844_v4 = vld [vmem:[#allocation453_spill] sm:$0xff]  ;;  %v12909_v61 = vmax.f32 %v9921_v61, 1e-10  }
 0x3b4   : >> { %v9952_v8 = vmul.f32 %v9754_v39, %v12837_v6  ;;  %v9959_v47 = vmul.f32 %v9754_v39, %v12840_v20  ;;  %v9973_v16 = vmul.f32 %v9754_v39, %v12844_v4  ;;  %v12847_v35 = vld [vmem:[#allocation417_spill] sm:$0xff]  ;;  %v12848_v41 = vld [vmem:[#allocation403_spill] sm:$0xff]  ;;  %v12849_v52 = vld [vmem:[#allocation440_spill] sm:$0xff]  ;;  %v12908_v60 = vmax.f32 %v9924_v60, 1e-10  }
 0x3b5   : >> { %v9980_v38 = vmul.f32 %v9754_v39, %v12847_v35  ;;  %v3105_v9 = vmul.f32 %v9754_v39, %v12848_v41  ;;  %v3106_v1 = vmul.f32 %v9754_v39, %v12849_v52  ;;  %v12850_v46 = vld [vmem:[#allocation418_spill] sm:$0xff]  ;;  %v12851_v30 = vld [vmem:[#allocation404_spill] sm:$0xff]  ;;  %v12852_v17 = vld [vmem:[#allocation441_spill] sm:$0xff]  ;;  %v12910_v32 = vmax.f32 %v9918_v32, 1e-10  }
 0x3b6   : >> { %v3107_v56 = vmul.f32 %v9754_v39, %v12850_v46  ;;  %v3108_v55 = vmul.f32 %v9754_v39, %v12851_v30  ;;  %v3109_v19 = vmul.f32 %v9754_v39, %v12852_v17  ;;  %v12853_v6 = vld [vmem:[#allocation419_spill] sm:$0xff]  ;;  %v12854_v20 = vld [vmem:[#allocation405_spill] sm:$0xff]  ;;  %v12855_v29 = vld [vmem:[#allocation420_spill] sm:$0xff]  ;;  %v12912_v0 = vmax.f32 %v9912_v0, 1e-10  }
 0x3b7   : >> { %v3110_v43 = vmul.f32 %v9754_v39, %v12853_v6  ;;  %v3111_v57 = vmul.f32 %v9754_v39, %v12854_v20  ;;  %v3112_v13 = vmul.f32 %v9754_v39, %v12855_v29  ;;  %v12856_v14 = vld [vmem:[#allocation406_spill] sm:$0xff]  ;;  %v12857_v11 = vld [vmem:[#allocation421_spill] sm:$0xff]  ;;  %v12860_v17 = vld [vmem:[#allocation315_spill] sm:$0xff]  ;;  %v12914_v51 = vmax.f32 %v9906_v51, 1e-10  }
 0x3b8   : >> { %v3113_v4 = vmul.f32 %v9754_v39, %v12856_v14  ;;  %v3114_v35 = vmul.f32 %v9754_v39, %v12857_v11  ;;  %v12858_v41 = vld [vmem:[#allocation309_spill] sm:$0xff]  ;;  %v3117_v6 = vmul.f32 %v9754_v39, %v12860_v17  ;;  %v12861_v15 = vld [vmem:[#allocation319_spill] sm:$0xff]  ;;  %v3121_v11 = vmul.f32 %v9754_v39, %v12705_v34  ;;  %v12864_v12 = vld [vmem:[#allocation334_spill] sm:$0xff] }
 0x3b9   : >> { %v3115_v52 = vmul.f32 %v9754_v39, %v12858_v41  ;;  %v12859_v46 = vld [vmem:[#allocation329_spill] sm:$0xff]  ;;  %v3118_v20 = vmul.f32 %v9754_v39, %v12861_v15  ;;  %v12862_v7 = vld [vmem:[#allocation323_spill] sm:$0xff]  ;;  %v3122_v41 = vmul.f32 %v9754_v39, %v12707_v22  ;;  %v3124_v17 = vmul.f32 %v9754_v39, %v12711_v3  ;;  %v12866_v44 = vld [vmem:[#allocation336_spill] sm:$0xff] }
 0x3ba   : >> { %v3116_v30 = vmul.f32 %v9754_v39, %v12859_v46  ;;  %v3119_v29 = vmul.f32 %v9754_v39, %v12862_v7  ;;  %v12863_v2 = vld [vmem:[#allocation301_spill] sm:$0xff]  ;;  %v3123_v46 = vmul.f32 %v9754_v39, %v12709_v42  ;;  %v3125_v15 = vmul.f32 %v9754_v39, %v12864_v12  ;;  %v12865_v58 = vld [vmem:[#allocation335_spill] sm:$0xff]  ;;  %v12868_v22 = vld [vmem:[#allocation242_spill] sm:$0xff] }
 0x3bb   : >> { %v3120_v14 = vmul.f32 %v9754_v39, %v12863_v2  ;;  %v3126_v7 = vmul.f32 %v9754_v39, %v12865_v58  ;;  %v3127_v2 = vmul.f32 %v9754_v39, %v12866_v44  ;;  %v12867_v34 = vld [vmem:[#allocation243_spill] sm:$0xff]  ;;  %v3129_v63 = vsub.f32 %v12868_v22, %v9938_v27  ;;  %v12869_v42 = vld [vmem:[#allocation241_spill] sm:$0xff]  ;;  %v12870_v3 = vld [vmem:[#allocation240_spill] sm:$0xff] }
 0x3bc   : >> { %v3128_v50 = vsub.f32 %v12867_v34, %v9931_v48  ;;  %v3130_v21 = vsub.f32 %v12869_v42, %v9945_v45  ;;  %v3131_v62 = vsub.f32 %v12870_v3, %v9952_v8  ;;  %v12871_v12 = vld [vmem:[#allocation239_spill] sm:$0xff]  ;;  %v12872_v58 = vld [vmem:[#allocation238_spill] sm:$0xff]  ;;  %v12873_v39 = vld [vmem:[#allocation237_spill] sm:$0xff]  ;;  %v12915_v23 = vmax.f32 %v9903_v23, 1e-10  }
 0x3bd   : >> { %v3132_v36 = vsub.f32 %v12871_v12, %v9959_v47  ;;  %v3133_v37 = vsub.f32 %v12872_v58, %v9966_v53  ;;  %v3134_v44 = vsub.f32 %v12873_v39, %v9973_v16  ;;  %v12874_v48 = vld [vmem:[#allocation236_spill] sm:$0xff]  ;;  %v12875_v25 = vld [vmem:[#allocation235_spill] sm:$0xff]  ;;  %v12876_v22 = vld [vmem:[#allocation234_spill] sm:$0xff]  ;;  %v12916_v18 = vmax.f32 %v12846_v18, 1e-10  }
 0x3be   : >> { %v3135_v34 = vsub.f32 %v12874_v48, %v9980_v38  ;;  %v3136_v27 = vsub.f32 %v12875_v25, %v3105_v9  ;;  %v3137_v10 = vsub.f32 %v12876_v22, %v3106_v1  ;;  %v12877_v45 = vld [vmem:[#allocation233_spill] sm:$0xff]  ;;  %v12878_v54 = vld [vmem:[#allocation232_spill] sm:$0xff]  ;;  %v12879_v3 = vld [vmem:[#allocation231_spill] sm:$0xff]  ;;  %v12918_v5 = vmax.f32 %v12820_v5, 1e-10  }
 0x3bf   : >> { %v3138_v42 = vsub.f32 %v12877_v45, %v3107_v56  ;;  %v3139_v8 = vsub.f32 %v12878_v54, %v3108_v55  ;;  %v3140_v40 = vsub.f32 %v12879_v3, %v3109_v19  ;;  %v12880_v47 = vld [vmem:[#allocation230_spill] sm:$0xff]  ;;  %v12881_v24 = vld [vmem:[#allocation229_spill] sm:$0xff]  ;;  %v12882_v58 = vld [vmem:[#allocation228_spill] sm:$0xff]  ;;  %12917 = vst [vmem:[#allocation195_spill] sm:$0xff] %v12916_v18 }
 0x3c0   : >> { %v3141_v12 = vsub.f32 %v12880_v47, %v3110_v43  ;;  %v3142_v53 = vsub.f32 %v12881_v24, %v3111_v57  ;;  %v3143_v28 = vsub.f32 %v12882_v58, %v3112_v13  ;;  %v12883_v16 = vld [vmem:[#allocation227_spill] sm:$0xff]  ;;  %v12884_v26 = vld [vmem:[#allocation226_spill] sm:$0xff]  ;;  %v12885_v48 = vld [vmem:[#allocation225_spill] sm:$0xff]  ;;  %v10070_v57 = vmax.f32 %v3129_v63, 1e-10  }
 0x3c1   : >> { %v3144_v39 = vsub.f32 %v12883_v16, %v3113_v4  ;;  %v3145_v38 = vsub.f32 %v12884_v26, %v3114_v35  ;;  %v3146_v25 = vsub.f32 %v12885_v48, %v3115_v52  ;;  %v12886_v9 = vld [vmem:[#allocation224_spill] sm:$0xff]  ;;  %v12887_v22 = vld [vmem:[#allocation223_spill] sm:$0xff]  ;;  %v12888_v45 = vld [vmem:[#allocation222_spill] sm:$0xff]  ;;  %v10072_v13 = vmax.f32 %v3130_v21, 1e-10  }
 0x3c2   : >> { %v3147_v1 = vsub.f32 %v12886_v9, %v3116_v30  ;;  %v3148_v56 = vsub.f32 %v12887_v22, %v3117_v6  ;;  %v3149_v54 = vsub.f32 %v12888_v45, %v3118_v20  ;;  %v12889_v55 = vld [vmem:[#allocation221_spill] sm:$0xff]  ;;  %v12890_v3 = vld [vmem:[#allocation220_spill] sm:$0xff]  ;;  %v12891_v47 = vld [vmem:[#allocation219_spill] sm:$0xff]  ;;  %v12892_v58 = vmov %v10070_v57 }
 0x3c3   : >> { %v3150_v19 = vsub.f32 %v12889_v55, %v3119_v29  ;;  %v3151_v43 = vsub.f32 %v12890_v3, %v3120_v14  ;;  %v3152_v24 = vsub.f32 %v12891_v47, %v3121_v11  ;;  %v10068_v29 = vmax.f32 %v3128_v50, 1e-10   ;;  %v12894_v4 = vld [vmem:[#allocation218_spill] sm:$0xff]  ;;  %v12895_v52 = vld [vmem:[#allocation217_spill] sm:$0xff]  ;;  %v12896_v20 = vld [vmem:[#allocation216_spill] sm:$0xff] }
 0x3c4   : >> { %v12893_v26 = vmov %v10072_v13  ;;  %v3153_v35 = vsub.f32 %v12894_v4, %v3122_v41  ;;  %v3162_v30 = vmax.f32 %v3131_v62, 1e-10   ;;  %v3163_v6 = vmax.f32 %v3132_v36, 1e-10   ;;  %v12897_v48 = vld [vmem:[#allocation215_spill] sm:$0xff]  ;;  %v12898_v21 = vld [vmem:[#allocation214_spill] sm:$0xff] }
 0x3c5   : >> { %v3164_v11 = vmax.f32 %v3133_v37, 1e-10   ;;  %v3154_v16 = vsub.f32 %v12895_v52, %v3123_v46  ;;  %v3165_v22 = vmax.f32 %v3134_v44, 1e-10   ;;  %v3166_v4 = vmax.f32 %v3135_v34, 1e-10  }
 0x3c6   : >> { %v3167_v3 = vmax.f32 %v3136_v27, 1e-10   ;;  %v3155_v14 = vsub.f32 %v12896_v20, %v3124_v17  ;;  %v3168_v9 = vmax.f32 %v3137_v10, 1e-10   ;;  %v3169_v42 = vmax.f32 %v3138_v42, 1e-10  }
 0x3c7   : >> { %v3170_v50 = vmax.f32 %v3139_v8, 1e-10   ;;  %v3156_v63 = vsub.f32 %v12897_v48, %v3125_v15  ;;  %v3171_v59 = vmax.f32 %v3140_v40, 1e-10   ;;  %v3172_v41 = vmax.f32 %v3141_v12, 1e-10  }
 0x3c8   : >> { %v3173_v55 = vmax.f32 %v3142_v53, 1e-10   ;;  %v3157_v45 = vsub.f32 %v12898_v21, %v3126_v7  ;;  %v3174_v34 = vmax.f32 %v3143_v28, 1e-10   ;;  %v3175_v36 = vmax.f32 %v3144_v39, 1e-10  }
 0x3c9   : >> { %v3176_v57 = vmax.f32 %v3145_v38, 1e-10   ;;  %v12899_v62 = vld [vmem:[#allocation213_spill] sm:$0xff]  ;;  %v3177_v44 = vmax.f32 %v3146_v25, 1e-10   ;;  %v12906_v53 = vmov %v12893_v26  ;;  %v12924_v48 = vld [vmem:[#allocation474_spill] sm:$0xff] }
 0x3ca   : >> { %v3158_v37 = vsub.f32 %v12899_v62, %v3127_v2  ;;  %v3178_v46 = vmax.f32 %v3147_v1, 1e-10   ;;  %v3179_v1 = vmax.f32 %v3148_v56, 1e-10   ;;  %v3180_v20 = vmax.f32 %v3149_v54, 1e-10  }
 0x3cb   : >> { %v3181_v8 = vmax.f32 %v3150_v19, 1e-10   ;;  %v3182_v27 = vmax.f32 %v3151_v43, 1e-10   ;;  %v3183_v38 = vmax.f32 %v3152_v24, 1e-10   ;;  %v12903_v19 = vmov %v3175_v36 }
 0x3cc   : >> { %v3184_v10 = vmax.f32 %v3153_v35, 1e-10   ;;  %v3185_v56 = vmax.f32 %v3154_v16, 1e-10   ;;  %v3186_v17 = vmax.f32 %v3155_v14, 1e-10   ;;  %v12904_v16 = vmov %v3171_v59 }
 0x3cd   : >> { %v3187_v52 = vmax.f32 %v3156_v63, 1e-10   ;;  %v3188_v47 = vmax.f32 %v3157_v45, 1e-10   ;;  %v3189_v13 = vmax.f32 %v3158_v37, 1e-10   ;;  %v12902_v45 = vmov %v3177_v44 }
 0x3ce   : >> { %v12901_v14 = vmov %v3184_v10  ;;  %v12905_v35 = vmov %v3170_v50  ;;  %v12907_v43 = vmov %v12892_v58  ;;  %v12919_v28 = vmax.f32 %v12818_v33, 1e-10   ;;  %v12921_v37 = vld [vmem:[#allocation197_spill] sm:$0xff]  ;;  %v12926_v58 = vld [vmem:[#allocation198_spill] sm:$0xff]  ;;  %v12929_v40 = vld [vmem:[#allocation199_spill] sm:$0xff] }
 0x3cf   : >> { %v12922_v37 = vmax.f32 %v12921_v37, 1e-10   ;;  %v12925_v48 = vmax.f32 %v12924_v48, 1e-10   ;;  %v12927_v58 = vmax.f32 %v12926_v58, 1e-10  }
 0x3d0   : >> { %12920 = vst [vmem:[#allocation196_spill] sm:$0xff] %v12919_v28  ;;  %v12930_v40 = vmax.f32 %v12929_v40, 1e-10   ;;  %v12932_v59 = vld [vmem:[#allocation200_spill] sm:$0xff]  ;;  %v12935_v54 = vld [vmem:[#allocation473_spill] sm:$0xff]  ;;  %v12937_v33 = vld [vmem:[#allocation472_spill] sm:$0xff] }
 0x3d1   : >> { %12923 = vst [vmem:[#allocation197_spill] sm:$0xff] %v12922_v37  ;;  %12928 = vst [vmem:[#allocation198_spill] sm:$0xff] %v12927_v58  ;;  %v12933_v59 = vmax.f32 %v12932_v59, 1e-10   ;;  %v12936_v54 = vmax.f32 %v12935_v54, 1e-10  }
 0x3d2   : >> { %12931 = vst [vmem:[#allocation199_spill] sm:$0xff] %v12930_v40  ;;  %v12938_v33 = vmax.f32 %v12937_v33, 1e-10   ;;  %v12939_v25 = vld [vmem:[#allocation471_spill] sm:$0xff]  ;;  %v12941_v7 = vld [vmem:[#allocation201_spill] sm:$0xff]  ;;  %v12944_v44 = vld [vmem:[#allocation470_spill] sm:$0xff] }
 0x3d3   : >> { %12934 = vst [vmem:[#allocation200_spill] sm:$0xff] %v12933_v59  ;;  %v12940_v25 = vmax.f32 %v12939_v25, 1e-10   ;;  %v12942_v7 = vmax.f32 %v12941_v7, 1e-10   ;;  %v12946_v24 = vld [vmem:[#allocation202_spill] sm:$0xff] }
 0x3d4   : >> { %v12945_v44 = vmax.f32 %v12944_v44, 1e-10   ;;  %v12947_v24 = vmax.f32 %v12946_v24, 1e-10   ;;  %v12949_v40 = vld [vmem:[#allocation203_spill] sm:$0xff]  ;;  %v12952_v63 = vld [vmem:[#allocation209_spill] sm:$0xff] }
 0x3d5   : >> { %12943 = vst [vmem:[#allocation201_spill] sm:$0xff] %v12942_v7  ;;  %v12950_v59 = vmax.f32 %v12949_v40, 1e-10   ;;  %v12953_v63 = vmax.f32 %v12952_v63, 1e-10   ;;  %v12954_v12 = vld [vmem:[#allocation208_spill] sm:$0xff] }
 0x3d6   : >> { %12948 = vst [vmem:[#allocation202_spill] sm:$0xff] %v12947_v24  ;;  %v12955_v12 = vmax.f32 %v12954_v12, 1e-10   ;;  %v12956_v10 = vld [vmem:[#allocation204_spill] sm:$0xff]  ;;  %v12959_v2 = vld [vmem:[#allocation205_spill] sm:$0xff]  ;;  %v12962_v26 = vld [vmem:[#allocation206_spill] sm:$0xff] }
 0x3d7   : >> { %12951 = vst [vmem:[#allocation203_spill] sm:$0xff] %v12950_v59  ;;  %v12957_v10 = vmax.f32 %v12956_v10, 1e-10   ;;  %v12960_v2 = vmax.f32 %v12959_v2, 1e-10   ;;  %v12965_v15 = vld [vmem:[#allocation207_spill] sm:$0xff] }
 0x3d8   : >> { %v12963_v26 = vmax.f32 %v12962_v26, 1e-10   ;;  %v12966_v15 = vmax.f32 %v12965_v15, 1e-10   ;;  %v12968_v39 = vld [vmem:[#allocation212_spill] sm:$0xff]  ;;  %v12971_v62 = vld [vmem:[#allocation211_spill] sm:$0xff] }
 0x3d9   : >> { %12958 = vst [vmem:[#allocation204_spill] sm:$0xff] %v12957_v10  ;;  %12961 = vst [vmem:[#allocation205_spill] sm:$0xff] %v12960_v2  ;;  %v12969_v39 = vmax.f32 %v12968_v39, 1e-10   ;;  %v12972_v62 = vmax.f32 %v12971_v62, 1e-10  }
 0x3da   : >> { %12964 = vst [vmem:[#allocation206_spill] sm:$0xff] %v12963_v26  ;;  %12967 = vst [vmem:[#allocation207_spill] sm:$0xff] %v12966_v15  ;;  %v12974_v50 = vld [vmem:[#allocation210_spill] sm:$0xff]  ;;  %v12978_v21 = vld [vmem:[#allocation468_spill] sm:$0xff]  ;;  %1587 = sbr.rel (!%p10083_p13) target bundleno = 447 (0x1bf), region = 164 }
 0x3db   : >> { %12970 = vst [vmem:[#allocation208_spill] sm:$0xff] %v12969_v39  ;;  %12973 = vst [vmem:[#allocation209_spill] sm:$0xff] %v12972_v62  ;;  %v12976_v36 = vld [vmem:[#allocation469_spill] sm:$0xff]  ;;  %v12981_v18 = vld [vmem:[#allocation468_spill] sm:$0xff] (%p10083_p13) }
 0x3dc   : >> { %12975 = vst [vmem:[#allocation210_spill] sm:$0xff] %v12974_v50  ;;  %12977 = vst [vmem:[#allocation211_spill] sm:$0xff] %v12976_v36  ;;  %v12982_v28 = vld [vmem:[#allocation469_spill] sm:$0xff] (%p10083_p13) }
 0x3dd   : >> { %12979 = vst [vmem:[#allocation212_spill] sm:$0xff] %v12978_v21  ;;  %3190 = vst [vmem:[%s6790_s9] sm:$0xff] (%p10083_p13), %v12981_v18 }
 0x3de   : > { %3191 = vst [vmem:[%s6790_s9 + $0x8] sm:$0xff] (%p10083_p13), %v12982_v28 }
 0x3e1   : > { %4409 = shalt.err (!%p4406_p12)
}
 0x3e2   : > { %s4410_s9 = scalar_lea.hbm %s10301_s19, 256  ;;  %s4414_s5 = scalar_lea.hbm %s10380_s6, 512 }
 0x3e3   : > { %p4411_p0 = scmp.ne.s32.totalorder %s10301_s19, %s4410_s9  ;;  %p4415_p5 = scmp.lt.u32.totalorder %s10301_s19, %s10380_s6 }
 0x3e4   : > { %p4416_p6 = scmp.lt.u32.totalorder %s4414_s5, %s4410_s9  ;;  %p4418_p1 = scmp.lt.u32.totalorder %s4410_s9, %s10301_s19 }
 0x3e5   : > { %p4412_p2 = pnand %p4411_p0, %p12983_p3 }
 0x3e6   : > { %p4417_p13 = por %p4416_p6, %p4415_p5 }
 0x3e7   : > { %p4413_p4 = pneg %p4412_p2 }
 0x3e8   : > { %p4419_p7 = por %p4418_p1, %p4417_p13 }
 0x3ea   : > { %p4420_p8 = pnand %p4419_p7, %p4413_p4 }
 0x3ec   : > { %4423 = shalt.err (!%p4420_p8)
}
 0x3ed   : > { %s5037_s21 = smov 128   ;;  %s5038_s17 = smov 256  }
 0x3ee   : > { %s5039_s20 = smov 8   ;;  %s10335_s29 = scalar_lea.hbm %s10381_s7, %s3629_s16 }
 0x3ef   : > { %3639 = dma.vmem_to_hbm [thread:$0]  (%p12983_p3), %s10304_s11, 256, %s10301_s19, %s3193_s15, %s5037_s21, %s5038_s17, %s5039_s20  }
 0x3f0   : > { %s3226_s5 = sshll.u32 %s6784_s12, 4  ;;  %s3198_s22 = scalar_lea.sflag [#allocation10], %s5198_s18  ;;  %s3227_s5 = int_to_ptr.vmem [resolvable:$true] %s3226_s5 }
 0x3f1   : > { %s4424_s23 = scalar_lea.vmem %s3227_s5, 128  ;;  %s5040_s0 = smov [#allocation9]  }
 0x3f2   : > { %p4425_p9 = scmp.ne.s32.totalorder %s3227_s5, %s4424_s23  ;;  %s4428_s1 = sshll.u32 %s5040_s0, 4  ;;  %s4429_s1 = int_to_ptr.vmem [resolvable:$false] %s4428_s1 }
 0x3f3   : > { %s4430_s2 = scalar_lea.vmem %s4429_s1, 256  ;;  %p4431_p12 = scmp.lt.s32.totalorder %s3227_s5, %s4429_s1 }
 0x3f4   : > { %p4426_p10 = pnand %p4425_p9, %p12983_p3  ;;  %p4432_p0 = scmp.lt.s32.totalorder %s4430_s2, %s4424_s23 }
 0x3f6   : > { %p4427_p11 = pneg %p4426_p10  ;;  %p4433_p2 = por %p4432_p0, %p4431_p12 }
 0x3f8   : > { %p4434_p4 = pnand %p4433_p2, %p4427_p11 }
 0x3fa   : > { %4437 = shalt.err (!%p4434_p4)
}
 0x3fb   : > { %s4438_s28 = scalar_lea.hbm %s10335_s29, 128  ;;  %s4442_s0 = scalar_lea.hbm %s10381_s7, 256 }
 0x3fc   : > { %p4439_p5 = scmp.ne.s32.totalorder %s10335_s29, %s4438_s28  ;;  %p4443_p1 = scmp.lt.u32.totalorder %s10335_s29, %s10381_s7 }
 0x3fd   : > { %p4444_p7 = scmp.lt.u32.totalorder %s4442_s0, %s4438_s28  ;;  %p4446_p9 = scmp.lt.u32.totalorder %s4438_s28, %s10335_s29 }
 0x3fe   : > { %p4440_p6 = pnand %p4439_p5, %p12983_p3 }
 0x3ff   : > { %p4445_p8 = por %p4444_p7, %p4443_p1 }
 0x400   : > { %p4441_p13 = pneg %p4440_p6 }
 0x401   : > { %p4447_p10 = por %p4446_p9, %p4445_p8 }
 0x403   : > { %p4448_p11 = pnand %p4447_p10, %p4441_p13 }
 0x405   : > { %4451 = shalt.err (!%p4448_p11)
}
 0x406   : > { %3640 = dma.vmem_to_hbm [thread:$0]  (%p12983_p3), %s3227_s5, 128, %s10335_s29, %s3198_s22  }
 0x407 PF: > { %s3238_s2 = sand.u32 1, %s4750_s24   ;;  %p12984_p12 = scmp.ne.s32.totalorder %s10986_s14, 0 }
 0x408   : > { %p12985_p0 = scmp.ge.s32.totalorder %s4762_s27, 2  ;;  %s3239_s19 = scalar_lea.sflag [#allocation5], %s3238_s2 }
 0x40a   : > { %p3648_p2 = pnand %p12985_p0, %p12984_p12 }
 0x40c   : > { %4741 = dma.done.wait (!%p3648_p2), %s3239_s19, 256  }
 0x40d   : > { %4743 = vsyncadd (!%p3648_p2), %s3239_s19, 4294967040  ;;  %s3248_s11 = scalar_lea.sflag [#allocation10], %s3238_s2 }
 0x40e   : > { %4745 = dma.done.wait (!%p3648_p2), %s3248_s11, 128  }
 0x40f   : > { %4747 = vsyncadd (!%p3648_p2), %s3248_s11, 4294967168  ;;  %p25_p3 = scmp.ge.s32.totalorder %s5106_s30, 4   ;;  %s12986_s24 = smov %s4754_s25 }
 0x410   : > { %s12987_s25 = smov %s4758_s26  ;;  %s12988_s26 = smov %s5118_s10 }
 0x411   : > { %s12989_s27 = smov %s5106_s30  ;;  %27 = sbr.rel (!%p25_p3) target bundleno = 13 (0xd), region = 175 }
 0x418   :  { %3253 = vsyncpa [#allocation4], 1 }
 0x419   :  { %3255 = vsyncpa [#allocation4 + $0x1], 1 }
 0x41a   :  { %3256 = vsyncpa [#allocation5], 1 }
 0x41b   :  { %3258 = vsyncpa [#allocation5 + $0x1], 1 }
 0x41c   :  { %3259 = vsyncpa [#allocation10], 1 }
 0x41d   :  { %3261 = vsyncpa [#allocation10 + $0x1], 1 }
 0x41e   :  { %3262 = vsyncpa [#allocation6], 1 }
 0x41f   :  { %3264 = vsyncpa [#allocation6 + $0x1], 1 }

</bundles_post_ra>
